<compile_context>
chip_gen: v5e
topology: v5e:2x2
jax: 0.10.0
libtpu: 0.0.40
codegen_flags: <defaults>
</compile_context>

<pallas_src>
import jax
import jax.numpy as jnp
from jax import lax
from jax.experimental import pallas as pl
from jax.experimental.pallas import tpu as pltpu

C_IN = 512
C_OUT = 64
H = 14
W = 14
HW = H * W


def _maxpool_conv_kernel(x_ref, w_ref, o_ref):
    # x_ref: (C_IN, HW)    f32 -- NCHW-contiguous view, channels x flat spatial
    # w_ref: (C_OUT, C_IN) f32 -- 1x1 conv weight
    # o_ref: (C_OUT, HW)   f32 -- conv output (already NCHW-ordered)
    x = x_ref[...]
    neg_inf = jnp.float32(-jnp.inf)

    # Boundary masks, built once: w-coordinate of each flat position p = h*W + w.
    pos = lax.broadcasted_iota(jnp.int32, (1, HW), 1)
    wcol = lax.rem(pos, W)
    mask_l = wcol > 0           # p-1 is inside the same row
    mask_r = wcol < W - 1       # p+1 is inside the same row

    # ---- separable 3x3 max pool, stride 1, padding 1 ----
    # (ceil_mode=True is a no-op at stride 1 with this padding.)
    # Pass 1 (W direction): neighbours at p-1 / p+1, masked at row edges.
    # TODO(synk): if a bundle dump shows these concatenates materializing VMEM
    # copies instead of XLU lane shifts, switch to pltpu.roll(x, +/-1 / +/-W,
    # axis=-1) with the same masks (plus p<W / p>=HW-W masks for the H pass).
    fill1 = jnp.full((C_IN, 1), neg_inf, jnp.float32)
    left = jnp.concatenate([fill1, x[:, : HW - 1]], axis=1)   # value from p-1
    right = jnp.concatenate([x[:, 1:], fill1], axis=1)        # value from p+1
    left = jnp.where(mask_l, left, neg_inf)                   # w == 0: padding
    right = jnp.where(mask_r, right, neg_inf)                 # w == W-1: padding
    row_max = jnp.maximum(jnp.maximum(left, x), right)

    # Pass 2 (H direction): neighbours at p-W / p+W; the -inf fill lands exactly
    # on the top/bottom image border, so no extra mask is needed.
    # TODO(synk): on v6e/v7x (bf16 VPU) this whole pooling section could run in
    # bf16 to halve vreg pressure; kept f32 so v5e does not regress.
    fill_w = jnp.full((C_IN, W), neg_inf, jnp.float32)
    up = jnp.concatenate([fill_w, row_max[:, : HW - W]], axis=1)
    down = jnp.concatenate([row_max[:, W:], fill_w], axis=1)
    pooled = jnp.maximum(jnp.maximum(up, row_max), down)

    # ---- 1x1 conv == channel contraction on the MXU ----
    # f32 operands, f32 accumulation: exact parity with the PyTorch module
    # (the matmul is ~13 MFLOPs, far from the bottleneck -> no bf16 downcast).
    o_ref[...] = jnp.dot(w_ref[...], pooled, preferred_element_type=jnp.float32)


@jax.jit
def maxpool2d_conv2d(x_nchw, weight_oihw):
    """x_nchw: (1, 512, 14, 14) f32; weight_oihw: (64, 512, 1, 1) f32."""
    n, c, h, w = x_nchw.shape
    assert (n, c, h, w) == (1, C_IN, H, W)

    x_flat = x_nchw.reshape(C_IN, HW)            # bit-free (NCHW contiguous)
    w_flat = weight_oihw.reshape(C_OUT, C_IN)    # bit-free

    cost = pl.CostEstimate(
        flops=2 * C_OUT * C_IN * HW,                       # 12.8 MFLOPs
        transcendentals=0,
        bytes_accessed=(C_IN * HW + C_OUT * C_IN + C_OUT * HW) * 4,  # ~583 KB
    )

    out_flat = pl.pallas_call(
        _maxpool_conv_kernel,
        out_shape=jax.ShapeDtypeStruct((C_OUT, HW), jnp.float32),
        in_specs=[
            pl.BlockSpec(memory_space=pltpu.MemorySpace.VMEM),
            pl.BlockSpec(memory_space=pltpu.MemorySpace.VMEM),
        ],
        out_specs=pl.BlockSpec(memory_space=pltpu.MemorySpace.VMEM),
        cost_estimate=cost,
    )(x_flat, w_flat)
    # TODO(synk): measure-first options intentionally skipped at this size:
    #   - v5e: 2-step grid over C_in (256-channel blocks, f32 acc scratch) to
    #     overlap the x DMA with pooling+partial matmul (0.35 us/step may eat it).
    #   - v7x: 2-TensorCore split would need a row-boundary lane split
    #     (rows 0-7 / 7-13 with a one-row halo); per-core launch overhead
    #     exceeds the <1 us of total work, so not done.
    #   - bf16 weight/input handoff if the surrounding GoogLeNet graph can feed
    #     bf16 (halves the dominant HBM reads); kept f32 for exact parity here.

    return out_flat.reshape(1, C_OUT, H, W)      # bit-free back to NCHW


def _reference(x_nchw, weight_oihw):
    """Pure-JAX f32 reference: 3x3/s1/p1 max pool (ceil_mode no-op) -> 1x1 conv."""
    x = x_nchw[0]                                              # (C, H, W)
    xp = jnp.pad(x, ((0, 0), (1, 1), (1, 1)), constant_values=-jnp.inf)
    pooled = xp[:, 0:H, 0:W]
    for dh in range(3):
        for dw in range(3):
            pooled = jnp.maximum(pooled, xp[:, dh:dh + H, dw:dw + W])
    out = jnp.einsum('oc,chw->ohw', weight_oihw.reshape(C_OUT, C_IN), pooled)
    return out[None, ...]


if __name__ == "__main__":
    key = jax.random.PRNGKey(0)
    kx, kw = jax.random.split(key)

    # Shapes implied by the module: input (1,512,14,14), conv weight (64,512,1,1).
    x = jax.random.normal(kx, (1, C_IN, H, W), dtype=jnp.float32)
    weight = jax.random.normal(kw, (C_OUT, C_IN, 1, 1), dtype=jnp.float32) * 0.02

    out = jax.block_until_ready(maxpool2d_conv2d(x, weight))
    ref = _reference(x, weight)

    assert out.shape == (1, C_OUT, H, W), out.shape
    # f32 operands / f32 accumulation; slack only for TPU default-precision
    # matmul internals vs the pure-JAX reference path.
    assert jnp.allclose(out, ref, atol=2e-2, rtol=2e-2), \
        float(jnp.max(jnp.abs(out - ref)))

    print("KERNEL_OK")
</pallas_src>

<mosaic_0001>
module attributes {stable_mosaic.version = 11 : i64} {
  func.func @_maxpool_conv_kernel(%arg0: memref<512x196xf32, #tpu.memory_space<vmem>>, %arg1: memref<64x512xf32, #tpu.memory_space<vmem>>, %arg2: memref<64x196xf32, #tpu.memory_space<vmem>>) attributes {dimension_semantics = [], scalar_prefetch = 0 : i64, scratch_operands = 0 : i64, tpu.core_type = #tpu.core_type<tc>} {
    %c0 = arith.constant 0 : index
    %c0_0 = arith.constant 0 : index
    %0 = vector.load %arg0[%c0, %c0_0] : memref<512x196xf32, #tpu.memory_space<vmem>>, vector<512x196xf32>
    %1 = tpu.iota {dimensions = array<i32: 1>} : vector<1x196xi32>
    %c14_i32 = arith.constant 14 : i32
    %2 = vector.broadcast %c14_i32 : i32 to vector<1x196xi32>
    %3 = arith.remsi %1, %2 : vector<1x196xi32>
    %c0_i32 = arith.constant 0 : i32
    %4 = vector.broadcast %c0_i32 : i32 to vector<1x196xi32>
    %5 = arith.cmpi sgt, %3, %4 : vector<1x196xi32>
    %c13_i32 = arith.constant 13 : i32
    %6 = vector.broadcast %c13_i32 : i32 to vector<1x196xi32>
    %7 = arith.cmpi slt, %3, %6 : vector<1x196xi32>
    %cst = arith.constant 0xFF800000 : f32
    %8 = vector.broadcast %cst : f32 to vector<512x1xf32>
    %9 = vector.extract_strided_slice %0 {offsets = [0, 0], sizes = [512, 195], strides = [1, 1]} : vector<512x196xf32> to vector<512x195xf32>
    %10 = tpu.concatenate %8, %9 in 1 : vector<512x1xf32>, vector<512x195xf32> -> vector<512x196xf32>
    %11 = vector.extract_strided_slice %0 {offsets = [0, 1], sizes = [512, 195], strides = [1, 1]} : vector<512x196xf32> to vector<512x195xf32>
    %12 = tpu.concatenate %11, %8 in 1 : vector<512x195xf32>, vector<512x1xf32> -> vector<512x196xf32>
    %cst_1 = arith.constant 0xFF800000 : f32
    %13 = vector.shape_cast %5 : vector<1x196xi1> to vector<1x196xi1>
    %14 = vector.broadcast %13 : vector<1x196xi1> to vector<512x196xi1>
    %15 = vector.broadcast %cst_1 : f32 to vector<512x196xf32>
    %16 = arith.select %14, %10, %15 : vector<512x196xi1>, vector<512x196xf32>
    %cst_2 = arith.constant 0xFF800000 : f32
    %17 = vector.shape_cast %7 : vector<1x196xi1> to vector<1x196xi1>
    %18 = vector.broadcast %17 : vector<1x196xi1> to vector<512x196xi1>
    %19 = vector.broadcast %cst_2 : f32 to vector<512x196xf32>
    %20 = arith.select %18, %12, %19 : vector<512x196xi1>, vector<512x196xf32>
    %21 = arith.maximumf %16, %0 : vector<512x196xf32>
    %22 = arith.maximumf %21, %20 : vector<512x196xf32>
    %cst_3 = arith.constant 0xFF800000 : f32
    %23 = vector.broadcast %cst_3 : f32 to vector<512x14xf32>
    %24 = vector.extract_strided_slice %22 {offsets = [0, 0], sizes = [512, 182], strides = [1, 1]} : vector<512x196xf32> to vector<512x182xf32>
    %25 = tpu.concatenate %23, %24 in 1 : vector<512x14xf32>, vector<512x182xf32> -> vector<512x196xf32>
    %26 = vector.extract_strided_slice %22 {offsets = [0, 14], sizes = [512, 182], strides = [1, 1]} : vector<512x196xf32> to vector<512x182xf32>
    %27 = tpu.concatenate %26, %23 in 1 : vector<512x182xf32>, vector<512x14xf32> -> vector<512x196xf32>
    %28 = arith.maximumf %25, %22 : vector<512x196xf32>
    %29 = arith.maximumf %28, %27 : vector<512x196xf32>
    %c0_4 = arith.constant 0 : index
    %c0_5 = arith.constant 0 : index
    %30 = vector.load %arg1[%c0_4, %c0_5] : memref<64x512xf32, #tpu.memory_space<vmem>>, vector<64x512xf32>
    %cst_6 = arith.constant dense<0.000000e+00> : vector<64x196xf32>
    %31 = tpu.matmul %30, %29, %cst_6 {dimension_numbers = #tpu.dot_dimension_numbers<[1], [0], [0], [1], [0, 0, 1, 1], [], []>} : vector<64x512xf32>, vector<512x196xf32>, vector<64x196xf32> -> vector<64x196xf32>
    %c0_7 = arith.constant 0 : index
    %c0_8 = arith.constant 0 : index
    %32 = vector.load %arg2[%c0_7, %c0_8] : memref<64x196xf32, #tpu.memory_space<vmem>>, vector<64x196xf32>
    tpu.vector_store %arg2[%c0_7, %c0_8], %31 {strides = array<i32>} : memref<64x196xf32, #tpu.memory_space<vmem>>, vector<64x196xf32>,
    return
  }
}

</mosaic_0001>

<bundles_post_ra>
// kernel: maxpool2d_conv2d.1
= control target key start
LH: loop header
LB: loop body
LE: loop exit
PB: predicated region body
PF: predicated region fallthrough
CT: control target
= control target key end

     0   :  { %s5079_s21 = smov 1   ;;  %s5080_s23 = smov 127   ;;  %vm594_vm6 = vcmask 7168   ;;  %vm1107_vm11 = vcmask 1039360   ;;  %vm1300_vm12 = vcmask 547840   ;;  %vm2269_vm13 = vcmask 113664   ;;  %s10984_s0 = inlined_call_operand.vmem [shape: f32[512,196], index: 0, kind: input, shape index: {}]   ;;  %s10985_s1 = inlined_call_operand.vmem [shape: f32[64,512], index: 1, kind: input, shape index: {}]   ;;  %s10986_s2 = inlined_call_operand.vmem [shape: f32[64,196], index: 2, kind: output, shape index: {}]  }
   0x1   :  { %v5102_v0 = vld [vmem:[%s10984_s0 + $0x40] sm:$0xff]  ;;  %v5107_v1 = vld [vmem:[%s10984_s0 + $0x48] sm:$0xff]  ;;  %v5146_v9 = vld [vmem:[%s10984_s0 + $0x50] sm:$0xff]  ;;  %s5082_s8 = smov 14   ;;  %vm2782_vm14 = vcmask 932864   ;;  %vm2975_vm15 = vcmask 441344  }
   0x2   :  { %11583 = vst [vmem:[#allocation2_spill] sm:$0xff] %v5102_v0  ;;  %v5112_v2 = vld [vmem:[%s10984_s0 + $0x20] sm:$0xff]  ;;  %v5116_v3 = vpack.i.bf16 %v5107_v1, %v5102_v0  ;;  %v5121_v4 = vld [vmem:[%s10984_s0 + $0x28] sm:$0xff]  ;;  %v5155_v10 = vld [vmem:[%s10984_s0 + $0x58] sm:$0xff] }
   0x3   :  { %11584 = vst [vmem:[#allocation3_spill] sm:$0xff] %v5107_v1  ;;  %v5126_v5 = vld [vmem:[%s10984_s0] sm:$0xff]  ;;  %v5131_v6 = vld [vmem:[%s10984_s0 + $0x8] sm:$0xff]  ;;  %v5135_v7 = vpack.i.bf16 %v5121_v4, %v5112_v2  ;;  %v5160_v11 = vld [vmem:[%s10984_s0 + $0x30] sm:$0xff]  ;;  %v5179_v15 = vpack.i.bf16 %v5155_v10, %v5146_v9 }
   0x4   :  { %11585 = vst [vmem:[#allocation4_spill] sm:$0xff] %v5112_v2  ;;  %v5139_v8 = vpack.i.bf16 %v5131_v6, %v5126_v5  ;;  %3703 = vrot.lane.b32.xlu2 %v5116_v3, %s5079_s21  ;;  %v5165_v12 = vld [vmem:[%s10984_s0 + $0x38] sm:$0xff]  ;;  %v5170_v13 = vld [vmem:[%s10984_s0 + $0x10] sm:$0xff]  ;;  %v5194_v18 = vld [vmem:[%s10984_s0 + $0x80] sm:$0xff] }
   0x5   :  { %11586 = vst [vmem:[#allocation5_spill] sm:$0xff] %v5121_v4  ;;  %3693 = vrot.lane.b32.xlu1 %v5135_v7, %s5079_s21  ;;  %v5175_v14 = vld [vmem:[%s10984_s0 + $0x18] sm:$0xff]  ;;  %v5183_v16 = vpack.i.bf16 %v5165_v12, %v5160_v11  ;;  %v5203_v19 = vld [vmem:[%s10984_s0 + $0x88] sm:$0xff]  ;;  %v5208_v20 = vld [vmem:[%s10984_s0 + $0x70] sm:$0xff] }
   0x6   :  { %11587 = vst [vmem:[#allocation6_spill] sm:$0xff] %v5126_v5  ;;  %3683 = vrot.lane.b32.xlu0 %v5139_v8, %s5079_s21  ;;  %v5187_v17 = vpack.i.bf16 %v5175_v14, %v5170_v13  ;;  %v5213_v21 = vld [vmem:[%s10984_s0 + $0x78] sm:$0xff]  ;;  %v5218_v22 = vld [vmem:[%s10984_s0 + $0x60] sm:$0xff]  ;;  %v5223_v23 = vld [vmem:[%s10984_s0 + $0x68] sm:$0xff]  ;;  %v5227_v24 = vpack.i.bf16 %v5203_v19, %v5194_v18 }
   0x7   :  { %11588 = vst [vmem:[#allocation7_spill] sm:$0xff] %v5131_v6  ;;  %v5231_v25 = vpack.i.bf16 %v5213_v21, %v5208_v20  ;;  %v5235_v26 = vpack.i.bf16 %v5223_v23, %v5218_v22  ;;  %v5242_v27 = vld [vmem:[%s10984_s0 + $0xb0] sm:$0xff]  ;;  %v5251_v28 = vld [vmem:[%s10984_s0 + $0xb8] sm:$0xff]  ;;  %v31_v29 = vld [vmem:[%s10984_s0 + $0xa0] sm:$0xff] }
   0x8   :  { %11589 = vst [vmem:[#allocation8_spill] sm:$0xff] %v5146_v9  ;;  %v32_v30 = vld [vmem:[%s10984_s0 + $0xa8] sm:$0xff]  ;;  %v29_v31 = vld [vmem:[%s10984_s0 + $0x90] sm:$0xff]  ;;  %v30_v32 = vld [vmem:[%s10984_s0 + $0x98] sm:$0xff]  ;;  %v5267_v33 = vpack.i.bf16 %v5251_v28, %v5242_v27 }
   0x9   :  { %11590 = vst [vmem:[#allocation9_spill] sm:$0xff] %v5155_v10  ;;  %v5269_v34 = vpack.i.bf16 %v32_v30, %v31_v29  ;;  %v5271_v35 = vpack.i.bf16 %v30_v32, %v29_v31  ;;  %v5278_v36 = vld [vmem:[%s10984_s0 + $0xe0] sm:$0xff]  ;;  %v5287_v37 = vld [vmem:[%s10984_s0 + $0xe8] sm:$0xff]  ;;  %v37_v38 = vld [vmem:[%s10984_s0 + $0xd0] sm:$0xff] }
   0xa   :  { %11591 = vst [vmem:[#allocation10_spill] sm:$0xff] %v5160_v11  ;;  %v38_v39 = vld [vmem:[%s10984_s0 + $0xd8] sm:$0xff]  ;;  %v35_v40 = vld [vmem:[%s10984_s0 + $0xc0] sm:$0xff]  ;;  %v36_v41 = vld [vmem:[%s10984_s0 + $0xc8] sm:$0xff]  ;;  %v5303_v42 = vpack.i.bf16 %v5287_v37, %v5278_v36 }
   0xb   :  { %11592 = vst [vmem:[#allocation11_spill] sm:$0xff] %v5165_v12  ;;  %v5305_v43 = vpack.i.bf16 %v38_v39, %v37_v38  ;;  %v5307_v44 = vpack.i.bf16 %v36_v41, %v35_v40  ;;  %v5314_v45 = vld [vmem:[%s10984_s0 + $0x110] sm:$0xff]  ;;  %v5323_v46 = vld [vmem:[%s10984_s0 + $0x118] sm:$0xff]  ;;  %v43_v47 = vld [vmem:[%s10984_s0 + $0x100] sm:$0xff] }
   0xc   :  { %11593 = vst [vmem:[#allocation12_spill] sm:$0xff] %v5170_v13  ;;  %3708 = vrot.lane.b32.xlu2 %v5179_v15, %s5079_s21  ;;  %v44_v48 = vld [vmem:[%s10984_s0 + $0x108] sm:$0xff]  ;;  %v41_v49 = vld [vmem:[%s10984_s0 + $0xf0] sm:$0xff]  ;;  %v42_v50 = vld [vmem:[%s10984_s0 + $0xf8] sm:$0xff]  ;;  %v5339_v51 = vpack.i.bf16 %v5323_v46, %v5314_v45 }
   0xd   :  { %11594 = vst [vmem:[#allocation13_spill] sm:$0xff] %v5175_v14  ;;  %3698 = vrot.lane.b32.xlu1 %v5183_v16, %s5079_s21  ;;  %v5341_v52 = vpack.i.bf16 %v44_v48, %v43_v47  ;;  %v5343_v53 = vpack.i.bf16 %v42_v50, %v41_v49  ;;  %v5350_v54 = vld [vmem:[%s10984_s0 + $0x140] sm:$0xff]  ;;  %v5359_v55 = vld [vmem:[%s10984_s0 + $0x148] sm:$0xff]  ;;  %v49_v56 = vld [vmem:[%s10984_s0 + $0x130] sm:$0xff] }
   0xe   :  { %11595 = vst [vmem:[#allocation14_spill] sm:$0xff] %v5194_v18  ;;  %3688 = vrot.lane.b32.xlu0 %v5187_v17, %s5079_s21  ;;  %v50_v57 = vld [vmem:[%s10984_s0 + $0x138] sm:$0xff]  ;;  %v47_v58 = vld [vmem:[%s10984_s0 + $0x120] sm:$0xff]  ;;  %v48_v59 = vld [vmem:[%s10984_s0 + $0x128] sm:$0xff]  ;;  %v5375_v60 = vpack.i.bf16 %v5359_v55, %v5350_v54 }
   0xf   :  { %11596 = vst [vmem:[#allocation15_spill] sm:$0xff] %v5203_v19  ;;  %v5377_v61 = vpack.i.bf16 %v50_v57, %v49_v56  ;;  %v5379_v62 = vpack.i.bf16 %v48_v59, %v47_v58  ;;  %v5386_v63 = vld [vmem:[%s10984_s0 + $0x170] sm:$0xff]  ;;  %v58_v29 = vld [vmem:[%s10984_s0 + $0x178] sm:$0xff]  ;;  %v55_v30 = vld [vmem:[%s10984_s0 + $0x160] sm:$0xff] }
  0x10   :  { %11597 = vst [vmem:[#allocation16_spill] sm:$0xff] %v5208_v20  ;;  %v56_v31 = vld [vmem:[%s10984_s0 + $0x168] sm:$0xff]  ;;  %v53_v32 = vld [vmem:[%s10984_s0 + $0x150] sm:$0xff]  ;;  %v54_v38 = vld [vmem:[%s10984_s0 + $0x158] sm:$0xff]  ;;  %v5408_v39 = vpack.i.bf16 %v58_v29, %v5386_v63 }
  0x11   :  { %11598 = vst [vmem:[#allocation17_spill] sm:$0xff] %v5213_v21  ;;  %v5410_v40 = vpack.i.bf16 %v56_v31, %v55_v30  ;;  %v5412_v41 = vpack.i.bf16 %v54_v38, %v53_v32  ;;  %v63_v47 = vld [vmem:[%s10984_s0 + $0x1a0] sm:$0xff]  ;;  %v64_v48 = vld [vmem:[%s10984_s0 + $0x1a8] sm:$0xff]  ;;  %v61_v49 = vld [vmem:[%s10984_s0 + $0x190] sm:$0xff] }
  0x12   :  { %11599 = vst [vmem:[#allocation18_spill] sm:$0xff] %v5218_v22  ;;  %v62_v50 = vld [vmem:[%s10984_s0 + $0x198] sm:$0xff]  ;;  %v59_v56 = vld [vmem:[%s10984_s0 + $0x180] sm:$0xff]  ;;  %v60_v57 = vld [vmem:[%s10984_s0 + $0x188] sm:$0xff]  ;;  %v5438_v58 = vpack.i.bf16 %v64_v48, %v63_v47 }
  0x13   :  { %11600 = vst [vmem:[#allocation19_spill] sm:$0xff] %v5223_v23  ;;  %v5440_v59 = vpack.i.bf16 %v62_v50, %v61_v49  ;;  %v5442_v29 = vpack.i.bf16 %v60_v57, %v59_v56  ;;  %v69_v30 = vld [vmem:[%s10984_s0 + $0x1d0] sm:$0xff]  ;;  %v70_v31 = vld [vmem:[%s10984_s0 + $0x1d8] sm:$0xff]  ;;  %v67_v32 = vld [vmem:[%s10984_s0 + $0x1c0] sm:$0xff] }
  0x14   :  { %3723 = vrot.lane.b32.xlu2 %v5227_v24, %s5079_s21  ;;  %11601 = vst [vmem:[#allocation20_spill] sm:$0xff] %v5242_v27  ;;  %v68_v38 = vld [vmem:[%s10984_s0 + $0x1c8] sm:$0xff]  ;;  %v65_v47 = vld [vmem:[%s10984_s0 + $0x1b0] sm:$0xff]  ;;  %v66_v48 = vld [vmem:[%s10984_s0 + $0x1b8] sm:$0xff]  ;;  %v5468_v49 = vpack.i.bf16 %v70_v31, %v69_v30 }
  0x15   :  { %3718 = vrot.lane.b32.xlu1 %v5231_v25, %s5079_s21  ;;  %11602 = vst [vmem:[#allocation21_spill] sm:$0xff] %v5251_v28  ;;  %v5470_v50 = vpack.i.bf16 %v68_v38, %v67_v32  ;;  %v5472_v56 = vpack.i.bf16 %v66_v48, %v65_v47  ;;  %v75_v57 = vld [vmem:[%s10984_s0 + $0x200] sm:$0xff]  ;;  %v76_v30 = vld [vmem:[%s10984_s0 + $0x208] sm:$0xff]  ;;  %v73_v31 = vld [vmem:[%s10984_s0 + $0x1f0] sm:$0xff]  ;;  %v5081_v28 = vmov 0  }
  0x16   :  { %3713 = vrot.lane.b32.xlu0 %v5235_v26, %s5079_s21  ;;  %11603 = vst [vmem:[#allocation22_spill] sm:$0xff] %v5278_v36  ;;  %v74_v32 = vld [vmem:[%s10984_s0 + $0x1f8] sm:$0xff]  ;;  %v71_v38 = vld [vmem:[%s10984_s0 + $0x1e0] sm:$0xff]  ;;  %v72_v47 = vld [vmem:[%s10984_s0 + $0x1e8] sm:$0xff]  ;;  %v5498_v48 = vpack.i.bf16 %v76_v30, %v75_v57 }
  0x17   :  { %11604 = vst [vmem:[#allocation23_spill] sm:$0xff] %v5287_v37  ;;  %v82_v57 = vld [vmem:[%s10984_s0 + $0x238] sm:$0xff]  ;;  %v79_v30 = vld [vmem:[%s10984_s0 + $0x220] sm:$0xff]  ;;  %v105_v23 = vld [vmem:[%s10984_s0 + $0x2f0] sm:$0xff] }
  0x18   :  { %11605 = vst [vmem:[#allocation24_spill] sm:$0xff] %v5314_v45  ;;  %v111_v22 = vld [vmem:[%s10984_s0 + $0x320] sm:$0xff]  ;;  %v117_v20 = vld [vmem:[%s10984_s0 + $0x350] sm:$0xff]  ;;  %v118_v45 = vld [vmem:[%s10984_s0 + $0x358] sm:$0xff] }
  0x19   :  { %11606 = vst [vmem:[#allocation25_spill] sm:$0xff] %v5323_v46  ;;  %v93_v46 = vld [vmem:[%s10984_s0 + $0x290] sm:$0xff]  ;;  %v123_v13 = vld [vmem:[%s10984_s0 + $0x380] sm:$0xff]  ;;  %v124_v12 = vld [vmem:[%s10984_s0 + $0x388] sm:$0xff] }
  0x1a   :  { %11607 = vst [vmem:[#allocation26_spill] sm:$0xff] %v5350_v54  ;;  %v99_v54 = vld [vmem:[%s10984_s0 + $0x2c0] sm:$0xff] }
  0x1b   :  { %11608 = vst [vmem:[#allocation27_spill] sm:$0xff] %v5359_v55  ;;  %v5502_v55 = vpack.i.bf16 %v72_v47, %v71_v38  ;;  %v78_v38 = vld [vmem:[%s10984_s0 + $0x218] sm:$0xff]  ;;  %v11664_v27 = vld [vmem:[#allocation6_spill] sm:$0xff] }
  0x1c   :  { %3738 = vrot.lane.b32.xlu2 %v5267_v33, %s5079_s21  ;;  %11609 = vst [vmem:[#allocation28_spill] sm:$0xff] %v5386_v63  ;;  %v5500_v63 = vpack.i.bf16 %v74_v32, %v73_v31  ;;  %v80_v31 = vld [vmem:[%s10984_s0 + $0x228] sm:$0xff]  ;;  %v77_v32 = vld [vmem:[%s10984_s0 + $0x210] sm:$0xff] }
  0x1d   :  { %3733 = vrot.lane.b32.xlu1 %v5269_v34, %s5079_s21  ;;  %11610 = vst [vmem:[#allocation29_spill] sm:$0xff] %v5408_v39 }
  0x1e   :  { %3728 = vrot.lane.b32.xlu0 %v5271_v35, %s5079_s21  ;;  %11611 = vst [vmem:[#allocation30_spill] sm:$0xff] %v5438_v58 }
  0x1f   :  { %11612 = vst [vmem:[#allocation31_spill] sm:$0xff] %v5440_v59 }
  0x20   :  { %11613 = vst [vmem:[#allocation32_spill] sm:$0xff] %v5442_v29 }
  0x21   :  { %11614 = vst [vmem:[#allocation33_spill] sm:$0xff] %v5468_v49 }
  0x22   :  { %11615 = vst [vmem:[#allocation34_spill] sm:$0xff] %v5470_v50 }
  0x23   :  { %11616 = vst [vmem:[#allocation35_spill] sm:$0xff] %v5472_v56 }
  0x24   :  { %3753 = vrot.lane.b32.xlu2 %v5303_v42, %s5079_s21  ;;  %11617 = vst [vmem:[#allocation36_spill] sm:$0xff] %v5498_v48  ;;  %v11672_v19 = vld [vmem:[#allocation29_spill] sm:$0xff] }
  0x25   :  { %3748 = vrot.lane.b32.xlu1 %v5305_v43, %s5079_s21  ;;  %11618 = vst [vmem:[#allocation37_spill] sm:$0xff] %v5500_v63 }
  0x26   :  { %3743 = vrot.lane.b32.xlu0 %v5307_v44, %s5079_s21  ;;  %11619 = vst [vmem:[#allocation38_spill] sm:$0xff] %v5502_v55 }
  0x2a   :  { %v11693_v1 = vld [vmem:[#allocation35_spill] sm:$0xff] }
  0x2c   :  { %3768 = vrot.lane.b32.xlu2 %v5339_v51, %s5079_s21 }
  0x2d   :  { %3763 = vrot.lane.b32.xlu1 %v5341_v52, %s5079_s21 }
  0x2e   :  { %3758 = vrot.lane.b32.xlu0 %v5343_v53, %s5079_s21 }
  0x34   :  { %3783 = vrot.lane.b32.xlu2 %v5375_v60, %s5079_s21 }
  0x35   :  { %3778 = vrot.lane.b32.xlu1 %v5377_v61, %s5079_s21 }
  0x36   :  { %3773 = vrot.lane.b32.xlu0 %v5379_v62, %s5079_s21 }
  0x3c   :  { %3798 = vrot.lane.b32.xlu2 %v5408_v39, %s5079_s21  ;;  %v129_v39 = vld [vmem:[%s10984_s0 + $0x3b0] sm:$0xff] }
  0x3d   :  { %3793 = vrot.lane.b32.xlu1 %v5410_v40, %s5079_s21 }
  0x3e   :  { %3788 = vrot.lane.b32.xlu0 %v5412_v41, %s5079_s21 }
  0x44   :  { %3813 = vrot.lane.b32.xlu2 %v5438_v58, %s5079_s21  ;;  %v106_v58 = vld [vmem:[%s10984_s0 + $0x2f8] sm:$0xff] }
  0x45   :  { %3808 = vrot.lane.b32.xlu1 %v5440_v59, %s5079_s21 }
  0x46   :  { %3803 = vrot.lane.b32.xlu0 %v5442_v29, %s5079_s21  ;;  %v130_v29 = vld [vmem:[%s10984_s0 + $0x3b8] sm:$0xff] }
  0x4c   :  { %3828 = vrot.lane.b32.xlu2 %v5468_v49, %s5079_s21  ;;  %v81_v49 = vld [vmem:[%s10984_s0 + $0x230] sm:$0xff] }
  0x4d   :  { %3823 = vrot.lane.b32.xlu1 %v5470_v50, %s5079_s21  ;;  %v5528_v47 = vpack.i.bf16 %v82_v57, %v81_v49  ;;  %v88_v49 = vld [vmem:[%s10984_s0 + $0x268] sm:$0xff]  ;;  %v85_v57 = vld [vmem:[%s10984_s0 + $0x250] sm:$0xff] }
  0x4e   :  { %3818 = vrot.lane.b32.xlu0 %v5472_v56, %s5079_s21  ;;  %v112_v50 = vld [vmem:[%s10984_s0 + $0x328] sm:$0xff] }
  0x4f   :  { %11620 = vst [vmem:[#allocation39_spill] sm:$0xff] %v5528_v47 }
  0x54   :  { %3843 = vrot.lane.b32.xlu2 %v5498_v48, %s5079_s21  ;;  %v5530_v48 = vpack.i.bf16 %v80_v31, %v79_v30  ;;  %v86_v31 = vld [vmem:[%s10984_s0 + $0x258] sm:$0xff] }
  0x55   :  { %3838 = vrot.lane.b32.xlu1 %v5500_v63, %s5079_s21  ;;  %v87_v63 = vld [vmem:[%s10984_s0 + $0x260] sm:$0xff] }
  0x56   :  { %3833 = vrot.lane.b32.xlu0 %v5502_v55, %s5079_s21  ;;  %11621 = vst [vmem:[#allocation40_spill] sm:$0xff] %v5530_v48  ;;  %v5532_v55 = vpack.i.bf16 %v78_v38, %v77_v32  ;;  %v83_v32 = vld [vmem:[%s10984_s0 + $0x240] sm:$0xff]  ;;  %v84_v38 = vld [vmem:[%s10984_s0 + $0x248] sm:$0xff] }
  0x58   :  { %11622 = vst [vmem:[#allocation41_spill] sm:$0xff] %v5532_v55 }
  0x5c   :  { %3858 = vrot.lane.b32.xlu2 %v5528_v47, %s5079_s21  ;;  %v3872_v47 = vpack.i.bf16 %v88_v49, %v87_v63  ;;  %v94_v63 = vld [vmem:[%s10984_s0 + $0x298] sm:$0xff]  ;;  %v91_v49 = vld [vmem:[%s10984_s0 + $0x280] sm:$0xff] }
  0x5d   :  { %3853 = vrot.lane.b32.xlu1 %v5530_v48, %s5079_s21  ;;  %v5562_v48 = vpack.i.bf16 %v84_v38, %v83_v32  ;;  %v90_v32 = vld [vmem:[%s10984_s0 + $0x278] sm:$0xff]  ;;  %v3887_v38 = vpack.i.bf16 %v94_v63, %v93_v46  ;;  %v100_v46 = vld [vmem:[%s10984_s0 + $0x2c8] sm:$0xff]  ;;  %v97_v63 = vld [vmem:[%s10984_s0 + $0x2b0] sm:$0xff] }
  0x5e   :  { %3848 = vrot.lane.b32.xlu0 %v5532_v55, %s5079_s21  ;;  %v5549_v30 = vpop.permute.xlu2 %3703  ;;  %v5560_v55 = vpack.i.bf16 %v86_v31, %v85_v57  ;;  %v89_v31 = vld [vmem:[%s10984_s0 + $0x270] sm:$0xff] }
  0x5f   :  { %11624 = vst [vmem:[#allocation43_spill] sm:$0xff] %v5562_v48 }
  0x60   :  { %11623 = vst [vmem:[#allocation42_spill] sm:$0xff] %v5560_v55 }
  0x64   :  { %3873 = vrot.lane.b32.xlu2 %v3872_v47, %s5079_s21  ;;  %v92_v47 = vld [vmem:[%s10984_s0 + $0x288] sm:$0xff] }
  0x65   :  { %3868 = vrot.lane.b32.xlu1 %v5560_v55, %s5079_s21  ;;  %v5591_v55 = vpack.i.bf16 %v90_v32, %v89_v31  ;;  %v95_v31 = vld [vmem:[%s10984_s0 + $0x2a0] sm:$0xff]  ;;  %v96_v32 = vld [vmem:[%s10984_s0 + $0x2a8] sm:$0xff] }
  0x66   :  { %3863 = vrot.lane.b32.xlu0 %v5562_v48, %s5079_s21  ;;  %v5578_v57 = vpop.permute.xlu2 %3708  ;;  %v5589_v48 = vpack.i.bf16 %v92_v47, %v91_v49  ;;  %v98_v47 = vld [vmem:[%s10984_s0 + $0x2b8] sm:$0xff] }
  0x67   :  { %11626 = vst [vmem:[#allocation45_spill] sm:$0xff] %v5591_v55 }
  0x68   :  { %11625 = vst [vmem:[#allocation44_spill] sm:$0xff] %v5589_v48 }
  0x6c   :  { %3888 = vrot.lane.b32.xlu2 %v3887_v38, %s5079_s21  ;;  %v3902_v38 = vpack.i.bf16 %v100_v46, %v99_v54  ;;  %v103_v54 = vld [vmem:[%s10984_s0 + $0x2e0] sm:$0xff] }
  0x6d   :  { %3883 = vrot.lane.b32.xlu1 %v5589_v48, %s5079_s21  ;;  %v3892_v48 = vpack.i.bf16 %v96_v32, %v95_v31  ;;  %v3917_v32 = vpack.i.bf16 %v106_v58, %v105_v23  ;;  %v109_v23 = vld [vmem:[%s10984_s0 + $0x310] sm:$0xff] }
  0x6e   :  { %3878 = vrot.lane.b32.xlu0 %v5591_v55, %s5079_s21  ;;  %v5607_v49 = vpop.permute.xlu2 %3723  ;;  %v3897_v55 = vpack.i.bf16 %v98_v47, %v97_v63  ;;  %v104_v63 = vld [vmem:[%s10984_s0 + $0x2e8] sm:$0xff] }
  0x74   :  { %3903 = vrot.lane.b32.xlu2 %v3902_v38, %s5079_s21  ;;  %v3912_v38 = vpack.i.bf16 %v104_v63, %v103_v54  ;;  %v110_v54 = vld [vmem:[%s10984_s0 + $0x318] sm:$0xff]  ;;  %v107_v63 = vld [vmem:[%s10984_s0 + $0x300] sm:$0xff] }
  0x75   :  { %3898 = vrot.lane.b32.xlu1 %v3897_v55, %s5079_s21  ;;  %v101_v55 = vld [vmem:[%s10984_s0 + $0x2d0] sm:$0xff] }
  0x76   :  { %3893 = vrot.lane.b32.xlu0 %v3892_v48, %s5079_s21  ;;  %v5630_v46 = vpop.permute.xlu2 %3738  ;;  %v102_v48 = vld [vmem:[%s10984_s0 + $0x2d8] sm:$0xff] }
  0x77   :  { %v5641_v47 = vpop.permute.xlu1 %3693  ;;  %v3907_v56 = vpack.i.bf16 %v102_v48, %v101_v55 }
  0x78   :  { %v5643_v31 = vpop.permute.xlu0 %3683 }
  0x7c   :  { %3918 = vrot.lane.b32.xlu2 %v3917_v32, %s5079_s21  ;;  %v3932_v32 = vpack.i.bf16 %v112_v50, %v111_v22  ;;  %v115_v22 = vld [vmem:[%s10984_s0 + $0x340] sm:$0xff] }
  0x7d   :  { %3913 = vrot.lane.b32.xlu1 %v3912_v38, %s5079_s21  ;;  %v3927_v38 = vpack.i.bf16 %v110_v54, %v109_v23  ;;  %v116_v23 = vld [vmem:[%s10984_s0 + $0x348] sm:$0xff]  ;;  %v113_v54 = vld [vmem:[%s10984_s0 + $0x330] sm:$0xff] }
  0x7e   :  { %3908 = vrot.lane.b32.xlu0 %v3907_v56, %s5079_s21  ;;  %v5657_v58 = vpop.permute.xlu2 %3753  ;;  %v108_v56 = vld [vmem:[%s10984_s0 + $0x308] sm:$0xff] }
  0x7f   :  { %v5668_v55 = vpop.permute.xlu1 %3698  ;;  %v3922_v21 = vpack.i.bf16 %v108_v56, %v107_v63 }
  0x80   :  { %v5670_v48 = vpop.permute.xlu0 %3688 }
  0x84   :  { %3933 = vrot.lane.b32.xlu2 %v3932_v32, %s5079_s21  ;;  %v3947_v32 = vpack.i.bf16 %v118_v45, %v117_v20  ;;  %v121_v20 = vld [vmem:[%s10984_s0 + $0x370] sm:$0xff] }
  0x85   :  { %3928 = vrot.lane.b32.xlu1 %v3927_v38, %s5079_s21  ;;  %v3942_v38 = vpack.i.bf16 %v116_v23, %v115_v22  ;;  %v122_v22 = vld [vmem:[%s10984_s0 + $0x378] sm:$0xff]  ;;  %v119_v23 = vld [vmem:[%s10984_s0 + $0x360] sm:$0xff] }
  0x86   :  { %3923 = vrot.lane.b32.xlu0 %v3922_v21, %s5079_s21  ;;  %v5684_v50 = vpop.permute.xlu2 %3768  ;;  %v114_v21 = vld [vmem:[%s10984_s0 + $0x338] sm:$0xff] }
  0x87   :  { %11627 = vst [vmem:[#allocation46_spill] sm:$0xff] %v5684_v50  ;;  %v5695_v63 = vpop.permute.xlu1 %3718  ;;  %v3937_v37 = vpack.i.bf16 %v114_v21, %v113_v54 }
  0x88   :  { %11628 = vst [vmem:[#allocation47_spill] sm:$0xff] %v5695_v63  ;;  %v5697_v56 = vpop.permute.xlu0 %3713 }
  0x89   :  { %11629 = vst [vmem:[#allocation48_spill] sm:$0xff] %v5697_v56 }
  0x8c   :  { %3948 = vrot.lane.b32.xlu2 %v3947_v32, %s5079_s21  ;;  %v3962_v32 = vpack.i.bf16 %v124_v12, %v123_v13  ;;  %v127_v12 = vld [vmem:[%s10984_s0 + $0x3a0] sm:$0xff] }
  0x8d   :  { %3943 = vrot.lane.b32.xlu1 %v3942_v38, %s5079_s21  ;;  %v3957_v38 = vpack.i.bf16 %v122_v22, %v121_v20  ;;  %v128_v20 = vld [vmem:[%s10984_s0 + $0x3a8] sm:$0xff]  ;;  %v125_v22 = vld [vmem:[%s10984_s0 + $0x390] sm:$0xff] }
  0x8e   :  { %3938 = vrot.lane.b32.xlu0 %v3937_v37, %s5079_s21  ;;  %v5711_v45 = vpop.permute.xlu2 %3783  ;;  %v120_v37 = vld [vmem:[%s10984_s0 + $0x368] sm:$0xff] }
  0x8f   :  { %11630 = vst [vmem:[#allocation49_spill] sm:$0xff] %v5711_v45  ;;  %v5722_v54 = vpop.permute.xlu1 %3733  ;;  %v3952_v14 = vpack.i.bf16 %v120_v37, %v119_v23 }
  0x90   :  { %11631 = vst [vmem:[#allocation50_spill] sm:$0xff] %v5722_v54  ;;  %v5724_v21 = vpop.permute.xlu0 %3728  ;;  %v135_v54 = vld [vmem:[%s10984_s0 + $0x3e0] sm:$0xff] }
  0x91   :  { %11632 = vst [vmem:[#allocation51_spill] sm:$0xff] %v5724_v21 }
  0x94   :  { %3963 = vrot.lane.b32.xlu2 %v3962_v32, %s5079_s21  ;;  %v3977_v32 = vpack.i.bf16 %v130_v29, %v129_v39  ;;  %v133_v39 = vld [vmem:[%s10984_s0 + $0x3d0] sm:$0xff] }
  0x95   :  { %3958 = vrot.lane.b32.xlu1 %v3957_v38, %s5079_s21  ;;  %v3972_v38 = vpack.i.bf16 %v128_v20, %v127_v12  ;;  %v134_v20 = vld [vmem:[%s10984_s0 + $0x3d8] sm:$0xff] }
  0x96   :  { %3953 = vrot.lane.b32.xlu0 %v3952_v14, %s5079_s21  ;;  %v5738_v13 = vpop.permute.xlu2 %3798  ;;  %v126_v14 = vld [vmem:[%s10984_s0 + $0x398] sm:$0xff] }
  0x97   :  { %11633 = vst [vmem:[#allocation52_spill] sm:$0xff] %v5738_v13  ;;  %v5749_v23 = vpop.permute.xlu1 %3748  ;;  %v3967_v21 = vpack.i.bf16 %v126_v14, %v125_v22  ;;  %v139_v13 = vlaneseq  ;;  %v132_v22 = vld [vmem:[%s10984_s0 + $0x3c8] sm:$0xff]  ;;  %v11678_v18 = vld [vmem:[#allocation50_spill] sm:$0xff] }
  0x98   :  { %11634 = vst [vmem:[#allocation53_spill] sm:$0xff] %v5749_v23  ;;  %v5751_v37 = vpop.permute.xlu0 %3743  ;;  %v136_v23 = vld [vmem:[%s10984_s0 + $0x3e8] sm:$0xff] }
  0x99   :  { %11635 = vst [vmem:[#allocation54_spill] sm:$0xff] %v5751_v37  ;;  %v5765_v29 = vand.u32 127, %v139_v13  ;;  %v3992_v13 = vpack.i.bf16 %v136_v23, %v135_v54  ;;  %v137_v54 = vld [vmem:[%s10984_s0 + $0x3f0] sm:$0xff]  ;;  %v138_v23 = vld [vmem:[%s10984_s0 + $0x3f8] sm:$0xff] }
  0x9b   :  { %v145_v59 = vand.u32 65535, %v5765_v29 }
  0x9c   :  { %3978 = vrot.lane.b32.xlu2 %v3977_v32, %s5079_s21 }
  0x9d   :  { %3973 = vrot.lane.b32.xlu1 %v3972_v38, %s5079_s21  ;;  %v3987_v38 = vpack.i.bf16 %v134_v20, %v133_v39 }
  0x9e   :  { %3968 = vrot.lane.b32.xlu0 %v3967_v21, %s5079_s21  ;;  %v5767_v12 = vpop.permute.xlu2 %3813  ;;  %v131_v21 = vld [vmem:[%s10984_s0 + $0x3c0] sm:$0xff] }
  0x9f   :  { %11636 = vst [vmem:[#allocation55_spill] sm:$0xff] %v5767_v12  ;;  %v5778_v14 = vpop.permute.xlu1 %3763  ;;  %v3982_v37 = vpack.i.bf16 %v132_v22, %v131_v21  ;;  %v5783_v12 = vadd.s32 128, %v5765_v29  ;;  %v146_v21 = vshrl.u32 %v5765_v29, 16  ;;  %v149_v22 = vmul.u32 37449, %v145_v59 }
  0xa0   :  { %11637 = vst [vmem:[#allocation56_spill] sm:$0xff] %v5778_v14  ;;  %v5780_v32 = vpop.permute.xlu0 %3758 }
  0xa1   :  { %11638 = vst [vmem:[#allocation57_spill] sm:$0xff] %v5780_v32  ;;  %v177_v45 = vand.u32 65535, %v5783_v12  ;;  %v148_v32 = vmul.u32 9362, %v145_v59  ;;  %v152_v14 = vshll.u32 %v149_v22, 16  ;;  %v151_v50 = vmul.u32 37449, %v146_v21 }
  0xa3   :  { %vm156_vm0 = vc.u32 %v148_v32, %v152_v14  ;;  %v158_v63 = vadd.s32 %v152_v14, %v148_v32 }
  0xa4   :  { %3993 = vrot.lane.b32.xlu2 %v3992_v13, %s5079_s21  ;;  %v178_v13 = vshrl.u32 %v5783_v12, 16 }
  0xa5   :  { %3988 = vrot.lane.b32.xlu1 %v3987_v38, %s5079_s21  ;;  %v181_v38 = vmul.u32 37449, %v177_v45 }
  0xa6   :  { %3983 = vrot.lane.b32.xlu0 %v3982_v37, %s5079_s21  ;;  %v5790_v11 = vpop.permute.xlu2 %3828  ;;  %v3997_v37 = vpack.i.bf16 %v138_v23, %v137_v54  ;;  %v183_v6 = vmul.u32 37449, %v178_v13 }
  0xa7   :  { %11639 = vst [vmem:[#allocation58_spill] sm:$0xff] %v5790_v11  ;;  %v5798_v39 = vpop.permute.xlu1 %3778  ;;  %v150_v11 = vmul.u32 9362, %v146_v21  ;;  %v184_v36 = vshll.u32 %v181_v38, 16 }
  0xa8   :  { %11640 = vst [vmem:[#allocation59_spill] sm:$0xff] %v5798_v39  ;;  %v5800_v20 = vpop.permute.xlu0 %3773  ;;  %v182_v39 = vmul.u32 9362, %v178_v13 }
  0xa9   :  { %11641 = vst [vmem:[#allocation60_spill] sm:$0xff] %v5800_v20  ;;  %v180_v20 = vmul.u32 9362, %v177_v45  ;;  %v154_v56 = vshll.u32 %v150_v11, 16 }
  0xab   :  { %vm188_vm1 = vc.u32 %v180_v20, %v184_v36  ;;  %v190_v59 = vadd.s32 %v184_v36, %v180_v20  ;;  %vm160_vm2 = vc.u32 %v158_v63, %v154_v56 }
  0xac   :  { %4008 = vrot.lane.b32.xlu2 %v5187_v17, %s5080_s23  ;;  %v186_v17 = vshll.u32 %v182_v39, 16  ;;  %v189_v45 = vsel %vm188_vm1, 1, %v5081_v28  ;;  %v161_v21 = vsel %vm160_vm2, 1, %v5081_v28 }
  0xad   :  { %4003 = vrot.lane.b32.xlu1 %v5139_v8, %s5080_s23  ;;  %v157_v8 = vsel %vm156_vm0, 1, %v5081_v28  ;;  %vm3657_vm0 = vcmask 556032  }
  0xae   :  { %3998 = vrot.lane.b32.xlu0 %v3997_v37, %s5079_s21  ;;  %v5809_v5 = vpop.permute.xlu2 %3843  ;;  %vm192_vm3 = vc.u32 %v190_v59, %v186_v17  ;;  %v159_v32 = vadd.s32 %v157_v8, %v151_v50  ;;  %v191_v37 = vadd.s32 %v189_v45, %v183_v6  ;;  %v155_v8 = vshrl.u32 %v150_v11, 16 }
  0xaf   :  { %11642 = vst [vmem:[#allocation61_spill] sm:$0xff] %v5809_v5  ;;  %v5811_v54 = vpop.permute.xlu1 %3793  ;;  %v193_v13 = vsel %vm192_vm3, 1, %v5081_v28 }
  0xb0   :  { %11643 = vst [vmem:[#allocation62_spill] sm:$0xff] %v5811_v54  ;;  %v5813_v23 = vpop.permute.xlu0 %3788  ;;  %v185_v54 = vshrl.u32 %v181_v38, 16  ;;  %v195_v5 = vadd.s32 %v193_v13, %v191_v37  ;;  %v187_v38 = vshrl.u32 %v182_v39, 16  ;;  %v3706_v37 = vunpack.i.h.bf16 %v5549_v30 }
  0xb1   :  { %11644 = vst [vmem:[#allocation63_spill] sm:$0xff] %v5813_v23  ;;  %v163_v23 = vadd.s32 %v161_v21, %v159_v32 }
  0xb2   :  { %v196_v32 = vadd.s32 %v195_v5, %v185_v54 }
  0xb4   :  { %4023 = vrot.lane.b32.xlu2 %v5116_v3, %s5080_s23  ;;  %v153_v3 = vshrl.u32 %v149_v22, 16 }
  0xb5   :  { %4018 = vrot.lane.b32.xlu1 %v5183_v16, %s5080_s23  ;;  %v162_v16 = vadd.s32 %v158_v63, %v154_v56  ;;  %v197_v56 = vadd.s32 %v196_v32, %v187_v38 }
  0xb6   :  { %4013 = vrot.lane.b32.xlu0 %v5135_v7, %s5080_s23  ;;  %v5821_v14 = vpop.permute.xlu2 %3858  ;;  %v194_v7 = vadd.s32 %v190_v59, %v186_v17  ;;  %v164_v6 = vadd.s32 %v163_v23, %v153_v3 }
  0xb7   :  { %v5823_v36 = vpop.permute.xlu1 %3808  ;;  %vm166_vm4 = vc.u32 %v162_v16, 2454267026  ;;  %v3726_v16 = vunpack.i.h.bf16 %v5607_v49 }
  0xb8   :  { %v5825_v20 = vpop.permute.xlu0 %3803  ;;  %vm198_vm5 = vc.u32 %v194_v7, 2454267026  ;;  %v167_v63 = vsel %vm166_vm4, 1, %v5081_v28  ;;  %v3740_v7 = vunpack.i.l.bf16 %v5630_v46 }
  0xbc   :  { %4038 = vrot.lane.b32.xlu2 %v5231_v25, %s5080_s23  ;;  %v165_v25 = vadd.s32 %v164_v6, %v155_v8 }
  0xbd   :  { %4033 = vrot.lane.b32.xlu1 %v5235_v26, %s5080_s23 }
  0xbe   :  { %4028 = vrot.lane.b32.xlu0 %v5179_v15, %s5080_s23  ;;  %v5833_v50 = vpop.permute.xlu2 %3873  ;;  %v199_v15 = vsel %vm198_vm5, 1, %v5081_v28  ;;  %v168_v26 = vadd.s32 %v167_v63, %v165_v25  ;;  %v3696_v25 = vunpack.i.h.bf16 %v5641_v47  ;;  %v3695_v63 = vunpack.i.l.bf16 %v5641_v47 }
  0xbf   :  { %v5835_v45 = vpop.permute.xlu1 %3823  ;;  %v200_v54 = vadd.s32 %v199_v15, %v197_v56  ;;  %v3686_v15 = vunpack.i.h.bf16 %v5643_v31 }
  0xc0   :  { %v5837_v22 = vpop.permute.xlu0 %3818  ;;  %v169_v23 = vshrl.u32 %v168_v26, 3  ;;  %v3685_v26 = vunpack.i.l.bf16 %v5643_v31 }
  0xc1   :  { %v201_v17 = vshrl.u32 %v200_v54, 3 }
  0xc2   :  { %v170_v28 = vmul.u32 14, %v169_v23  ;;  %v798_v23 = vsel %vm594_vm6, -inf, %v3740_v7 }
  0xc3   :  { %v202_v59 = vmul.u32 14, %v201_v17  ;;  %v11658_v17 = vld [vmem:[#allocation47_spill] sm:$0xff] }
  0xc4   :  { %4053 = vrot.lane.b32.xlu2 %v5269_v34, %s5080_s23  ;;  %v5864_v21 = vsub.s32 %v5765_v29, %v170_v28  ;;  %v597_v28 = vsel %vm594_vm6, %v3695_v63, %v3696_v25 }
  0xc5   :  { %4048 = vrot.lane.b32.xlu1 %v5271_v35, %s5080_s23  ;;  %v5870_v13 = vsub.s32 %v5783_v12, %v202_v59  ;;  %v789_v59 = vsel %vm594_vm6, -inf, %v3695_v63  ;;  %v3691_v63 = vunpack.i.h.bf16 %v5670_v48 }
  0xc6   :  { %4043 = vrot.lane.b32.xlu0 %v5227_v24, %s5080_s23  ;;  %v5845_v11 = vpop.permute.xlu2 %3888  ;;  %vm206_vm7 = vcmp.gt.s32.totalorder %v5864_v21, 0  ;;  %vm208_vm9 = vcmp.lt.s32.totalorder %v5864_v21, 13 }
  0xc7   :  { %v5847_v39 = vpop.permute.xlu1 %3838  ;;  %vm207_vm8 = vcmp.gt.s32.totalorder %v5870_v13, 0  ;;  %vm209_vm10 = vcmp.lt.s32.totalorder %v5870_v13, 13 }
  0xc8   :  { %v5849_v5 = vpop.permute.xlu0 %3833 }
  0xcc   :  { %4068 = vrot.lane.b32.xlu2 %v5305_v43, %s5080_s23  ;;  %v3705_v43 = vunpack.i.l.bf16 %v5549_v30 }
  0xcd   :  { %4063 = vrot.lane.b32.xlu1 %v5307_v44, %s5080_s23  ;;  %v3710_v44 = vunpack.i.l.bf16 %v5578_v57 }
  0xce   :  { %4058 = vrot.lane.b32.xlu0 %v5267_v33, %s5080_s23  ;;  %v5857_v24 = vpop.permute.xlu2 %3903  ;;  %v3711_v33 = vunpack.i.h.bf16 %v5578_v57  ;;  %v599_v30 = vsel %vm594_vm6, %v3705_v43, %v3706_v37  ;;  %v791_v12 = vsel %vm594_vm6, -inf, %v3705_v43 }
  0xcf   :  { %v5859_v34 = vpop.permute.xlu1 %3853  ;;  %v792_v57 = vsel %vm594_vm6, -inf, %v3710_v44  ;;  %v5896_v8 = vsel %vm206_vm7, %v791_v12, -inf  ;;  %v5900_v6 = vsel %vm207_vm8, %v599_v30, -inf  ;;  %v595_v30 = vsel %vm594_vm6, %v3685_v26, %v3686_v15 }
  0xd0   :  { %v5861_v35 = vpop.permute.xlu0 %3848  ;;  %11645 = vst [vmem:[#allocation64_spill] sm:$0xff] %v5896_v8  ;;  %v5904_v38 = vsel %vm206_vm7, %v792_v57, -inf  ;;  %v3755_v12 = vunpack.i.l.bf16 %v5657_v58  ;;  %v3700_v57 = vunpack.i.l.bf16 %v5668_v55  ;;  %v5972_v25 = vsel %vm207_vm8, %v595_v30, -inf  ;;  %v11655_v30 = vld [vmem:[#allocation7_spill] sm:$0xff] }
  0xd1   :  { %11646 = vst [vmem:[#allocation65_spill] sm:$0xff] %v5900_v6 }
  0xd2   :  { %11647 = vst [vmem:[#allocation66_spill] sm:$0xff] %v5904_v38 }
  0xd4   :  { %4083 = vrot.lane.b32.xlu2 %v5341_v52, %s5080_s23 }
  0xd5   :  { %4078 = vrot.lane.b32.xlu1 %v5343_v53, %s5080_s23  ;;  %v600_v53 = vsel %vm594_vm6, %v3710_v44, %v3711_v33  ;;  %v5951_v33 = vsel %vm206_vm7, %v798_v23, -inf  ;;  %v3756_v23 = vunpack.i.h.bf16 %v5657_v58 }
  0xd6   :  { %4073 = vrot.lane.b32.xlu0 %v5303_v42, %s5080_s23  ;;  %v5879_v29 = vpop.permute.xlu2 %3918  ;;  %v3725_v42 = vunpack.i.l.bf16 %v5607_v49  ;;  %v5908_v32 = vsel %vm207_vm8, %v600_v53, -inf  ;;  %v3741_v49 = vunpack.i.h.bf16 %v5630_v46  ;;  %11651 = vst [vmem:[#allocation70_spill] sm:$0xff] %v5951_v33  ;;  %v3721_v46 = vunpack.i.h.bf16 %v11658_v17 }
  0xd7   :  { %v5885_v3 = vpop.permute.xlu1 %3868  ;;  %11648 = vst [vmem:[#allocation67_spill] sm:$0xff] %v5908_v32  ;;  %v6777_v32 = vld [vmem:[%s10984_s0 + $0x1c8] sm:$0xff] }
  0xd8   :  { %v5887_v52 = vpop.permute.xlu0 %3863  ;;  %v795_v56 = vsel %vm594_vm6, -inf, %v3725_v42  ;;  %v603_v54 = vsel %vm594_vm6, %v3725_v42, %v3726_v16  ;;  %v5962_v42 = vsel %vm206_vm7, %v789_v59, -inf  ;;  %v5966_v16 = vsel %vm207_vm8, %v597_v28, -inf  ;;  %11822 = vst [vmem:[#allocation151_spill] sm:$0xff] %v6777_v32  ;;  %v6882_v32 = vld [vmem:[%s10984_s0 + $0x2f8] sm:$0xff] }
  0xd9   :  { %v5947_v44 = vsel %vm207_vm8, %v603_v54, -inf  ;;  %11653 = vst [vmem:[#allocation72_spill] sm:$0xff] %v5962_v42 }
  0xda   :  { %11650 = vst [vmem:[#allocation69_spill] sm:$0xff] %v5947_v44  ;;  %v3736_v44 = vunpack.i.h.bf16 %v11678_v18 }
  0xdb   :  { %11654 = vst [vmem:[#allocation73_spill] sm:$0xff] %v5966_v16  ;;  %v11748_v16 = vld [vmem:[#allocation62_spill] sm:$0xff] }
  0xdc   :  { %4098 = vrot.lane.b32.xlu2 %v5377_v61, %s5080_s23  ;;  %v3720_v61 = vunpack.i.l.bf16 %v11658_v17  ;;  %11837 = vst [vmem:[#allocation166_spill] sm:$0xff] %v6882_v32 }
  0xdd   :  { %4093 = vrot.lane.b32.xlu1 %v5379_v62, %s5080_s23  ;;  %v5936_v62 = vsel %vm206_vm7, %v795_v56, -inf  ;;  %v3690_v56 = vunpack.i.l.bf16 %v5670_v48  ;;  %v790_v48 = vsel %vm594_vm6, -inf, %v3700_v57 }
  0xde   :  { %4088 = vrot.lane.b32.xlu0 %v5339_v51, %s5080_s23  ;;  %v5928_v31 = vpop.permute.xlu2 %3933  ;;  %11649 = vst [vmem:[#allocation68_spill] sm:$0xff] %v5936_v62  ;;  %v606_v51 = vsel %vm594_vm6, %v3740_v7, %v3741_v49  ;;  %v3701_v7 = vunpack.i.h.bf16 %v5668_v55  ;;  %v787_v49 = vsel %vm594_vm6, -inf, %v3685_v26  ;;  %v794_v15 = vsel %vm594_vm6, -inf, %v3720_v61 }
  0xdf   :  { %v5941_v37 = vpop.permute.xlu1 %3883  ;;  %v5958_v53 = vsel %vm207_vm8, %v606_v51, -inf  ;;  %v801_v51 = vsel %vm594_vm6, -inf, %v3755_v12  ;;  %v596_v55 = vsel %vm594_vm6, %v3690_v56, %v3691_v63  ;;  %v788_v58 = vsel %vm594_vm6, -inf, %v3690_v56 }
  0xe0   :  { %v5943_v43 = vpop.permute.xlu0 %3878  ;;  %11652 = vst [vmem:[#allocation71_spill] sm:$0xff] %v5958_v53  ;;  %v598_v28 = vsel %vm594_vm6, %v3700_v57, %v3701_v7  ;;  %v609_v57 = vsel %vm594_vm6, %v3755_v12, %v3756_v23  ;;  %v6017_v7 = vsel %vm206_vm7, %v801_v51, -inf  ;;  %v6031_v54 = vsel %vm207_vm8, %v596_v55, -inf  ;;  %v11663_v12 = vld [vmem:[#allocation48_spill] sm:$0xff]  ;;  %v11692_v53 = vld [vmem:[#allocation53_spill] sm:$0xff] }
  0xe1   :  { %11659 = vst [vmem:[#allocation7_spill] sm:$0xff] %v6017_v7  ;;  %v6025_v63 = vsel %vm207_vm8, %v598_v28, -inf  ;;  %v3716_v23 = vunpack.i.h.bf16 %v11663_v12  ;;  %v3715_v51 = vunpack.i.l.bf16 %v11663_v12  ;;  %v602_v28 = vsel %vm594_vm6, %v3720_v61, %v3721_v46  ;;  %v11668_v12 = vld [vmem:[#allocation49_spill] sm:$0xff] }
  0xe2   :  { %11661 = vst [vmem:[#allocation47_spill] sm:$0xff] %v6025_v63  ;;  %v6042_v56 = vsel %vm207_vm8, %v609_v57, -inf  ;;  %v3785_v62 = vunpack.i.l.bf16 %v11668_v12  ;;  %v6053_v46 = vsel %vm206_vm7, %v788_v58, -inf  ;;  %v11671_v57 = vld [vmem:[#allocation32_spill] sm:$0xff]  ;;  %v6070_v58 = vsel %vm206_vm7, %v794_v15, -inf }
  0xe3   :  { %11662 = vst [vmem:[#allocation74_spill] sm:$0xff] %v6031_v54  ;;  %v3786_v7 = vunpack.i.h.bf16 %v11668_v12 }
  0xe4   :  { %4113 = vrot.lane.b32.xlu2 %v5410_v40, %s5080_s23  ;;  %v5997_v40 = vsel %vm206_vm7, %v787_v49, -inf  ;;  %11665 = vst [vmem:[#allocation48_spill] sm:$0xff] %v6042_v56  ;;  %v807_v38 = vsel %vm594_vm6, -inf, %v3785_v62  ;;  %v11689_v56 = vld [vmem:[#allocation34_spill] sm:$0xff] }
  0xe5   :  { %4108 = vrot.lane.b32.xlu1 %v5412_v41, %s5080_s23  ;;  %v6021_v41 = vsel %vm206_vm7, %v790_v48, -inf  ;;  %v11669_v48 = vld [vmem:[#allocation31_spill] sm:$0xff]  ;;  %11670 = vst [vmem:[#allocation6_spill] sm:$0xff] %v6053_v46  ;;  %v615_v12 = vsel %vm594_vm6, %v3785_v62, %v3786_v7  ;;  %v11691_v7 = vld [vmem:[#allocation52_spill] sm:$0xff] }
  0xe6   :  { %4103 = vrot.lane.b32.xlu0 %v5375_v60, %s5080_s23  ;;  %v6000_v59 = vpop.permute.xlu2 %3948  ;;  %v11657_v60 = vld [vmem:[#allocation46_spill] sm:$0xff]  ;;  %11676 = vst [vmem:[#allocation31_spill] sm:$0xff] %v6070_v58  ;;  %v3750_v58 = vunpack.i.l.bf16 %v11692_v53 }
  0xe7   :  { %v3770_v47 = vunpack.i.l.bf16 %v11657_v60  ;;  %v6010_v49 = vpop.permute.xlu1 %3898  ;;  %11660 = vst [vmem:[#allocation46_spill] sm:$0xff] %v6021_v41  ;;  %v3771_v17 = vunpack.i.h.bf16 %v11657_v60  ;;  %v6647_v60 = vld [vmem:[%s10984_s0 + $0x190] sm:$0xff] }
  0xe8   :  { %v6012_v26 = vpop.permute.xlu0 %3893  ;;  %11801 = vst [vmem:[#allocation130_spill] sm:$0xff] %v6647_v60  ;;  %v3891_v60 = vunpack.i.h.bf16 %v5845_v11 }
  0xe9   :  { %v804_v33 = vsel %vm594_vm6, -inf, %v3770_v47  ;;  %v612_v61 = vsel %vm594_vm6, %v3770_v47, %v3771_v17  ;;  %v6074_v47 = vsel %vm207_vm8, %v602_v28, -inf  ;;  %v11679_v28 = vld [vmem:[#allocation51_spill] sm:$0xff] }
  0xea   :  { %11677 = vst [vmem:[#allocation32_spill] sm:$0xff] %v6074_v47  ;;  %v3731_v10 = vunpack.i.h.bf16 %v11679_v28  ;;  %v6096_v8 = vsel %vm207_vm8, %v612_v61, -inf  ;;  %v6113_v61 = vsel %vm206_vm7, %v807_v38, -inf  ;;  %v3800_v38 = vunpack.i.l.bf16 %v11691_v7 }
  0xeb   :  { %11682 = vst [vmem:[#allocation29_spill] sm:$0xff] %v6096_v8  ;;  %v800_v8 = vsel %vm594_vm6, -inf, %v3750_v58 }
  0xec   :  { %4128 = vrot.lane.b32.xlu2 %v11669_v48, %s5080_s23  ;;  %v6066_v48 = vsel %vm206_vm7, %v804_v33, -inf  ;;  %v3735_v33 = vunpack.i.l.bf16 %v11678_v18  ;;  %11687 = vst [vmem:[#allocation75_spill] sm:$0xff] %v6113_v61 }
  0xed   :  { %4123 = vrot.lane.b32.xlu1 %v11671_v57, %s5080_s23  ;;  %11675 = vst [vmem:[#allocation49_spill] sm:$0xff] %v6066_v48  ;;  %v793_v57 = vsel %vm594_vm6, -inf, %v3715_v51 }
  0xee   :  { %4118 = vrot.lane.b32.xlu0 %v11672_v19, %s5080_s23  ;;  %v601_v19 = vsel %vm594_vm6, %v3715_v51, %v3716_v23  ;;  %v6077_v17 = vpop.permute.xlu2 %3963  ;;  %v3730_v23 = vunpack.i.l.bf16 %v11679_v28  ;;  %v6102_v6 = vsel %vm206_vm7, %v793_v57, -inf  ;;  %v605_v18 = vsel %vm594_vm6, %v3735_v33, %v3736_v44  ;;  %v11694_v44 = vld [vmem:[#allocation30_spill] sm:$0xff] }
  0xef   :  { %v6083_v9 = vpop.permute.xlu1 %3913  ;;  %11684 = vst [vmem:[#allocation50_spill] sm:$0xff] %v6102_v6  ;;  %v6106_v28 = vsel %vm207_vm8, %v601_v19, -inf  ;;  %v797_v57 = vsel %vm594_vm6, -inf, %v3735_v33  ;;  %v3801_v51 = vunpack.i.h.bf16 %v11691_v7  ;;  %v11705_v33 = vld [vmem:[#allocation55_spill] sm:$0xff] }
  0xf0   :  { %v6085_v15 = vpop.permute.xlu0 %3908  ;;  %11685 = vst [vmem:[#allocation51_spill] sm:$0xff] %v6106_v28  ;;  %v604_v48 = vsel %vm594_vm6, %v3730_v23, %v3731_v10  ;;  %v796_v19 = vsel %vm594_vm6, -inf, %v3730_v23  ;;  %v6135_v23 = vsel %vm207_vm8, %v615_v12, -inf  ;;  %v6150_v10 = vsel %vm207_vm8, %v605_v18, -inf  ;;  %v11706_v28 = vld [vmem:[#allocation56_spill] sm:$0xff] }
  0xf1   :  { %11696 = vst [vmem:[#allocation34_spill] sm:$0xff] %v6135_v23  ;;  %v6154_v12 = vsel %vm206_vm7, %v796_v19, -inf  ;;  %v6158_v7 = vsel %vm207_vm8, %v604_v48, -inf  ;;  %v810_v18 = vsel %vm594_vm6, -inf, %v3800_v38  ;;  %v6172_v19 = vld [vmem:[%s10984_s0 + $0xa0] sm:$0xff]  ;;  %v618_v6 = vsel %vm594_vm6, %v3800_v38, %v3801_v51  ;;  %v6190_v48 = vld [vmem:[%s10984_s0 + $0xa8] sm:$0xff] }
  0xf2   :  { %11700 = vst [vmem:[#allocation53_spill] sm:$0xff] %v6150_v10  ;;  %v3765_v41 = vunpack.i.l.bf16 %v11706_v28  ;;  %v3766_v42 = vunpack.i.h.bf16 %v11706_v28  ;;  %v6197_v38 = vld [vmem:[%s10984_s0 + $0x98] sm:$0xff]  ;;  %v6203_v2 = vsel %vm206_vm7, %v810_v18, -inf  ;;  %v3816_v51 = vunpack.i.h.bf16 %v11705_v33 }
  0xf3   :  { %11701 = vst [vmem:[#allocation35_spill] sm:$0xff] %v6154_v12  ;;  %v6215_v10 = vsel %vm207_vm8, %v618_v6, -inf  ;;  %v11717_v12 = vld [vmem:[#allocation57_spill] sm:$0xff] }
  0xf4   :  { %4143 = vrot.lane.b32.xlu2 %v11689_v56, %s5080_s23  ;;  %11702 = vst [vmem:[#allocation30_spill] sm:$0xff] %v6158_v7  ;;  %v3761_v6 = vunpack.i.h.bf16 %v11717_v12 }
  0xf5   :  { %4138 = vrot.lane.b32.xlu1 %v11693_v1, %s5080_s23  ;;  %v3751_v1 = vunpack.i.h.bf16 %v11692_v53  ;;  %v3815_v53 = vunpack.i.l.bf16 %v11705_v33  ;;  %11708 = vst [vmem:[#allocation56_spill] sm:$0xff] %v6190_v48  ;;  %v11712_v48 = vld [vmem:[#allocation37_spill] sm:$0xff]  ;;  %v11729_v33 = vld [vmem:[#allocation58_spill] sm:$0xff] }
  0xf6   :  { %4133 = vrot.lane.b32.xlu0 %v11694_v44, %s5080_s23  ;;  %v6140_v47 = vpop.permute.xlu2 %3978  ;;  %v6146_v44 = vsel %vm206_vm7, %v797_v57, -inf  ;;  %v11703_v57 = vld [vmem:[#allocation54_spill] sm:$0xff]  ;;  %11709 = vst [vmem:[#allocation76_spill] sm:$0xff] %v6197_v38  ;;  %v3760_v38 = vunpack.i.l.bf16 %v11717_v12 }
  0xf7   :  { %11699 = vst [vmem:[#allocation52_spill] sm:$0xff] %v6146_v44  ;;  %v6160_v62 = vpop.permute.xlu1 %3928  ;;  %v3746_v61 = vunpack.i.h.bf16 %v11703_v57  ;;  %v3745_v0 = vunpack.i.l.bf16 %v11703_v57  ;;  %v6182_v57 = vld [vmem:[%s10984_s0 + $0x90] sm:$0xff]  ;;  %v608_v28 = vsel %vm594_vm6, %v3750_v58, %v3751_v1  ;;  %v6208_v44 = vsel %vm206_vm7, %v800_v8, -inf  ;;  %v11715_v58 = vld [vmem:[#allocation33_spill] sm:$0xff] }
  0xf8   :  { %v6162_v56 = vpop.permute.xlu0 %3923  ;;  %11704 = vst [vmem:[#allocation54_spill] sm:$0xff] %v6172_v19  ;;  %v813_v1 = vsel %vm594_vm6, -inf, %v3815_v53  ;;  %v611_v8 = vsel %vm594_vm6, %v3765_v41, %v3766_v42 }
  0xf9   :  { %11707 = vst [vmem:[#allocation55_spill] sm:$0xff] %v6182_v57  ;;  %v607_v19 = vsel %vm594_vm6, %v3745_v0, %v3746_v61  ;;  %v799_v18 = vsel %vm594_vm6, -inf, %v3745_v0  ;;  %v11714_v57 = vld [vmem:[#allocation38_spill] sm:$0xff]  ;;  %v621_v0 = vsel %vm594_vm6, %v3815_v53, %v3816_v51  ;;  %v3831_v53 = vunpack.i.h.bf16 %v11729_v33 }
  0xfa   :  { %11710 = vst [vmem:[#allocation77_spill] sm:$0xff] %v6203_v2  ;;  %v6251_v7 = vsel %vm206_vm7, %v799_v18, -inf  ;;  %v6260_v2 = vsel %vm206_vm7, %v813_v1, -inf  ;;  %v610_v18 = vsel %vm594_vm6, %v3760_v38, %v3761_v6  ;;  %v11731_v1 = vld [vmem:[#allocation60_spill] sm:$0xff]  ;;  %v802_v6 = vsel %vm594_vm6, -inf, %v3760_v38 }
  0xfb   :  { %11711 = vst [vmem:[#allocation78_spill] sm:$0xff] %v6208_v44  ;;  %v3776_v44 = vunpack.i.h.bf16 %v11731_v1  ;;  %v6303_v38 = vsel %vm207_vm8, %v621_v0, -inf  ;;  %v11740_v0 = vld [vmem:[#allocation36_spill] sm:$0xff] }
  0xfc   :  { %4158 = vrot.lane.b32.xlu2 %v11712_v48, %s5080_s23  ;;  %11713 = vst [vmem:[#allocation37_spill] sm:$0xff] %v6215_v10  ;;  %v803_v48 = vsel %vm594_vm6, -inf, %v3765_v41  ;;  %v6268_v41 = vsel %vm207_vm8, %v611_v8, -inf }
  0xfd   :  { %4153 = vrot.lane.b32.xlu1 %v11714_v57, %s5080_s23  ;;  %v6235_v57 = vsel %vm207_vm8, %v608_v28, -inf  ;;  %11724 = vst [vmem:[#allocation81_spill] sm:$0xff] %v6251_v7  ;;  %v6255_v28 = vsel %vm207_vm8, %v607_v19, -inf  ;;  %v6264_v42 = vsel %vm206_vm7, %v803_v48, -inf  ;;  %v11730_v19 = vld [vmem:[#allocation59_spill] sm:$0xff]  ;;  %v6280_v48 = vld [vmem:[%s10984_s0 + $0xc0] sm:$0xff] }
  0xfe   :  { %4148 = vrot.lane.b32.xlu0 %v11715_v58, %s5080_s23  ;;  %v6229_v61 = vpop.permute.xlu2 %3993  ;;  %11720 = vst [vmem:[#allocation33_spill] sm:$0xff] %v6235_v57  ;;  %v6240_v58 = vld [vmem:[%s10984_s0 + $0xd0] sm:$0xff]  ;;  %v3781_v51 = vunpack.i.h.bf16 %v11730_v19  ;;  %v11739_v57 = vld [vmem:[#allocation41_spill] sm:$0xff] }
  0xff   :  { %11718 = vst [vmem:[#allocation38_spill] sm:$0xff] %v6229_v61  ;;  %v6245_v12 = vpop.permute.xlu1 %3943  ;;  %v11733_v61 = vld [vmem:[#allocation40_spill] sm:$0xff] }
 0x100   :  { %11721 = vst [vmem:[#allocation57_spill] sm:$0xff] %v6240_v58  ;;  %v6247_v23 = vpop.permute.xlu0 %3938  ;;  %v3780_v58 = vunpack.i.l.bf16 %v11730_v19  ;;  %v6347_v19 = vsel %vm206_vm7, %v802_v6, -inf }
 0x101   :  { %11722 = vst [vmem:[#allocation79_spill] sm:$0xff] %v6245_v12  ;;  %v3775_v12 = vunpack.i.l.bf16 %v11731_v1  ;;  %v6297_v1 = vld [vmem:[%s10984_s0 + $0xc8] sm:$0xff] }
 0x102   :  { %11723 = vst [vmem:[#allocation80_spill] sm:$0xff] %v6247_v23  ;;  %v3830_v23 = vunpack.i.l.bf16 %v11729_v33  ;;  %v6290_v33 = vld [vmem:[%s10984_s0 + $0xd8] sm:$0xff] }
 0x103   :  { %11725 = vst [vmem:[#allocation82_spill] sm:$0xff] %v6255_v28  ;;  %v613_v10 = vsel %vm594_vm6, %v3775_v12, %v3776_v44  ;;  %v11747_v28 = vld [vmem:[#allocation61_spill] sm:$0xff] }
 0x104   :  { %11726 = vst [vmem:[#allocation83_spill] sm:$0xff] %v6260_v2  ;;  %4173 = vrot.lane.b32.xlu2 %v11733_v61, %s5080_s23  ;;  %v6308_v61 = vld [vmem:[%s10984_s0 + $0x1a0] sm:$0xff]  ;;  %v816_v8 = vsel %vm594_vm6, -inf, %v3830_v23  ;;  %v806_v2 = vsel %vm594_vm6, -inf, %v3780_v58  ;;  %v3845_v4 = vunpack.i.l.bf16 %v11747_v28 }
 0x105   :  { %11727 = vst [vmem:[#allocation84_spill] sm:$0xff] %v6264_v42  ;;  %4168 = vrot.lane.b32.xlu1 %v11739_v57, %s5080_s23  ;;  %v6361_v6 = vsel %vm206_vm7, %v816_v8, -inf  ;;  %v6397_v8 = vld [vmem:[%s10984_s0 + $0xf8] sm:$0xff] }
 0x106   :  { %11728 = vst [vmem:[#allocation85_spill] sm:$0xff] %v6268_v41  ;;  %4163 = vrot.lane.b32.xlu0 %v11740_v0, %s5080_s23  ;;  %v6336_v57 = vpop.permute.xlu2 %4008  ;;  %v6341_v0 = vld [vmem:[%s10984_s0 + $0x108] sm:$0xff] }
 0x107   :  { %11732 = vst [vmem:[#allocation58_spill] sm:$0xff] %v6280_v48  ;;  %v6326_v48 = vld [vmem:[%s10984_s0 + $0x178] sm:$0xff]  ;;  %v6352_v42 = vpop.permute.xlu1 %3958 }
 0x108   :  { %11734 = vst [vmem:[#allocation59_spill] sm:$0xff] %v6290_v33  ;;  %v6315_v33 = vld [vmem:[%s10984_s0 + $0x100] sm:$0xff]  ;;  %v6354_v7 = vpop.permute.xlu0 %3953 }
 0x109   :  { %11735 = vst [vmem:[#allocation60_spill] sm:$0xff] %v6297_v1  ;;  %v805_v1 = vsel %vm594_vm6, -inf, %v3775_v12 }
 0x10a   :  { %11736 = vst [vmem:[#allocation40_spill] sm:$0xff] %v6303_v38  ;;  %v6433_v38 = vld [vmem:[%s10984_s0 + $0x138] sm:$0xff] }
 0x10b   :  { %11737 = vst [vmem:[#allocation86_spill] sm:$0xff] %v6308_v61  ;;  %v6332_v61 = vsel %vm207_vm8, %v610_v18, -inf  ;;  %v624_v18 = vsel %vm594_vm6, %v3830_v23, %v3831_v53  ;;  %v6365_v23 = vsel %vm206_vm7, %v806_v2, -inf  ;;  %v11752_v53 = vld [vmem:[#allocation63_spill] sm:$0xff]  ;;  %v6383_v2 = vsel %vm206_vm7, %v805_v1, -inf }
 0x10c   :  { %11738 = vst [vmem:[#allocation87_spill] sm:$0xff] %v6315_v33  ;;  %v3795_v33 = vunpack.i.l.bf16 %v11748_v16  ;;  %v3791_v12 = vunpack.i.h.bf16 %v11752_v53  ;;  %v6410_v41 = vsel %vm207_vm8, %v624_v18, -inf  ;;  %v11763_v18 = vld [vmem:[#allocation39_spill] sm:$0xff]  ;;  %v3860_v1 = vunpack.i.l.bf16 %v5821_v14 }
 0x10d   :  { %11741 = vst [vmem:[#allocation41_spill] sm:$0xff] %v6326_v48  ;;  %v614_v48 = vsel %vm594_vm6, %v3780_v58, %v3781_v51  ;;  %v3796_v58 = vunpack.i.h.bf16 %v11748_v16  ;;  %v3790_v51 = vunpack.i.l.bf16 %v11752_v53  ;;  %v3846_v16 = vunpack.i.h.bf16 %v11747_v28 }
 0x10e   :  { %11742 = vst [vmem:[#allocation36_spill] sm:$0xff] %v6332_v61  ;;  %v6369_v44 = vsel %vm207_vm8, %v614_v48, -inf  ;;  %v6387_v48 = vsel %vm207_vm8, %v613_v10, -inf  ;;  %v819_v53 = vsel %vm594_vm6, -inf, %v3845_v4  ;;  %v6404_v10 = vld [vmem:[%s10984_s0 + $0x1a8] sm:$0xff]  ;;  %4178 = vrot.lane.b32.xlu0 %v11763_v18, %s5080_s23  ;;  %v6640_v61 = vld [vmem:[%s10984_s0 + $0x230] sm:$0xff] }
 0x10f   :  { %11743 = vst [vmem:[#allocation88_spill] sm:$0xff] %v6341_v0  ;;  %v11756_v0 = vld [vmem:[#allocation42_spill] sm:$0xff]  ;;  %v616_v18 = vsel %vm594_vm6, %v3790_v51, %v3791_v12  ;;  %v6465_v12 = vpop.permute.xlu1 %3973 }
 0x110   :  { %11744 = vst [vmem:[#allocation89_spill] sm:$0xff] %v6347_v19  ;;  %4188 = vrot.lane.b32.xlu2 %v11756_v0, %s5080_s23  ;;  %v6415_v0 = vld [vmem:[%s10984_s0 + $0x1d0] sm:$0xff]  ;;  %v6467_v28 = vpop.permute.xlu0 %3968 }
 0x111   :  { %11745 = vst [vmem:[#allocation90_spill] sm:$0xff] %v6352_v42  ;;  %v809_v42 = vsel %vm594_vm6, -inf, %v3795_v33  ;;  %v11780_v19 = vld [vmem:[#allocation44_spill] sm:$0xff] }
 0x112   :  { %11746 = vst [vmem:[#allocation91_spill] sm:$0xff] %v6354_v7  ;;  %v6377_v7 = vld [vmem:[%s10984_s0 + $0xf0] sm:$0xff] }
 0x113   :  { %11749 = vst [vmem:[#allocation61_spill] sm:$0xff] %v6361_v6  ;;  %v6446_v6 = vpop.permute.xlu2 %4023 }
 0x114   :  { %11750 = vst [vmem:[#allocation62_spill] sm:$0xff] %v6365_v23  ;;  %v627_v23 = vsel %vm594_vm6, %v3845_v4, %v3846_v16  ;;  %v3810_v4 = vunpack.i.l.bf16 %v5823_v36 }
 0x115   :  { %11751 = vst [vmem:[#allocation92_spill] sm:$0xff] %v6369_v44  ;;  %v3861_v44 = vunpack.i.h.bf16 %v5821_v14 }
 0x116   :  { %11753 = vst [vmem:[#allocation63_spill] sm:$0xff] %v6377_v7  ;;  %v6422_v7 = vld [vmem:[%s10984_s0 + $0x130] sm:$0xff] }
 0x117   :  { %11754 = vst [vmem:[#allocation93_spill] sm:$0xff] %v6383_v2  ;;  %v6506_v2 = vld [vmem:[%s10984_s0 + $0x200] sm:$0xff] }
 0x118   :  { %11755 = vst [vmem:[#allocation94_spill] sm:$0xff] %v6387_v48  ;;  %v630_v48 = vsel %vm594_vm6, %v3860_v1, %v3861_v44  ;;  %4203 = vrot.lane.b32.xlu2 %v11780_v19, %s5080_s23  ;;  %v6543_v44 = vld [vmem:[%s10984_s0 + $0x168] sm:$0xff] }
 0x119   :  { %11757 = vst [vmem:[#allocation42_spill] sm:$0xff] %v6397_v8  ;;  %v6562_v19 = vld [vmem:[%s10984_s0 + $0x208] sm:$0xff]  ;;  %v3820_v8 = vunpack.i.l.bf16 %v5837_v22 }
 0x11a   :  { %11758 = vst [vmem:[#allocation95_spill] sm:$0xff] %v6404_v10  ;;  %v11762_v10 = vld [vmem:[#allocation43_spill] sm:$0xff] }
 0x11b   :  { %11759 = vst [vmem:[#allocation96_spill] sm:$0xff] %v6410_v41  ;;  %4183 = vrot.lane.b32.xlu1 %v11762_v10, %s5080_s23  ;;  %v617_v10 = vsel %vm594_vm6, %v3795_v33, %v3796_v58  ;;  %v6462_v33 = vsel %vm206_vm7, %v809_v42, -inf  ;;  %v808_v58 = vsel %vm594_vm6, -inf, %v3790_v51  ;;  %v6478_v42 = vsel %vm207_vm8, %v616_v18, -inf  ;;  %v6483_v51 = vld [vmem:[%s10984_s0 + $0x260] sm:$0xff]  ;;  %v6557_v41 = vpop.permute.xlu2 %4038 }
 0x11c   :  { %11760 = vst [vmem:[#allocation97_spill] sm:$0xff] %v6415_v0  ;;  %v6440_v0 = vld [vmem:[%s10984_s0 + $0x120] sm:$0xff]  ;;  %v6474_v16 = vsel %vm207_vm8, %v617_v10, -inf  ;;  %v6494_v10 = vsel %vm206_vm7, %v808_v58, -inf  ;;  %v3811_v18 = vunpack.i.h.bf16 %v5823_v36  ;;  %v11782_v58 = vld [vmem:[#allocation45_spill] sm:$0xff] }
 0x11d   :  { %11761 = vst [vmem:[#allocation98_spill] sm:$0xff] %v6422_v7  ;;  %v6451_v7 = vld [vmem:[%s10984_s0 + $0x128] sm:$0xff]  ;;  %v6513_v36 = vld [vmem:[%s10984_s0 + $0x160] sm:$0xff] }
 0x11e   :  { %11764 = vst [vmem:[#allocation43_spill] sm:$0xff] %v6433_v38  ;;  %v6458_v38 = vsel %vm206_vm7, %v819_v53, -inf  ;;  %v6488_v53 = vld [vmem:[%s10984_s0 + $0x268] sm:$0xff] }
 0x11f   :  { %11765 = vst [vmem:[#allocation39_spill] sm:$0xff] %v6440_v0  ;;  %v4192_v14 = vpack.i.bf16 %v6488_v53, %v6483_v51  ;;  %v6501_v0 = vsel %vm207_vm8, %v627_v23, -inf  ;;  %v6520_v23 = vld [vmem:[%s10984_s0 + $0x1d8] sm:$0xff] }
 0x120   :  { %11766 = vst [vmem:[#allocation99_spill] sm:$0xff] %v6451_v7  ;;  %v822_v7 = vsel %vm594_vm6, -inf, %v3860_v1  ;;  %v6550_v1 = vld [vmem:[%s10984_s0 + $0x158] sm:$0xff] }
 0x121   :  { %11767 = vst [vmem:[#allocation100_spill] sm:$0xff] %v6458_v38  ;;  %v3875_v38 = vunpack.i.l.bf16 %v5833_v50  ;;  %4193 = vrot.lane.b32.xlu0 %v4192_v14, %s5080_s23 }
 0x122   :  { %11768 = vst [vmem:[#allocation101_spill] sm:$0xff] %v6462_v33 }
 0x123   :  { %11769 = vst [vmem:[#allocation102_spill] sm:$0xff] %v6465_v12  ;;  %v3805_v12 = vunpack.i.l.bf16 %v5825_v20  ;;  %4198 = vrot.lane.b32.xlu1 %v11782_v58, %s5080_s23  ;;  %v620_v58 = vsel %vm594_vm6, %v3810_v4, %v3811_v18  ;;  %v6579_v18 = vpop.permute.xlu1 %3988  ;;  %v825_v33 = vsel %vm594_vm6, -inf, %v3875_v38 }
 0x124   :  { %11770 = vst [vmem:[#allocation103_spill] sm:$0xff] %v6467_v28  ;;  %v3806_v28 = vunpack.i.h.bf16 %v5825_v20  ;;  %v6533_v20 = vld [vmem:[%s10984_s0 + $0x150] sm:$0xff] }
 0x125   :  { %11771 = vst [vmem:[#allocation104_spill] sm:$0xff] %v6474_v16 }
 0x126   :  { %11772 = vst [vmem:[#allocation105_spill] sm:$0xff] %v6478_v42  ;;  %v619_v14 = vsel %vm594_vm6, %v3805_v12, %v3806_v28  ;;  %v811_v28 = vsel %vm594_vm6, -inf, %v3805_v12 }
 0x127   :  { %11773 = vst [vmem:[#allocation106_spill] sm:$0xff] %v6483_v51  ;;  %v6632_v42 = vsel %vm206_vm7, %v811_v28, -inf }
 0x128   :  { %11774 = vst [vmem:[#allocation107_spill] sm:$0xff] %v6488_v53 }
 0x129   :  { %11775 = vst [vmem:[#allocation108_spill] sm:$0xff] %v6494_v10  ;;  %v3821_v10 = vunpack.i.h.bf16 %v5837_v22  ;;  %v3890_v22 = vunpack.i.l.bf16 %v5845_v11 }
 0x12a   :  { %11776 = vst [vmem:[#allocation109_spill] sm:$0xff] %v6501_v0  ;;  %v6614_v0 = vld [vmem:[%s10984_s0 + $0x2a8] sm:$0xff] }
 0x12b   :  { %11777 = vst [vmem:[#allocation110_spill] sm:$0xff] %v6506_v2  ;;  %v812_v2 = vsel %vm594_vm6, -inf, %v3810_v4  ;;  %v6572_v4 = vsel %vm207_vm8, %v630_v48, -inf  ;;  %v6589_v48 = vld [vmem:[%s10984_s0 + $0x2b0] sm:$0xff]  ;;  %v6711_v51 = vpop.permute.xlu1 %4003 }
 0x12c   :  { %11778 = vst [vmem:[#allocation111_spill] sm:$0xff] %v6513_v36  ;;  %v6581_v36 = vpop.permute.xlu0 %3983 }
 0x12d   :  { %11779 = vst [vmem:[#allocation112_spill] sm:$0xff] %v6520_v23  ;;  %v3876_v23 = vunpack.i.h.bf16 %v5833_v50  ;;  %v6576_v50 = vsel %vm206_vm7, %v812_v2, -inf  ;;  %v6594_v2 = vld [vmem:[%s10984_s0 + $0x2b8] sm:$0xff] }
 0x12e   :  { %11781 = vst [vmem:[#allocation44_spill] sm:$0xff] %v6533_v20  ;;  %v4217_v12 = vpack.i.bf16 %v6594_v2, %v6589_v48 }
 0x12f   :  { %11783 = vst [vmem:[#allocation45_spill] sm:$0xff] %v6543_v44  ;;  %v6568_v44 = vsel %vm206_vm7, %v822_v7, -inf  ;;  %v3825_v7 = vunpack.i.l.bf16 %v5835_v45  ;;  %v633_v20 = vsel %vm594_vm6, %v3875_v38, %v3876_v23  ;;  %v6653_v23 = vsel %vm206_vm7, %v825_v33, -inf  ;;  %v6670_v33 = vld [vmem:[%s10984_s0 + $0x180] sm:$0xff] }
 0x130   :  { %11784 = vst [vmem:[#allocation113_spill] sm:$0xff] %v6550_v1  ;;  %4218 = vrot.lane.b32.xlu2 %v4217_v12, %s5080_s23  ;;  %v6683_v12 = vld [vmem:[%s10984_s0 + $0x188] sm:$0xff] }
 0x131   :  { %11785 = vst [vmem:[#allocation114_spill] sm:$0xff] %v6557_v41  ;;  %v815_v63 = vsel %vm594_vm6, -inf, %v3825_v7  ;;  %v3840_v41 = vunpack.i.l.bf16 %v5847_v39 }
 0x132   :  { %11786 = vst [vmem:[#allocation115_spill] sm:$0xff] %v6562_v19  ;;  %v3826_v19 = vunpack.i.h.bf16 %v5835_v45  ;;  %v6604_v45 = vsel %vm207_vm8, %v619_v14, -inf  ;;  %v6626_v14 = vld [vmem:[%s10984_s0 + $0x298] sm:$0xff]  ;;  %v6703_v38 = vsel %vm206_vm7, %v815_v63, -inf  ;;  %v6721_v63 = vld [vmem:[%s10984_s0 + $0x2e0] sm:$0xff] }
 0x133   :  { %11787 = vst [vmem:[#allocation116_spill] sm:$0xff] %v6568_v44  ;;  %v814_v44 = vsel %vm594_vm6, -inf, %v3820_v8  ;;  %v818_v11 = vsel %vm594_vm6, -inf, %v3840_v41 }
 0x134   :  { %11788 = vst [vmem:[#allocation117_spill] sm:$0xff] %v6572_v4  ;;  %v623_v28 = vsel %vm594_vm6, %v3825_v7, %v3826_v19  ;;  %v6676_v7 = vsel %vm207_vm8, %v633_v20, -inf  ;;  %v6690_v19 = vld [vmem:[%s10984_s0 + $0x238] sm:$0xff]  ;;  %v828_v20 = vsel %vm594_vm6, -inf, %v3890_v22  ;;  %v6784_v54 = vsel %vm206_vm7, %v818_v11, -inf }
 0x135   :  { %11789 = vst [vmem:[#allocation118_spill] sm:$0xff] %v6576_v50  ;;  %v6699_v50 = vpop.permute.xlu2 %4053  ;;  %v6746_v4 = vld [vmem:[%s10984_s0 + $0x2d8] sm:$0xff] }
 0x136   :  { %11790 = vst [vmem:[#allocation119_spill] sm:$0xff] %v6579_v18  ;;  %v6609_v18 = vld [vmem:[%s10984_s0 + $0x2a0] sm:$0xff] }
 0x137   :  { %11791 = vst [vmem:[#allocation120_spill] sm:$0xff] %v6581_v36  ;;  %v6600_v36 = vsel %vm207_vm8, %v620_v58, -inf  ;;  %v4212_v16 = vpack.i.bf16 %v6614_v0, %v6609_v18  ;;  %v6621_v58 = vld [vmem:[%s10984_s0 + $0x290] sm:$0xff] }
 0x138   :  { %11792 = vst [vmem:[#allocation121_spill] sm:$0xff] %v6589_v48  ;;  %v4207_v1 = vpack.i.bf16 %v6626_v14, %v6621_v58  ;;  %v4006_v48 = vunpack.i.h.bf16 %v6711_v51 }
 0x139   :  { %11793 = vst [vmem:[#allocation122_spill] sm:$0xff] %v6594_v2  ;;  %4213 = vrot.lane.b32.xlu1 %v4212_v16, %s5080_s23  ;;  %v3841_v16 = vunpack.i.h.bf16 %v5847_v39 }
 0x13a   :  { %11794 = vst [vmem:[#allocation123_spill] sm:$0xff] %v6600_v36  ;;  %4208 = vrot.lane.b32.xlu0 %v4207_v1, %s5080_s23  ;;  %v622_v1 = vsel %vm594_vm6, %v3820_v8, %v3821_v10  ;;  %v6713_v10 = vpop.permute.xlu0 %3998  ;;  %v3836_v8 = vunpack.i.h.bf16 %v5849_v5 }
 0x13b   :  { %11795 = vst [vmem:[#allocation124_spill] sm:$0xff] %v6604_v45  ;;  %v6765_v45 = vld [vmem:[%s10984_s0 + $0x1c0] sm:$0xff]  ;;  %v626_v55 = vsel %vm594_vm6, %v3840_v41, %v3841_v16  ;;  %v3856_v41 = vunpack.i.h.bf16 %v5859_v34  ;;  %v6801_v16 = vld [vmem:[%s10984_s0 + $0x1b8] sm:$0xff] }
 0x13c   :  { %11796 = vst [vmem:[#allocation125_spill] sm:$0xff] %v6614_v0  ;;  %v6819_v11 = vsel %vm207_vm8, %v626_v55, -inf }
 0x13d   :  { %11797 = vst [vmem:[#allocation126_spill] sm:$0xff] %v6621_v58  ;;  %v3851_v58 = vunpack.i.h.bf16 %v5861_v35 }
 0x13e   :  { %11798 = vst [vmem:[#allocation127_spill] sm:$0xff] %v6626_v14 }
 0x13f   :  { %11799 = vst [vmem:[#allocation128_spill] sm:$0xff] %v6632_v42  ;;  %v636_v42 = vsel %vm594_vm6, %v3890_v22, %v3891_v60  ;;  %v3905_v60 = vunpack.i.l.bf16 %v5857_v24  ;;  %v3855_v22 = vunpack.i.l.bf16 %v5859_v34 }
 0x140   :  { %11800 = vst [vmem:[#allocation129_spill] sm:$0xff] %v6640_v61  ;;  %v6663_v61 = vld [vmem:[%s10984_s0 + $0x198] sm:$0xff] }
 0x141   :  { %11802 = vst [vmem:[#allocation131_spill] sm:$0xff] %v6653_v23  ;;  %v3835_v23 = vunpack.i.l.bf16 %v5849_v5  ;;  %v6736_v5 = vsel %vm207_vm8, %v622_v1, -inf  ;;  %v6758_v1 = vld [vmem:[%s10984_s0 + $0x2c8] sm:$0xff]  ;;  %v821_v55 = vsel %vm594_vm6, -inf, %v3855_v22 }
 0x142   :  { %11803 = vst [vmem:[#allocation132_spill] sm:$0xff] %v6663_v61  ;;  %v6707_v61 = vsel %vm207_vm8, %v623_v28, -inf  ;;  %v6726_v28 = vld [vmem:[%s10984_s0 + $0x2e8] sm:$0xff]  ;;  %v6840_v53 = vpop.permute.xlu0 %4013 }
 0x143   :  { %11804 = vst [vmem:[#allocation133_spill] sm:$0xff] %v6670_v33  ;;  %v4232_v39 = vpack.i.bf16 %v6726_v28, %v6721_v63  ;;  %v625_v46 = vsel %vm594_vm6, %v3835_v23, %v3836_v8  ;;  %v817_v33 = vsel %vm594_vm6, -inf, %v3835_v23  ;;  %v3850_v8 = vunpack.i.l.bf16 %v5861_v35  ;;  %v6856_v35 = vld [vmem:[%s10984_s0 + $0x318] sm:$0xff] }
 0x144   :  { %11805 = vst [vmem:[#allocation134_spill] sm:$0xff] %v6676_v7  ;;  %v3906_v23 = vunpack.i.h.bf16 %v5857_v24  ;;  %v6833_v34 = vsel %vm207_vm8, %v625_v46, -inf  ;;  %v629_v24 = vsel %vm594_vm6, %v3855_v22, %v3856_v41  ;;  %v6851_v46 = vld [vmem:[%s10984_s0 + $0x310] sm:$0xff]  ;;  %v6865_v22 = vld [vmem:[%s10984_s0 + $0x300] sm:$0xff]  ;;  %v6870_v41 = vld [vmem:[%s10984_s0 + $0x308] sm:$0xff] }
 0x145   :  { %11806 = vst [vmem:[#allocation135_spill] sm:$0xff] %v6683_v12  ;;  %4233 = vrot.lane.b32.xlu2 %v4232_v39, %s5080_s23  ;;  %v831_v39 = vsel %vm594_vm6, -inf, %v3905_v60  ;;  %v4242_v7 = vpack.i.bf16 %v6870_v41, %v6865_v22 }
 0x146   :  { %11807 = vst [vmem:[#allocation136_spill] sm:$0xff] %v6690_v19  ;;  %v6741_v19 = vld [vmem:[%s10984_s0 + $0x2d0] sm:$0xff] }
 0x147   :  { %11808 = vst [vmem:[#allocation137_spill] sm:$0xff] %v6699_v50  ;;  %v4227_v36 = vpack.i.bf16 %v6746_v4, %v6741_v19  ;;  %v6772_v50 = vsel %vm206_vm7, %v828_v20, -inf  ;;  %v6791_v20 = vld [vmem:[%s10984_s0 + $0x1b0] sm:$0xff] }
 0x148   :  { %11809 = vst [vmem:[#allocation138_spill] sm:$0xff] %v6703_v38  ;;  %v6877_v38 = vld [vmem:[%s10984_s0 + $0x2f0] sm:$0xff] }
 0x149   :  { %11810 = vst [vmem:[#allocation139_spill] sm:$0xff] %v6707_v61  ;;  %4228 = vrot.lane.b32.xlu1 %v4227_v36, %s5080_s23  ;;  %v6844_v36 = vsel %vm206_vm7, %v817_v33, -inf  ;;  %v820_v33 = vsel %vm594_vm6, -inf, %v3850_v8  ;;  %v4237_v61 = vpack.i.bf16 %v6882_v32, %v6877_v38 }
 0x14a   :  { %11811 = vst [vmem:[#allocation140_spill] sm:$0xff] %v6713_v10  ;;  %v6732_v10 = vsel %vm206_vm7, %v814_v44, -inf  ;;  %v6753_v44 = vld [vmem:[%s10984_s0 + $0x2c0] sm:$0xff] }
 0x14b   :  { %11812 = vst [vmem:[#allocation141_spill] sm:$0xff] %v6721_v63  ;;  %v4222_v12 = vpack.i.bf16 %v6758_v1, %v6753_v44  ;;  %v11893_v63 = vld [vmem:[#allocation74_spill] sm:$0xff] }
 0x14c   :  { %11813 = vst [vmem:[#allocation142_spill] sm:$0xff] %v6726_v28 }
 0x14d   :  { %11814 = vst [vmem:[#allocation143_spill] sm:$0xff] %v6732_v10  ;;  %4223 = vrot.lane.b32.xlu0 %v4222_v12, %s5080_s23  ;;  %v6829_v12 = vpop.permute.xlu2 %4068  ;;  %v6898_v10 = vld [vmem:[%s10984_s0 + $0x1f8] sm:$0xff] }
 0x14e   :  { %11815 = vst [vmem:[#allocation144_spill] sm:$0xff] %v6736_v5  ;;  %v6889_v5 = vsel %vm206_vm7, %v831_v39, -inf  ;;  %v6926_v39 = vld [vmem:[%s10984_s0 + $0x1e8] sm:$0xff] }
 0x14f   :  { %11816 = vst [vmem:[#allocation145_spill] sm:$0xff] %v6741_v19 }
 0x150   :  { %11817 = vst [vmem:[#allocation146_spill] sm:$0xff] %v6746_v4  ;;  %v11911_v4 = vld [vmem:[#allocation4_spill] sm:$0xff] }
 0x151   :  { %11818 = vst [vmem:[#allocation147_spill] sm:$0xff] %v6753_v44  ;;  %4243 = vrot.lane.b32.xlu1 %v4242_v7, %s5080_s23 }
 0x152   :  { %11819 = vst [vmem:[#allocation148_spill] sm:$0xff] %v6758_v1 }
 0x153   :  { %11820 = vst [vmem:[#allocation149_spill] sm:$0xff] %v6765_v45  ;;  %v6807_v45 = vsel %vm207_vm8, %v636_v42, -inf  ;;  %v6824_v42 = vld [vmem:[%s10984_s0 + $0x1f0] sm:$0xff] }
 0x154   :  { %11821 = vst [vmem:[#allocation150_spill] sm:$0xff] %v6772_v50  ;;  %v6838_v50 = vpop.permute.xlu1 %4018 }
 0x155   :  { %11823 = vst [vmem:[#allocation152_spill] sm:$0xff] %v6784_v54  ;;  %v3870_v54 = vunpack.i.l.bf16 %v5885_v3  ;;  %4238 = vrot.lane.b32.xlu0 %v4237_v61, %s5080_s23  ;;  %v6966_v61 = vld [vmem:[%s10984_s0 + $0x210] sm:$0xff]  ;;  %v4021_v0 = vunpack.i.h.bf16 %v6838_v50 }
 0x156   :  { %11824 = vst [vmem:[#allocation153_spill] sm:$0xff] %v6791_v20  ;;  %v6893_v20 = vsel %vm206_vm7, %v821_v55, -inf  ;;  %v628_v55 = vsel %vm594_vm6, %v3850_v8, %v3851_v58  ;;  %v6954_v58 = vpop.permute.xlu2 %4083 }
 0x157   :  { %11825 = vst [vmem:[#allocation154_spill] sm:$0xff] %v6801_v16  ;;  %v639_v16 = vsel %vm594_vm6, %v3905_v60, %v3906_v23  ;;  %v6905_v60 = vld [vmem:[%s10984_s0 + $0x1e0] sm:$0xff]  ;;  %v6911_v23 = vsel %vm207_vm8, %v629_v24, -inf  ;;  %v3866_v24 = vunpack.i.h.bf16 %v5887_v52 }
 0x158   :  { %11826 = vst [vmem:[#allocation155_spill] sm:$0xff] %v6807_v45  ;;  %v6934_v8 = vsel %vm207_vm8, %v639_v16, -inf  ;;  %v6950_v16 = vsel %vm207_vm8, %v628_v55, -inf  ;;  %v6978_v45 = vpop.permute.xlu0 %4028  ;;  %v3885_v55 = vunpack.i.l.bf16 %v5941_v37 }
 0x159   :  { %11827 = vst [vmem:[#allocation156_spill] sm:$0xff] %v6819_v11 }
 0x15a   :  { %11828 = vst [vmem:[#allocation157_spill] sm:$0xff] %v6824_v42  ;;  %v4247_v42 = vpack.i.bf16 %v6856_v35, %v6851_v46 }
 0x15b   :  { %11829 = vst [vmem:[#allocation158_spill] sm:$0xff] %v6829_v12  ;;  %v3871_v12 = vunpack.i.h.bf16 %v5885_v3  ;;  %v3865_v3 = vunpack.i.l.bf16 %v5887_v52  ;;  %v3921_v52 = vunpack.i.h.bf16 %v5879_v29 }
 0x15c   :  { %11830 = vst [vmem:[#allocation159_spill] sm:$0xff] %v6833_v34  ;;  %4248 = vrot.lane.b32.xlu2 %v4247_v42, %s5080_s23  ;;  %v6941_v42 = vld [vmem:[%s10984_s0 + $0x220] sm:$0xff]  ;;  %v6976_v14 = vpop.permute.xlu1 %4033 }
 0x15d   :  { %11831 = vst [vmem:[#allocation160_spill] sm:$0xff] %v6844_v36  ;;  %v823_v34 = vsel %vm594_vm6, -inf, %v3865_v3  ;;  %v3881_v36 = vunpack.i.h.bf16 %v5943_v43 }
 0x15e   :  { %11832 = vst [vmem:[#allocation161_spill] sm:$0xff] %v6851_v46 }
 0x15f   :  { %11833 = vst [vmem:[#allocation162_spill] sm:$0xff] %v6856_v35  ;;  %v12029_v35 = vld [vmem:[#allocation22_spill] sm:$0xff] }
 0x160   :  { %11834 = vst [vmem:[#allocation163_spill] sm:$0xff] %v6865_v22  ;;  %v6917_v22 = vsel %vm206_vm7, %v820_v33, -inf  ;;  %v6959_v33 = vld [vmem:[%s10984_s0 + $0x228] sm:$0xff] }
 0x161   :  { %11835 = vst [vmem:[#allocation164_spill] sm:$0xff] %v6870_v41  ;;  %v11844_v41 = vunpack.i.l.bf16 %v5879_v29 }
 0x162   :  { %11836 = vst [vmem:[#allocation165_spill] sm:$0xff] %v6877_v38  ;;  %v3950_v38 = vunpack.i.l.bf16 %v6000_v59 }
 0x163   :  { %11838 = vst [vmem:[#allocation167_spill] sm:$0xff] %v6889_v5  ;;  %v632_v5 = vsel %vm594_vm6, %v3870_v54, %v3871_v12  ;;  %v3886_v12 = vunpack.i.h.bf16 %v5941_v37  ;;  %v7020_v37 = vld [vmem:[%s10984_s0 + $0x328] sm:$0xff] }
 0x164   :  { %11839 = vst [vmem:[#allocation168_spill] sm:$0xff] %v6893_v20  ;;  %v6989_v20 = vld [vmem:[%s10984_s0 + $0x340] sm:$0xff] }
 0x165   :  { %11840 = vst [vmem:[#allocation169_spill] sm:$0xff] %v6898_v10  ;;  %v834_v10 = vsel %vm594_vm6, -inf, %v11844_v41  ;;  %v824_v41 = vsel %vm594_vm6, -inf, %v3870_v54  ;;  %v6994_v54 = vld [vmem:[%s10984_s0 + $0x348] sm:$0xff] }
 0x166   :  { %11841 = vst [vmem:[#allocation170_spill] sm:$0xff] %v6905_v60  ;;  %v6973_v44 = vsel %vm206_vm7, %v834_v10, -inf  ;;  %v6982_v7 = vsel %vm206_vm7, %v824_v41, -inf  ;;  %v4262_v10 = vpack.i.bf16 %v6994_v54, %v6989_v20  ;;  %v3880_v41 = vunpack.i.l.bf16 %v5943_v43  ;;  %v7049_v43 = vld [vmem:[%s10984_s0 + $0x250] sm:$0xff] }
 0x167   :  { %11842 = vst [vmem:[#allocation171_spill] sm:$0xff] %v6911_v23  ;;  %v7008_v23 = vld [vmem:[%s10984_s0 + $0x338] sm:$0xff]  ;;  %v3936_v60 = vunpack.i.h.bf16 %v5928_v31 }
 0x168   :  { %11843 = vst [vmem:[#allocation172_spill] sm:$0xff] %v6917_v22  ;;  %v7015_v22 = vld [vmem:[%s10984_s0 + $0x320] sm:$0xff]  ;;  %4263 = vrot.lane.b32.xlu2 %v4262_v10, %s5080_s23  ;;  %v634_v10 = vsel %vm594_vm6, %v3880_v41, %v3881_v36  ;;  %v3900_v36 = vunpack.i.l.bf16 %v6010_v49 }
 0x169   :  { %11845 = vst [vmem:[#allocation173_spill] sm:$0xff] %v6926_v39  ;;  %v4252_v11 = vpack.i.bf16 %v7020_v37, %v7015_v22  ;;  %v631_v39 = vsel %vm594_vm6, %v3865_v3, %v3866_v24  ;;  %v827_v24 = vsel %vm594_vm6, -inf, %v3885_v55  ;;  %v826_v3 = vsel %vm594_vm6, -inf, %v3880_v41 }
 0x16a   :  { %11846 = vst [vmem:[#allocation174_spill] sm:$0xff] %v6934_v8  ;;  %v7114_v1 = vsel %vm207_vm8, %v634_v10, -inf }
 0x16b   :  { %11847 = vst [vmem:[#allocation175_spill] sm:$0xff] %v6941_v42  ;;  %v3935_v42 = vunpack.i.l.bf16 %v5928_v31  ;;  %v635_v31 = vsel %vm594_vm6, %v3885_v55, %v3886_v12  ;;  %4253 = vrot.lane.b32.xlu0 %v4252_v11, %s5080_s23  ;;  %v7086_v11 = vsel %vm206_vm7, %v827_v24, -inf  ;;  %v3895_v24 = vunpack.i.l.bf16 %v6012_v26  ;;  %v5035_v55 = vld [vmem:[%s10984_s0 + $0x370] sm:$0xff] }
 0x16c   :  { %11848 = vst [vmem:[#allocation176_spill] sm:$0xff] %v6950_v16  ;;  %v7099_v41 = vsel %vm207_vm8, %v635_v31, -inf  ;;  %v5038_v31 = vld [vmem:[%s10984_s0 + $0x368] sm:$0xff]  ;;  %v830_v16 = vsel %vm594_vm6, -inf, %v3900_v36 }
 0x16d   :  { %11849 = vst [vmem:[#allocation177_spill] sm:$0xff] %v6959_v33  ;;  %v7003_v33 = vld [vmem:[%s10984_s0 + $0x330] sm:$0xff] }
 0x16e   :  { %11850 = vst [vmem:[#allocation178_spill] sm:$0xff] %v6966_v61  ;;  %v4257_v61 = vpack.i.bf16 %v7008_v23, %v7003_v33 }
 0x16f   :  { %11851 = vst [vmem:[#allocation179_spill] sm:$0xff] %v6973_v44  ;;  %v5036_v44 = vld [vmem:[%s10984_s0 + $0x378] sm:$0xff] }
 0x170   :  { %11852 = vst [vmem:[#allocation180_spill] sm:$0xff] %v6982_v7  ;;  %4258 = vrot.lane.b32.xlu1 %v4257_v61, %s5080_s23  ;;  %v3951_v7 = vunpack.i.h.bf16 %v6000_v59  ;;  %v7153_v59 = vld [vmem:[%s10984_s0 + $0x248] sm:$0xff] }
 0x171   :  { %11853 = vst [vmem:[#allocation181_spill] sm:$0xff] %v6989_v20  ;;  %v7038_v20 = vld [vmem:[%s10984_s0 + $0x218] sm:$0xff] }
 0x172   :  { %11854 = vst [vmem:[#allocation182_spill] sm:$0xff] %v6994_v54  ;;  %v7033_v54 = vsel %vm207_vm8, %v632_v5, -inf  ;;  %v645_v5 = vsel %vm594_vm6, %v3935_v42, %v3936_v60  ;;  %v7089_v60 = vpop.permute.xlu1 %4048 }
 0x173   :  { %11855 = vst [vmem:[#allocation183_spill] sm:$0xff] %v7003_v33 }
 0x174   :  { %11856 = vst [vmem:[#allocation184_spill] sm:$0xff] %v7008_v23  ;;  %v11859_v23 = vunpack.i.l.bf16 %v5879_v29  ;;  %v7062_v29 = vsel %vm207_vm8, %v631_v39, -inf  ;;  %v7076_v39 = vld [vmem:[%s10984_s0 + $0x258] sm:$0xff] }
 0x175   :  { %11857 = vst [vmem:[#allocation185_spill] sm:$0xff] %v7015_v22 }
 0x176   :  { %11858 = vst [vmem:[#allocation186_spill] sm:$0xff] %v7020_v37  ;;  %v642_v33 = vsel %vm594_vm6, %v11859_v23, %v3921_v52  ;;  %v837_v23 = vsel %vm594_vm6, -inf, %v3935_v42  ;;  %v7058_v52 = vsel %vm206_vm7, %v823_v34, -inf  ;;  %v7071_v34 = vpop.permute.xlu2 %4098  ;;  %v7091_v42 = vpop.permute.xlu0 %4043 }
 0x177   :  { %11860 = vst [vmem:[#allocation187_spill] sm:$0xff] %v7033_v54  ;;  %v7082_v61 = vsel %vm206_vm7, %v837_v23, -inf  ;;  %v7095_v12 = vsel %vm207_vm8, %v642_v33, -inf  ;;  %v7103_v23 = vsel %vm206_vm7, %v826_v3, -inf  ;;  %v4277_v33 = vpack.i.bf16 %v5036_v44, %v5035_v55  ;;  %v5037_v3 = vld [vmem:[%s10984_s0 + $0x360] sm:$0xff]  ;;  %v7130_v44 = vld [vmem:[%s10984_s0 + $0x358] sm:$0xff] }
 0x178   :  { %11861 = vst [vmem:[#allocation188_spill] sm:$0xff] %v7038_v20  ;;  %v4272_v8 = vpack.i.bf16 %v5038_v31, %v5037_v3  ;;  %v7136_v55 = vsel %vm207_vm8, %v645_v5, -inf  ;;  %v840_v3 = vsel %vm594_vm6, -inf, %v3950_v38  ;;  %v3901_v31 = vunpack.i.h.bf16 %v6010_v49  ;;  %v7145_v54 = vld [vmem:[%s10984_s0 + $0x240] sm:$0xff]  ;;  %v7173_v49 = vld [vmem:[%s10984_s0 + $0x288] sm:$0xff] }
 0x179   :  { %11862 = vst [vmem:[#allocation189_spill] sm:$0xff] %v7049_v43  ;;  %v7125_v43 = vld [vmem:[%s10984_s0 + $0x350] sm:$0xff]  ;;  %v7164_v20 = vld [vmem:[%s10984_s0 + $0x280] sm:$0xff]  ;;  %4278 = vrot.lane.b32.xlu2 %v4277_v33, %s5080_s23  ;;  %v7186_v22 = vsel %vm206_vm7, %v840_v3, -inf  ;;  %v7193_v33 = vld [vmem:[%s10984_s0 + $0x278] sm:$0xff]  ;;  %v3965_v5 = vunpack.i.l.bf16 %v6077_v17 }
 0x17a   :  { %11863 = vst [vmem:[#allocation190_spill] sm:$0xff] %v7058_v52  ;;  %v4267_v10 = vpack.i.bf16 %v7130_v44, %v7125_v43  ;;  %v829_v52 = vsel %vm594_vm6, -inf, %v3895_v24  ;;  %4273 = vrot.lane.b32.xlu1 %v4272_v8, %s5080_s23  ;;  %v638_v3 = vsel %vm594_vm6, %v3900_v36, %v3901_v31  ;;  %v7203_v8 = vsel %vm206_vm7, %v830_v16, -inf  ;;  %v5048_v31 = vld [vmem:[%s10984_s0 + $0x3a8] sm:$0xff]  ;;  %v5049_v16 = vld [vmem:[%s10984_s0 + $0x390] sm:$0xff] }
 0x17b   :  { %11864 = vst [vmem:[#allocation191_spill] sm:$0xff] %v7076_v39  ;;  %v3896_v39 = vunpack.i.h.bf16 %v6012_v26  ;;  %v7180_v26 = vld [vmem:[%s10984_s0 + $0x270] sm:$0xff]  ;;  %v7231_v37 = vsel %vm207_vm8, %v638_v3, -inf  ;;  %v7248_v3 = vld [vmem:[%s10984_s0 + $0x388] sm:$0xff] }
 0x17c   :  { %11865 = vst [vmem:[#allocation192_spill] sm:$0xff] %v7082_v61  ;;  %4268 = vrot.lane.b32.xlu0 %v4267_v10, %s5080_s23  ;;  %v3916_v61 = vunpack.i.h.bf16 %v6083_v9 }
 0x17d   :  { %11866 = vst [vmem:[#allocation193_spill] sm:$0xff] %v7086_v11  ;;  %v637_v10 = vsel %vm594_vm6, %v3895_v24, %v3896_v39  ;;  %v3911_v39 = vunpack.i.h.bf16 %v6085_v15  ;;  %v3910_v24 = vunpack.i.l.bf16 %v6085_v15  ;;  %v5050_v15 = vld [vmem:[%s10984_s0 + $0x398] sm:$0xff] }
 0x17e   :  { %11867 = vst [vmem:[#allocation194_spill] sm:$0xff] %v7095_v12  ;;  %v7206_v32 = vpop.permute.xlu2 %4113  ;;  %v7210_v12 = vsel %vm206_vm7, %v829_v52, -inf  ;;  %v7217_v36 = vpop.permute.xlu0 %4058  ;;  %v5047_v52 = vld [vmem:[%s10984_s0 + $0x3a0] sm:$0xff] }
 0x17f   :  { %11868 = vst [vmem:[#allocation195_spill] sm:$0xff] %v7125_v43  ;;  %v4287_v43 = vpack.i.bf16 %v5050_v15, %v5049_v16  ;;  %v843_v15 = vsel %vm594_vm6, -inf, %v3965_v5  ;;  %v4005_v16 = vunpack.i.l.bf16 %v6711_v51 }
 0x180   :  { %11869 = vst [vmem:[#allocation196_spill] sm:$0xff] %v7130_v44 }
 0x181   :  { %11870 = vst [vmem:[#allocation197_spill] sm:$0xff] %v7136_v55  ;;  %v3966_v55 = vunpack.i.h.bf16 %v6077_v17 }
 0x182   :  { %11871 = vst [vmem:[#allocation198_spill] sm:$0xff] %v7145_v54  ;;  %v648_v54 = vsel %vm594_vm6, %v3950_v38, %v3951_v7  ;;  %v3915_v38 = vunpack.i.l.bf16 %v6083_v9  ;;  %v7215_v7 = vpop.permute.xlu1 %4063  ;;  %v4292_v9 = vpack.i.bf16 %v5048_v31, %v5047_v52  ;;  %v7256_v31 = vsel %vm207_vm8, %v637_v10, -inf  ;;  %4288 = vrot.lane.b32.xlu1 %v4287_v43, %s5080_s23 }
 0x183   :  { %11872 = vst [vmem:[#allocation199_spill] sm:$0xff] %v7164_v20  ;;  %v640_v52 = vsel %vm594_vm6, %v3910_v24, %v3911_v39  ;;  %v832_v10 = vsel %vm594_vm6, -inf, %v3910_v24 }
 0x184   :  { %11873 = vst [vmem:[#allocation200_spill] sm:$0xff] %v7173_v49  ;;  %v641_v20 = vsel %vm594_vm6, %v3915_v38, %v3916_v61  ;;  %v833_v11 = vsel %vm594_vm6, -inf, %v3915_v38  ;;  %v7266_v49 = vsel %vm207_vm8, %v648_v54, -inf  ;;  %4293 = vrot.lane.b32.xlu2 %v4292_v9, %s5080_s23  ;;  %v7279_v54 = vsel %vm206_vm7, %v843_v15, -inf }
 0x185   :  { %11874 = vst [vmem:[#allocation201_spill] sm:$0xff] %v7186_v22  ;;  %v7243_v22 = vld [vmem:[%s10984_s0 + $0x380] sm:$0xff]  ;;  %v7291_v43 = vsel %vm206_vm7, %v833_v11, -inf  ;;  %v7295_v38 = vsel %vm206_vm7, %v832_v10, -inf  ;;  %v7303_v9 = vsel %vm207_vm8, %v641_v20, -inf  ;;  %v1301_v15 = vsel %vm1300_vm12, %v4006_v48, -inf }
 0x186   :  { %11875 = vst [vmem:[#allocation202_spill] sm:$0xff] %v7203_v8  ;;  %v4282_v17 = vpack.i.bf16 %v7248_v3, %v7243_v22  ;;  %v651_v8 = vsel %vm594_vm6, %v3965_v5, %v3966_v55  ;;  %v7281_v61 = vpop.permute.xlu2 %4128  ;;  %v7299_v24 = vpop.permute.xlu0 %4073  ;;  %v1108_v11 = vsel %vm1107_vm11, %v4005_v16, %v4006_v48  ;;  %v5053_v10 = vld [vmem:[%s10984_s0 + $0x3d0] sm:$0xff]  ;;  %v5054_v5 = vld [vmem:[%s10984_s0 + $0x3d8] sm:$0xff]  ;;  %v4010_v55 = vunpack.i.l.bf16 %v6336_v57  ;;  %v5055_v48 = vld [vmem:[%s10984_s0 + $0x3c0] sm:$0xff] }
 0x187   :  { %11876 = vst [vmem:[#allocation203_spill] sm:$0xff] %v7231_v37  ;;  %v4307_v51 = vpack.i.bf16 %v5054_v5, %v5053_v10  ;;  %v7319_v20 = vsel %vm207_vm8, %v651_v8, -inf  ;;  %v5056_v16 = vld [vmem:[%s10984_s0 + $0x3c8] sm:$0xff]  ;;  %v7332_v5 = vld [vmem:[%s10984_s0 + $0x3b0] sm:$0xff]  ;;  %v7337_v8 = vld [vmem:[%s10984_s0 + $0x3b8] sm:$0xff]  ;;  %v1502_v2 = vsel %vm209_vm10, %v1301_v15, -inf  ;;  %v4016_v10 = vunpack.i.h.bf16 %v6840_v53 }
 0x188   :  { %11877 = vst [vmem:[#allocation204_spill] sm:$0xff] %v7243_v22  ;;  %4283 = vrot.lane.b32.xlu0 %v4282_v17, %s5080_s23  ;;  %v7307_v17 = vsel %vm207_vm8, %v640_v52, -inf  ;;  %v4011_v52 = vunpack.i.h.bf16 %v6336_v57  ;;  %v4302_v44 = vpack.i.bf16 %v5056_v16, %v5055_v48  ;;  %v4297_v57 = vpack.i.bf16 %v7337_v8, %v7332_v5 }
 0x189   :  { %11878 = vst [vmem:[#allocation205_spill] sm:$0xff] %v7248_v3  ;;  %v1501_v37 = vsel %vm208_vm9, %v1108_v11, -inf  ;;  %v3981_v15 = vunpack.i.h.bf16 %v6140_v47  ;;  %v3980_v11 = vunpack.i.l.bf16 %v6140_v47  ;;  %v11888_v48 = vmax.f32 %v5972_v25, %v11655_v30 }
 0x18a   :  { %11879 = vst [vmem:[#allocation206_spill] sm:$0xff] %v7256_v31  ;;  %v7297_v39 = vpop.permute.xlu1 %4078  ;;  %v4020_v31 = vunpack.i.l.bf16 %v6838_v50  ;;  %v1302_v22 = vsel %vm1300_vm12, %v4011_v52, -inf  ;;  %v1109_v50 = vsel %vm1107_vm11, %v4010_v55, %v4011_v52  ;;  %4303 = vrot.lane.b32.xlu1 %v4302_v44, %s5080_s23  ;;  %v11890_v47 = vmax.f32 %v5997_v40, %v11664_v27 }
 0x18b   :  { %11880 = vst [vmem:[#allocation207_spill] sm:$0xff] %v7266_v49  ;;  %v4015_v49 = vunpack.i.l.bf16 %v6840_v53  ;;  %v3931_v53 = vunpack.i.h.bf16 %v6160_v62  ;;  %v7373_v16 = vmax.f32 %v11888_v48, %v1502_v2  ;;  %v3926_v44 = vunpack.i.h.bf16 %v6162_v56 }
 0x18c   :  { %11881 = vst [vmem:[#allocation208_spill] sm:$0xff] %v7279_v54  ;;  %4308 = vrot.lane.b32.xlu2 %v4307_v51, %s5080_s23  ;;  %v3930_v51 = vunpack.i.l.bf16 %v6160_v62  ;;  %v7380_v3 = vmax.f32 %v11890_v47, %v1501_v37  ;;  %v1304_v52 = vsel %vm1300_vm12, %v4021_v0, -inf  ;;  %v1111_v62 = vsel %vm1107_vm11, %v4020_v31, %v4021_v0  ;;  %v5059_v0 = vld [vmem:[%s10984_s0 + $0x3f0] sm:$0xff]  ;;  %v5060_v31 = vld [vmem:[%s10984_s0 + $0x3f8] sm:$0xff] }
 0x18d   :  { %11882 = vst [vmem:[#allocation209_spill] sm:$0xff] %v7291_v43  ;;  %v1504_v30 = vsel %vm209_vm10, %v1302_v22, -inf  ;;  %v1503_v27 = vsel %vm208_vm9, %v1109_v50, -inf  ;;  %v1303_v40 = vsel %vm1300_vm12, %v4016_v10, -inf  ;;  %v1110_v2 = vsel %vm1107_vm11, %v4015_v49, %v4016_v10  ;;  %v5061_v50 = vld [vmem:[%s10984_s0 + $0x3e0] sm:$0xff]  ;;  %v5062_v49 = vld [vmem:[%s10984_s0 + $0x3e8] sm:$0xff] }
 0x18e   :  { %11883 = vst [vmem:[#allocation210_spill] sm:$0xff] %v7303_v9  ;;  %v7375_v54 = vpop.permute.xlu2 %4143  ;;  %v7388_v25 = vpop.permute.xlu0 %4088  ;;  %v4026_v37 = vunpack.i.h.bf16 %v6446_v6  ;;  %v4025_v48 = vunpack.i.l.bf16 %v6446_v6  ;;  %v4317_v22 = vpack.i.bf16 %v5060_v31, %v5059_v0  ;;  %v4312_v10 = vpack.i.bf16 %v5062_v49, %v5061_v50  ;;  %v11894_v43 = vld [vmem:[#allocation13_spill] sm:$0xff] }
 0x18f   :  { %11884 = vst [vmem:[#allocation211_spill] sm:$0xff] %v7307_v17  ;;  %v846_v6 = vsel %vm594_vm6, -inf, %v3980_v11  ;;  %v1508_v47 = vsel %vm209_vm10, %v1304_v52, -inf  ;;  %v1507_v55 = vsel %vm208_vm9, %v1111_v62, -inf  ;;  %v7417_v0 = vpack.i.bf16 %v7373_v16, %v7380_v3 }
 0x190   :  { %11885 = vst [vmem:[#allocation212_spill] sm:$0xff] %v7319_v20  ;;  %4298 = vrot.lane.b32.xlu0 %v4297_v57, %s5080_s23  ;;  %v1506_v31 = vsel %vm209_vm10, %v1303_v40, -inf  ;;  %v1505_v20 = vsel %vm208_vm9, %v1110_v2, -inf  ;;  %v4036_v50 = vunpack.i.h.bf16 %v6976_v14  ;;  %v4035_v49 = vunpack.i.l.bf16 %v6976_v14  ;;  %v11897_v40 = vld [vmem:[#allocation6_spill] sm:$0xff] }
 0x191   :  { %11886 = vst [vmem:[#allocation213_spill] sm:$0xff] %v7332_v5  ;;  %v11895_v52 = vmax.f32 %v11893_v63, %v11894_v43  ;;  %v4031_v62 = vunpack.i.h.bf16 %v6978_v45  ;;  %v7440_v14 = vsel %vm594_vm6, %v3980_v11, %v3981_v15  ;;  %v7444_v63 = vsel %vm206_vm7, %v846_v6, -inf  ;;  %v11907_v15 = vld [vmem:[#allocation5_spill] sm:$0xff] }
 0x192   :  { %11887 = vst [vmem:[#allocation214_spill] sm:$0xff] %v7337_v8  ;;  %v7386_v57 = vpop.permute.xlu1 %4093  ;;  %v1305_v43 = vsel %vm1300_vm12, %v4026_v37, -inf  ;;  %4318 = vrot.lane.b32.xlu1 %v4317_v22, %s5080_s23  ;;  %v11915_v22 = vld [vmem:[#allocation10_spill] sm:$0xff] }
 0x193   :  { %11889 = vst [vmem:[#allocation215_spill] sm:$0xff] %v7373_v16  ;;  %v7428_v28 = vmax.f32 %v11895_v52, %v1504_v30  ;;  %v4030_v16 = vunpack.i.l.bf16 %v6978_v45  ;;  %v1112_v45 = vsel %vm1107_vm11, %v4025_v48, %v4026_v37  ;;  %v11902_v30 = vld [vmem:[#allocation47_spill] sm:$0xff]  ;;  %v11914_v48 = vld [vmem:[#allocation46_spill] sm:$0xff] }
 0x194   :  { %11891 = vst [vmem:[#allocation216_spill] sm:$0xff] %v7380_v3  ;;  %4323 = vrot.lane.b32.xlu2 %v7417_v0, %s5082_s8  ;;  %v11898_v3 = vld [vmem:[#allocation12_spill] sm:$0xff]  ;;  %v11903_v52 = vld [vmem:[#allocation11_spill] sm:$0xff] }
 0x195   :  { %11892 = vst [vmem:[#allocation217_spill] sm:$0xff] %v7417_v0  ;;  %v11899_v2 = vmax.f32 %v11897_v40, %v11898_v3  ;;  %v11904_v3 = vmax.f32 %v11902_v30, %v11903_v52  ;;  %v11906_v40 = vld [vmem:[#allocation73_spill] sm:$0xff]  ;;  %v11910_v0 = vld [vmem:[#allocation72_spill] sm:$0xff]  ;;  %v836_v30 = vsel %vm594_vm6, -inf, %v3930_v51  ;;  %v1307_v52 = vsel %vm1300_vm12, %v4036_v50, -inf }
 0x196   :  { %11896 = vst [vmem:[#allocation74_spill] sm:$0xff] %v7428_v28  ;;  %v11908_v11 = vmax.f32 %v11906_v40, %v11907_v15  ;;  %v7460_v6 = vpop.permute.xlu2 %4158  ;;  %v11912_v17 = vmax.f32 %v11910_v0, %v11911_v4  ;;  %v7478_v40 = vpop.permute.xlu0 %4103  ;;  %v11918_v4 = vunpack.i.l.bf16 %v6162_v56  ;;  %v1509_v0 = vsel %vm208_vm9, %v1112_v45, -inf }
 0x197   :  { %v7437_v9 = vmax.f32 %v11899_v2, %v1503_v27  ;;  %11901 = vst [vmem:[#allocation6_spill] sm:$0xff] %v7444_v63  ;;  %v7453_v27 = vmax.f32 %v11904_v3, %v1508_v47  ;;  %v644_v47 = vsel %vm594_vm6, %v3930_v51, %v3931_v53  ;;  %v1510_v51 = vsel %vm209_vm10, %v1305_v43, -inf }
 0x198   :  { %4313 = vrot.lane.b32.xlu0 %v4312_v10, %s5080_s23  ;;  %v7458_v2 = vmax.f32 %v11908_v11, %v1506_v31  ;;  %v7465_v37 = vmax.f32 %v11912_v17, %v1505_v20  ;;  %v11916_v10 = vmax.f32 %v11914_v48, %v11915_v22  ;;  %v1114_v31 = vsel %vm1107_vm11, %v4035_v49, %v4036_v50  ;;  %v11920_v50 = vld [vmem:[#allocation114_spill] sm:$0xff] }
 0x199   :  { %11900 = vst [vmem:[#allocation13_spill] sm:$0xff] %v7437_v9  ;;  %v7483_v17 = vsel %vm594_vm6, %v11918_v4, %v3926_v44  ;;  %v1306_v20 = vsel %vm1300_vm12, %v4031_v62, -inf  ;;  %v7489_v53 = vpack.i.bf16 %v7428_v28, %v7437_v9  ;;  %v4041_v49 = vunpack.i.h.bf16 %v11920_v50 }
 0x19a   :  { %11905 = vst [vmem:[#allocation12_spill] sm:$0xff] %v7453_v27  ;;  %v7470_v19 = vmax.f32 %v11916_v10, %v1507_v55  ;;  %v7476_v3 = vpop.permute.xlu1 %4108  ;;  %v1113_v55 = vsel %vm1107_vm11, %v4030_v16, %v4031_v62  ;;  %v4040_v15 = vunpack.i.l.bf16 %v11920_v50  ;;  %v1514_v44 = vsel %vm209_vm10, %v1307_v52, -inf  ;;  %v11923_v10 = vld [vmem:[#allocation65_spill] sm:$0xff]  ;;  %v11924_v52 = vld [vmem:[#allocation3_spill] sm:$0xff] }
 0x19b   :  { %11909 = vst [vmem:[#allocation47_spill] sm:$0xff] %v7458_v2  ;;  %v1513_v16 = vsel %vm208_vm9, %v1114_v31, -inf  ;;  %v7503_v62 = vpack.i.bf16 %v7458_v2, %v7465_v37  ;;  %v1512_v45 = vsel %vm209_vm10, %v1306_v20, -inf  ;;  %v1511_v11 = vsel %vm208_vm9, %v1113_v55, -inf  ;;  %v11927_v20 = vld [vmem:[#allocation64_spill] sm:$0xff]  ;;  %v11940_v2 = vld [vmem:[#allocation66_spill] sm:$0xff] }
 0x19c   :  { %11913 = vst [vmem:[#allocation11_spill] sm:$0xff] %v7465_v37  ;;  %v7507_v43 = vpack.i.bf16 %v7453_v27, %v7470_v19  ;;  %v4051_v48 = vunpack.i.h.bf16 %v7089_v60  ;;  %v4050_v22 = vunpack.i.l.bf16 %v7089_v60  ;;  %v11925_v31 = vmax.f32 %v11923_v10, %v11924_v52 }
 0x19d   :  { %11917 = vst [vmem:[#allocation73_spill] sm:$0xff] %v7470_v19  ;;  %v4046_v50 = vunpack.i.h.bf16 %v7091_v42  ;;  %v4045_v27 = vunpack.i.l.bf16 %v7091_v42  ;;  %v11928_v19 = vld [vmem:[#allocation2_spill] sm:$0xff]  ;;  %v11931_v9 = vunpack.i.l.bf16 %v6162_v56  ;;  %v1308_v10 = vsel %vm1300_vm12, %v4041_v49, -inf  ;;  %4333 = vrot.lane.b32.xlu1 %v7503_v62, %s5082_s8 }
 0x19e   :  { %11919 = vst [vmem:[#allocation5_spill] sm:$0xff] %v7489_v53  ;;  %v7518_v4 = vmax.f32 %v11925_v31, %v1510_v51  ;;  %4338 = vrot.lane.b32.xlu2 %v7507_v43, %s5082_s8  ;;  %v11929_v28 = vmax.f32 %v11927_v20, %v11928_v19  ;;  %v1115_v52 = vsel %vm1107_vm11, %v4040_v15, %v4041_v49  ;;  %v11932_v19 = vld [vmem:[#allocation51_spill] sm:$0xff]  ;;  %v11937_v20 = vld [vmem:[#allocation9_spill] sm:$0xff]  ;;  %v11941_v49 = vld [vmem:[#allocation8_spill] sm:$0xff] }
 0x19f   :  { %11921 = vst [vmem:[#allocation72_spill] sm:$0xff] %v7503_v62  ;;  %v835_v51 = vsel %vm594_vm6, -inf, %v11931_v9  ;;  %v11936_v31 = vld [vmem:[#allocation67_spill] sm:$0xff]  ;;  %v7550_v9 = vpop.permute.xlu2 %4173  ;;  %v11942_v15 = vmax.f32 %v11940_v2, %v11941_v49  ;;  %v11945_v62 = vld [vmem:[#allocation18_spill] sm:$0xff]  ;;  %v7574_v2 = vsel %vm207_vm8, %v644_v47, -inf  ;;  %v11951_v47 = vld [vmem:[#allocation137_spill] sm:$0xff] }
 0x1a0   :  { %11922 = vst [vmem:[#allocation4_spill] sm:$0xff] %v7507_v43  ;;  %v7527_v55 = vmax.f32 %v11929_v28, %v1509_v0  ;;  %4328 = vrot.lane.b32.xlu0 %v7489_v53, %s5082_s8  ;;  %v11933_v28 = vld [vmem:[#allocation19_spill] sm:$0xff]  ;;  %v11938_v56 = vmax.f32 %v11936_v31, %v11937_v20  ;;  %v11944_v43 = vld [vmem:[#allocation50_spill] sm:$0xff]  ;;  %v4066_v20 = vunpack.i.h.bf16 %v7215_v7  ;;  %v11954_v49 = vld [vmem:[#allocation32_spill] sm:$0xff] }
 0x1a1   :  { %11926 = vst [vmem:[#allocation46_spill] sm:$0xff] %v7518_v4  ;;  %v11934_v42 = vmax.f32 %v11932_v19, %v11933_v28  ;;  %v7555_v37 = vmax.f32 %v11942_v15, %v1511_v11  ;;  %v11946_v53 = vmax.f32 %v11944_v43, %v11945_v62  ;;  %v1310_v19 = vsel %vm1300_vm12, %v4051_v48, -inf  ;;  %v11955_v15 = vld [vmem:[#allocation17_spill] sm:$0xff] }
 0x1a2   :  { %11930 = vst [vmem:[#allocation10_spill] sm:$0xff] %v7527_v55  ;;  %v7548_v60 = vmax.f32 %v11938_v56, %v1512_v45  ;;  %v1117_v45 = vsel %vm1107_vm11, %v4050_v22, %v4051_v48  ;;  %v7568_v28 = vpop.permute.xlu1 %4123  ;;  %v7584_v62 = vpack.i.bf16 %v7518_v4, %v7527_v55  ;;  %v1516_v43 = vsel %vm209_vm10, %v1308_v10, -inf }
 0x1a3   :  { %v7543_v0 = vmax.f32 %v11934_v42, %v1514_v44  ;;  %11943 = vst [vmem:[#allocation3_spill] sm:$0xff] %v7555_v37  ;;  %v7560_v5 = vmax.f32 %v11946_v53, %v1513_v16  ;;  %v7564_v44 = vsel %vm206_vm7, %v836_v30, -inf  ;;  %v7570_v42 = vpop.permute.xlu0 %4118  ;;  %v7578_v53 = vsel %vm206_vm7, %v835_v51, -inf }
 0x1a4   :  { %11939 = vst [vmem:[#allocation65_spill] sm:$0xff] %v7548_v60  ;;  %v1309_v16 = vsel %vm1300_vm12, %v4046_v50, -inf  ;;  %v1116_v30 = vsel %vm1107_vm11, %v4045_v27, %v4046_v50  ;;  %v1515_v11 = vsel %vm208_vm9, %v1115_v52, -inf  ;;  %v4056_v48 = vunpack.i.h.bf16 %v11951_v47 }
 0x1a5   :  { %11935 = vst [vmem:[#allocation114_spill] sm:$0xff] %v7543_v0  ;;  %v4055_v22 = vunpack.i.l.bf16 %v11951_v47  ;;  %v1520_v51 = vsel %vm209_vm10, %v1310_v19, -inf  ;;  %v1519_v27 = vsel %vm208_vm9, %v1117_v45, -inf  ;;  %v7598_v50 = vpack.i.bf16 %v7548_v60, %v7555_v37  ;;  %v11971_v60 = vld [vmem:[#allocation14_spill] sm:$0xff] }
 0x1a6   :  { %11947 = vst [vmem:[#allocation64_spill] sm:$0xff] %v7560_v5  ;;  %v7602_v10 = vpack.i.bf16 %v7543_v0, %v7560_v5  ;;  %v1518_v52 = vsel %vm209_vm10, %v1309_v16, -inf  ;;  %v1517_v31 = vsel %vm208_vm9, %v1116_v30, -inf  ;;  %v4065_v56 = vunpack.i.l.bf16 %v7215_v7  ;;  %v11958_v16 = vld [vmem:[#allocation31_spill] sm:$0xff]  ;;  %v11959_v5 = vld [vmem:[#allocation16_spill] sm:$0xff] }
 0x1a7   :  { %11948 = vst [vmem:[#allocation2_spill] sm:$0xff] %v7564_v44  ;;  %v11956_v19 = vmax.f32 %v11954_v49, %v11955_v15  ;;  %v4061_v47 = vunpack.i.h.bf16 %v7217_v36  ;;  %v4060_v0 = vunpack.i.l.bf16 %v7217_v36  ;;  %v11960_v4 = vmax.f32 %v11958_v16, %v11959_v5  ;;  %4348 = vrot.lane.b32.xlu1 %v7598_v50, %s5082_s8  ;;  %v11962_v49 = vld [vmem:[#allocation30_spill] sm:$0xff]  ;;  %v11963_v5 = vld [vmem:[#allocation76_spill] sm:$0xff]  ;;  %v11966_v15 = vld [vmem:[#allocation69_spill] sm:$0xff] }
 0x1a8   :  { %11949 = vst [vmem:[#allocation51_spill] sm:$0xff] %v7574_v2  ;;  %4353 = vrot.lane.b32.xlu2 %v7602_v10, %s5082_s8  ;;  %v1311_v55 = vsel %vm1300_vm12, %v4056_v48, -inf  ;;  %4343 = vrot.lane.b32.xlu0 %v7584_v62, %s5082_s8  ;;  %v12006_v44 = vld [vmem:[#allocation58_spill] sm:$0xff] }
 0x1a9   :  { %11950 = vst [vmem:[#allocation19_spill] sm:$0xff] %v7584_v62  ;;  %v7613_v45 = vmax.f32 %v11956_v19, %v1516_v43  ;;  %v7622_v30 = vmax.f32 %v11960_v4, %v1515_v11  ;;  %v1118_v43 = vsel %vm1107_vm11, %v4055_v22, %v4056_v48  ;;  %v11964_v4 = vmax.f32 %v11962_v49, %v11963_v5  ;;  %v11967_v19 = vld [vmem:[#allocation15_spill] sm:$0xff]  ;;  %v7644_v48 = vpop.permute.xlu2 %4188  ;;  %v11970_v22 = vld [vmem:[#allocation68_spill] sm:$0xff] }
 0x1aa   :  { %11952 = vst [vmem:[#allocation67_spill] sm:$0xff] %v7598_v50  ;;  %v11968_v16 = vmax.f32 %v11966_v15, %v11967_v19  ;;  %v11972_v37 = vmax.f32 %v11970_v22, %v11971_v60  ;;  %v11974_v62 = vld [vmem:[#allocation35_spill] sm:$0xff]  ;;  %v1313_v5 = vsel %vm1300_vm12, %v4066_v20, -inf  ;;  %v1312_v60 = vsel %vm1300_vm12, %v4061_v47, -inf }
 0x1ab   :  { %11953 = vst [vmem:[#allocation9_spill] sm:$0xff] %v7602_v10  ;;  %v7637_v11 = vmax.f32 %v11964_v4, %v1520_v51  ;;  %v11975_v50 = vld [vmem:[#allocation55_spill] sm:$0xff]  ;;  %v7660_v4 = vpop.permute.xlu1 %4138  ;;  %v7662_v15 = vpop.permute.xlu0 %4133  ;;  %v4080_v22 = vunpack.i.l.bf16 %v7297_v39 }
 0x1ac   :  { %11957 = vst [vmem:[#allocation66_spill] sm:$0xff] %v7613_v45  ;;  %v7642_v7 = vmax.f32 %v11968_v16, %v1518_v52  ;;  %v7649_v10 = vmax.f32 %v11972_v37, %v1517_v31  ;;  %v11976_v36 = vmax.f32 %v11974_v62, %v11975_v50  ;;  %v11978_v49 = vld [vmem:[#allocation163_spill] sm:$0xff]  ;;  %v1120_v52 = vsel %vm1107_vm11, %v4065_v56, %v4066_v20  ;;  %v11982_v20 = vld [vmem:[#allocation158_spill] sm:$0xff] }
 0x1ad   :  { %11961 = vst [vmem:[#allocation8_spill] sm:$0xff] %v7622_v30  ;;  %v7667_v37 = vsel %vm207_vm8, %v7483_v17, -inf  ;;  %v1119_v62 = vsel %vm1107_vm11, %v4060_v0, %v4061_v47  ;;  %v7678_v50 = vsel %vm207_vm8, %v7440_v14, -inf  ;;  %v1522_v31 = vsel %vm209_vm10, %v1311_v55, -inf }
 0x1ae   :  { %11965 = vst [vmem:[#allocation50_spill] sm:$0xff] %v7637_v11  ;;  %v7654_v63 = vmax.f32 %v11976_v36, %v1519_v27  ;;  %v7673_v27 = vpack.i.bf16 %v7613_v45, %v7622_v30  ;;  %v1521_v17 = vsel %vm208_vm9, %v1118_v43, -inf  ;;  %v4071_v56 = vunpack.i.h.bf16 %v11982_v20 }
 0x1af   :  { %11969 = vst [vmem:[#allocation18_spill] sm:$0xff] %v7642_v7  ;;  %v4070_v36 = vunpack.i.l.bf16 %v11982_v20  ;;  %v1526_v0 = vsel %vm209_vm10, %v1313_v5, -inf  ;;  %v1525_v47 = vsel %vm208_vm9, %v1120_v52, -inf  ;;  %v7692_v14 = vpack.i.bf16 %v7642_v7, %v7649_v10  ;;  %v11984_v5 = vld [vmem:[#allocation53_spill] sm:$0xff]  ;;  %v11985_v20 = vld [vmem:[#allocation56_spill] sm:$0xff] }
 0x1b0   :  { %11973 = vst [vmem:[#allocation137_spill] sm:$0xff] %v7649_v10  ;;  %v4367_v55 = vpack.i.bf16 %v7637_v11, %v7654_v63  ;;  %v1524_v43 = vsel %vm209_vm10, %v1312_v60, -inf  ;;  %v1523_v19 = vsel %vm208_vm9, %v1119_v62, -inf  ;;  %v4081_v16 = vunpack.i.h.bf16 %v7297_v39  ;;  %v11988_v7 = vld [vmem:[#allocation52_spill] sm:$0xff]  ;;  %v11989_v60 = vld [vmem:[#allocation54_spill] sm:$0xff]  ;;  %4358 = vrot.lane.b32.xlu0 %v7673_v27, %s5082_s8 }
 0x1b1   :  { %11977 = vst [vmem:[#allocation32_spill] sm:$0xff] %v7654_v63  ;;  %v11986_v52 = vmax.f32 %v11984_v5, %v11985_v20  ;;  %v4076_v45 = vunpack.i.h.bf16 %v7299_v24  ;;  %v4075_v30 = vunpack.i.l.bf16 %v7299_v24  ;;  %v11990_v10 = vmax.f32 %v11988_v7, %v11989_v60  ;;  %4363 = vrot.lane.b32.xlu1 %v7692_v14, %s5082_s8  ;;  %v11993_v5 = vld [vmem:[#allocation82_spill] sm:$0xff]  ;;  %v11994_v7 = vld [vmem:[#allocation60_spill] sm:$0xff]  ;;  %v11997_v20 = vld [vmem:[#allocation71_spill] sm:$0xff]  ;;  %v7735_v60 = vpop.permute.xlu2 %4203 }
 0x1b2   :  { %11979 = vst [vmem:[#allocation17_spill] sm:$0xff] %v7667_v37  ;;  %4368 = vrot.lane.b32.xlu2 %v4367_v55, %s5082_s8  ;;  %v1314_v62 = vsel %vm1300_vm12, %v4071_v56, -inf  ;;  %v1121_v39 = vsel %vm1107_vm11, %v4070_v36, %v4071_v56  ;;  %v12001_v63 = vld [vmem:[#allocation70_spill] sm:$0xff]  ;;  %v12005_v24 = vld [vmem:[#allocation81_spill] sm:$0xff] }
 0x1b3   :  { %11980 = vst [vmem:[#allocation31_spill] sm:$0xff] %v7673_v27  ;;  %v7705_v51 = vmax.f32 %v11986_v52, %v1522_v31  ;;  %v7713_v11 = vmax.f32 %v11990_v10, %v1521_v17  ;;  %v11995_v10 = vmax.f32 %v11993_v5, %v11994_v7  ;;  %v11998_v52 = vld [vmem:[#allocation21_spill] sm:$0xff]  ;;  %v12002_v27 = vld [vmem:[#allocation20_spill] sm:$0xff]  ;;  %v12007_v55 = vmax.f32 %v12005_v24, %v12006_v44  ;;  %v12009_v5 = vld [vmem:[#allocation38_spill] sm:$0xff] }
 0x1b4   :  { %11981 = vst [vmem:[#allocation16_spill] sm:$0xff] %v7678_v50  ;;  %v11999_v56 = vmax.f32 %v11997_v20, %v11998_v52  ;;  %v7751_v20 = vpop.permute.xlu1 %4153  ;;  %v7753_v52 = vpop.permute.xlu0 %4148  ;;  %v1122_v44 = vsel %vm1107_vm11, %v4075_v30, %v4076_v45  ;;  %v1527_v24 = vsel %vm208_vm9, %v1121_v39, -inf }
 0x1b5   :  { %11983 = vst [vmem:[#allocation30_spill] sm:$0xff] %v7692_v14  ;;  %v7728_v17 = vmax.f32 %v11995_v10, %v1526_v0  ;;  %v12003_v14 = vmax.f32 %v12001_v63, %v12002_v27  ;;  %v7745_v8 = vmax.f32 %v12007_v55, %v1525_v47  ;;  %v1316_v10 = vsel %vm1300_vm12, %v4081_v16, -inf  ;;  %v12010_v63 = vld [vmem:[#allocation79_spill] sm:$0xff] }
 0x1b6   :  { %11987 = vst [vmem:[#allocation76_spill] sm:$0xff] %v7705_v51  ;;  %v7733_v36 = vmax.f32 %v11999_v56, %v1524_v43  ;;  %v1123_v43 = vsel %vm1107_vm11, %v4080_v22, %v4081_v16  ;;  %v4372_v47 = vpack.i.bf16 %v7705_v51, %v7713_v11  ;;  %v4086_v16 = vunpack.i.h.bf16 %v6954_v58  ;;  %v12012_v27 = vld [vmem:[#allocation59_spill] sm:$0xff] }
 0x1b7   :  { %11991 = vst [vmem:[#allocation69_spill] sm:$0xff] %v7713_v11  ;;  %v7740_v46 = vmax.f32 %v12003_v14, %v1523_v19  ;;  %v1315_v14 = vsel %vm1300_vm12, %v4076_v45, -inf  ;;  %v1528_v19 = vsel %vm209_vm10, %v1314_v62, -inf  ;;  %v4085_v22 = vunpack.i.l.bf16 %v6954_v58 }
 0x1b8   :  { %11996 = vst [vmem:[#allocation15_spill] sm:$0xff] %v7728_v17  ;;  %v1532_v55 = vsel %vm209_vm10, %v1316_v10, -inf  ;;  %v1531_v56 = vsel %vm208_vm9, %v1123_v43, -inf  ;;  %v4382_v30 = vpack.i.bf16 %v7728_v17, %v7745_v8  ;;  %v1530_v62 = vsel %vm209_vm10, %v1315_v14, -inf  ;;  %v12011_v10 = vld [vmem:[#allocation33_spill] sm:$0xff]  ;;  %v12019_v17 = vld [vmem:[#allocation80_spill] sm:$0xff]  ;;  %4373 = vrot.lane.b32.xlu0 %v4372_v47, %s5082_s8 }
 0x1b9   :  { %12000 = vst [vmem:[#allocation68_spill] sm:$0xff] %v7733_v36  ;;  %v4377_v45 = vpack.i.bf16 %v7733_v36, %v7740_v46  ;;  %v1529_v39 = vsel %vm208_vm9, %v1122_v44, -inf  ;;  %v4096_v58 = vunpack.i.h.bf16 %v7386_v57  ;;  %v4095_v0 = vunpack.i.l.bf16 %v7386_v57  ;;  %v12016_v14 = vld [vmem:[#allocation57_spill] sm:$0xff]  ;;  %v12028_v57 = vld [vmem:[#allocation7_spill] sm:$0xff] }
 0x1ba   :  { %12004 = vst [vmem:[#allocation14_spill] sm:$0xff] %v7740_v46  ;;  %v12013_v7 = vmax.f32 %v12011_v10, %v12012_v27  ;;  %v4091_v51 = vunpack.i.h.bf16 %v7388_v25  ;;  %v4090_v11 = vunpack.i.l.bf16 %v7388_v25  ;;  %4383 = vrot.lane.b32.xlu2 %v4382_v30, %s5082_s8  ;;  %v12015_v46 = vld [vmem:[#allocation78_spill] sm:$0xff]  ;;  %v3946_v44 = vunpack.i.h.bf16 %v12010_v63  ;;  %v12020_v25 = vld [vmem:[#allocation36_spill] sm:$0xff] }
 0x1bb   :  { %12008 = vst [vmem:[#allocation35_spill] sm:$0xff] %v7745_v8  ;;  %v12017_v36 = vmax.f32 %v12015_v46, %v12016_v14  ;;  %v1317_v50 = vsel %vm1300_vm12, %v4086_v16, -inf  ;;  %4378 = vrot.lane.b32.xlu1 %v4377_v45, %s5082_s8  ;;  %v12021_v27 = vld [vmem:[#allocation42_spill] sm:$0xff]  ;;  %v12024_v46 = vld [vmem:[#allocation48_spill] sm:$0xff]  ;;  %v7809_v14 = vpop.permute.xlu2 %4218  ;;  %v12030_v2 = vmax.f32 %v12028_v57, %v12029_v35  ;;  %v12033_v45 = vld [vmem:[#allocation63_spill] sm:$0xff] }
 0x1bc   :  { %v7783_v43 = vmax.f32 %v12013_v7, %v1528_v19  ;;  %v1124_v7 = vsel %vm1107_vm11, %v4085_v22, %v4086_v16  ;;  %v12022_v19 = vmax.f32 %v12020_v25, %v12021_v27  ;;  %v12032_v22 = vld [vmem:[#allocation89_spill] sm:$0xff]  ;;  %v7829_v35 = vpop.permute.xlu0 %4163  ;;  %v1125_v57 = vsel %vm1107_vm11, %v4090_v11, %v4091_v51 }
 0x1bd   :  { %v7791_v8 = vmax.f32 %v12017_v36, %v1527_v24  ;;  %v12025_v36 = vld [vmem:[#allocation23_spill] sm:$0xff]  ;;  %v7814_v16 = vmax.f32 %v12030_v2, %v1529_v39  ;;  %v12034_v47 = vmax.f32 %v12032_v22, %v12033_v45  ;;  %v12037_v2 = vunpack.i.l.bf16 %v12010_v63 }
 0x1be   :  { %12014 = vst [vmem:[#allocation55_spill] sm:$0xff] %v7783_v43  ;;  %v7802_v30 = vmax.f32 %v12022_v19, %v1532_v55  ;;  %v12026_v24 = vmax.f32 %v12024_v46, %v12025_v36  ;;  %v12036_v55 = vunpack.i.l.bf16 %v12009_v5  ;;  %v1126_v19 = vsel %vm1107_vm11, %v4095_v0, %v4096_v58  ;;  %v7827_v46 = vpop.permute.xlu1 %4168 }
 0x1bf   :  { %12018 = vst [vmem:[#allocation163_spill] sm:$0xff] %v7791_v8  ;;  %v7819_v31 = vmax.f32 %v12034_v47, %v1531_v56  ;;  %v839_v39 = vsel %vm594_vm6, -inf, %v12037_v2  ;;  %v1318_v56 = vsel %vm1300_vm12, %v4091_v51, -inf  ;;  %v4387_v36 = vpack.i.bf16 %v7783_v43, %v7791_v8  ;;  %v12039_v2 = vld [vmem:[#allocation88_spill] sm:$0xff] }
 0x1c0   :  { %12023 = vst [vmem:[#allocation158_spill] sm:$0xff] %v7802_v30  ;;  %v7807_v10 = vmax.f32 %v12026_v24, %v1530_v62  ;;  %v849_v25 = vsel %vm594_vm6, -inf, %v12036_v55  ;;  %v1319_v62 = vsel %vm1300_vm12, %v4096_v58, -inf  ;;  %v1534_v24 = vsel %vm209_vm10, %v1317_v50, -inf }
 0x1c1   :  { %12031 = vst [vmem:[#allocation56_spill] sm:$0xff] %v7814_v16  ;;  %v1533_v0 = vsel %vm208_vm9, %v1124_v7, -inf  ;;  %v4101_v58 = vunpack.i.h.bf16 %v7071_v34  ;;  %v4100_v22 = vunpack.i.l.bf16 %v7071_v34  ;;  %v1538_v45 = vsel %vm209_vm10, %v1319_v62, -inf  ;;  %v12038_v62 = vld [vmem:[#allocation85_spill] sm:$0xff]  ;;  %4388 = vrot.lane.b32.xlu0 %v4387_v36, %s5082_s8 }
 0x1c2   :  { %12027 = vst [vmem:[#allocation53_spill] sm:$0xff] %v7807_v10  ;;  %v1537_v47 = vsel %vm208_vm9, %v1126_v19, -inf  ;;  %v4392_v11 = vpack.i.bf16 %v7807_v10, %v7814_v16  ;;  %v4397_v51 = vpack.i.bf16 %v7802_v30, %v7819_v31  ;;  %v1536_v50 = vsel %vm209_vm10, %v1318_v56, -inf  ;;  %v12042_v16 = vld [vmem:[#allocation84_spill] sm:$0xff]  ;;  %v12043_v56 = vld [vmem:[#allocation87_spill] sm:$0xff] }
 0x1c3   :  { %12035 = vst [vmem:[#allocation52_spill] sm:$0xff] %v7819_v31  ;;  %v1535_v7 = vsel %vm208_vm9, %v1125_v57, -inf  ;;  %v4111_v34 = vunpack.i.h.bf16 %v7476_v3  ;;  %v4110_v55 = vunpack.i.l.bf16 %v7476_v3  ;;  %v12040_v27 = vmax.f32 %v12038_v62, %v12039_v2  ;;  %v12054_v62 = vld [vmem:[#allocation25_spill] sm:$0xff] }
 0x1c4   :  { %v4106_v43 = vunpack.i.h.bf16 %v7478_v40  ;;  %v4105_v8 = vunpack.i.l.bf16 %v7478_v40  ;;  %4398 = vrot.lane.b32.xlu2 %v4397_v51, %s5082_s8  ;;  %v12044_v10 = vmax.f32 %v12042_v16, %v12043_v56  ;;  %v12046_v57 = vunpack.i.h.bf16 %v12009_v5  ;;  %4393 = vrot.lane.b32.xlu1 %v4392_v11, %s5082_s8  ;;  %v12050_v16 = vld [vmem:[#allocation99_spill] sm:$0xff] }
 0x1c5   :  { %v7861_v19 = vmax.f32 %v12040_v27, %v1534_v24  ;;  %v12047_v3 = vunpack.i.l.bf16 %v12009_v5  ;;  %v7880_v27 = vsel %vm206_vm7, %v849_v25, -inf  ;;  %v1320_v40 = vsel %vm1300_vm12, %v4101_v58, -inf  ;;  %v12053_v5 = vld [vmem:[#allocation29_spill] sm:$0xff]  ;;  %v7896_v25 = vpop.permute.xlu2 %4233  ;;  %v12062_v11 = vld [vmem:[#allocation39_spill] sm:$0xff] }
 0x1c6   :  { %v7869_v31 = vmax.f32 %v12044_v10, %v1533_v0  ;;  %12048 = vst [vmem:[#allocation60_spill] sm:$0xff] %v7880_v27  ;;  %v1127_v24 = vsel %vm1107_vm11, %v4100_v22, %v4101_v58  ;;  %v12049_v10 = vld [vmem:[#allocation94_spill] sm:$0xff]  ;;  %v12055_v2 = vmax.f32 %v12053_v5, %v12054_v62  ;;  %v12061_v22 = vld [vmem:[#allocation93_spill] sm:$0xff]  ;;  %v7917_v5 = vpop.permute.xlu1 %4183  ;;  %v1540_v62 = vsel %vm209_vm10, %v1320_v40, -inf }
 0x1c7   :  { %12041 = vst [vmem:[#allocation54_spill] sm:$0xff] %v7861_v19  ;;  %v7876_v30 = vsel %vm594_vm6, %v12047_v3, %v12046_v57  ;;  %v12051_v0 = vmax.f32 %v12049_v10, %v12050_v16  ;;  %v12057_v57 = vld [vmem:[#allocation49_spill] sm:$0xff]  ;;  %v12058_v3 = vld [vmem:[#allocation24_spill] sm:$0xff]  ;;  %v12063_v36 = vmax.f32 %v12061_v22, %v12062_v11  ;;  %v1322_v16 = vsel %vm1300_vm12, %v4111_v34, -inf }
 0x1c8   :  { %12045 = vst [vmem:[#allocation82_spill] sm:$0xff] %v7869_v31  ;;  %v7894_v56 = vmax.f32 %v12055_v2, %v1536_v50  ;;  %v12059_v27 = vmax.f32 %v12057_v57, %v12058_v3  ;;  %v7913_v50 = vsel %vm206_vm7, %v839_v39, -inf  ;;  %v7928_v39 = vpack.i.bf16 %v7861_v19, %v7869_v31  ;;  %v12071_v11 = vld [vmem:[#allocation92_spill] sm:$0xff] }
 0x1c9   :  { %v7889_v51 = vmax.f32 %v12051_v0, %v1538_v45  ;;  %v7906_v37 = vmax.f32 %v12063_v36, %v1537_v47  ;;  %v12065_v45 = vunpack.i.l.bf16 %v12010_v63  ;;  %12066 = vst [vmem:[#allocation81_spill] sm:$0xff] %v7913_v50  ;;  %v1129_v0 = vsel %vm1107_vm11, %v4110_v55, %v4111_v34  ;;  %v12072_v36 = vld [vmem:[#allocation43_spill] sm:$0xff] }
 0x1ca   :  { %12056 = vst [vmem:[#allocation21_spill] sm:$0xff] %v7894_v56  ;;  %v7901_v58 = vmax.f32 %v12059_v27, %v1535_v7  ;;  %v7919_v7 = vpop.permute.xlu0 %4178  ;;  %v12067_v27 = vunpack.i.l.bf16 %v12019_v17  ;;  %v1321_v63 = vsel %vm1300_vm12, %v4106_v43, -inf  ;;  %v1539_v34 = vsel %vm208_vm9, %v1127_v24, -inf  ;;  %4403 = vrot.lane.b32.xlu0 %v7928_v39, %s5082_s8 }
 0x1cb   :  { %12052 = vst [vmem:[#allocation71_spill] sm:$0xff] %v7889_v51  ;;  %v647_v10 = vsel %vm594_vm6, %v12065_v45, %v3946_v44  ;;  %v1128_v44 = vsel %vm1107_vm11, %v4105_v8, %v4106_v43  ;;  %v4116_v55 = vunpack.i.h.bf16 %v7206_v32  ;;  %v4115_v2 = vunpack.i.l.bf16 %v7206_v32 }
 0x1cc   :  { %12060 = vst [vmem:[#allocation70_spill] sm:$0xff] %v7901_v58  ;;  %v838_v47 = vsel %vm594_vm6, -inf, %v12067_v27  ;;  %v1544_v57 = vsel %vm209_vm10, %v1322_v16, -inf  ;;  %v1543_v8 = vsel %vm208_vm9, %v1129_v0, -inf  ;;  %v7942_v43 = vpack.i.bf16 %v7894_v56, %v7901_v58  ;;  %v12075_v0 = vld [vmem:[#allocation62_spill] sm:$0xff] }
 0x1cd   :  { %12064 = vst [vmem:[#allocation20_spill] sm:$0xff] %v7906_v37  ;;  %v7946_v40 = vpack.i.bf16 %v7889_v51, %v7906_v37  ;;  %v1542_v24 = vsel %vm209_vm10, %v1321_v63, -inf  ;;  %v1541_v32 = vsel %vm208_vm9, %v1128_v44, -inf  ;;  %v4126_v3 = vunpack.i.h.bf16 %v7568_v28  ;;  %v12076_v27 = vld [vmem:[#allocation98_spill] sm:$0xff]  ;;  %v12094_v37 = vld [vmem:[#allocation75_spill] sm:$0xff] }
 0x1ce   :  { %12068 = vst [vmem:[#allocation58_spill] sm:$0xff] %v7928_v39  ;;  %v4125_v22 = vunpack.i.l.bf16 %v7568_v28  ;;  %v12073_v45 = vmax.f32 %v12071_v11, %v12072_v36  ;;  %v12077_v19 = vmax.f32 %v12075_v0, %v12076_v27  ;;  %v4121_v51 = vunpack.i.h.bf16 %v7570_v42  ;;  %4408 = vrot.lane.b32.xlu1 %v7942_v43, %s5082_s8  ;;  %v12086_v0 = vld [vmem:[#allocation105_spill] sm:$0xff]  ;;  %v12095_v39 = vld [vmem:[#allocation26_spill] sm:$0xff] }
 0x1cf   :  { %12069 = vst [vmem:[#allocation38_spill] sm:$0xff] %v7942_v43  ;;  %v4120_v63 = vunpack.i.l.bf16 %v7570_v42  ;;  %4413 = vrot.lane.b32.xlu2 %v7946_v40, %s5082_s8  ;;  %v12079_v44 = vunpack.i.h.bf16 %v12019_v17  ;;  %v12080_v28 = vunpack.i.l.bf16 %v12019_v17  ;;  %v1130_v36 = vsel %vm1107_vm11, %v4115_v2, %v4116_v55  ;;  %v12087_v27 = vld [vmem:[#allocation113_spill] sm:$0xff]  ;;  %v12091_v2 = vld [vmem:[#allocation27_spill] sm:$0xff] }
 0x1d0   :  { %12070 = vst [vmem:[#allocation79_spill] sm:$0xff] %v7946_v40  ;;  %v7957_v16 = vmax.f32 %v12073_v45, %v1540_v62  ;;  %v7962_v56 = vmax.f32 %v12077_v19, %v1539_v34  ;;  %v1323_v62 = vsel %vm1300_vm12, %v4116_v55, -inf  ;;  %v7981_v42 = vsel %vm207_vm8, %v647_v10, -inf  ;;  %v12082_v19 = vld [vmem:[#allocation108_spill] sm:$0xff]  ;;  %v12090_v55 = vld [vmem:[#allocation34_spill] sm:$0xff]  ;;  %v8003_v40 = vpop.permute.xlu2 %4248 }
 0x1d1   :  { %v646_v11 = vsel %vm594_vm6, %v12080_v28, %v12079_v44  ;;  %12081 = vst [vmem:[#allocation78_spill] sm:$0xff] %v7981_v42  ;;  %v12083_v34 = vld [vmem:[#allocation44_spill] sm:$0xff]  ;;  %v12088_v44 = vmax.f32 %v12086_v0, %v12087_v27  ;;  %v12092_v31 = vmax.f32 %v12090_v55, %v12091_v2  ;;  %v12096_v43 = vmax.f32 %v12094_v37, %v12095_v39  ;;  %v12156_v42 = vld [vmem:[#allocation83_spill] sm:$0xff] }
 0x1d2   :  { %12074 = vst [vmem:[#allocation33_spill] sm:$0xff] %v7957_v16  ;;  %v12084_v45 = vmax.f32 %v12082_v19, %v12083_v34  ;;  %v8009_v34 = vsel %vm206_vm7, %v838_v47, -inf  ;;  %v1324_v37 = vsel %vm1300_vm12, %v4121_v51, -inf  ;;  %v1131_v39 = vsel %vm1107_vm11, %v4120_v63, %v4121_v51  ;;  %v12126_v19 = vld [vmem:[#allocation28_spill] sm:$0xff] }
 0x1d3   :  { %12078 = vst [vmem:[#allocation59_spill] sm:$0xff] %v7962_v56  ;;  %v7991_v28 = vmax.f32 %v12088_v44, %v1544_v57  ;;  %v7996_v58 = vmax.f32 %v12092_v31, %v1542_v24  ;;  %v8001_v10 = vmax.f32 %v12096_v43, %v1541_v32  ;;  %v1325_v57 = vsel %vm1300_vm12, %v4126_v3, -inf  ;;  %v8013_v31 = vpop.permute.xlu1 %4198  ;;  %v8015_v24 = vpop.permute.xlu0 %4193 }
 0x1d4   :  { %v7986_v17 = vmax.f32 %v12084_v45, %v1543_v8  ;;  %12099 = vst [vmem:[#allocation48_spill] sm:$0xff] %v8009_v34  ;;  %v1132_v45 = vsel %vm1107_vm11, %v4125_v22, %v4126_v3  ;;  %v8021_v43 = vpack.i.bf16 %v7957_v16, %v7962_v56  ;;  %v1546_v0 = vsel %vm209_vm10, %v1323_v62, -inf  ;;  %v12108_v16 = vld [vmem:[#allocation101_spill] sm:$0xff] }
 0x1d5   :  { %12089 = vst [vmem:[#allocation80_spill] sm:$0xff] %v7991_v28  ;;  %v1545_v3 = vsel %vm208_vm9, %v1130_v36, -inf  ;;  %v4131_v22 = vunpack.i.h.bf16 %v7281_v61  ;;  %v4130_v27 = vunpack.i.l.bf16 %v7281_v61  ;;  %v1550_v51 = vsel %vm209_vm10, %v1325_v57, -inf  ;;  %v12104_v57 = vld [vmem:[#allocation104_spill] sm:$0xff] }
 0x1d6   :  { %12085 = vst [vmem:[#allocation57_spill] sm:$0xff] %v7986_v17  ;;  %v1549_v63 = vsel %vm208_vm9, %v1132_v45, -inf  ;;  %v8037_v44 = vpack.i.bf16 %v7996_v58, %v8001_v10  ;;  %v8041_v62 = vpack.i.bf16 %v7991_v28, %v7986_v17  ;;  %v1548_v36 = vsel %vm209_vm10, %v1324_v37, -inf  ;;  %v12105_v45 = vld [vmem:[#allocation45_spill] sm:$0xff]  ;;  %4418 = vrot.lane.b32.xlu0 %v8021_v43, %s5082_s8 }
 0x1d7   :  { %12093 = vst [vmem:[#allocation36_spill] sm:$0xff] %v7996_v58  ;;  %v1547_v61 = vsel %vm208_vm9, %v1131_v39, -inf  ;;  %v4141_v55 = vunpack.i.h.bf16 %v7660_v4  ;;  %v4140_v2 = vunpack.i.l.bf16 %v7660_v4  ;;  %v12106_v8 = vmax.f32 %v12104_v57, %v12105_v45  ;;  %v12109_v58 = vld [vmem:[#allocation111_spill] sm:$0xff] }
 0x1d8   :  { %12097 = vst [vmem:[#allocation42_spill] sm:$0xff] %v8001_v10  ;;  %v12110_v56 = vmax.f32 %v12108_v16, %v12109_v58  ;;  %v4136_v10 = vunpack.i.h.bf16 %v7662_v15  ;;  %v4135_v37 = vunpack.i.l.bf16 %v7662_v15  ;;  %4428 = vrot.lane.b32.xlu2 %v8041_v62, %s5082_s8  ;;  %v1326_v17 = vsel %vm1300_vm12, %v4131_v22, -inf  ;;  %4423 = vrot.lane.b32.xlu1 %v8037_v44, %s5082_s8  ;;  %v12113_v15 = vld [vmem:[#allocation128_spill] sm:$0xff]  ;;  %v12114_v58 = vld [vmem:[#allocation133_spill] sm:$0xff]  ;;  %v12118_v57 = vld [vmem:[#allocation135_spill] sm:$0xff]  ;;  %v8095_v32 = vpop.permute.xlu2 %4263 }
 0x1d9   :  { %12100 = vst [vmem:[#allocation23_spill] sm:$0xff] %v8021_v43  ;;  %v8052_v47 = vmax.f32 %v12106_v8, %v1546_v0  ;;  %v1133_v8 = vsel %vm1107_vm11, %v4130_v27, %v4131_v22  ;;  %v12115_v16 = vmax.f32 %v12113_v15, %v12114_v58  ;;  %v12121_v22 = vld [vmem:[#allocation37_spill] sm:$0xff]  ;;  %v12129_v15 = vld [vmem:[#allocation90_spill] sm:$0xff]  ;;  %v1328_v58 = vsel %vm1300_vm12, %v4141_v55, -inf }
 0x1da   :  { %12102 = vst [vmem:[#allocation7_spill] sm:$0xff] %v8037_v44  ;;  %v8057_v28 = vmax.f32 %v12110_v56, %v1545_v3  ;;  %v8073_v56 = vsel %vm207_vm8, %v646_v11, -inf  ;;  %v12117_v3 = vld [vmem:[#allocation124_spill] sm:$0xff]  ;;  %v12122_v27 = vld [vmem:[#allocation41_spill] sm:$0xff] }
 0x1db   :  { %12103 = vst [vmem:[#allocation22_spill] sm:$0xff] %v8041_v62  ;;  %v8078_v0 = vmax.f32 %v12115_v16, %v1549_v63  ;;  %v12119_v45 = vmax.f32 %v12117_v3, %v12118_v57  ;;  %v12123_v44 = vmax.f32 %v12121_v22, %v12122_v27  ;;  %v12125_v43 = vld [vmem:[#allocation77_spill] sm:$0xff]  ;;  %v1135_v16 = vsel %vm1107_vm11, %v4140_v2, %v4141_v55  ;;  %v8102_v3 = vpop.permute.xlu0 %4208 }
 0x1dc   :  { %12107 = vst [vmem:[#allocation89_spill] sm:$0xff] %v8052_v47  ;;  %v12127_v50 = vmax.f32 %v12125_v43, %v12126_v19  ;;  %v12131_v19 = vld [vmem:[#allocation91_spill] sm:$0xff]  ;;  %v1327_v43 = vsel %vm1300_vm12, %v4136_v10, -inf  ;;  %v1552_v55 = vsel %vm209_vm10, %v1326_v17, -inf  ;;  %v1551_v2 = vsel %vm208_vm9, %v1133_v8, -inf }
 0x1dd   :  { %12111 = vst [vmem:[#allocation63_spill] sm:$0xff] %v8057_v28  ;;  %v8083_v4 = vmax.f32 %v12119_v45, %v1550_v51  ;;  %v8088_v62 = vmax.f32 %v12123_v44, %v1548_v36  ;;  %v8100_v51 = vpop.permute.xlu1 %4213  ;;  %v8107_v44 = vsel %vm207_vm8, %v7876_v30, -inf  ;;  %v1134_v36 = vsel %vm1107_vm11, %v4135_v37, %v4136_v10 }
 0x1de   :  { %12116 = vst [vmem:[#allocation85_spill] sm:$0xff] %v8078_v0  ;;  %v8093_v11 = vmax.f32 %v12127_v50, %v1547_v61  ;;  %v8114_v61 = vpack.i.bf16 %v8052_v47, %v8057_v28  ;;  %v4146_v57 = vunpack.i.h.bf16 %v7375_v54  ;;  %v4145_v30 = vunpack.i.l.bf16 %v7375_v54  ;;  %v12139_v47 = vld [vmem:[#allocation118_spill] sm:$0xff] }
 0x1df   :  { %12120 = vst [vmem:[#allocation88_spill] sm:$0xff] %v8083_v4  ;;  %v1556_v45 = vsel %vm209_vm10, %v1328_v58, -inf  ;;  %v1555_v10 = vsel %vm208_vm9, %v1135_v16, -inf  ;;  %v8132_v17 = vpack.i.bf16 %v8083_v4, %v8078_v0  ;;  %v1554_v8 = vsel %vm209_vm10, %v1327_v43, -inf  ;;  %v12135_v58 = vld [vmem:[#allocation123_spill] sm:$0xff]  ;;  %v12136_v16 = vld [vmem:[#allocation132_spill] sm:$0xff] }
 0x1e0   :  { %12124 = vst [vmem:[#allocation84_spill] sm:$0xff] %v8088_v62  ;;  %v8128_v37 = vpack.i.bf16 %v8088_v62, %v8093_v11  ;;  %v1553_v54 = vsel %vm208_vm9, %v1134_v36, -inf  ;;  %v4156_v22 = vunpack.i.h.bf16 %v7751_v20  ;;  %v4155_v27 = vunpack.i.l.bf16 %v7751_v20  ;;  %v12140_v28 = vld [vmem:[#allocation130_spill] sm:$0xff]  ;;  %4433 = vrot.lane.b32.xlu0 %v8114_v61, %s5082_s8 }
 0x1e1   :  { %12128 = vst [vmem:[#allocation87_spill] sm:$0xff] %v8093_v11  ;;  %v12137_v50 = vmax.f32 %v12135_v58, %v12136_v16  ;;  %v12141_v62 = vmax.f32 %v12139_v47, %v12140_v28  ;;  %v4151_v4 = vunpack.i.h.bf16 %v7753_v52  ;;  %v4150_v43 = vunpack.i.l.bf16 %v7753_v52  ;;  %4443 = vrot.lane.b32.xlu2 %v8132_v17, %s5082_s8  ;;  %v12145_v52 = vld [vmem:[#allocation153_spill] sm:$0xff]  ;;  %v12149_v16 = vld [vmem:[#allocation154_spill] sm:$0xff]  ;;  %v8183_v47 = vpop.permute.xlu2 %4278 }
 0x1e2   :  { %12130 = vst [vmem:[#allocation94_spill] sm:$0xff] %v8107_v44  ;;  %v3961_v36 = vunpack.i.h.bf16 %v12129_v15  ;;  %v1329_v20 = vsel %vm1300_vm12, %v4146_v57, -inf  ;;  %v1136_v58 = vsel %vm1107_vm11, %v4145_v30, %v4146_v57  ;;  %4438 = vrot.lane.b32.xlu1 %v8128_v37, %s5082_s8  ;;  %v12152_v57 = vld [vmem:[#allocation40_spill] sm:$0xff]  ;;  %v12153_v30 = vld [vmem:[#allocation95_spill] sm:$0xff] }
 0x1e3   :  { %12132 = vst [vmem:[#allocation99_spill] sm:$0xff] %v8114_v61  ;;  %v8143_v63 = vmax.f32 %v12137_v50, %v1552_v55  ;;  %v8148_v11 = vmax.f32 %v12141_v62, %v1551_v2  ;;  %v12144_v62 = vld [vmem:[#allocation143_spill] sm:$0xff]  ;;  %v12148_v2 = vld [vmem:[#allocation144_spill] sm:$0xff]  ;;  %v12154_v44 = vmax.f32 %v12152_v57, %v12153_v30  ;;  %v12157_v61 = vld [vmem:[#allocation86_spill] sm:$0xff] }
 0x1e4   :  { %12133 = vst [vmem:[#allocation29_spill] sm:$0xff] %v8128_v37  ;;  %v12146_v50 = vmax.f32 %v12144_v62, %v12145_v52  ;;  %v12150_v0 = vmax.f32 %v12148_v2, %v12149_v16  ;;  %v12158_v39 = vmax.f32 %v12156_v42, %v12157_v61  ;;  %v3956_v52 = vunpack.i.h.bf16 %v12131_v19 }
 0x1e5   :  { %12134 = vst [vmem:[#allocation25_spill] sm:$0xff] %v8132_v17  ;;  %v8176_v37 = vmax.f32 %v12154_v44, %v1554_v8  ;;  %v8193_v44 = vpop.permute.xlu0 %4223  ;;  %v12162_v42 = vunpack.i.l.bf16 %v12131_v19  ;;  %v1330_v61 = vsel %vm1300_vm12, %v4151_v4, -inf  ;;  %v1137_v8 = vsel %vm1107_vm11, %v4150_v43, %v4151_v4 }
 0x1e6   :  { %12138 = vst [vmem:[#allocation49_spill] sm:$0xff] %v8143_v63  ;;  %v8166_v55 = vmax.f32 %v12146_v50, %v1555_v10  ;;  %v8171_v17 = vmax.f32 %v12150_v0, %v1556_v45  ;;  %v8181_v34 = vmax.f32 %v12158_v39, %v1553_v54  ;;  %v12161_v10 = vunpack.i.l.bf16 %v12129_v15  ;;  %v8191_v50 = vpop.permute.xlu1 %4228 }
 0x1e7   :  { %12142 = vst [vmem:[#allocation24_spill] sm:$0xff] %v8148_v11  ;;  %v1331_v0 = vsel %vm1300_vm12, %v4156_v22, -inf  ;;  %v1138_v45 = vsel %vm1107_vm11, %v4155_v27, %v4156_v22  ;;  %v841_v39 = vsel %vm594_vm6, -inf, %v12162_v42  ;;  %v8202_v54 = vpack.i.bf16 %v8143_v63, %v8148_v11  ;;  %v12165_v42 = vld [vmem:[#allocation151_spill] sm:$0xff]  ;;  %v12168_v11 = vld [vmem:[#allocation138_spill] sm:$0xff] }
 0x1e8   :  { %12147 = vst [vmem:[#allocation93_spill] sm:$0xff] %v8166_v55  ;;  %v842_v62 = vsel %vm594_vm6, -inf, %v12161_v10  ;;  %v1558_v2 = vsel %vm209_vm10, %v1329_v20, -inf  ;;  %v1557_v22 = vsel %vm208_vm9, %v1136_v58, -inf  ;;  %v4161_v27 = vunpack.i.h.bf16 %v7460_v6 }
 0x1e9   :  { %12151 = vst [vmem:[#allocation39_spill] sm:$0xff] %v8171_v17  ;;  %v4160_v16 = vunpack.i.l.bf16 %v7460_v6  ;;  %v1562_v57 = vsel %vm209_vm10, %v1331_v0, -inf  ;;  %v1561_v4 = vsel %vm208_vm9, %v1138_v45, -inf  ;;  %v4452_v43 = vpack.i.bf16 %v8176_v37, %v8181_v34  ;;  %v12164_v0 = vld [vmem:[#allocation139_spill] sm:$0xff]  ;;  %4448 = vrot.lane.b32.xlu0 %v8202_v54, %s5082_s8 }
 0x1ea   :  { %12155 = vst [vmem:[#allocation92_spill] sm:$0xff] %v8176_v37  ;;  %v4457_v30 = vpack.i.bf16 %v8171_v17, %v8166_v55  ;;  %v1560_v20 = vsel %vm209_vm10, %v1330_v61, -inf  ;;  %v1559_v58 = vsel %vm208_vm9, %v1137_v8, -inf  ;;  %v4171_v6 = vunpack.i.h.bf16 %v7827_v46 }
 0x1eb   :  { %12159 = vst [vmem:[#allocation43_spill] sm:$0xff] %v8181_v34  ;;  %v4170_v10 = vunpack.i.l.bf16 %v7827_v46  ;;  %v12166_v63 = vmax.f32 %v12164_v0, %v12165_v42  ;;  %v12169_v34 = vld [vmem:[#allocation149_spill] sm:$0xff]  ;;  %v4166_v17 = vunpack.i.h.bf16 %v7829_v35  ;;  %v4165_v61 = vunpack.i.l.bf16 %v7829_v35  ;;  %4453 = vrot.lane.b32.xlu1 %v4452_v43, %s5082_s8  ;;  %v12174_v35 = vld [vmem:[#allocation160_spill] sm:$0xff] }
 0x1ec   :  { %12160 = vst [vmem:[#allocation62_spill] sm:$0xff] %v8183_v47  ;;  %v12170_v37 = vmax.f32 %v12168_v11, %v12169_v34  ;;  %4458 = vrot.lane.b32.xlu2 %v4457_v30, %s5082_s8  ;;  %v12172_v8 = vunpack.i.l.bf16 %v12129_v15  ;;  %v8242_v0 = vsel %vm206_vm7, %v842_v62, -inf  ;;  %v1139_v34 = vsel %vm1107_vm11, %v4160_v16, %v4161_v27  ;;  %v12175_v11 = vld [vmem:[#allocation170_spill] sm:$0xff]  ;;  %v12178_v15 = vld [vmem:[#allocation159_spill] sm:$0xff]  ;;  %v12182_v62 = vld [vmem:[#allocation96_spill] sm:$0xff] }
 0x1ed   :  { %12163 = vst [vmem:[#allocation98_spill] sm:$0xff] %v8202_v54  ;;  %v8227_v45 = vmax.f32 %v12166_v63, %v1558_v2  ;;  %v1332_v63 = vsel %vm1300_vm12, %v4161_v27, -inf  ;;  %v12183_v42 = vld [vmem:[#allocation112_spill] sm:$0xff]  ;;  %v12186_v27 = vld [vmem:[#allocation61_spill] sm:$0xff]  ;;  %v8269_v54 = vpop.permute.xlu2 %4293 }
 0x1ee   :  { %v8232_v47 = vmax.f32 %v12170_v37, %v1557_v22  ;;  %v650_v46 = vsel %vm594_vm6, %v12172_v8, %v3961_v36  ;;  %12173 = vst [vmem:[#allocation105_spill] sm:$0xff] %v8242_v0  ;;  %v12176_v37 = vmax.f32 %v12174_v35, %v12175_v11  ;;  %v12179_v36 = vld [vmem:[#allocation173_spill] sm:$0xff]  ;;  %v12184_v8 = vmax.f32 %v12182_v62, %v12183_v42 }
 0x1ef   :  { %12167 = vst [vmem:[#allocation108_spill] sm:$0xff] %v8227_v45  ;;  %v12180_v22 = vmax.f32 %v12178_v15, %v12179_v36  ;;  %v12187_v16 = vld [vmem:[#allocation97_spill] sm:$0xff]  ;;  %v1334_v11 = vsel %vm1300_vm12, %v4171_v6, -inf  ;;  %v8282_v15 = vpop.permute.xlu0 %4238  ;;  %v1140_v36 = vsel %vm1107_vm11, %v4165_v61, %v4166_v17  ;;  %v4185_v42 = vunpack.i.l.bf16 %v7917_v5 }
 0x1f0   :  { %12171 = vst [vmem:[#allocation44_spill] sm:$0xff] %v8232_v47  ;;  %v8252_v2 = vmax.f32 %v12176_v37, %v1561_v4  ;;  %v8262_v55 = vmax.f32 %v12184_v8, %v1560_v20  ;;  %v12188_v43 = vmax.f32 %v12186_v27, %v12187_v16  ;;  %v12190_v4 = vunpack.i.l.bf16 %v12131_v19  ;;  %v8280_v37 = vpop.permute.xlu1 %4243  ;;  %v12191_v8 = vld [vmem:[#allocation156_spill] sm:$0xff]  ;;  %v12192_v27 = vld [vmem:[#allocation169_spill] sm:$0xff] }
 0x1f1   :  { %v8257_v30 = vmax.f32 %v12180_v22, %v1562_v57  ;;  %v8276_v57 = vsel %vm206_vm7, %v841_v39, -inf  ;;  %v1141_v20 = vsel %vm1107_vm11, %v4170_v10, %v4171_v6  ;;  %v8288_v19 = vsel %vm207_vm8, %v650_v46, -inf }
 0x1f2   :  { %12177 = vst [vmem:[#allocation113_spill] sm:$0xff] %v8252_v2  ;;  %v8267_v28 = vmax.f32 %v12188_v43, %v1559_v58  ;;  %v649_v35 = vsel %vm594_vm6, %v12190_v4, %v3956_v52  ;;  %v1333_v58 = vsel %vm1300_vm12, %v4166_v17, -inf  ;;  %v4462_v52 = vpack.i.bf16 %v8227_v45, %v8232_v47  ;;  %v12195_v4 = vld [vmem:[#allocation152_spill] sm:$0xff] }
 0x1f3   :  { %12181 = vst [vmem:[#allocation34_spill] sm:$0xff] %v8257_v30  ;;  %v1564_v39 = vsel %vm209_vm10, %v1332_v63, -inf  ;;  %v1563_v6 = vsel %vm208_vm9, %v1139_v34, -inf  ;;  %v4176_v10 = vunpack.i.h.bf16 %v7550_v9  ;;  %v4175_v22 = vunpack.i.l.bf16 %v7550_v9 }
 0x1f4   :  { %12185 = vst [vmem:[#allocation27_spill] sm:$0xff] %v8262_v55  ;;  %v1568_v17 = vsel %vm209_vm10, %v1334_v11, -inf  ;;  %v1567_v61 = vsel %vm208_vm9, %v1141_v20, -inf  ;;  %v4467_v46 = vpack.i.bf16 %v8262_v55, %v8267_v28  ;;  %v4472_v62 = vpack.i.bf16 %v8257_v30, %v8252_v2  ;;  %v12196_v11 = vld [vmem:[#allocation157_spill] sm:$0xff]  ;;  %4463 = vrot.lane.b32.xlu0 %v4462_v52, %s5082_s8 }
 0x1f5   :  { %12189 = vst [vmem:[#allocation75_spill] sm:$0xff] %v8267_v28  ;;  %v1566_v63 = vsel %vm209_vm10, %v1333_v58, -inf  ;;  %v1565_v34 = vsel %vm208_vm9, %v1140_v36, -inf  ;;  %v4186_v9 = vunpack.i.h.bf16 %v7917_v5  ;;  %v12193_v16 = vmax.f32 %v12191_v8, %v12192_v27  ;;  %v8328_v5 = vld [vmem:[%s10984_s0 + $0x370] sm:$0xff]  ;;  %v12201_v27 = vld [vmem:[#allocation178_spill] sm:$0xff]  ;;  %v12208_v55 = vld [vmem:[#allocation109_spill] sm:$0xff]  ;;  %v8363_v52 = vpop.permute.xlu2 %4308 }
 0x1f6   :  { %v12197_v20 = vmax.f32 %v12195_v4, %v12196_v11  ;;  %v4181_v45 = vunpack.i.h.bf16 %v7919_v7  ;;  %v4180_v58 = vunpack.i.l.bf16 %v7919_v7  ;;  %4473 = vrot.lane.b32.xlu2 %v4472_v62, %s5082_s8  ;;  %12199 = vst [vmem:[#allocation45_spill] sm:$0xff] %v8328_v5  ;;  %v1335_v7 = vsel %vm1300_vm12, %v4176_v10, -inf  ;;  %4468 = vrot.lane.b32.xlu1 %v4467_v46, %s5082_s8  ;;  %v12200_v8 = vld [vmem:[#allocation172_spill] sm:$0xff] }
 0x1f7   :  { %v8315_v43 = vmax.f32 %v12193_v16, %v1564_v39  ;;  %v8335_v39 = vld [vmem:[%s10984_s0 + $0x360] sm:$0xff]  ;;  %v1142_v62 = vsel %vm1107_vm11, %v4175_v22, %v4176_v10  ;;  %v12202_v16 = vmax.f32 %v12200_v8, %v12201_v27  ;;  %v12204_v11 = vld [vmem:[#allocation176_spill] sm:$0xff]  ;;  %12216 = vst [vmem:[#allocation124_spill] sm:$0xff] %v8363_v52  ;;  %v1144_v8 = vsel %vm1107_vm11, %v4185_v42, %v4186_v9 }
 0x1f8   :  { %v8320_v47 = vmax.f32 %v12197_v20, %v1563_v6  ;;  %v12205_v20 = vld [vmem:[#allocation188_spill] sm:$0xff]  ;;  %v12209_v6 = vld [vmem:[#allocation115_spill] sm:$0xff]  ;;  %v12213_v22 = vld [vmem:[#allocation110_spill] sm:$0xff]  ;;  %v1143_v42 = vsel %vm1107_vm11, %v4180_v58, %v4181_v45 }
 0x1f9   :  { %12194 = vst [vmem:[#allocation26_spill] sm:$0xff] %v8315_v43  ;;  %v8346_v4 = vmax.f32 %v12202_v16, %v1567_v61  ;;  %v12206_v36 = vmax.f32 %v12204_v11, %v12205_v20  ;;  %v12210_v30 = vmax.f32 %v12208_v55, %v12209_v6  ;;  %v12212_v10 = vld [vmem:[#allocation100_spill] sm:$0xff]  ;;  %v1337_v61 = vsel %vm1300_vm12, %v4186_v9, -inf }
 0x1fa   :  { %12198 = vst [vmem:[#allocation104_spill] sm:$0xff] %v8320_v47  ;;  %v12214_v46 = vmax.f32 %v12212_v10, %v12213_v22  ;;  %v1336_v9 = vsel %vm1300_vm12, %v4181_v45, -inf  ;;  %v4477_v27 = vpack.i.bf16 %v8315_v43, %v8320_v47  ;;  %v1570_v16 = vsel %vm209_vm10, %v1335_v7, -inf }
 0x1fb   :  { %12203 = vst [vmem:[#allocation101_spill] sm:$0xff] %v8346_v4  ;;  %v8351_v28 = vmax.f32 %v12206_v36, %v1568_v17  ;;  %v8356_v2 = vmax.f32 %v12210_v30, %v1566_v63  ;;  %v8370_v17 = vld [vmem:[%s10984_s0 + $0x378] sm:$0xff]  ;;  %v8374_v30 = vpop.permute.xlu1 %4258  ;;  %v8376_v63 = vpop.permute.xlu0 %4253  ;;  %v12217_v36 = vld [vmem:[#allocation102_spill] sm:$0xff]  ;;  %v1569_v11 = vsel %vm208_vm9, %v1142_v62, -inf  ;;  %v4191_v20 = vunpack.i.h.bf16 %v7644_v48 }
 0x1fc   :  { %v8361_v5 = vmax.f32 %v12214_v46, %v1565_v34  ;;  %v8380_v34 = vsel %vm207_vm8, %v649_v35, -inf  ;;  %v3975_v6 = vunpack.i.l.bf16 %v12217_v36  ;;  %v4190_v35 = vunpack.i.l.bf16 %v7644_v48  ;;  %4478 = vrot.lane.b32.xlu0 %v4477_v27, %s5082_s8  ;;  %v12235_v27 = vld [vmem:[#allocation136_spill] sm:$0xff] }
 0x1fd   :  { %12207 = vst [vmem:[#allocation111_spill] sm:$0xff] %v8351_v28  ;;  %v1574_v10 = vsel %vm209_vm10, %v1337_v61, -inf  ;;  %v1573_v22 = vsel %vm208_vm9, %v1144_v8, -inf  ;;  %v8403_v58 = vpack.i.bf16 %v8351_v28, %v8346_v4  ;;  %v1572_v7 = vsel %vm209_vm10, %v1336_v9, -inf  ;;  %v12220_v61 = vld [vmem:[#allocation171_spill] sm:$0xff]  ;;  %v12221_v8 = vld [vmem:[#allocation177_spill] sm:$0xff] }
 0x1fe   :  { %12211 = vst [vmem:[#allocation128_spill] sm:$0xff] %v8356_v2  ;;  %v8399_v45 = vpack.i.bf16 %v8356_v2, %v8361_v5  ;;  %v1571_v48 = vsel %vm208_vm9, %v1143_v42, -inf  ;;  %v4201_v62 = vunpack.i.h.bf16 %v8013_v31  ;;  %v4200_v46 = vunpack.i.l.bf16 %v8013_v31  ;;  %v12224_v2 = vld [vmem:[#allocation168_spill] sm:$0xff] }
 0x1ff   :  { %12215 = vst [vmem:[#allocation133_spill] sm:$0xff] %v8361_v5  ;;  %v12222_v55 = vmax.f32 %v12220_v61, %v12221_v8  ;;  %v12225_v5 = vld [vmem:[#allocation175_spill] sm:$0xff]  ;;  %v4196_v4 = vunpack.i.h.bf16 %v8015_v24  ;;  %v4195_v9 = vunpack.i.l.bf16 %v8015_v24  ;;  %4488 = vrot.lane.b32.xlu2 %v8403_v58, %s5082_s8  ;;  %v3976_v42 = vunpack.i.h.bf16 %v12217_v36  ;;  %v8458_v24 = vpop.permute.xlu2 %4323 }
 0x200   :  { %12218 = vst [vmem:[#allocation135_spill] sm:$0xff] %v8399_v45  ;;  %v12226_v43 = vmax.f32 %v12224_v2, %v12225_v5  ;;  %v1338_v31 = vsel %vm1300_vm12, %v4191_v20, -inf  ;;  %v1145_v61 = vsel %vm1107_vm11, %v4190_v35, %v4191_v20  ;;  %4483 = vrot.lane.b32.xlu1 %v8399_v45, %s5082_s8  ;;  %v8434_v2 = vld [vmem:[%s10984_s0 + $0x368] sm:$0xff]  ;;  %v12229_v5 = vld [vmem:[#allocation198_spill] sm:$0xff]  ;;  %v12234_v20 = vld [vmem:[#allocation117_spill] sm:$0xff] }
 0x201   :  { %12219 = vst [vmem:[#allocation37_spill] sm:$0xff] %v8403_v58  ;;  %v8414_v47 = vmax.f32 %v12222_v55, %v1570_v16  ;;  %v12232_v16 = vmax.f32 %v7062_v29, %v7153_v59  ;;  %v12236_v35 = vmax.f32 %v12234_v20, %v12235_v27  ;;  %v12238_v45 = vld [vmem:[#allocation116_spill] sm:$0xff]  ;;  %v12239_v58 = vld [vmem:[#allocation129_spill] sm:$0xff]  ;;  %v1340_v29 = vsel %vm1300_vm12, %v4201_v62, -inf }
 0x202   :  { %v8419_v28 = vmax.f32 %v12226_v43, %v1569_v11  ;;  %v12228_v43 = vld [vmem:[#allocation190_spill] sm:$0xff]  ;;  %v12240_v52 = vmax.f32 %v12238_v45, %v12239_v58  ;;  %12242 = vst [vmem:[#allocation132_spill] sm:$0xff] %v8458_v24  ;;  %v1147_v59 = vsel %vm1107_vm11, %v4200_v46, %v4201_v62  ;;  %v1339_v45 = vsel %vm1300_vm12, %v4196_v4, -inf }
 0x203   :  { %12223 = vst [vmem:[#allocation41_spill] sm:$0xff] %v8414_v47  ;;  %v12230_v55 = vmax.f32 %v12228_v43, %v12229_v5  ;;  %v8446_v11 = vmax.f32 %v12232_v16, %v1574_v10  ;;  %v8451_v8 = vmax.f32 %v12236_v35, %v1572_v7  ;;  %v12243_v43 = vld [vmem:[#allocation103_spill] sm:$0xff]  ;;  %v8464_v10 = vpop.permute.xlu1 %4273  ;;  %v845_v7 = vsel %vm594_vm6, -inf, %v3975_v6 }
 0x204   :  { %12227 = vst [vmem:[#allocation77_spill] sm:$0xff] %v8419_v28  ;;  %v8456_v0 = vmax.f32 %v12240_v52, %v1571_v48  ;;  %v3970_v5 = vunpack.i.l.bf16 %v12243_v43  ;;  %v1146_v52 = vsel %vm1107_vm11, %v4195_v9, %v4196_v4  ;;  %v8473_v58 = vpack.i.bf16 %v8414_v47, %v8419_v28  ;;  %v12252_v28 = vld [vmem:[#allocation189_spill] sm:$0xff] }
 0x205   :  { %v8441_v36 = vmax.f32 %v12230_v55, %v1573_v22  ;;  %12233 = vst [vmem:[#allocation90_spill] sm:$0xff] %v8446_v11  ;;  %v3971_v22 = vunpack.i.h.bf16 %v12243_v43  ;;  %v8466_v55 = vpop.permute.xlu0 %4268  ;;  %v1576_v48 = vsel %vm209_vm10, %v1338_v31, -inf  ;;  %v1575_v62 = vsel %vm208_vm9, %v1145_v61, -inf  ;;  %v12247_v43 = vld [vmem:[#allocation187_spill] sm:$0xff] }
 0x206   :  { %12237 = vst [vmem:[#allocation91_spill] sm:$0xff] %v8451_v8  ;;  %v4206_v46 = vunpack.i.h.bf16 %v7735_v60  ;;  %v4205_v16 = vunpack.i.l.bf16 %v7735_v60  ;;  %v1580_v20 = vsel %vm209_vm10, %v1340_v29, -inf  ;;  %v1579_v4 = vsel %vm208_vm9, %v1147_v59, -inf  ;;  %v12248_v29 = vld [vmem:[#allocation191_spill] sm:$0xff]  ;;  %4493 = vrot.lane.b32.xlu0 %v8473_v58, %s5082_s8 }
 0x207   :  { %12231 = vst [vmem:[#allocation28_spill] sm:$0xff] %v8441_v36  ;;  %v8487_v9 = vpack.i.bf16 %v8451_v8, %v8456_v0  ;;  %v8491_v31 = vpack.i.bf16 %v8446_v11, %v8441_v36  ;;  %v1578_v61 = vsel %vm209_vm10, %v1339_v45, -inf  ;;  %v1577_v60 = vsel %vm208_vm9, %v1146_v52, -inf  ;;  %v12251_v8 = vld [vmem:[#allocation180_spill] sm:$0xff] }
 0x208   :  { %12241 = vst [vmem:[#allocation123_spill] sm:$0xff] %v8456_v0  ;;  %v4216_v27 = vunpack.i.h.bf16 %v8100_v51  ;;  %v4215_v35 = vunpack.i.l.bf16 %v8100_v51  ;;  %v12249_v59 = vmax.f32 %v12247_v43, %v12248_v29  ;;  %v12253_v0 = vmax.f32 %v12251_v8, %v12252_v28  ;;  %v12260_v8 = vld [vmem:[#allocation107_spill] sm:$0xff]  ;;  %v12264_v29 = vld [vmem:[#allocation106_spill] sm:$0xff] }
 0x209   :  { %12244 = vst [vmem:[#allocation118_spill] sm:$0xff] %v8473_v58  ;;  %v4211_v36 = vunpack.i.h.bf16 %v8102_v3  ;;  %v4210_v45 = vunpack.i.l.bf16 %v8102_v3  ;;  %4503 = vrot.lane.b32.xlu2 %v8491_v31, %s5082_s8  ;;  %v653_v52 = vsel %vm594_vm6, %v3975_v6, %v3976_v42  ;;  %v844_v51 = vsel %vm594_vm6, -inf, %v3970_v5  ;;  %4498 = vrot.lane.b32.xlu1 %v8487_v9, %s5082_s8  ;;  %v12259_v42 = vld [vmem:[#allocation134_spill] sm:$0xff]  ;;  %v8541_v58 = vpop.permute.xlu2 %4338 }
 0x20a   :  { %12245 = vst [vmem:[#allocation130_spill] sm:$0xff] %v8487_v9  ;;  %v8502_v47 = vmax.f32 %v12249_v59, %v1576_v48  ;;  %v8507_v11 = vmax.f32 %v12253_v0, %v1575_v62  ;;  %v1341_v43 = vsel %vm1300_vm12, %v4206_v46, -inf  ;;  %v1148_v48 = vsel %vm1107_vm11, %v4205_v16, %v4206_v46  ;;  %v12263_v16 = vld [vmem:[#allocation131_spill] sm:$0xff] }
 0x20b   :  { %12246 = vst [vmem:[#allocation143_spill] sm:$0xff] %v8491_v31  ;;  %v12255_v3 = vmax.f32 %v7103_v23, %v7180_v26  ;;  %v12257_v0 = vmax.f32 %v7114_v1, %v7193_v33  ;;  %v12261_v62 = vmax.f32 %v12259_v42, %v12260_v8  ;;  %v12265_v59 = vmax.f32 %v12263_v16, %v12264_v29  ;;  %v12271_v8 = vld [vmem:[#allocation200_spill] sm:$0xff]  ;;  %v12274_v29 = vld [vmem:[#allocation193_spill] sm:$0xff] }
 0x20c   :  { %12250 = vst [vmem:[#allocation153_spill] sm:$0xff] %v8502_v47  ;;  %v8545_v23 = vsel %vm206_vm7, %v845_v7, -inf  ;;  %v652_v1 = vsel %vm594_vm6, %v3970_v5, %v3971_v22  ;;  %v1343_v26 = vsel %vm1300_vm12, %v4216_v27, -inf  ;;  %v1150_v33 = vsel %vm1107_vm11, %v4215_v35, %v4216_v27  ;;  %v12298_v31 = vld [vmem:[#allocation121_spill] sm:$0xff] }
 0x20d   :  { %12254 = vst [vmem:[#allocation144_spill] sm:$0xff] %v8507_v11  ;;  %v8524_v28 = vmax.f32 %v12255_v3, %v1579_v4  ;;  %v8529_v6 = vmax.f32 %v12257_v0, %v1580_v20  ;;  %v8534_v46 = vmax.f32 %v12261_v62, %v1578_v61  ;;  %v8539_v9 = vmax.f32 %v12265_v59, %v1577_v60  ;;  %v8550_v20 = vpop.permute.xlu1 %4288  ;;  %v8552_v4 = vpop.permute.xlu0 %4283  ;;  %v12275_v59 = vld [vmem:[#allocation199_spill] sm:$0xff] }
 0x20e   :  { %12267 = vst [vmem:[#allocation86_spill] sm:$0xff] %v8541_v58  ;;  %v8556_v61 = vsel %vm206_vm7, %v844_v51, -inf  ;;  %v1342_v60 = vsel %vm1300_vm12, %v4211_v36, -inf  ;;  %v1149_v3 = vsel %vm1107_vm11, %v4210_v45, %v4211_v36  ;;  %v8562_v7 = vpack.i.bf16 %v8502_v47, %v8507_v11 }
 0x20f   :  { %12256 = vst [vmem:[#allocation154_spill] sm:$0xff] %v8524_v28  ;;  %v1582_v22 = vsel %vm209_vm10, %v1341_v43, -inf  ;;  %v1581_v5 = vsel %vm208_vm9, %v1148_v48, -inf  ;;  %v4221_v27 = vunpack.i.h.bf16 %v7809_v14  ;;  %v4220_v35 = vunpack.i.l.bf16 %v7809_v14 }
 0x210   :  { %12258 = vst [vmem:[#allocation40_spill] sm:$0xff] %v8529_v6  ;;  %v1586_v51 = vsel %vm209_vm10, %v1343_v26, -inf  ;;  %v1585_v36 = vsel %vm208_vm9, %v1150_v33, -inf  ;;  %v8576_v45 = vpack.i.bf16 %v8534_v46, %v8539_v9  ;;  %v8580_v43 = vpack.i.bf16 %v8529_v6, %v8524_v28  ;;  %4508 = vrot.lane.b32.xlu0 %v8562_v7, %s5082_s8  ;;  %v12289_v6 = vld [vmem:[#allocation126_spill] sm:$0xff] }
 0x211   :  { %12262 = vst [vmem:[#allocation95_spill] sm:$0xff] %v8534_v46  ;;  %v1584_v48 = vsel %vm209_vm10, %v1342_v60, -inf  ;;  %v1583_v14 = vsel %vm208_vm9, %v1149_v3, -inf  ;;  %v4231_v0 = vunpack.i.h.bf16 %v8191_v50  ;;  %v4230_v42 = vunpack.i.l.bf16 %v8191_v50  ;;  %v8605_v50 = vld [vmem:[%s10984_s0 + $0x3a0] sm:$0xff]  ;;  %v8639_v28 = vpop.permute.xlu2 %4353 }
 0x212   :  { %12266 = vst [vmem:[#allocation83_spill] sm:$0xff] %v8539_v9  ;;  %v12272_v62 = vmax.f32 %v7099_v41, %v12271_v8  ;;  %v12276_v26 = vmax.f32 %v12274_v29, %v12275_v59  ;;  %v4226_v47 = vunpack.i.h.bf16 %v8193_v44  ;;  %v4225_v60 = vunpack.i.l.bf16 %v8193_v44  ;;  %4518 = vrot.lane.b32.xlu2 %v8580_v43, %s5082_s8  ;;  %4513 = vrot.lane.b32.xlu1 %v8576_v45, %s5082_s8  ;;  %v12281_v29 = vld [vmem:[#allocation125_spill] sm:$0xff]  ;;  %v12288_v46 = vld [vmem:[#allocation150_spill] sm:$0xff] }
 0x213   :  { %12268 = vst [vmem:[#allocation139_spill] sm:$0xff] %v8562_v7  ;;  %v1344_v3 = vsel %vm1300_vm12, %v4221_v27, -inf  ;;  %v12278_v44 = vmax.f32 %v7210_v12, %v6609_v18  ;;  %v12290_v11 = vmax.f32 %v12288_v46, %v12289_v6  ;;  %v8644_v18 = vld [vmem:[%s10984_s0 + $0x390] sm:$0xff]  ;;  %v4251_v24 = vunpack.i.h.bf16 %v8003_v40 }
 0x214   :  { %12269 = vst [vmem:[#allocation151_spill] sm:$0xff] %v8576_v45  ;;  %v8591_v16 = vmax.f32 %v12272_v62, %v1582_v22  ;;  %v8596_v33 = vmax.f32 %v12276_v26, %v1581_v5  ;;  %v1151_v22 = vsel %vm1107_vm11, %v4220_v35, %v4221_v27  ;;  %v8613_v5 = vsel %vm207_vm8, %v653_v52, -inf  ;;  %v12280_v62 = vld [vmem:[#allocation206_spill] sm:$0xff]  ;;  %v12284_v27 = vld [vmem:[#allocation155_spill] sm:$0xff] }
 0x215   :  { %12270 = vst [vmem:[#allocation138_spill] sm:$0xff] %v8580_v43  ;;  %v8622_v8 = vmax.f32 %v12278_v44, %v1585_v36  ;;  %v12282_v59 = vmax.f32 %v12280_v62, %v12281_v29  ;;  %v12285_v35 = vld [vmem:[#allocation127_spill] sm:$0xff]  ;;  %v8637_v9 = vmax.f32 %v12290_v11, %v1583_v14  ;;  %v1153_v36 = vsel %vm1107_vm11, %v4230_v42, %v4231_v0  ;;  %v8654_v11 = vpop.permute.xlu1 %4303  ;;  %v8656_v6 = vpop.permute.xlu0 %4298 }
 0x216   :  { %12273 = vst [vmem:[#allocation149_spill] sm:$0xff] %v8591_v16  ;;  %v12286_v52 = vmax.f32 %v12284_v27, %v12285_v35  ;;  %v1345_v46 = vsel %vm1300_vm12, %v4226_v47, -inf  ;;  %v1152_v14 = vsel %vm1107_vm11, %v4225_v60, %v4226_v47  ;;  %v8663_v44 = vld [vmem:[%s10984_s0 + $0x3a8] sm:$0xff]  ;;  %v1588_v42 = vsel %vm209_vm10, %v1344_v3, -inf }
 0x217   :  { %12277 = vst [vmem:[#allocation160_spill] sm:$0xff] %v8596_v33  ;;  %v8627_v26 = vmax.f32 %v12282_v59, %v1586_v51  ;;  %v1346_v51 = vsel %vm1300_vm12, %v4231_v0, -inf  ;;  %v1587_v62 = vsel %vm208_vm9, %v1151_v22, -inf  ;;  %v4236_v29 = vunpack.i.h.bf16 %v7896_v25  ;;  %v12294_v0 = vld [vmem:[#allocation122_spill] sm:$0xff]  ;;  %v12312_v43 = vld [vmem:[#allocation147_spill] sm:$0xff] }
 0x218   :  { %12279 = vst [vmem:[#allocation170_spill] sm:$0xff] %v8622_v8  ;;  %v8632_v41 = vmax.f32 %v12286_v52, %v1584_v48  ;;  %v8652_v48 = vsel %vm207_vm8, %v652_v1, -inf  ;;  %v4522_v1 = vpack.i.bf16 %v8591_v16, %v8596_v33  ;;  %v4235_v47 = vunpack.i.l.bf16 %v7896_v25  ;;  %v12321_v16 = vld [vmem:[#allocation141_spill] sm:$0xff] }
 0x219   :  { %12283 = vst [vmem:[#allocation159_spill] sm:$0xff] %v8627_v26  ;;  %v1592_v60 = vsel %vm209_vm10, %v1346_v51, -inf  ;;  %v1591_v59 = vsel %vm208_vm9, %v1153_v36, -inf  ;;  %v4532_v35 = vpack.i.bf16 %v8627_v26, %v8622_v8  ;;  %v1590_v3 = vsel %vm209_vm10, %v1345_v46, -inf  ;;  %v12293_v51 = vld [vmem:[#allocation203_spill] sm:$0xff]  ;;  %v12323_v8 = vld [vmem:[#allocation120_spill] sm:$0xff] }
 0x21a   :  { %12287 = vst [vmem:[#allocation173_spill] sm:$0xff] %v8632_v41  ;;  %v4527_v27 = vpack.i.bf16 %v8632_v41, %v8637_v9  ;;  %v1589_v22 = vsel %vm208_vm9, %v1152_v14, -inf  ;;  %v4246_v25 = vunpack.i.h.bf16 %v8280_v37  ;;  %v4245_v52 = vunpack.i.l.bf16 %v8280_v37  ;;  %4523 = vrot.lane.b32.xlu0 %v4522_v1, %s5082_s8  ;;  %v8728_v1 = vpop.permute.xlu2 %4368 }
 0x21b   :  { %12291 = vst [vmem:[#allocation96_spill] sm:$0xff] %v8637_v9  ;;  %v12295_v12 = vmax.f32 %v12293_v51, %v12294_v0  ;;  %v4241_v45 = vunpack.i.h.bf16 %v8282_v15  ;;  %v4240_v46 = vunpack.i.l.bf16 %v8282_v15  ;;  %4533 = vrot.lane.b32.xlu2 %v4532_v35, %s5082_s8  ;;  %v1347_v14 = vsel %vm1300_vm12, %v4236_v29, -inf  ;;  %v12303_v15 = vld [vmem:[#allocation211_spill] sm:$0xff]  ;;  %v12304_v0 = vld [vmem:[#allocation146_spill] sm:$0xff] }
 0x21c   :  { %12292 = vst [vmem:[#allocation112_spill] sm:$0xff] %v8639_v28  ;;  %v12297_v28 = vld [vmem:[#allocation202_spill] sm:$0xff]  ;;  %v1154_v37 = vsel %vm1107_vm11, %v4235_v47, %v4236_v29  ;;  %4528 = vrot.lane.b32.xlu1 %v4527_v27, %s5082_s8  ;;  %v12308_v29 = vld [vmem:[#allocation148_spill] sm:$0xff]  ;;  %v4256_v26 = vunpack.i.h.bf16 %v8376_v63 }
 0x21d   :  { %v8692_v36 = vmax.f32 %v12295_v12, %v1588_v42  ;;  %v12299_v7 = vmax.f32 %v12297_v28, %v12298_v31  ;;  %v4250_v12 = vunpack.i.l.bf16 %v8003_v40  ;;  %v12301_v31 = vld [vmem:[#allocation145_spill] sm:$0xff]  ;;  %v12305_v42 = vmax.f32 %v12303_v15, %v12304_v0  ;;  %v12307_v35 = vld [vmem:[#allocation174_spill] sm:$0xff]  ;;  %v12311_v40 = vld [vmem:[#allocation167_spill] sm:$0xff]  ;;  %12315 = vst [vmem:[#allocation157_spill] sm:$0xff] %v8728_v1  ;;  %v8740_v15 = vpop.permute.xlu1 %4318 }
 0x21e   :  { %v12302_v28 = vmax.f32 %v7295_v38, %v12301_v31  ;;  %v12309_v47 = vmax.f32 %v12307_v35, %v12308_v29  ;;  %v12313_v27 = vmax.f32 %v12311_v40, %v12312_v43  ;;  %v12316_v38 = vld [vmem:[#allocation119_spill] sm:$0xff]  ;;  %v1349_v31 = vsel %vm1300_vm12, %v4246_v25, -inf  ;;  %v8742_v43 = vpop.permute.xlu0 %4313  ;;  %v12320_v1 = vld [vmem:[#allocation209_spill] sm:$0xff] }
 0x21f   :  { %12296 = vst [vmem:[#allocation61_spill] sm:$0xff] %v8692_v36  ;;  %v8697_v58 = vmax.f32 %v12299_v7, %v1587_v62  ;;  %v8716_v62 = vmax.f32 %v12305_v42, %v1592_v60  ;;  %v8736_v60 = vld [vmem:[%s10984_s0 + $0x398] sm:$0xff]  ;;  %v1348_v0 = vsel %vm1300_vm12, %v4241_v45, -inf  ;;  %v1155_v42 = vsel %vm1107_vm11, %v4240_v46, %v4241_v45 }
 0x220   :  { %v8711_v7 = vmax.f32 %v12302_v28, %v1591_v59  ;;  %v8721_v51 = vmax.f32 %v12309_v47, %v1590_v3  ;;  %v8726_v33 = vmax.f32 %v12313_v27, %v1589_v22  ;;  %v3991_v59 = vunpack.i.h.bf16 %v12316_v38 }
 0x221   :  { %12300 = vst [vmem:[#allocation97_spill] sm:$0xff] %v8697_v58  ;;  %v1156_v28 = vsel %vm1107_vm11, %v4245_v52, %v4246_v25  ;;  %v3990_v22 = vunpack.i.l.bf16 %v12316_v38  ;;  %v4537_v25 = vpack.i.bf16 %v8692_v36, %v8697_v58  ;;  %v1594_v52 = vsel %vm209_vm10, %v1347_v14, -inf  ;;  %v12317_v38 = vld [vmem:[#allocation210_spill] sm:$0xff]  ;;  %v12334_v36 = vld [vmem:[#allocation165_spill] sm:$0xff] }
 0x222   :  { %12306 = vst [vmem:[#allocation156_spill] sm:$0xff] %v8716_v62  ;;  %v1593_v35 = vsel %vm208_vm9, %v1154_v37, -inf  ;;  %v1350_v29 = vsel %vm1300_vm12, %v4251_v24, -inf  ;;  %v1157_v47 = vsel %vm1107_vm11, %v4250_v12, %v4251_v24  ;;  %v1598_v40 = vsel %vm209_vm10, %v1349_v31, -inf  ;;  %v12318_v31 = vld [vmem:[#allocation142_spill] sm:$0xff] }
 0x223   :  { %12310 = vst [vmem:[#allocation169_spill] sm:$0xff] %v8721_v51  ;;  %v1597_v27 = vsel %vm208_vm9, %v1156_v28, -inf  ;;  %v4542_v45 = vpack.i.bf16 %v8721_v51, %v8726_v33  ;;  %v4547_v46 = vpack.i.bf16 %v8716_v62, %v8711_v7  ;;  %v1596_v14 = vsel %vm209_vm10, %v1348_v0, -inf  ;;  %4538 = vrot.lane.b32.xlu0 %v4537_v25, %s5082_s8  ;;  %v8810_v25 = vpop.permute.xlu2 %4383 }
 0x224   :  { %12314 = vst [vmem:[#allocation152_spill] sm:$0xff] %v8726_v33  ;;  %v1595_v37 = vsel %vm208_vm9, %v1155_v42, -inf  ;;  %v4261_v24 = vunpack.i.h.bf16 %v8374_v30  ;;  %v4260_v12 = vunpack.i.l.bf16 %v8374_v30  ;;  %v12319_v3 = vmax.f32 %v12317_v38, %v12318_v31  ;;  %v12331_v31 = vld [vmem:[#allocation166_spill] sm:$0xff] }
 0x225   :  { %v12322_v9 = vmax.f32 %v12320_v1, %v12321_v16  ;;  %v4255_v0 = vunpack.i.l.bf16 %v8376_v63  ;;  %4548 = vrot.lane.b32.xlu2 %v4547_v46, %s5082_s8  ;;  %v848_v42 = vsel %vm594_vm6, -inf, %v3990_v22  ;;  %v3986_v30 = vunpack.i.h.bf16 %v12323_v8  ;;  %4543 = vrot.lane.b32.xlu1 %v4542_v45, %s5082_s8  ;;  %v12326_v16 = vld [vmem:[#allocation17_spill] sm:$0xff]  ;;  %v12327_v1 = vld [vmem:[#allocation164_spill] sm:$0xff]  ;;  %v12330_v46 = vld [vmem:[#allocation194_spill] sm:$0xff]  ;;  %12336 = vst [vmem:[#allocation176_spill] sm:$0xff] %v8810_v25 }
 0x226   :  { %v8772_v28 = vmax.f32 %v12319_v3, %v1594_v52  ;;  %v1600_v38 = vsel %vm209_vm10, %v1350_v29, -inf  ;;  %v1599_v3 = vsel %vm208_vm9, %v1157_v47, -inf  ;;  %v12328_v52 = vmax.f32 %v12326_v16, %v12327_v1  ;;  %v12333_v47 = vld [vmem:[#allocation179_spill] sm:$0xff]  ;;  %v12355_v25 = vld [vmem:[#allocation197_spill] sm:$0xff] }
 0x227   :  { %v8777_v41 = vmax.f32 %v12322_v9, %v1593_v35  ;;  %v12324_v9 = vmax.f32 %v7578_v53, %v11978_v49  ;;  %v12332_v29 = vmax.f32 %v12330_v46, %v12331_v31  ;;  %v12335_v45 = vmax.f32 %v12333_v47, %v12334_v36 }
 0x228   :  { %v8798_v35 = vmax.f32 %v12328_v52, %v1598_v40  ;;  %v8813_v53 = vsel %vm594_vm6, %v3990_v22, %v3991_v59  ;;  %v3985_v49 = vunpack.i.l.bf16 %v12323_v8  ;;  %v1352_v40 = vsel %vm1300_vm12, %v4261_v24, -inf  ;;  %v12338_v8 = vld [vmem:[#allocation51_spill] sm:$0xff]  ;;  %v12339_v22 = vld [vmem:[#allocation162_spill] sm:$0xff] }
 0x229   :  { %v8793_v63 = vmax.f32 %v12324_v9, %v1597_v27  ;;  %v8803_v58 = vmax.f32 %v12332_v29, %v1596_v14  ;;  %v8808_v33 = vmax.f32 %v12335_v45, %v1595_v37  ;;  %v1159_v27 = vsel %vm1107_vm11, %v4260_v12, %v4261_v24  ;;  %v8818_v9 = vpop.permute.xlu1 %4333  ;;  %v8820_v14 = vpop.permute.xlu0 %4328  ;;  %v12342_v24 = vld [vmem:[#allocation2_spill] sm:$0xff]  ;;  %v12343_v12 = vld [vmem:[#allocation161_spill] sm:$0xff] }
 0x22a   :  { %12329 = vst [vmem:[#allocation178_spill] sm:$0xff] %v8798_v35  ;;  %v8824_v36 = vsel %vm206_vm7, %v848_v42, -inf  ;;  %v1351_v37 = vsel %vm1300_vm12, %v4256_v26, -inf  ;;  %v1158_v16 = vsel %vm1107_vm11, %v4255_v0, %v4256_v26  ;;  %v4552_v59 = vpack.i.bf16 %v8772_v28, %v8777_v41 }
 0x22b   :  { %12325 = vst [vmem:[#allocation172_spill] sm:$0xff] %v8793_v63  ;;  %v12340_v1 = vmax.f32 %v12338_v8, %v12339_v22  ;;  %v12344_v46 = vmax.f32 %v12342_v24, %v12343_v12  ;;  %v4266_v42 = vunpack.i.h.bf16 %v8095_v32  ;;  %v4265_v29 = vunpack.i.l.bf16 %v8095_v32  ;;  %v12349_v24 = vld [vmem:[#allocation183_spill] sm:$0xff] }
 0x22c   :  { %12337 = vst [vmem:[#allocation188_spill] sm:$0xff] %v8820_v14  ;;  %v1604_v26 = vsel %vm209_vm10, %v1352_v40, -inf  ;;  %v1603_v0 = vsel %vm208_vm9, %v1159_v27, -inf  ;;  %v4557_v47 = vpack.i.bf16 %v8803_v58, %v8808_v33  ;;  %v1601_v45 = vsel %vm208_vm9, %v1158_v16, -inf  ;;  %4553 = vrot.lane.b32.xlu0 %v4552_v59, %s5082_s8  ;;  %v12359_v59 = vld [vmem:[#allocation192_spill] sm:$0xff] }
 0x22d   :  { %v8833_v52 = vmax.f32 %v12340_v1, %v1600_v38  ;;  %v8838_v31 = vmax.f32 %v12344_v46, %v1599_v3  ;;  %v8850_v38 = vpack.i.bf16 %v8798_v35, %v8793_v63  ;;  %v1602_v3 = vsel %vm209_vm10, %v1351_v37, -inf  ;;  %v8867_v37 = vld [vmem:[%s10984_s0 + $0x3d0] sm:$0xff] }
 0x22e   :  { %v4276_v32 = vunpack.i.h.bf16 %v8464_v10  ;;  %v4275_v40 = vunpack.i.l.bf16 %v8464_v10  ;;  %v655_v8 = vsel %vm594_vm6, %v3985_v49, %v3986_v30  ;;  %v847_v27 = vsel %vm594_vm6, -inf, %v3985_v49  ;;  %4558 = vrot.lane.b32.xlu1 %v4557_v47, %s5082_s8  ;;  %v12348_v49 = vld [vmem:[#allocation48_spill] sm:$0xff] }
 0x22f   :  { %12341 = vst [vmem:[#allocation109_spill] sm:$0xff] %v8833_v52  ;;  %v4271_v22 = vunpack.i.h.bf16 %v8466_v55  ;;  %v4270_v1 = vunpack.i.l.bf16 %v8466_v55  ;;  %4563 = vrot.lane.b32.xlu2 %v8850_v38, %s5082_s8  ;;  %v1353_v10 = vsel %vm1300_vm12, %v4266_v42, -inf  ;;  %v1160_v30 = vsel %vm1107_vm11, %v4265_v29, %v4266_v42  ;;  %v12352_v35 = vld [vmem:[#allocation184_spill] sm:$0xff]  ;;  %v12356_v42 = vld [vmem:[#allocation186_spill] sm:$0xff] }
 0x230   :  { %12345 = vst [vmem:[#allocation115_spill] sm:$0xff] %v8838_v31  ;;  %v8877_v55 = vpack.i.bf16 %v8833_v52, %v8838_v31  ;;  %v12350_v12 = vmax.f32 %v12348_v49, %v12349_v24  ;;  %v12353_v16 = vmax.f32 %v8073_v56, %v12352_v35  ;;  %v12357_v29 = vmax.f32 %v12355_v25, %v12356_v42  ;;  %v8899_v31 = vpop.permute.xlu2 %4398 }
 0x231   :  { %12346 = vst [vmem:[#allocation100_spill] sm:$0xff] %v8850_v38  ;;  %v12360_v38 = vld [vmem:[#allocation185_spill] sm:$0xff]  ;;  %v1162_v49 = vsel %vm1107_vm11, %v4275_v40, %v4276_v32  ;;  %v8903_v24 = vpop.permute.xlu1 %4348  ;;  %v8905_v56 = vpop.permute.xlu0 %4343  ;;  %v4401_v35 = vunpack.i.h.bf16 %v8899_v31  ;;  %v11436_v25 = vunpack.i.l.bf16 %v8899_v31 }
 0x232   :  { %12347 = vst [vmem:[#allocation110_spill] sm:$0xff] %v8877_v55  ;;  %v8882_v46 = vmax.f32 %v12350_v12, %v1603_v0  ;;  %v8887_v63 = vmax.f32 %v12353_v16, %v1604_v26  ;;  %v8892_v47 = vmax.f32 %v12357_v29, %v1602_v3  ;;  %v12361_v14 = vmax.f32 %v12359_v59, %v12360_v38 }
 0x233   :  { %v1355_v0 = vsel %vm1300_vm12, %v4276_v32, -inf  ;;  %v1606_v26 = vsel %vm209_vm10, %v1353_v10, -inf  ;;  %v1161_v38 = vsel %vm1107_vm11, %v4270_v1, %v4271_v22  ;;  %v1605_v3 = vsel %vm208_vm9, %v1160_v30, -inf }
 0x234   :  { %12351 = vst [vmem:[#allocation102_spill] sm:$0xff] %v8882_v46  ;;  %v8897_v52 = vmax.f32 %v12361_v14, %v1601_v45  ;;  %v1354_v14 = vsel %vm1300_vm12, %v4271_v22, -inf  ;;  %v12363_v45 = vld [vmem:[#allocation62_spill] sm:$0xff]  ;;  %v8920_v16 = vsel %vm2269_vm13, %v11436_v25, %v4401_v35  ;;  %v1610_v10 = vsel %vm209_vm10, %v1355_v0, -inf  ;;  %v12369_v25 = vld [vmem:[#allocation81_spill] sm:$0xff]  ;;  %4568 = vrot.lane.b32.xlu0 %v8877_v55, %s5082_s8 }
 0x235   :  { %12354 = vst [vmem:[#allocation171_spill] sm:$0xff] %v8887_v63  ;;  %v4281_v32 = vunpack.i.h.bf16 %v12363_v45  ;;  %v4280_v40 = vunpack.i.l.bf16 %v12363_v45  ;;  %v1609_v12 = vsel %vm208_vm9, %v1162_v49, -inf  ;;  %v8932_v1 = vpack.i.bf16 %v8887_v63, %v8882_v46  ;;  %v12365_v0 = vld [vmem:[#allocation78_spill] sm:$0xff] }
 0x236   :  { %12358 = vst [vmem:[#allocation177_spill] sm:$0xff] %v8892_v47  ;;  %v8928_v22 = vpack.i.bf16 %v8892_v47, %v8897_v52  ;;  %v1608_v30 = vsel %vm209_vm10, %v1354_v14, -inf  ;;  %v1607_v42 = vsel %vm208_vm9, %v1161_v38, -inf  ;;  %v4291_v29 = vunpack.i.h.bf16 %v8550_v20  ;;  %v12366_v49 = vld [vmem:[#allocation182_spill] sm:$0xff]  ;;  %v12370_v47 = vld [vmem:[#allocation181_spill] sm:$0xff] }
 0x237   :  { %12362 = vst [vmem:[#allocation168_spill] sm:$0xff] %v8897_v52  ;;  %v4290_v59 = vunpack.i.l.bf16 %v8550_v20  ;;  %v12367_v35 = vmax.f32 %v12365_v0, %v12366_v49  ;;  %v12371_v52 = vmax.f32 %v12369_v25, %v12370_v47  ;;  %v4286_v46 = vunpack.i.h.bf16 %v8552_v4  ;;  %4578 = vrot.lane.b32.xlu2 %v8932_v1, %s5082_s8  ;;  %v12381_v0 = vld [vmem:[#allocation201_spill] sm:$0xff]  ;;  %v12382_v49 = vld [vmem:[#allocation195_spill] sm:$0xff] }
 0x238   :  { %12364 = vst [vmem:[#allocation175_spill] sm:$0xff] %v8928_v22  ;;  %v4285_v14 = vunpack.i.l.bf16 %v8552_v4  ;;  %v8956_v20 = vsel %vm206_vm7, %v847_v27, -inf  ;;  %v1356_v38 = vsel %vm1300_vm12, %v4281_v32, -inf  ;;  %4573 = vrot.lane.b32.xlu1 %v8928_v22, %s5082_s8  ;;  %v12373_v4 = vmax.f32 %v8276_v57, %v8335_v39  ;;  %v8989_v55 = vpop.permute.xlu2 %4413  ;;  %v12386_v57 = vld [vmem:[#allocation140_spill] sm:$0xff] }
 0x239   :  { %v8943_v45 = vmax.f32 %v12367_v35, %v1606_v26  ;;  %v8948_v63 = vmax.f32 %v12371_v52, %v1605_v3  ;;  %v1163_v26 = vsel %vm1107_vm11, %v4280_v40, %v4281_v32  ;;  %v8963_v52 = vsel %vm207_vm8, %v8813_v53, -inf  ;;  %v12377_v3 = vld [vmem:[#allocation207_spill] sm:$0xff]  ;;  %v12378_v32 = vld [vmem:[#allocation196_spill] sm:$0xff]  ;;  %12385 = vst [vmem:[#allocation103_spill] sm:$0xff] %v8989_v55 }
 0x23a   :  { %v8972_v27 = vmax.f32 %v12373_v4, %v1609_v12  ;;  %v12375_v47 = vmax.f32 %v8380_v34, %v8434_v2  ;;  %v12379_v53 = vmax.f32 %v12377_v3, %v12378_v32  ;;  %v12383_v35 = vmax.f32 %v12381_v0, %v12382_v49 }
 0x23b   :  { %12368 = vst [vmem:[#allocation190_spill] sm:$0xff] %v8943_v45  ;;  %v4001_v39 = vunpack.i.h.bf16 %v12386_v57  ;;  %v1358_v12 = vsel %vm1300_vm12, %v4291_v29, -inf  ;;  %v1165_v34 = vsel %vm1107_vm11, %v4290_v59, %v4291_v29  ;;  %v8996_v2 = vsel %vm207_vm8, %v655_v8, -inf }
 0x23c   :  { %12372 = vst [vmem:[#allocation198_spill] sm:$0xff] %v8948_v63  ;;  %v8977_v25 = vmax.f32 %v12375_v47, %v1610_v10  ;;  %v8982_v40 = vmax.f32 %v12379_v53, %v1608_v30  ;;  %v8987_v22 = vmax.f32 %v12383_v35, %v1607_v42  ;;  %v8998_v10 = vpop.permute.xlu1 %4363  ;;  %v9000_v30 = vpop.permute.xlu0 %4358  ;;  %v4000_v4 = vunpack.i.l.bf16 %v12386_v57 }
 0x23d   :  { %12374 = vst [vmem:[#allocation117_spill] sm:$0xff] %v8972_v27  ;;  %v1357_v42 = vsel %vm1300_vm12, %v4286_v46, -inf  ;;  %v1164_v47 = vsel %vm1107_vm11, %v4285_v14, %v4286_v46  ;;  %v9007_v3 = vpack.i.bf16 %v8943_v45, %v8948_v63  ;;  %v1612_v29 = vsel %vm209_vm10, %v1356_v38, -inf }
 0x23e   :  { %12376 = vst [vmem:[#allocation136_spill] sm:$0xff] %v8977_v25  ;;  %v1611_v8 = vsel %vm208_vm9, %v1163_v26, -inf  ;;  %v4296_v59 = vunpack.i.h.bf16 %v8269_v54  ;;  %v4295_v32 = vunpack.i.l.bf16 %v8269_v54  ;;  %v1616_v53 = vsel %vm209_vm10, %v1358_v12, -inf  ;;  %v12389_v12 = vld [vmem:[#allocation105_spill] sm:$0xff] }
 0x23f   :  { %12380 = vst [vmem:[#allocation116_spill] sm:$0xff] %v8982_v40  ;;  %v1615_v46 = vsel %vm208_vm9, %v1165_v34, -inf  ;;  %v9021_v14 = vpack.i.bf16 %v8982_v40, %v8987_v22  ;;  %v9025_v38 = vpack.i.bf16 %v8977_v25, %v8972_v27  ;;  %v1614_v26 = vsel %vm209_vm10, %v1357_v42, -inf  ;;  %v12390_v34 = vld [vmem:[#allocation45_spill] sm:$0xff]  ;;  %4583 = vrot.lane.b32.xlu0 %v9007_v3, %s5082_s8 }
 0x240   :  { %12384 = vst [vmem:[#allocation129_spill] sm:$0xff] %v8987_v22  ;;  %v1613_v54 = vsel %vm208_vm9, %v1164_v47, -inf  ;;  %v4306_v0 = vunpack.i.h.bf16 %v8654_v11  ;;  %v4305_v49 = vunpack.i.l.bf16 %v8654_v11  ;;  %v12387_v35 = vmax.f32 %v8288_v19, %v8370_v17  ;;  %v5072_v11 = vld [vmem:[%s10984_s0 + $0x3c0] sm:$0xff]  ;;  %v9084_v22 = vpop.permute.xlu2 %4428 }
 0x241   :  { %v12391_v45 = vmax.f32 %v12389_v12, %v12390_v34  ;;  %v4301_v25 = vunpack.i.h.bf16 %v8656_v6  ;;  %v4300_v42 = vunpack.i.l.bf16 %v8656_v6  ;;  %4593 = vrot.lane.b32.xlu2 %v9025_v38, %s5082_s8  ;;  %v1749_v19 = vmax.f32 %v8956_v20, %v5072_v11  ;;  %4588 = vrot.lane.b32.xlu1 %v9021_v14, %s5082_s8  ;;  %v12401_v11 = vld [vmem:[#allocation208_spill] sm:$0xff]  ;;  %12405 = vst [vmem:[#allocation131_spill] sm:$0xff] %v9084_v22 }
 0x242   :  { %v9036_v57 = vmax.f32 %v12387_v35, %v1612_v29  ;;  %v1359_v17 = vsel %vm1300_vm12, %v4296_v59, -inf  ;;  %v1166_v47 = vsel %vm1107_vm11, %v4295_v32, %v4296_v59  ;;  %v12393_v20 = vmax.f32 %v8556_v61, %v8644_v18  ;;  %v12397_v32 = vld [vmem:[#allocation212_spill] sm:$0xff]  ;;  %v12398_v35 = vld [vmem:[#allocation205_spill] sm:$0xff] }
 0x243   :  { %v9041_v40 = vmax.f32 %v12391_v45, %v1611_v8  ;;  %v9056_v45 = vld [vmem:[%s10984_s0 + $0x3d8] sm:$0xff]  ;;  %v12395_v8 = vmax.f32 %v8652_v48, %v8736_v60  ;;  %v12399_v12 = vmax.f32 %v12397_v32, %v12398_v35  ;;  %v12402_v6 = vld [vmem:[#allocation204_spill] sm:$0xff]  ;;  %v658_v61 = vsel %vm594_vm6, %v4000_v4, %v4001_v39  ;;  %v5074_v60 = vld [vmem:[%s10984_s0 + $0x3c8] sm:$0xff] }
 0x244   :  { %12388 = vst [vmem:[#allocation187_spill] sm:$0xff] %v9036_v57  ;;  %v9067_v29 = vmax.f32 %v12393_v20, %v1615_v46  ;;  %v12403_v63 = vmax.f32 %v12401_v11, %v12402_v6  ;;  %v1361_v18 = vsel %vm1300_vm12, %v4306_v0, -inf  ;;  %v1168_v48 = vsel %vm1107_vm11, %v4305_v49, %v4306_v0  ;;  %v9093_v46 = vpop.permute.xlu1 %4378  ;;  %v12408_v49 = vld [vmem:[#allocation124_spill] sm:$0xff] }
 0x245   :  { %12392 = vst [vmem:[#allocation191_spill] sm:$0xff] %v9041_v40  ;;  %v9072_v59 = vmax.f32 %v12395_v8, %v1616_v53  ;;  %v9077_v34 = vmax.f32 %v12399_v12, %v1614_v26  ;;  %v1750_v53 = vmax.f32 %v8996_v2, %v5074_v60  ;;  %v9095_v26 = vpop.permute.xlu0 %4373  ;;  %v1167_v39 = vsel %vm1107_vm11, %v4300_v42, %v4301_v25 }
 0x246   :  { %12394 = vst [vmem:[#allocation180_spill] sm:$0xff] %v9067_v29  ;;  %v9082_v55 = vmax.f32 %v12403_v63, %v1613_v54  ;;  %v850_v63 = vsel %vm594_vm6, -inf, %v4000_v4  ;;  %v1360_v54 = vsel %vm1300_vm12, %v4301_v25, -inf  ;;  %v9102_v6 = vpack.i.bf16 %v9036_v57, %v9041_v40  ;;  %v5075_v57 = vld [vmem:[%s10984_s0 + $0x3f0] sm:$0xff] }
 0x247   :  { %12396 = vst [vmem:[#allocation189_spill] sm:$0xff] %v9072_v59  ;;  %v1618_v0 = vsel %vm209_vm10, %v1359_v17, -inf  ;;  %v1617_v2 = vsel %vm208_vm9, %v1166_v47, -inf  ;;  %v4311_v20 = vunpack.i.h.bf16 %v12408_v49  ;;  %v4310_v8 = vunpack.i.l.bf16 %v12408_v49 }
 0x248   :  { %12400 = vst [vmem:[#allocation134_spill] sm:$0xff] %v9077_v34  ;;  %v1622_v4 = vsel %vm209_vm10, %v1361_v18, -inf  ;;  %v1621_v25 = vsel %vm208_vm9, %v1168_v48, -inf  ;;  %v9116_v42 = vpack.i.bf16 %v9077_v34, %v9082_v55  ;;  %v4607_v17 = vpack.i.bf16 %v9072_v59, %v9067_v29  ;;  %4598 = vrot.lane.b32.xlu0 %v9102_v6, %s5082_s8 }
 0x249   :  { %12404 = vst [vmem:[#allocation107_spill] sm:$0xff] %v9082_v55  ;;  %v1620_v47 = vsel %vm209_vm10, %v1360_v54, -inf  ;;  %v1619_v32 = vsel %vm208_vm9, %v1167_v39, -inf  ;;  %v4321_v35 = vunpack.i.h.bf16 %v8740_v15  ;;  %v4320_v12 = vunpack.i.l.bf16 %v8740_v15 }
 0x24a   :  { %12406 = vst [vmem:[#allocation106_spill] sm:$0xff] %v9093_v46  ;;  %v1495_v11 = vsel %vm206_vm7, %v850_v63, -inf  ;;  %v12409_v18 = vmax.f32 %v8613_v5, %v8663_v44  ;;  %v12411_v60 = vmax.f32 %v8545_v23, %v8605_v50  ;;  %v1496_v54 = vsel %vm207_vm8, %v658_v61, -inf  ;;  %4608 = vrot.lane.b32.xlu2 %v4607_v17, %s5082_s8  ;;  %4603 = vrot.lane.b32.xlu1 %v9116_v42, %s5082_s8  ;;  %v12415_v44 = vld [vmem:[#allocation16_spill] sm:$0xff]  ;;  %v12416_v61 = vld [vmem:[#allocation214_spill] sm:$0xff] }
 0x24b   :  { %12407 = vst [vmem:[#allocation200_spill] sm:$0xff] %v9095_v26  ;;  %v1362_v15 = vsel %vm1300_vm12, %v4311_v20, -inf  ;;  %v1169_v39 = vsel %vm1107_vm11, %v4310_v8, %v4311_v20  ;;  %v4316_v63 = vunpack.i.h.bf16 %v8742_v43  ;;  %v4315_v5 = vunpack.i.l.bf16 %v8742_v43  ;;  %v12419_v20 = vld [vmem:[#allocation6_spill] sm:$0xff]  ;;  %v12420_v8 = vld [vmem:[#allocation213_spill] sm:$0xff]  ;;  %v9163_v43 = vpop.permute.xlu2 %4443 }
 0x24c   :  { %v9131_v48 = vmax.f32 %v12409_v18, %v1618_v0  ;;  %v9136_v49 = vmax.f32 %v12411_v60, %v1617_v2  ;;  %v9149_v23 = vmax.f32 %v1749_v19, %v1621_v25  ;;  %v9151_v50 = vmax.f32 %v1750_v53, %v1622_v4  ;;  %12423 = vst [vmem:[#allocation150_spill] sm:$0xff] %v9163_v43  ;;  %v9167_v19 = vpop.permute.xlu1 %4393 }
 0x24d   :  { %v12417_v0 = vmax.f32 %v12415_v44, %v12416_v61  ;;  %v12421_v17 = vmax.f32 %v12419_v20, %v12420_v8  ;;  %v1364_v60 = vsel %vm1300_vm12, %v4321_v35, -inf  ;;  %v1171_v27 = vsel %vm1107_vm11, %v4320_v12, %v4321_v35  ;;  %v9169_v53 = vpop.permute.xlu0 %4388 }
 0x24e   :  { %12410 = vst [vmem:[#allocation193_spill] sm:$0xff] %v9131_v48  ;;  %v4446_v4 = vunpack.i.h.bf16 %v9163_v43  ;;  %v11450_v25 = vunpack.i.l.bf16 %v9163_v43  ;;  %v11452_v44 = vunpack.i.l.bf16 %v9167_v19  ;;  %v1170_v35 = vsel %vm1107_vm11, %v4315_v5, %v4316_v63 }
 0x24f   :  { %12412 = vst [vmem:[#allocation199_spill] sm:$0xff] %v9136_v49  ;;  %v9156_v2 = vmax.f32 %v12417_v0, %v1620_v47  ;;  %v9161_v18 = vmax.f32 %v12421_v17, %v1619_v32  ;;  %v4396_v47 = vunpack.i.h.bf16 %v9167_v19  ;;  %v4391_v32 = vunpack.i.h.bf16 %v9169_v53 }
 0x250   :  { %12413 = vst [vmem:[#allocation206_spill] sm:$0xff] %v9149_v23  ;;  %v1363_v0 = vsel %vm1300_vm12, %v4316_v63, -inf  ;;  %v4612_v12 = vpack.i.bf16 %v9131_v48, %v9136_v49  ;;  %v9184_v20 = vsel %vm2269_vm13, %v11450_v25, %v4446_v4  ;;  %v1624_v8 = vsel %vm209_vm10, %v1362_v15, -inf }
 0x251   :  { %12414 = vst [vmem:[#allocation125_spill] sm:$0xff] %v9151_v50  ;;  %v1623_v17 = vsel %vm208_vm9, %v1169_v39, -inf  ;;  %v4622_v61 = vpack.i.bf16 %v9151_v50, %v9149_v23  ;;  %v9195_v63 = vsel %vm2269_vm13, %v11452_v44, %v4396_v47  ;;  %v1628_v5 = vsel %vm209_vm10, %v1364_v60, -inf  ;;  %v5076_v60 = vld [vmem:[%s10984_s0 + $0x3f8] sm:$0xff] }
 0x252   :  { %12418 = vst [vmem:[#allocation155_spill] sm:$0xff] %v9156_v2  ;;  %v1627_v4 = vsel %vm208_vm9, %v1171_v27, -inf  ;;  %v4617_v15 = vpack.i.bf16 %v9156_v2, %v9161_v18  ;;  %v12426_v25 = vunpack.i.l.bf16 %v9169_v53  ;;  %v1755_v47 = vmax.f32 %v1495_v11, %v5075_v57  ;;  %v5078_v57 = vld [vmem:[%s10984_s0 + $0x3e8] sm:$0xff]  ;;  %v12429_v11 = vld [vmem:[#allocation94_spill] sm:$0xff]  ;;  %4613 = vrot.lane.b32.xlu0 %v4612_v12, %s5082_s8 }
 0x253   :  { %12422 = vst [vmem:[#allocation127_spill] sm:$0xff] %v9161_v18  ;;  %v1756_v44 = vmax.f32 %v1496_v54, %v5076_v60  ;;  %v1626_v27 = vsel %vm209_vm10, %v1363_v0, -inf  ;;  %v1625_v40 = vsel %vm208_vm9, %v1170_v35, -inf  ;;  %4623 = vrot.lane.b32.xlu2 %v4622_v61, %s5082_s8  ;;  %v1754_v54 = vmax.f32 %v12429_v11, %v5078_v57  ;;  %v12443_v57 = vld [vmem:[#allocation72_spill] sm:$0xff]  ;;  %v12444_v11 = vld [vmem:[#allocation5_spill] sm:$0xff] }
 0x254   :  { %12424 = vst [vmem:[#allocation126_spill] sm:$0xff] %v9169_v53  ;;  %v9206_v39 = vsel %vm2269_vm13, %v12426_v25, %v4391_v32  ;;  %v5077_v25 = vld [vmem:[%s10984_s0 + $0x3e0] sm:$0xff]  ;;  %v12428_v32 = vld [vmem:[#allocation60_spill] sm:$0xff]  ;;  %4618 = vrot.lane.b32.xlu1 %v4617_v15, %s5082_s8  ;;  %v12430_v21 = vmax.f32 %v8963_v52, %v9056_v45  ;;  %v12431_v61 = vmax.f32 %v8824_v36, %v8867_v37  ;;  %v9249_v12 = vpop.permute.xlu1 %4408  ;;  %s5083_s0 = smov 114   ;;  %v12509_v53 = vld [vmem:[#allocation159_spill] sm:$0xff] }
 0x255   :  { %12425 = vst [vmem:[#allocation203_spill] sm:$0xff] %v9184_v20  ;;  %v1753_v22 = vmax.f32 %v12428_v32, %v5077_v25  ;;  %v9239_v35 = vmax.f32 %v1755_v47, %v1627_v4  ;;  %v9241_v60 = vmax.f32 %v1756_v44, %v1628_v5  ;;  %v9243_v25 = vpop.permute.xlu2 %4458  ;;  %v9245_v32 = vmax.f32 %v1754_v54, %v1626_v27  ;;  %v9251_v52 = vpop.permute.xlu0 %4403  ;;  %v12445_v54 = vld [vmem:[#allocation217_spill] sm:$0xff] }
 0x256   :  { %12427 = vst [vmem:[#allocation122_spill] sm:$0xff] %v9206_v39  ;;  %v9232_v13 = vmax.f32 %v12430_v21, %v1624_v8  ;;  %v9237_v0 = vmax.f32 %v12431_v61, %v1623_v17  ;;  %v4461_v45 = vunpack.i.h.bf16 %v9243_v25  ;;  %v11455_v36 = vunpack.i.l.bf16 %v9243_v25 }
 0x257   :  { %12433 = vst [vmem:[#allocation121_spill] sm:$0xff] %v9243_v25  ;;  %v9247_v15 = vmax.f32 %v1753_v22, %v1625_v40  ;;  %v4637_v44 = vpack.i.bf16 %v9241_v60, %v9239_v35 }
 0x258   :  { %12432 = vst [vmem:[#allocation202_spill] sm:$0xff] %v9237_v0  ;;  %v9258_v37 = vsel %vm2269_vm13, %v11455_v36, %v4461_v45  ;;  %v4627_v40 = vpack.i.bf16 %v9232_v13, %v9237_v0  ;;  %v12452_v36 = vld [vmem:[#allocation19_spill] sm:$0xff]  ;;  %v4737_v46 = vpack.i.bf16 %v9237_v0, %v8721_v51 }
 0x259   :  { %12434 = vst [vmem:[#allocation145_spill] sm:$0xff] %v9245_v32  ;;  %v4632_v22 = vpack.i.bf16 %v9245_v32, %v9247_v15  ;;  %v12493_v51 = vld [vmem:[#allocation55_spill] sm:$0xff] }
 0x25a   :  { %12435 = vst [vmem:[#allocation211_spill] sm:$0xff] %v9247_v15  ;;  %4628 = vrot.lane.b32.xlu0 %v4627_v40, %s5082_s8 }
 0x25b   :  { %12436 = vst [vmem:[#allocation146_spill] sm:$0xff] %v9249_v12  ;;  %4638 = vrot.lane.b32.xlu2 %v4637_v44, %s5082_s8 }
 0x25c   :  { %12437 = vst [vmem:[#allocation174_spill] sm:$0xff] %v9251_v52  ;;  %4633 = vrot.lane.b32.xlu1 %v4632_v22, %s5082_s8  ;;  %v9271_v17 = vpop.permute.xlu1 %4423 }
 0x25d   :  { %12438 = vst [vmem:[#allocation148_spill] sm:$0xff] %v9258_v37  ;;  %v9269_v8 = vpop.permute.xlu2 %4473  ;;  %v9273_v5 = vpop.permute.xlu0 %4418 }
 0x25e   :  { %12439 = vst [vmem:[#allocation167_spill] sm:$0xff] %v9269_v8  ;;  %v4476_v4 = vunpack.i.h.bf16 %v9269_v8  ;;  %v11456_v47 = vunpack.i.l.bf16 %v9269_v8 }
 0x25f   :  { %12440 = vst [vmem:[#allocation147_spill] sm:$0xff] %v9271_v17  ;;  %v12460_v17 = vld [vmem:[#allocation31_spill] sm:$0xff] }
 0x260   :  { %12441 = vst [vmem:[#allocation119_spill] sm:$0xff] %v9273_v5  ;;  %v9280_v27 = vsel %vm2269_vm13, %v11456_v47, %v4476_v4  ;;  %v12453_v47 = vld [vmem:[#allocation4_spill] sm:$0xff]  ;;  %v12459_v5 = vld [vmem:[#allocation30_spill] sm:$0xff] }
 0x261   :  { %12442 = vst [vmem:[#allocation210_spill] sm:$0xff] %v9280_v27  ;;  %v12494_v27 = vld [vmem:[#allocation75_spill] sm:$0xff] }
 0x262   :  { %4643 = vrot.lane.b32.xlu0 %v12445_v54, %s5083_s0  ;;  %v12451_v54 = vld [vmem:[#allocation67_spill] sm:$0xff] }
 0x263   :  { %4653 = vrot.lane.b32.xlu2 %v12443_v57, %s5083_s0 }
 0x264   :  { %4648 = vrot.lane.b32.xlu1 %v12444_v11, %s5083_s0  ;;  %v9290_v61 = vpop.permute.xlu1 %4438 }
 0x265   :  { %v9288_v21 = vpop.permute.xlu2 %4488  ;;  %12447 = vst [vmem:[#allocation209_spill] sm:$0xff] %v9290_v61  ;;  %v9292_v45 = vpop.permute.xlu0 %4433  ;;  %v4441_v44 = vunpack.i.h.bf16 %v9290_v61  ;;  %v11459_v22 = vunpack.i.l.bf16 %v9290_v61  ;;  %v12465_v61 = vld [vmem:[#allocation32_spill] sm:$0xff] }
 0x266   :  { %12446 = vst [vmem:[#allocation142_spill] sm:$0xff] %v9288_v21  ;;  %v4436_v40 = vunpack.i.h.bf16 %v9292_v45  ;;  %v11460_v4 = vunpack.i.l.bf16 %v9292_v45  ;;  %v4687_v34 = vpack.i.bf16 %v8808_v33, %v12465_v61 }
 0x267   :  { %12448 = vst [vmem:[#allocation141_spill] sm:$0xff] %v9292_v45  ;;  %v9301_v57 = vsel %vm2269_vm13, %v11459_v22, %v4441_v44 }
 0x268   :  { %12449 = vst [vmem:[#allocation120_spill] sm:$0xff] %v9301_v57  ;;  %v9306_v11 = vsel %vm2269_vm13, %v11460_v4, %v4436_v40 }
 0x269   :  { %12450 = vst [vmem:[#allocation17_spill] sm:$0xff] %v9306_v11  ;;  %v12461_v11 = vld [vmem:[#allocation9_spill] sm:$0xff] }
 0x26a   :  { %4658 = vrot.lane.b32.xlu0 %v12453_v47, %s5083_s0 }
 0x26b   :  { %4668 = vrot.lane.b32.xlu2 %v12451_v54, %s5083_s0 }
 0x26c   :  { %4663 = vrot.lane.b32.xlu1 %v12452_v36, %s5083_s0  ;;  %v9316_v12 = vpop.permute.xlu1 %4453 }
 0x26d   :  { %v9314_v52 = vpop.permute.xlu2 %4503  ;;  %12455 = vst [vmem:[#allocation194_spill] sm:$0xff] %v9316_v12  ;;  %v9318_v44 = vpop.permute.xlu0 %4448  ;;  %v4456_v22 = vunpack.i.h.bf16 %v9316_v12  ;;  %v11464_v40 = vunpack.i.l.bf16 %v9316_v12 }
 0x26e   :  { %12454 = vst [vmem:[#allocation164_spill] sm:$0xff] %v9314_v52  ;;  %v4451_v4 = vunpack.i.h.bf16 %v9318_v44  ;;  %v11465_v54 = vunpack.i.l.bf16 %v9318_v44 }
 0x26f   :  { %12456 = vst [vmem:[#allocation166_spill] sm:$0xff] %v9318_v44  ;;  %v9327_v36 = vsel %vm2269_vm13, %v11464_v40, %v4456_v22 }
 0x270   :  { %12457 = vst [vmem:[#allocation179_spill] sm:$0xff] %v9327_v36  ;;  %v9332_v47 = vsel %vm2269_vm13, %v11465_v54, %v4451_v4 }
 0x271   :  { %12458 = vst [vmem:[#allocation165_spill] sm:$0xff] %v9332_v47 }
 0x272   :  { %4673 = vrot.lane.b32.xlu0 %v12461_v11, %s5083_s0  ;;  %v4692_v11 = vpack.i.bf16 %v8777_v41, %v8803_v58 }
 0x273   :  { %4683 = vrot.lane.b32.xlu2 %v12459_v5, %s5083_s0 }
 0x274   :  { %4678 = vrot.lane.b32.xlu1 %v12460_v17, %s5083_s0  ;;  %v9342_v57 = vpop.permute.xlu1 %4468  ;;  %v4697_v17 = vpack.i.bf16 %v9239_v35, %v8772_v28 }
 0x275   :  { %v9340_v45 = vpop.permute.xlu2 %4518  ;;  %12463 = vst [vmem:[#allocation162_spill] sm:$0xff] %v9342_v57  ;;  %v9344_v22 = vpop.permute.xlu0 %4463  ;;  %v4471_v40 = vunpack.i.h.bf16 %v9342_v57  ;;  %v11470_v4 = vunpack.i.l.bf16 %v9342_v57 }
 0x276   :  { %12462 = vst [vmem:[#allocation51_spill] sm:$0xff] %v9340_v45  ;;  %v4466_v54 = vunpack.i.h.bf16 %v9344_v22  ;;  %v11472_v5 = vunpack.i.l.bf16 %v9344_v22  ;;  %v12474_v45 = vld [vmem:[#allocation52_spill] sm:$0xff] }
 0x277   :  { %12464 = vst [vmem:[#allocation2_spill] sm:$0xff] %v9344_v22  ;;  %v9359_v20 = vsel %vm2269_vm13, %v11470_v4, %v4471_v40  ;;  %v4702_v12 = vpack.i.bf16 %v12474_v45, %v9241_v60  ;;  %v12485_v22 = vld [vmem:[#allocation34_spill] sm:$0xff] }
 0x278   :  { %12466 = vst [vmem:[#allocation161_spill] sm:$0xff] %v9359_v20  ;;  %v9364_v55 = vsel %vm2269_vm13, %v11472_v5, %v4466_v54  ;;  %v12472_v5 = vld [vmem:[#allocation158_spill] sm:$0xff]  ;;  %v12486_v20 = vld [vmem:[#allocation152_spill] sm:$0xff] }
 0x279   :  { %12467 = vst [vmem:[#allocation48_spill] sm:$0xff] %v9364_v55  ;;  %v4732_v39 = vpack.i.bf16 %v12486_v20, %v12485_v22  ;;  %v4747_v22 = vpack.i.bf16 %v12494_v27, %v12493_v51  ;;  %v12503_v27 = vld [vmem:[#allocation35_spill] sm:$0xff] }
 0x27a   :  { %4688 = vrot.lane.b32.xlu0 %v4687_v34, %s5083_s0  ;;  %v12471_v34 = vld [vmem:[#allocation26_spill] sm:$0xff]  ;;  %v4762_v0 = vpack.i.bf16 %v12503_v27, %v9151_v50  ;;  %v12507_v27 = vld [vmem:[#allocation93_spill] sm:$0xff] }
 0x27b   :  { %4698 = vrot.lane.b32.xlu2 %v4697_v17, %s5083_s0 }
 0x27c   :  { %4693 = vrot.lane.b32.xlu1 %v4692_v11, %s5083_s0  ;;  %v9371_v47 = vpop.permute.xlu1 %4483  ;;  %v4712_v11 = vpack.i.bf16 %v8711_v7, %v12471_v34 }
 0x27d   :  { %v9369_v21 = vpop.permute.xlu2 %4533  ;;  %12469 = vst [vmem:[#allocation184_spill] sm:$0xff] %v9371_v47  ;;  %v9373_v36 = vpop.permute.xlu0 %4478  ;;  %v12473_v47 = vld [vmem:[#allocation104_spill] sm:$0xff] }
 0x27e   :  { %12468 = vst [vmem:[#allocation183_spill] sm:$0xff] %v9369_v21  ;;  %v4536_v40 = vunpack.i.h.bf16 %v9369_v21  ;;  %v11477_v4 = vunpack.i.l.bf16 %v9369_v21  ;;  %v4481_v44 = vunpack.i.h.bf16 %v9373_v36  ;;  %v11479_v54 = vunpack.i.l.bf16 %v9373_v36 }
 0x27f   :  { %v4707_v37 = vpack.i.bf16 %v12473_v47, %v12472_v5 }
 0x280   :  { %v9382_v17 = vsel %vm2269_vm13, %v11477_v4, %v4536_v40  ;;  %v9393_v43 = vsel %vm2269_vm13, %v11479_v54, %v4481_v44  ;;  %v12479_v54 = vld [vmem:[#allocation113_spill] sm:$0xff] }
 0x281   :  { %12470 = vst [vmem:[#allocation197_spill] sm:$0xff] %v9382_v17 }
 0x282   :  { %4703 = vrot.lane.b32.xlu0 %v4702_v12, %s5083_s0  ;;  %v12480_v12 = vld [vmem:[#allocation56_spill] sm:$0xff] }
 0x283   :  { %4713 = vrot.lane.b32.xlu2 %v4712_v11, %s5083_s0  ;;  %v12478_v11 = vld [vmem:[#allocation53_spill] sm:$0xff]  ;;  %v4722_v52 = vpack.i.bf16 %v12480_v12, %v9245_v32 }
 0x284   :  { %4708 = vrot.lane.b32.xlu1 %v4707_v37, %s5083_s0  ;;  %v9400_v4 = vpop.permute.xlu1 %4498  ;;  %v4727_v37 = vpack.i.bf16 %v12479_v54, %v12478_v11 }
 0x285   :  { %v9398_v40 = vpop.permute.xlu2 %4548  ;;  %12475 = vst [vmem:[#allocation186_spill] sm:$0xff] %v9400_v4  ;;  %v9402_v61 = vpop.permute.xlu0 %4493  ;;  %v4717_v4 = vpack.i.bf16 %v9247_v15, %v8716_v62 }
 0x286   :  { %12476 = vst [vmem:[#allocation192_spill] sm:$0xff] %v9402_v61  ;;  %v4551_v25 = vunpack.i.h.bf16 %v9398_v40  ;;  %v11484_v17 = vunpack.i.l.bf16 %v9398_v40 }
 0x288   :  { %v9409_v44 = vsel %vm2269_vm13, %v11484_v17, %v4551_v25  ;;  %v12484_v17 = vld [vmem:[#allocation163_spill] sm:$0xff] }
 0x289   :  { %12477 = vst [vmem:[#allocation185_spill] sm:$0xff] %v9409_v44  ;;  %v4742_v26 = vpack.i.bf16 %v12484_v17, %v9232_v13  ;;  %v12492_v17 = vld [vmem:[#allocation97_spill] sm:$0xff] }
 0x28a   :  { %4718 = vrot.lane.b32.xlu0 %v4717_v4, %s5083_s0 }
 0x28b   :  { %4728 = vrot.lane.b32.xlu2 %v4727_v37, %s5083_s0 }
 0x28c   :  { %4723 = vrot.lane.b32.xlu1 %v4722_v52, %s5083_s0  ;;  %v9422_v21 = vpop.permute.xlu1 %4513 }
 0x28d   :  { %v9420_v61 = vpop.permute.xlu2 %4563  ;;  %12482 = vst [vmem:[#allocation78_spill] sm:$0xff] %v9422_v21  ;;  %v9424_v25 = vpop.permute.xlu0 %4508  ;;  %v12491_v21 = vld [vmem:[#allocation27_spill] sm:$0xff] }
 0x28e   :  { %12481 = vst [vmem:[#allocation62_spill] sm:$0xff] %v9420_v61  ;;  %v12490_v61 = vld [vmem:[#allocation61_spill] sm:$0xff]  ;;  %v4752_v57 = vpack.i.bf16 %v12492_v17, %v12491_v21  ;;  %v12498_v21 = vld [vmem:[#allocation108_spill] sm:$0xff] }
 0x28f   :  { %12483 = vst [vmem:[#allocation182_spill] sm:$0xff] %v9424_v25  ;;  %v4757_v25 = vpack.i.bf16 %v9149_v23, %v12490_v61 }
 0x292   :  { %4733 = vrot.lane.b32.xlu0 %v4732_v39, %s5083_s0 }
 0x293   :  { %4743 = vrot.lane.b32.xlu2 %v4742_v26, %s5083_s0 }
 0x294   :  { %4738 = vrot.lane.b32.xlu1 %v4737_v46, %s5083_s0  ;;  %v9437_v4 = vpop.permute.xlu1 %4528 }
 0x295   :  { %v9435_v52 = vpop.permute.xlu2 %4578  ;;  %12488 = vst [vmem:[#allocation181_spill] sm:$0xff] %v9437_v4  ;;  %v9439_v37 = vpop.permute.xlu0 %4523 }
 0x296   :  { %12487 = vst [vmem:[#allocation81_spill] sm:$0xff] %v9435_v52 }
 0x297   :  { %12489 = vst [vmem:[#allocation207_spill] sm:$0xff] %v9439_v37 }
 0x29a   :  { %4748 = vrot.lane.b32.xlu0 %v4747_v22, %s5083_s0  ;;  %v12501_v22 = vld [vmem:[#allocation15_spill] sm:$0xff] }
 0x29b   :  { %4758 = vrot.lane.b32.xlu2 %v4757_v25, %s5083_s0  ;;  %v12499_v25 = vld [vmem:[#allocation170_spill] sm:$0xff] }
 0x29c   :  { %4753 = vrot.lane.b32.xlu1 %v4752_v57, %s5083_s0  ;;  %v9452_v26 = vpop.permute.xlu1 %4543  ;;  %v4772_v17 = vpack.i.bf16 %v12499_v25, %v12498_v21 }
 0x29d   :  { %v9450_v46 = vpop.permute.xlu2 %4593  ;;  %12496 = vst [vmem:[#allocation201_spill] sm:$0xff] %v9452_v26  ;;  %v9454_v39 = vpop.permute.xlu0 %4538  ;;  %v4546_v52 = vunpack.i.h.bf16 %v9452_v26  ;;  %v11499_v37 = vunpack.i.l.bf16 %v9452_v26  ;;  %v4777_v26 = vpack.i.bf16 %v9161_v18, %v12509_v53  ;;  %v12524_v18 = vld [vmem:[#allocation43_spill] sm:$0xff] }
 0x29e   :  { %12495 = vst [vmem:[#allocation196_spill] sm:$0xff] %v9450_v46  ;;  %v4541_v4 = vunpack.i.h.bf16 %v9454_v39  ;;  %v11501_v23 = vunpack.i.l.bf16 %v9454_v39  ;;  %v12502_v46 = vld [vmem:[#allocation44_spill] sm:$0xff] }
 0x29f   :  { %12497 = vst [vmem:[#allocation195_spill] sm:$0xff] %v9454_v39  ;;  %v9465_v57 = vsel %vm2269_vm13, %v11499_v37, %v4546_v52  ;;  %v4767_v51 = vpack.i.bf16 %v12502_v46, %v12501_v22 }
 0x2a0   :  { %12500 = vst [vmem:[#allocation140_spill] sm:$0xff] %v9465_v57  ;;  %v9474_v20 = vsel %vm2269_vm13, %v11501_v23, %v4541_v4  ;;  %v12506_v23 = vld [vmem:[#allocation68_spill] sm:$0xff]  ;;  %v12508_v57 = vld [vmem:[#allocation14_spill] sm:$0xff] }
 0x2a1   :  { %v4787_v39 = vpack.i.bf16 %v12507_v27, %v12506_v23  ;;  %v4782_v54 = vpack.i.bf16 %v12508_v57, %v9156_v2  ;;  %v12517_v27 = vld [vmem:[#allocation96_spill] sm:$0xff] }
 0x2a2   :  { %4763 = vrot.lane.b32.xlu0 %v4762_v0, %s5083_s0 }
 0x2a3   :  { %4773 = vrot.lane.b32.xlu2 %v4772_v17, %s5083_s0 }
 0x2a4   :  { %4768 = vrot.lane.b32.xlu1 %v4767_v51, %s5083_s0  ;;  %v9481_v52 = vpop.permute.xlu1 %4558 }
 0x2a5   :  { %v9479_v25 = vpop.permute.xlu2 %4608  ;;  %v9483_v37 = vpop.permute.xlu0 %4553  ;;  %v4561_v46 = vunpack.i.h.bf16 %v9481_v52  ;;  %v11508_v4 = vunpack.i.l.bf16 %v9481_v52 }
 0x2a6   :  { %12504 = vst [vmem:[#allocation105_spill] sm:$0xff] %v9479_v25  ;;  %v4611_v22 = vunpack.i.h.bf16 %v9479_v25  ;;  %v11507_v50 = vunpack.i.l.bf16 %v9479_v25  ;;  %v4556_v17 = vunpack.i.h.bf16 %v9483_v37  ;;  %v11509_v51 = vunpack.i.l.bf16 %v9483_v37 }
 0x2a7   :  { %v9505_v8 = vsel %vm2269_vm13, %v11508_v4, %v4561_v46 }
 0x2a8   :  { %v9494_v0 = vsel %vm2269_vm13, %v11507_v50, %v4611_v22  ;;  %v9510_v25 = vsel %vm2269_vm13, %v11509_v51, %v4556_v17  ;;  %v12515_v51 = vld [vmem:[#allocation173_spill] sm:$0xff] }
 0x2a9   :  { %12505 = vst [vmem:[#allocation45_spill] sm:$0xff] %v9494_v0  ;;  %v12516_v0 = vld [vmem:[#allocation39_spill] sm:$0xff] }
 0x2aa   :  { %4778 = vrot.lane.b32.xlu0 %v4777_v26, %s5083_s0  ;;  %v4797_v26 = vpack.i.bf16 %v9136_v49, %v12515_v51 }
 0x2ab   :  { %4788 = vrot.lane.b32.xlu2 %v4787_v39, %s5083_s0  ;;  %v12514_v39 = vld [vmem:[#allocation69_spill] sm:$0xff] }
 0x2ac   :  { %4783 = vrot.lane.b32.xlu1 %v4782_v54, %s5083_s0  ;;  %v9517_v50 = vpop.permute.xlu1 %4573  ;;  %v4802_v54 = vpack.i.bf16 %v12514_v39, %v9131_v48 }
 0x2ad   :  { %v9515_v22 = vpop.permute.xlu2 %4623  ;;  %12511 = vst [vmem:[#allocation205_spill] sm:$0xff] %v9517_v50  ;;  %v9519_v23 = vpop.permute.xlu0 %4568  ;;  %v4792_v50 = vpack.i.bf16 %v12517_v27, %v12516_v0  ;;  %v12521_v27 = vld [vmem:[#allocation92_spill] sm:$0xff] }
 0x2ae   :  { %12510 = vst [vmem:[#allocation212_spill] sm:$0xff] %v9515_v22  ;;  %v4626_v46 = vunpack.i.h.bf16 %v9515_v22  ;;  %v11512_v4 = vunpack.i.l.bf16 %v9515_v22 }
 0x2af   :  { %12512 = vst [vmem:[#allocation208_spill] sm:$0xff] %v9519_v23 }
 0x2b0   :  { %v9526_v17 = vsel %vm2269_vm13, %v11512_v4, %v4626_v46  ;;  %v4336_v46 = vunpack.i.h.bf16 %v8818_v9  ;;  %v4335_v4 = vunpack.i.l.bf16 %v8818_v9  ;;  %v12522_v9 = vld [vmem:[#allocation160_spill] sm:$0xff] }
 0x2b1   :  { %12513 = vst [vmem:[#allocation204_spill] sm:$0xff] %v9526_v17  ;;  %v4812_v53 = vpack.i.bf16 %v12522_v9, %v12521_v27  ;;  %v4351_v9 = vunpack.i.h.bf16 %v8903_v24  ;;  %v4350_v27 = vunpack.i.l.bf16 %v8903_v24  ;;  %v12529_v24 = vld [vmem:[#allocation50_spill] sm:$0xff] }
 0x2b2   :  { %4793 = vrot.lane.b32.xlu0 %v4792_v50, %s5083_s0  ;;  %v12520_v50 = vld [vmem:[#allocation149_spill] sm:$0xff]  ;;  %v2464_v49 = vsel %vm2269_vm13, -inf, %v4335_v4  ;;  %v2272_v57 = vsel %vm2269_vm13, %v4335_v4, %v4336_v46 }
 0x2b3   :  { %4803 = vrot.lane.b32.xlu2 %v4802_v54, %s5083_s0  ;;  %v2275_v32 = vsel %vm2269_vm13, %v4350_v27, %v4351_v9 }
 0x2b4   :  { %4798 = vrot.lane.b32.xlu1 %v4797_v26, %s5083_s0  ;;  %v9541_v2 = vpop.permute.xlu1 %4588  ;;  %v4817_v26 = vpack.i.bf16 %v9067_v29, %v12520_v50  ;;  %v12526_v29 = vld [vmem:[#allocation47_spill] sm:$0xff] }
 0x2b5   :  { %v9537_v23 = vpop.permute.xlu2 %4638  ;;  %12518 = vst [vmem:[#allocation124_spill] sm:$0xff] %v9541_v2  ;;  %v9543_v39 = vpop.permute.xlu0 %4583  ;;  %v12523_v2 = vld [vmem:[#allocation76_spill] sm:$0xff]  ;;  %v3045_v17 = vmax.f32 %v2272_v57, %v12526_v29 }
 0x2b6   :  { %12519 = vst [vmem:[#allocation16_spill] sm:$0xff] %v9543_v39  ;;  %v4641_v51 = vunpack.i.h.bf16 %v9537_v23  ;;  %v11518_v0 = vunpack.i.l.bf16 %v9537_v23  ;;  %v4807_v39 = vpack.i.bf16 %v12524_v18, %v12523_v2 }
 0x2b8   :  { %v9550_v54 = vsel %vm2269_vm13, %v11518_v0, %v4641_v51  ;;  %v12525_v0 = vld [vmem:[#allocation11_spill] sm:$0xff] }
 0x2b9   :  { %v3044_v50 = vmax.f32 %v2464_v49, %v12525_v0  ;;  %v4822_v0 = vpack.i.bf16 %v12529_v24, %v9072_v59 }
 0x2ba   :  { %4808 = vrot.lane.b32.xlu0 %v4807_v39, %s5083_s0 }
 0x2bb   :  { %4818 = vrot.lane.b32.xlu2 %v4817_v26, %s5083_s0 }
 0x2bc   :  { %4813 = vrot.lane.b32.xlu1 %v4812_v53, %s5083_s0  ;;  %v9567_v2 = vpop.permute.xlu1 %4603 }
 0x2bd   :  { %v4654_v51 = vpop.permute.xlu2 %4653  ;;  %12527 = vst [vmem:[#allocation214_spill] sm:$0xff] %v9567_v2  ;;  %v9569_v4 = vpop.permute.xlu0 %4598  ;;  %v4606_v53 = vunpack.i.h.bf16 %v9567_v2  ;;  %v11523_v39 = vunpack.i.l.bf16 %v9567_v2  ;;  %v12550_v2 = vld [vmem:[#allocation86_spill] sm:$0xff] }
 0x2be   :  { %12528 = vst [vmem:[#allocation6_spill] sm:$0xff] %v9569_v4  ;;  %v4656_v46 = vunpack.i.h.bf16 %v4654_v51  ;;  %v4655_v26 = vunpack.i.l.bf16 %v4654_v51  ;;  %v4601_v18 = vunpack.i.h.bf16 %v9569_v4  ;;  %v11524_v49 = vunpack.i.l.bf16 %v9569_v4 }
 0x2bf   :  { %v2467_v51 = vsel %vm2269_vm13, -inf, %v4350_v27  ;;  %v9588_v44 = vsel %vm2269_vm13, %v11523_v39, %v4606_v53  ;;  %v12536_v27 = vld [vmem:[#allocation3_spill] sm:$0xff]  ;;  %v4366_v53 = vunpack.i.h.bf16 %v8998_v10  ;;  %v4365_v39 = vunpack.i.l.bf16 %v8998_v10 }
 0x2c0   :  { %v2785_v29 = vsel %vm2782_vm14, %v4655_v26, %v4656_v46  ;;  %v2978_v57 = vsel %vm2975_vm15, %v4656_v46, -inf  ;;  %12532 = vst [vmem:[#allocation94_spill] sm:$0xff] %v9588_v44  ;;  %v9593_v46 = vsel %vm2269_vm13, %v11524_v49, %v4601_v18  ;;  %v12534_v26 = vld [vmem:[#allocation138_spill] sm:$0xff]  ;;  %v3050_v9 = vmax.f32 %v2467_v51, %v12536_v27 }
 0x2c1   :  { %v9579_v22 = vmax.f32 %v3044_v50, %v2785_v29  ;;  %v9581_v48 = vmax.f32 %v3045_v17, %v2978_v57  ;;  %12533 = vst [vmem:[#allocation72_spill] sm:$0xff] %v9593_v46  ;;  %v12535_v17 = vld [vmem:[#allocation98_spill] sm:$0xff]  ;;  %v12537_v29 = vld [vmem:[#allocation65_spill] sm:$0xff]  ;;  %v4340_v59 = vunpack.i.l.bf16 %v12550_v2 }
 0x2c2   :  { %4823 = vrot.lane.b32.xlu0 %v4822_v0, %s5083_s0  ;;  %v3051_v57 = vmax.f32 %v2275_v32, %v12537_v29  ;;  %v12540_v29 = vld [vmem:[#allocation132_spill] sm:$0xff] }
 0x2c3   :  { %12530 = vst [vmem:[#allocation213_spill] sm:$0xff] %v9579_v22  ;;  %4833 = vrot.lane.b32.xlu2 %v12534_v26, %s5083_s0  ;;  %v4325_v10 = vunpack.i.l.bf16 %v12540_v29 }
 0x2c4   :  { %12531 = vst [vmem:[#allocation60_spill] sm:$0xff] %v9581_v48  ;;  %4828 = vrot.lane.b32.xlu1 %v12535_v17, %s5083_s0 }
 0x2c5   :  { %v4669_v50 = vpop.permute.xlu2 %4668  ;;  %v9606_v18 = vpop.permute.xlu0 %4613 }
 0x2c6   :  { %v9604_v48 = vpop.permute.xlu1 %4618  ;;  %12539 = vst [vmem:[#allocation217_spill] sm:$0xff] %v9606_v18  ;;  %v4671_v49 = vunpack.i.h.bf16 %v4669_v50  ;;  %v4670_v26 = vunpack.i.l.bf16 %v4669_v50  ;;  %v4616_v0 = vunpack.i.h.bf16 %v9606_v18  ;;  %v11526_v51 = vunpack.i.l.bf16 %v9606_v18 }
 0x2c7   :  { %12538 = vst [vmem:[#allocation5_spill] sm:$0xff] %v9604_v48  ;;  %v4621_v24 = vunpack.i.h.bf16 %v9604_v48  ;;  %v11527_v17 = vunpack.i.l.bf16 %v9604_v48  ;;  %v12551_v48 = vld [vmem:[#allocation188_spill] sm:$0xff] }
 0x2c8   :  { %v2788_v32 = vsel %vm2782_vm14, %v4670_v26, %v4671_v49  ;;  %v2981_v27 = vsel %vm2975_vm15, %v4671_v49, -inf  ;;  %v9627_v4 = vsel %vm2269_vm13, %v11526_v51, %v4616_v0  ;;  %v2470_v26 = vsel %vm2269_vm13, -inf, %v4365_v39  ;;  %v12545_v49 = vld [vmem:[#allocation151_spill] sm:$0xff] }
 0x2c9   :  { %v9615_v22 = vmax.f32 %v3050_v9, %v2788_v32  ;;  %v9617_v46 = vmax.f32 %v3051_v57, %v2981_v27  ;;  %v9622_v50 = vsel %vm2269_vm13, %v11527_v17, %v4621_v24  ;;  %12544 = vst [vmem:[#allocation30_spill] sm:$0xff] %v9627_v4  ;;  %v2278_v9 = vsel %vm2269_vm13, %v4365_v39, %v4366_v53  ;;  %v12546_v32 = vld [vmem:[#allocation25_spill] sm:$0xff]  ;;  %v12549_v39 = vld [vmem:[#allocation18_spill] sm:$0xff] }
 0x2ca   :  { %12543 = vst [vmem:[#allocation4_spill] sm:$0xff] %v9622_v50  ;;  %v4326_v57 = vunpack.i.h.bf16 %v12540_v29  ;;  %4838 = vrot.lane.b32.xlu0 %v9116_v42, %s5083_s0  ;;  %v2462_v24 = vsel %vm2269_vm13, -inf, %v4325_v10  ;;  %v3057_v53 = vmax.f32 %v2278_v9, %v12549_v39  ;;  %v4330_v9 = vunpack.i.l.bf16 %v12551_v48 }
 0x2cb   :  { %12541 = vst [vmem:[#allocation67_spill] sm:$0xff] %v9615_v22  ;;  %4848 = vrot.lane.b32.xlu2 %v12545_v49, %s5083_s0  ;;  %v12548_v49 = vld [vmem:[#allocation137_spill] sm:$0xff] }
 0x2cc   :  { %12542 = vst [vmem:[#allocation19_spill] sm:$0xff] %v9617_v46  ;;  %4843 = vrot.lane.b32.xlu1 %v12546_v32, %s5083_s0  ;;  %v3056_v22 = vmax.f32 %v2470_v26, %v12548_v49  ;;  %v4331_v26 = vunpack.i.h.bf16 %v12551_v48  ;;  %v12557_v48 = vld [vmem:[#allocation29_spill] sm:$0xff] }
 0x2cd   :  { %v4684_v27 = vpop.permute.xlu2 %4683  ;;  %v9641_v51 = vpop.permute.xlu0 %4628 }
 0x2ce   :  { %v9639_v0 = vpop.permute.xlu1 %4633  ;;  %12547 = vst [vmem:[#allocation31_spill] sm:$0xff] %v9641_v51  ;;  %v4686_v17 = vunpack.i.h.bf16 %v4684_v27  ;;  %v4685_v46 = vunpack.i.l.bf16 %v4684_v27  ;;  %v4631_v44 = vunpack.i.h.bf16 %v9641_v51  ;;  %v2270_v27 = vsel %vm2269_vm13, %v4325_v10, %v4326_v57 }
 0x2cf   :  { %v4636_v29 = vunpack.i.h.bf16 %v9639_v0  ;;  %v11532_v32 = vunpack.i.l.bf16 %v9639_v0  ;;  %v12555_v4 = vunpack.i.l.bf16 %v9641_v51  ;;  %v4341_v10 = vunpack.i.h.bf16 %v12550_v2 }
 0x2d0   :  { %v2791_v18 = vsel %vm2782_vm14, %v4685_v46, %v4686_v17  ;;  %v2984_v50 = vsel %vm2975_vm15, %v4686_v17, -inf  ;;  %v12556_v17 = vld [vmem:[#allocation139_spill] sm:$0xff]  ;;  %v4346_v2 = vunpack.i.h.bf16 %v8905_v56 }
 0x2d1   :  { %v9655_v49 = vmax.f32 %v3056_v22, %v2791_v18  ;;  %v9657_v39 = vmax.f32 %v3057_v53, %v2984_v50  ;;  %v9662_v42 = vsel %vm2269_vm13, %v11532_v32, %v4636_v29  ;;  %v9667_v46 = vsel %vm2269_vm13, %v12555_v4, %v4631_v44  ;;  %v12558_v22 = vld [vmem:[#allocation216_spill] sm:$0xff]  ;;  %v12559_v50 = vld [vmem:[#allocation215_spill] sm:$0xff] }
 0x2d2   :  { %12554 = vst [vmem:[#allocation158_spill] sm:$0xff] %v9662_v42  ;;  %4853 = vrot.lane.b32.xlu0 %v9102_v6, %s5083_s0  ;;  %v3040_v18 = vmax.f32 %v2462_v24, %v12558_v22  ;;  %v3041_v57 = vmax.f32 %v2270_v27, %v12559_v50  ;;  %v2465_v53 = vsel %vm2269_vm13, -inf, %v4340_v59  ;;  %v2463_v44 = vsel %vm2269_vm13, -inf, %v4330_v9 }
 0x2d3   :  { %12552 = vst [vmem:[#allocation9_spill] sm:$0xff] %v9655_v49  ;;  %4863 = vrot.lane.b32.xlu2 %v12556_v17, %s5083_s0  ;;  %v2271_v29 = vsel %vm2269_vm13, %v4330_v9, %v4331_v26  ;;  %v4345_v17 = vunpack.i.l.bf16 %v8905_v56  ;;  %v3133_v24 = vmax.f32 %v9510_v25, %v8772_v28  ;;  %v12560_v49 = vld [vmem:[#allocation13_spill] sm:$0xff]  ;;  %v2273_v9 = vsel %vm2269_vm13, %v4340_v59, %v4341_v10  ;;  %v12561_v56 = vld [vmem:[#allocation74_spill] sm:$0xff]  ;;  %v12563_v10 = vld [vmem:[#allocation143_spill] sm:$0xff] }
 0x2d4   :  { %12553 = vst [vmem:[#allocation26_spill] sm:$0xff] %v9657_v39  ;;  %4858 = vrot.lane.b32.xlu1 %v12557_v48, %s5083_s0  ;;  %v3042_v51 = vmax.f32 %v2463_v44, %v12560_v49  ;;  %v3043_v42 = vmax.f32 %v2271_v29, %v12561_v56  ;;  %v12570_v56 = vld [vmem:[#allocation46_spill] sm:$0xff] }
 0x2d5   :  { %v9680_v4 = vpop.permute.xlu2 %4698  ;;  %v4644_v32 = vpop.permute.xlu0 %4643  ;;  %v2466_v59 = vsel %vm2269_vm13, -inf, %v4345_v17  ;;  %v2274_v29 = vsel %vm2269_vm13, %v4345_v17, %v4346_v2  ;;  %v12569_v17 = vld [vmem:[#allocation10_spill] sm:$0xff] }
 0x2d6   :  { %v4649_v48 = vpop.permute.xlu1 %4648  ;;  %v11536_v6 = vunpack.i.l.bf16 %v9680_v4  ;;  %v4646_v50 = vunpack.i.h.bf16 %v4644_v32  ;;  %v4645_v39 = vunpack.i.l.bf16 %v4644_v32 }
 0x2d7   :  { %v4651_v27 = vunpack.i.h.bf16 %v4649_v48  ;;  %v4650_v22 = vunpack.i.l.bf16 %v4649_v48  ;;  %v12565_v48 = vld [vmem:[#allocation99_spill] sm:$0xff] }
 0x2d8   :  { %v3022_v26 = vsel %vm2975_vm15, %v11536_v6, -inf  ;;  %v2783_v15 = vsel %vm2782_vm14, %v4645_v39, %v4646_v50  ;;  %v2976_v44 = vsel %vm2975_vm15, %v4646_v50, -inf  ;;  %v4361_v6 = vunpack.i.h.bf16 %v9000_v30 }
 0x2d9   :  { %v2784_v62 = vsel %vm2782_vm14, %v4650_v22, %v4651_v27  ;;  %v9696_v55 = vmax.f32 %v3133_v24, %v3022_v26  ;;  %v2977_v28 = vsel %vm2975_vm15, %v4651_v27, -inf  ;;  %v9701_v32 = vmax.f32 %v3040_v18, %v2783_v15  ;;  %v12568_v24 = vld [vmem:[#allocation12_spill] sm:$0xff] }
 0x2da   :  { %v9699_v25 = vmax.f32 %v3042_v51, %v2784_v62  ;;  %v9703_v49 = vmax.f32 %v3043_v42, %v2977_v28  ;;  %v9710_v39 = vmax.f32 %v3041_v57, %v2976_v44  ;;  %4868 = vrot.lane.b32.xlu0 %v9025_v38, %s5083_s0  ;;  %v12566_v62 = vld [vmem:[#allocation112_spill] sm:$0xff]  ;;  %v12567_v42 = vld [vmem:[#allocation73_spill] sm:$0xff]  ;;  %v3047_v27 = vmax.f32 %v2273_v9, %v12568_v24 }
 0x2db   :  { %4878 = vrot.lane.b32.xlu2 %v12563_v10, %s5083_s0  ;;  %v4356_v15 = vunpack.i.h.bf16 %v12566_v62  ;;  %v3046_v18 = vmax.f32 %v2465_v53, %v12567_v42  ;;  %v4355_v22 = vunpack.i.l.bf16 %v12566_v62  ;;  %v3048_v26 = vmax.f32 %v2466_v59, %v12569_v17 }
 0x2dc   :  { %12562 = vst [vmem:[#allocation104_spill] sm:$0xff] %v9703_v49  ;;  %4873 = vrot.lane.b32.xlu1 %v12565_v48, %s5083_s0  ;;  %v3049_v28 = vmax.f32 %v2274_v29, %v12570_v56  ;;  %v4360_v53 = vunpack.i.l.bf16 %v9000_v30  ;;  %v3103_v62 = vmax.f32 %v9393_v43, %v12471_v34  ;;  %v12573_v43 = vld [vmem:[#allocation130_spill] sm:$0xff]  ;;  %v12697_v49 = vld [vmem:[#allocation28_spill] sm:$0xff] }
 0x2dd   :  { %12564 = vst [vmem:[#allocation52_spill] sm:$0xff] %v9710_v39  ;;  %v9717_v51 = vpop.permute.xlu2 %4713  ;;  %v4659_v2 = vpop.permute.xlu0 %4658  ;;  %v2468_v56 = vsel %vm2269_vm13, -inf, %v4355_v22  ;;  %v12693_v39 = vld [vmem:[#allocation148_spill] sm:$0xff] }
 0x2de   :  { %v4664_v50 = vpop.permute.xlu1 %4663  ;;  %v11537_v57 = vunpack.i.l.bf16 %v9717_v51  ;;  %v4661_v10 = vunpack.i.h.bf16 %v4659_v2  ;;  %v4660_v48 = vunpack.i.l.bf16 %v4659_v2 }
 0x2df   :  { %v4666_v44 = vunpack.i.h.bf16 %v4664_v50  ;;  %v4665_v38 = vunpack.i.l.bf16 %v4664_v50 }
 0x2e0   :  { %v3007_v9 = vsel %vm2975_vm15, %v11537_v57, -inf  ;;  %v2786_v59 = vsel %vm2782_vm14, %v4660_v48, %v4661_v10  ;;  %v2979_v24 = vsel %vm2975_vm15, %v4661_v10, -inf }
 0x2e1   :  { %v2787_v42 = vsel %vm2782_vm14, %v4665_v38, %v4666_v44  ;;  %v2980_v29 = vsel %vm2975_vm15, %v4666_v44, -inf  ;;  %v9738_v2 = vmax.f32 %v3046_v18, %v2786_v59  ;;  %v9742_v17 = vmax.f32 %v3047_v27, %v2979_v24  ;;  %v12575_v38 = vld [vmem:[#allocation22_spill] sm:$0xff] }
 0x2e2   :  { %v9736_v50 = vmax.f32 %v3048_v26, %v2787_v42  ;;  %v9740_v30 = vmax.f32 %v3049_v28, %v2980_v29  ;;  %v9747_v34 = vmax.f32 %v3103_v62, %v3007_v9  ;;  %4883 = vrot.lane.b32.xlu0 %v9021_v14, %s5083_s0  ;;  %v2469_v18 = vsel %vm2269_vm13, -inf, %v4360_v53  ;;  %v12576_v9 = vld [vmem:[#allocation64_spill] sm:$0xff] }
 0x2e3   :  { %12572 = vst [vmem:[#allocation56_spill] sm:$0xff] %v9742_v17  ;;  %4893 = vrot.lane.b32.xlu2 %v12573_v43, %s5083_s0  ;;  %v2277_v27 = vsel %vm2269_vm13, %v4360_v53, %v4361_v6  ;;  %v2276_v28 = vsel %vm2269_vm13, %v4355_v22, %v4356_v15  ;;  %v3052_v62 = vmax.f32 %v2468_v56, %v12576_v9  ;;  %v12577_v43 = vld [vmem:[#allocation8_spill] sm:$0xff]  ;;  %v12578_v15 = vld [vmem:[#allocation66_spill] sm:$0xff] }
 0x2e4   :  { %12571 = vst [vmem:[#allocation53_spill] sm:$0xff] %v9740_v30  ;;  %4888 = vrot.lane.b32.xlu1 %v12575_v38, %s5083_s0  ;;  %v3069_v42 = vmax.f32 %v9195_v63, %v12478_v11  ;;  %v3054_v38 = vmax.f32 %v2469_v18, %v12577_v43  ;;  %v3055_v22 = vmax.f32 %v2277_v27, %v12578_v15  ;;  %v12579_v53 = vld [vmem:[#allocation114_spill] sm:$0xff] }
 0x2e5   :  { %12574 = vst [vmem:[#allocation61_spill] sm:$0xff] %v9747_v34  ;;  %v9754_v26 = vpop.permute.xlu2 %4728  ;;  %v4674_v10 = vpop.permute.xlu0 %4673  ;;  %v3053_v57 = vmax.f32 %v2276_v28, %v12579_v53  ;;  %v12580_v27 = vld [vmem:[#allocation118_spill] sm:$0xff] }
 0x2e6   :  { %v4679_v44 = vpop.permute.xlu1 %4678  ;;  %v4730_v48 = vunpack.i.l.bf16 %v9754_v26  ;;  %v4676_v14 = vunpack.i.h.bf16 %v4674_v10  ;;  %v4675_v24 = vunpack.i.l.bf16 %v4674_v10 }
 0x2e7   :  { %v4681_v59 = vunpack.i.h.bf16 %v4679_v44  ;;  %v4680_v29 = vunpack.i.l.bf16 %v4679_v44 }
 0x2e8   :  { %v2990_v6 = vsel %vm2975_vm15, %v4730_v48, -inf  ;;  %v2789_v56 = vsel %vm2782_vm14, %v4675_v24, %v4676_v14  ;;  %v2982_v10 = vsel %vm2975_vm15, %v4676_v14, -inf }
 0x2e9   :  { %v2790_v34 = vsel %vm2782_vm14, %v4680_v29, %v4681_v59  ;;  %v9770_v9 = vmax.f32 %v3069_v42, %v2990_v6  ;;  %v2983_v63 = vsel %vm2975_vm15, %v4681_v59, -inf  ;;  %v9775_v44 = vmax.f32 %v3052_v62, %v2789_v56  ;;  %v12581_v29 = vld [vmem:[#allocation7_spill] sm:$0xff] }
 0x2ea   :  { %v9773_v11 = vmax.f32 %v3054_v38, %v2790_v34  ;;  %v9777_v18 = vmax.f32 %v3055_v22, %v2983_v63  ;;  %v9782_v28 = vmax.f32 %v3053_v57, %v2982_v10  ;;  %4898 = vrot.lane.b32.xlu0 %v9007_v3, %s5083_s0  ;;  %v12582_v34 = vunpack.i.l.bf16 %v9481_v52 }
 0x2eb   :  { %4908 = vrot.lane.b32.xlu2 %v12580_v27, %s5083_s0  ;;  %v3163_v6 = vmax.f32 %v9667_v46, %v9232_v13  ;;  %v12583_v3 = vunpack.i.l.bf16 %v9483_v37  ;;  %v3135_v22 = vmax.f32 %v9505_v8, %v8803_v58  ;;  %v12585_v37 = vunpack.i.l.bf16 %v9680_v4  ;;  %v12587_v8 = vld [vmem:[#allocation37_spill] sm:$0xff] }
 0x2ec   :  { %4903 = vrot.lane.b32.xlu1 %v12581_v29, %s5083_s0  ;;  %v2509_v62 = vsel %vm2269_vm13, -inf, %v12582_v34  ;;  %v12588_v34 = vunpack.i.l.bf16 %v9373_v36  ;;  %v3071_v36 = vmax.f32 %v8920_v16, %v12472_v5  ;;  %v3167_v5 = vmax.f32 %v9550_v54, %v9241_v60  ;;  %v12594_v60 = vld [vmem:[#allocation135_spill] sm:$0xff] }
 0x2ed   :  { %v9788_v42 = vpop.permute.xlu2 %4743  ;;  %v9793_v24 = vpop.permute.xlu0 %4688  ;;  %v2508_v15 = vsel %vm2269_vm13, -inf, %v12583_v3  ;;  %v3134_v52 = vmax.f32 %v2509_v62, %v8808_v33  ;;  %v12586_v33 = vunpack.i.l.bf16 %v8899_v31 }
 0x2ee   :  { %v4694_v59 = vpop.permute.xlu1 %4693  ;;  %v4745_v14 = vunpack.i.l.bf16 %v9788_v42  ;;  %v4691_v38 = vunpack.i.h.bf16 %v9793_v24  ;;  %v3132_v29 = vmax.f32 %v2508_v15, %v8777_v41  ;;  %v2493_v62 = vsel %vm2269_vm13, -inf, %v12588_v34 }
 0x2ef   :  { %v4696_v43 = vunpack.i.h.bf16 %v4694_v59  ;;  %v4695_v57 = vunpack.i.l.bf16 %v4694_v59  ;;  %v2477_v27 = vsel %vm2269_vm13, -inf, %v12586_v33  ;;  %v12589_v59 = vld [vmem:[#allocation23_spill] sm:$0xff]  ;;  %v4701_v15 = vunpack.i.h.bf16 %v9680_v4 }
 0x2f0   :  { %v3037_v53 = vsel %vm2975_vm15, %v4745_v14, -inf }
 0x2f1   :  { %v2830_v56 = vsel %vm2782_vm14, %v4691_v38, %v4695_v57  ;;  %v3023_v63 = vsel %vm2975_vm15, %v4695_v57, -inf  ;;  %v9810_v10 = vmax.f32 %v3163_v6, %v3037_v53  ;;  %v2829_v46 = vsel %vm2782_vm14, %v4696_v43, %v12585_v37 }
 0x2f2   :  { %v3262_v13 = vmax.f32 %v3134_v52, %v2830_v56  ;;  %v9818_v58 = vmax.f32 %v3135_v22, %v3023_v63  ;;  %4913 = vrot.lane.b32.xlu0 %v8932_v1, %s5083_s0  ;;  %v3260_v43 = vmax.f32 %v3132_v29, %v2829_v46  ;;  %v3070_v57 = vmax.f32 %v2477_v27, %v12474_v45 }
 0x2f3   :  { %12584 = vst [vmem:[#allocation108_spill] sm:$0xff] %v9810_v10  ;;  %4923 = vrot.lane.b32.xlu2 %v12587_v8, %s5083_s0  ;;  %v12590_v38 = vunpack.i.l.bf16 %v9537_v23  ;;  %v12591_v6 = vunpack.i.l.bf16 %v9167_v19  ;;  %v3102_v53 = vmax.f32 %v2493_v62, %v12473_v47  ;;  %v3127_v19 = vmax.f32 %v9474_v20, %v12490_v61  ;;  %v12596_v62 = vld [vmem:[#allocation79_spill] sm:$0xff] }
 0x2f4   :  { %4918 = vrot.lane.b32.xlu1 %v12589_v59, %s5083_s0  ;;  %3410 = vmatpush.msra.mxu2 %v3262_v13  ;;  %v12592_v47 = vunpack.i.l.bf16 %v9717_v51  ;;  %v12593_v20 = vunpack.i.l.bf16 %v9398_v40  ;;  %v12597_v59 = vld [vmem:[#allocation175_spill] sm:$0xff] }
 0x2f5   :  { %v9830_v31 = vpop.permute.xlu2 %4758  ;;  %v2525_v41 = vsel %vm2269_vm13, -inf, %v12590_v38  ;;  %v2476_v3 = vsel %vm2269_vm13, -inf, %v12591_v6  ;;  %v4704_v52 = vpop.permute.xlu0 %4703 }
 0x2f6   :  { %v4709_v1 = vpop.permute.xlu1 %4708  ;;  %v4760_v22 = vunpack.i.l.bf16 %v9830_v31  ;;  %v4706_v23 = vunpack.i.h.bf16 %v4704_v52  ;;  %v4705_v63 = vunpack.i.l.bf16 %v4704_v52  ;;  %3411 = vmatpush.msra.mxu2 %v3260_v43  ;;  %v3166_v13 = vmax.f32 %v2525_v41, %v9239_v35 }
 0x2f7   :  { %v4711_v45 = vunpack.i.h.bf16 %v4709_v1  ;;  %v4710_v56 = vunpack.i.l.bf16 %v4709_v1  ;;  %v2507_v61 = vsel %vm2269_vm13, -inf, %v12593_v20  ;;  %v3068_v41 = vmax.f32 %v2476_v3, %v12480_v12  ;;  %v12603_v12 = vld [vmem:[#allocation185_spill] sm:$0xff]  ;;  %v12606_v20 = vld [vmem:[#allocation100_spill] sm:$0xff] }
 0x2f8   :  { %v3019_v16 = vsel %vm2975_vm15, %v4760_v22, -inf  ;;  %v2846_v46 = vsel %vm2782_vm14, %v4701_v15, %v4705_v63  ;;  %v3039_v34 = vsel %vm2975_vm15, %v4705_v63, -inf  ;;  %v3130_v52 = vmax.f32 %v2507_v61, %v8711_v7 }
 0x2f9   :  { %v2798_v4 = vsel %vm2782_vm14, %v4706_v23, %v4710_v56  ;;  %v2814_v37 = vsel %vm2782_vm14, %v4711_v45, %v12592_v47  ;;  %v2991_v35 = vsel %vm2975_vm15, %v4710_v56, -inf  ;;  %v3294_v8 = vmax.f32 %v3166_v13, %v2846_v46  ;;  %v12601_v13 = vld [vmem:[#allocation211_spill] sm:$0xff] }
 0x2fa   :  { %v3198_v33 = vmax.f32 %v3070_v57, %v2798_v4  ;;  %v3230_v27 = vmax.f32 %v3102_v53, %v2814_v37  ;;  %v9858_v29 = vmax.f32 %v3071_v36, %v2991_v35  ;;  %v9865_v54 = vmax.f32 %v3127_v19, %v3019_v16  ;;  %4928 = vrot.lane.b32.xlu0 %v12597_v59, %s5083_s0  ;;  %v12600_v53 = vld [vmem:[#allocation48_spill] sm:$0xff]  ;;  %v12611_v59 = vld [vmem:[#allocation167_spill] sm:$0xff] }
 0x2fb   :  { %4938 = vrot.lane.b32.xlu2 %v12594_v60, %s5083_s0  ;;  %v9872_v43 = vmax.f32 %v3167_v5, %v3039_v34  ;;  %v12599_v57 = vunpack.i.l.bf16 %v9639_v0  ;;  %v4716_v36 = vunpack.i.h.bf16 %v9717_v51  ;;  %3451 = vmatpush.msra.mxu3 %v3294_v8  ;;  %v3097_v0 = vmax.f32 %v12600_v53, %v12498_v21  ;;  %v12602_v19 = vld [vmem:[#allocation156_spill] sm:$0xff]  ;;  %v12604_v51 = vld [vmem:[#allocation145_spill] sm:$0xff]  ;;  %v12605_v5 = vld [vmem:[#allocation158_spill] sm:$0xff] }
 0x2fc   :  { %12595 = vst [vmem:[#allocation11_spill] sm:$0xff] %v9865_v54  ;;  %4933 = vrot.lane.b32.xlu1 %v12596_v62, %s5083_s0  ;;  %3328 = vmatpush.msra.mxu0 %v3198_v33  ;;  %v3131_v3 = vmax.f32 %v12603_v12, %v12602_v19  ;;  %v3165_v4 = vmax.f32 %v12605_v5, %v12604_v51  ;;  %v12609_v34 = vld [vmem:[#allocation110_spill] sm:$0xff]  ;;  %v12619_v5 = vld [vmem:[#allocation113_spill] sm:$0xff] }
 0x2fd   :  { %12598 = vst [vmem:[#allocation47_spill] sm:$0xff] %v9872_v43  ;;  %v2524_v40 = vsel %vm2269_vm13, -inf, %v12599_v57  ;;  %3369 = vmatpush.msra.mxu1 %v3230_v27  ;;  %v9877_v38 = vpop.permute.xlu2 %4773  ;;  %v4719_v15 = vpop.permute.xlu0 %4718  ;;  %v12612_v57 = vunpack.i.l.bf16 %v12611_v59 }
 0x2fe   :  { %v4724_v6 = vpop.permute.xlu1 %4723  ;;  %v4775_v1 = vunpack.i.l.bf16 %v9877_v38  ;;  %v4721_v23 = vunpack.i.h.bf16 %v4719_v15  ;;  %v4720_v63 = vunpack.i.l.bf16 %v4719_v15  ;;  %v3164_v16 = vmax.f32 %v2524_v40, %v12601_v13  ;;  %v12615_v15 = vld [vmem:[#allocation31_spill] sm:$0xff] }
 0x2ff   :  { %v4726_v45 = vunpack.i.h.bf16 %v4724_v6  ;;  %v4725_v56 = vunpack.i.l.bf16 %v4724_v6  ;;  %v2492_v40 = vsel %vm2269_vm13, -inf, %v12612_v57 }
 0x300   :  { %v3004_v47 = vsel %vm2975_vm15, %v4775_v1, -inf  ;;  %v2828_v21 = vsel %vm2782_vm14, %v4716_v36, %v4720_v63  ;;  %v3021_v46 = vsel %vm2975_vm15, %v4720_v63, -inf  ;;  %v4731_v63 = vunpack.i.h.bf16 %v9754_v26 }
 0x301   :  { %v2797_v7 = vsel %vm2782_vm14, %v4726_v45, %v4730_v48  ;;  %v2845_v37 = vsel %vm2782_vm14, %v4721_v23, %v4725_v56  ;;  %v3258_v33 = vmax.f32 %v3130_v52, %v2828_v21  ;;  %v9899_v8 = vmax.f32 %v3131_v3, %v3021_v46  ;;  %v12608_v48 = vld [vmem:[#allocation38_spill] sm:$0xff] }
 0x302   :  { %v3196_v35 = vmax.f32 %v3068_v41, %v2797_v7  ;;  %v3292_v27 = vmax.f32 %v3164_v16, %v2845_v37  ;;  %v3038_v61 = vsel %vm2975_vm15, %v4725_v56, -inf  ;;  %v9904_v60 = vmax.f32 %v3097_v0, %v3004_v47  ;;  %4943 = vrot.lane.b32.xlu0 %v12609_v34, %s5083_s0  ;;  %v12613_v41 = vld [vmem:[#allocation201_spill] sm:$0xff]  ;;  %v12617_v45 = vld [vmem:[#allocation126_spill] sm:$0xff]  ;;  %v12620_v47 = vld [vmem:[#allocation152_spill] sm:$0xff] }
 0x303   :  { %4953 = vrot.lane.b32.xlu2 %v12606_v20, %s5083_s0  ;;  %v9910_v62 = vmax.f32 %v3165_v4, %v3038_v61  ;;  %v12614_v36 = vunpack.i.l.bf16 %v12613_v41  ;;  %v12616_v52 = vunpack.i.l.bf16 %v12615_v15  ;;  %3412 = vmatpush.msra.mxu2 %v3258_v33  ;;  %v12618_v56 = vunpack.i.l.bf16 %v12617_v45  ;;  %v12621_v21 = vld [vmem:[#allocation202_spill] sm:$0xff]  ;;  %v12624_v61 = vld [vmem:[#allocation169_spill] sm:$0xff] }
 0x304   :  { %12607 = vst [vmem:[#allocation138_spill] sm:$0xff] %v9904_v60  ;;  %4948 = vrot.lane.b32.xlu1 %v12608_v48, %s5083_s0  ;;  %3329 = vmatpush.msra.mxu0 %v3196_v35  ;;  %v3100_v4 = vmax.f32 %v2492_v40, %v12619_v5  ;;  %v12622_v46 = vld [vmem:[#allocation34_spill] sm:$0xff]  ;;  %v12625_v48 = vld [vmem:[#allocation140_spill] sm:$0xff] }
 0x305   :  { %12610 = vst [vmem:[#allocation98_spill] sm:$0xff] %v9910_v62  ;;  %v2506_v6 = vsel %vm2269_vm13, -inf, %v12614_v36  ;;  %v2523_v53 = vsel %vm2269_vm13, -inf, %v12616_v52  ;;  %v9921_v0 = vpop.permute.xlu2 %4788  ;;  %v2475_v23 = vsel %vm2269_vm13, -inf, %v12618_v56  ;;  %3452 = vmatpush.msra.mxu3 %v3292_v27  ;;  %v4734_v16 = vpop.permute.xlu0 %4733  ;;  %v12623_v35 = vld [vmem:[#allocation210_spill] sm:$0xff]  ;;  %v3129_v34 = vmax.f32 %v12625_v48, %v12624_v61  ;;  %v12631_v56 = vld [vmem:[#allocation176_spill] sm:$0xff] }
 0x306   :  { %v4739_v13 = vpop.permute.xlu1 %4738  ;;  %v4736_v3 = vunpack.i.h.bf16 %v4734_v16  ;;  %v4735_v51 = vunpack.i.l.bf16 %v4734_v16  ;;  %v3128_v7 = vmax.f32 %v2506_v6, %v12620_v47  ;;  %v3162_v37 = vmax.f32 %v2523_v53, %v12621_v21  ;;  %v12626_v36 = vld [vmem:[#allocation162_spill] sm:$0xff]  ;;  %v12635_v21 = vld [vmem:[#allocation75_spill] sm:$0xff]  ;;  %v12638_v48 = vld [vmem:[#allocation97_spill] sm:$0xff] }
 0x307   :  { %v4741_v19 = vunpack.i.h.bf16 %v4739_v13  ;;  %v4740_v12 = vunpack.i.l.bf16 %v4739_v13  ;;  %v3101_v33 = vmax.f32 %v12623_v35, %v12622_v46  ;;  %v12627_v6 = vunpack.i.l.bf16 %v12626_v36  ;;  %v12629_v45 = vld [vmem:[#allocation58_spill] sm:$0xff]  ;;  %v12632_v13 = vld [vmem:[#allocation195_spill] sm:$0xff] }
 0x308   :  { %v2813_v20 = vsel %vm2782_vm14, %v4731_v63, %v4735_v51  ;;  %v3006_v53 = vsel %vm2975_vm15, %v4735_v51, -inf  ;;  %v11542_v63 = vunpack.i.l.bf16 %v12631_v56  ;;  %v12633_v16 = vunpack.i.l.bf16 %v12632_v13  ;;  %v12636_v46 = vld [vmem:[#allocation55_spill] sm:$0xff]  ;;  %v12637_v35 = vld [vmem:[#allocation122_spill] sm:$0xff] }
 0x309   :  { %v2827_v26 = vsel %vm2782_vm14, %v4736_v3, %v4740_v12  ;;  %v2844_v27 = vsel %vm2782_vm14, %v4741_v19, %v4745_v14  ;;  %v3228_v59 = vmax.f32 %v3100_v4, %v2813_v20  ;;  %v3020_v41 = vsel %vm2975_vm15, %v4740_v12, -inf  ;;  %v12634_v3 = vld [vmem:[#allocation163_spill] sm:$0xff] }
 0x30a   :  { %v3256_v57 = vmax.f32 %v3128_v7, %v2827_v26  ;;  %v3290_v40 = vmax.f32 %v3162_v37, %v2844_v27  ;;  %v2491_v15 = vsel %vm2269_vm13, -inf, %v12627_v6  ;;  %v9943_v52 = vmax.f32 %v3129_v34, %v3020_v41  ;;  %4958 = vrot.lane.b32.xlu0 %v12629_v45, %s5083_s0  ;;  %v12642_v41 = vld [vmem:[#allocation30_spill] sm:$0xff] }
 0x30b   :  { %3370 = vmatpush.msra.mxu1 %v3228_v59  ;;  %v9948_v14 = vmax.f32 %v3101_v33, %v3006_v53  ;;  %v2505_v19 = vsel %vm2269_vm13, -inf, %v12633_v16  ;;  %v3066_v5 = vmax.f32 %v2475_v23, %v12634_v3  ;;  %v4746_v51 = vunpack.i.h.bf16 %v9788_v42  ;;  %v12639_v59 = vld [vmem:[#allocation27_spill] sm:$0xff] }
 0x30c   :  { %12628 = vst [vmem:[#allocation3_spill] sm:$0xff] %v9943_v52  ;;  %3413 = vmatpush.msra.mxu2 %v3256_v57  ;;  %3453 = vmatpush.msra.mxu3 %v3290_v40  ;;  %v3098_v37 = vmax.f32 %v2491_v15, %v12635_v21  ;;  %v3067_v33 = vmax.f32 %v12637_v35, %v12636_v46  ;;  %v12640_v57 = vld [vmem:[#allocation161_spill] sm:$0xff]  ;;  %v2474_v21 = vsel %vm2269_vm13, -inf, %v11542_v63  ;;  %v12667_v63 = vld [vmem:[#allocation159_spill] sm:$0xff]  ;;  %v12711_v52 = vld [vmem:[#allocation186_spill] sm:$0xff] }
 0x30d   :  { %12630 = vst [vmem:[#allocation65_spill] sm:$0xff] %v9948_v14  ;;  %v9954_v12 = vpop.permute.xlu2 %4803  ;;  %v4749_v47 = vpop.permute.xlu0 %4748  ;;  %v3126_v34 = vmax.f32 %v2505_v19, %v12638_v48  ;;  %v3099_v23 = vmax.f32 %v12640_v57, %v12639_v59  ;;  %v12641_v40 = vld [vmem:[#allocation193_spill] sm:$0xff]  ;;  %v12689_v14 = vld [vmem:[#allocation199_spill] sm:$0xff] }
 0x30e   :  { %v4754_v4 = vpop.permute.xlu1 %4753  ;;  %v11543_v7 = vunpack.i.l.bf16 %v9954_v12  ;;  %v4751_v27 = vunpack.i.h.bf16 %v4749_v47  ;;  %v4750_v61 = vunpack.i.l.bf16 %v4749_v47  ;;  %v3157_v36 = vmax.f32 %v12642_v41, %v12641_v40  ;;  %v12650_v40 = vld [vmem:[#allocation157_spill] sm:$0xff] }
 0x30f   :  { %v4756_v20 = vunpack.i.h.bf16 %v4754_v4  ;;  %v4755_v26 = vunpack.i.l.bf16 %v4754_v4  ;;  %v11541_v41 = vunpack.i.l.bf16 %v12650_v40 }
 0x310   :  { %v3034_v42 = vsel %vm2975_vm15, %v11543_v7, -inf  ;;  %v2796_v6 = vsel %vm2782_vm14, %v4746_v51, %v4750_v61  ;;  %v2989_v45 = vsel %vm2975_vm15, %v4750_v61, -inf  ;;  %v4761_v61 = vunpack.i.h.bf16 %v9830_v31  ;;  %v12668_v7 = vld [vmem:[#allocation197_spill] sm:$0xff] }
 0x311   :  { %v2812_v15 = vsel %vm2782_vm14, %v4751_v27, %v4755_v26  ;;  %v2826_v53 = vsel %vm2782_vm14, %v4756_v20, %v4760_v22  ;;  %v3194_v13 = vmax.f32 %v3066_v5, %v2796_v6  ;;  %v9976_v3 = vmax.f32 %v3067_v33, %v2989_v45  ;;  %v12645_v22 = vld [vmem:[#allocation2_spill] sm:$0xff] }
 0x312   :  { %v3226_v16 = vmax.f32 %v3098_v37, %v2812_v15  ;;  %v3254_v19 = vmax.f32 %v3126_v34, %v2826_v53  ;;  %v3005_v4 = vsel %vm2975_vm15, %v4755_v26, -inf  ;;  %v9979_v47 = vmax.f32 %v3157_v36, %v3034_v42  ;;  %v12647_v37 = vld [vmem:[#allocation212_spill] sm:$0xff]  ;;  %v12649_v26 = vld [vmem:[#allocation106_spill] sm:$0xff]  ;;  %v12651_v36 = vld [vmem:[#allocation35_spill] sm:$0xff] }
 0x313   :  { %3330 = vmatpush.msra.mxu0 %v3194_v13  ;;  %v9981_v51 = vmax.f32 %v3099_v23, %v3005_v4  ;;  %v12646_v46 = vunpack.i.l.bf16 %v12645_v22  ;;  %v12648_v35 = vunpack.i.l.bf16 %v12647_v37  ;;  %v11540_v27 = vunpack.i.l.bf16 %v12649_v26  ;;  %v12652_v15 = vld [vmem:[#allocation44_spill] sm:$0xff]  ;;  %v12653_v45 = vld [vmem:[#allocation206_spill] sm:$0xff] }
 0x314   :  { %12643 = vst [vmem:[#allocation132_spill] sm:$0xff] %v9979_v47  ;;  %3371 = vmatpush.msra.mxu1 %v3226_v16  ;;  %3414 = vmatpush.msra.mxu2 %v3254_v19  ;;  %v3064_v6 = vmax.f32 %v2474_v21, %v12651_v36  ;;  %v12654_v16 = vld [vmem:[#allocation200_spill] sm:$0xff]  ;;  %v12655_v21 = vld [vmem:[#allocation125_spill] sm:$0xff] }
 0x315   :  { %12644 = vst [vmem:[#allocation151_spill] sm:$0xff] %v9981_v51  ;;  %v2490_v5 = vsel %vm2269_vm13, -inf, %v12646_v46  ;;  %v2522_v33 = vsel %vm2269_vm13, -inf, %v12648_v35  ;;  %v9992_v20 = vpop.permute.xlu2 %4818  ;;  %v4764_v34 = vpop.permute.xlu0 %4763  ;;  %v11539_v19 = vunpack.i.l.bf16 %v12654_v16 }
 0x316   :  { %v9996_v48 = vpop.permute.xlu1 %4768  ;;  %v4766_v23 = vunpack.i.h.bf16 %v4764_v34  ;;  %v4765_v42 = vunpack.i.l.bf16 %v4764_v34  ;;  %v3096_v53 = vmax.f32 %v2490_v5, %v12652_v15  ;;  %v3160_v13 = vmax.f32 %v2522_v33, %v12653_v45  ;;  %v12656_v34 = vld [vmem:[#allocation204_spill] sm:$0xff] }
 0x317   :  { %v4771_v59 = vunpack.i.h.bf16 %v9996_v48  ;;  %v11538_v57 = vunpack.i.l.bf16 %v9996_v48  ;;  %v3161_v5 = vmax.f32 %v12656_v34, %v12655_v21  ;;  %v2473_v33 = vsel %vm2269_vm13, -inf, %v11540_v27  ;;  %v12663_v34 = vld [vmem:[#allocation14_spill] sm:$0xff]  ;;  %v12666_v27 = vld [vmem:[#allocation127_spill] sm:$0xff] }
 0x318   :  { %v2843_v22 = vsel %vm2782_vm14, %v4761_v61, %v4765_v42  ;;  %v3036_v36 = vsel %vm2975_vm15, %v4765_v42, -inf  ;;  %v10028_v61 = vsel %vm2269_vm13, -inf, %v11539_v19  ;;  %v12706_v54 = vunpack.i.l.bf16 %v9992_v20 }
 0x319   :  { %v2795_v31 = vsel %vm2782_vm14, %v4766_v23, %v11538_v57  ;;  %v2811_v4 = vsel %vm2782_vm14, %v4771_v59, %v4775_v1  ;;  %v3288_v35 = vmax.f32 %v3160_v13, %v2843_v22  ;;  %v10018_v23 = vmax.f32 %v3161_v5, %v3036_v36  ;;  %v12658_v59 = vld [vmem:[#allocation183_spill] sm:$0xff] }
 0x31a   :  { %v3192_v46 = vmax.f32 %v3064_v6, %v2795_v31  ;;  %v3224_v37 = vmax.f32 %v3096_v53, %v2811_v4  ;;  %v10023_v1 = vsel %vm2269_vm13, -inf, %v11541_v41  ;;  %v12659_v6 = vunpack.i.l.bf16 %v12658_v59  ;;  %v12660_v53 = vld [vmem:[#allocation5_spill] sm:$0xff]  ;;  %v12662_v31 = vld [vmem:[#allocation164_spill] sm:$0xff] }
 0x31b   :  { %12657 = vst [vmem:[#allocation25_spill] sm:$0xff] %v10018_v23  ;;  %v12661_v42 = vunpack.i.l.bf16 %v12660_v53  ;;  %3454 = vmatpush.msra.mxu3 %v3288_v35  ;;  %v4776_v22 = vunpack.i.h.bf16 %v9877_v38  ;;  %v3062_v5 = vmax.f32 %v2473_v33, %v12663_v34  ;;  %v12664_v53 = vld [vmem:[#allocation181_spill] sm:$0xff]  ;;  %v3125_v4 = vmax.f32 %v12668_v7, %v12667_v63  ;;  %v12670_v34 = vld [vmem:[#allocation4_spill] sm:$0xff]  ;;  %v12690_v23 = vld [vmem:[#allocation207_spill] sm:$0xff] }
 0x31c   :  { %3331 = vmatpush.msra.mxu0 %v3192_v46  ;;  %3372 = vmatpush.msra.mxu1 %v3224_v37  ;;  %v2504_v15 = vsel %vm2269_vm13, -inf, %v12659_v6  ;;  %v11544_v46 = vunpack.i.l.bf16 %v9921_v0 }
 0x31d   :  { %v2521_v45 = vsel %vm2269_vm13, -inf, %v12661_v42  ;;  %v10036_v13 = vpop.permute.xlu2 %4833  ;;  %v4779_v21 = vpop.permute.xlu0 %4778  ;;  %v12665_v42 = vld [vmem:[#allocation170_spill] sm:$0xff] }
 0x31e   :  { %v4784_v37 = vpop.permute.xlu1 %4783  ;;  %v4781_v6 = vunpack.i.h.bf16 %v4779_v21  ;;  %v4780_v57 = vunpack.i.l.bf16 %v4779_v21  ;;  %v3124_v35 = vmax.f32 %v2504_v15, %v12665_v42  ;;  %v3158_v41 = vmax.f32 %v2521_v45, %v12666_v27  ;;  %v12671_v27 = vld [vmem:[#allocation121_spill] sm:$0xff] }
 0x31f   :  { %v4786_v36 = vunpack.i.h.bf16 %v4784_v37  ;;  %v4785_v59 = vunpack.i.l.bf16 %v4784_v37  ;;  %v12669_v37 = vld [vmem:[#allocation155_spill] sm:$0xff]  ;;  %v12672_v45 = vunpack.i.l.bf16 %v12671_v27  ;;  %v12684_v27 = vld [vmem:[#allocation93_spill] sm:$0xff] }
 0x320   :  { %v2825_v60 = vsel %vm2782_vm14, %v4776_v22, %v4780_v57  ;;  %v3159_v21 = vmax.f32 %v12670_v34, %v12669_v37  ;;  %v3018_v15 = vsel %vm2975_vm15, %v4780_v57, -inf  ;;  %v12682_v37 = vunpack.i.l.bf16 %v12662_v31 }
 0x321   :  { %v2794_v38 = vsel %vm2782_vm14, %v4786_v36, %v11544_v46  ;;  %v2842_v33 = vsel %vm2782_vm14, %v4781_v6, %v4785_v59  ;;  %v3252_v19 = vmax.f32 %v3124_v35, %v2825_v60  ;;  %v2489_v63 = vsel %vm2269_vm13, -inf, %v12672_v45  ;;  %v12676_v60 = vld [vmem:[#allocation217_spill] sm:$0xff]  ;;  %v12688_v46 = vld [vmem:[#allocation96_spill] sm:$0xff] }
 0x322   :  { %v3190_v51 = vmax.f32 %v3062_v5, %v2794_v38  ;;  %v3286_v47 = vmax.f32 %v3158_v41, %v2842_v33  ;;  %v10058_v7 = vmax.f32 %v3125_v4, %v3018_v15  ;;  %v3035_v36 = vsel %vm2975_vm15, %v4785_v59, -inf  ;;  %v12678_v35 = vld [vmem:[#allocation69_spill] sm:$0xff]  ;;  %v12679_v38 = vld [vmem:[#allocation32_spill] sm:$0xff] }
 0x323   :  { %3415 = vmatpush.msra.mxu2 %v3252_v19  ;;  %v10061_v22 = vmax.f32 %v3159_v21, %v3035_v36  ;;  %v12675_v6 = vunpack.i.l.bf16 %v12664_v53  ;;  %v12677_v41 = vunpack.i.l.bf16 %v12676_v60  ;;  %v3060_v4 = vmax.f32 %v10028_v61, %v12678_v35  ;;  %v12680_v19 = vld [vmem:[#allocation150_spill] sm:$0xff] }
 0x324   :  { %12673 = vst [vmem:[#allocation137_spill] sm:$0xff] %v10058_v7  ;;  %3332 = vmatpush.msra.mxu0 %v3190_v51  ;;  %3455 = vmatpush.msra.mxu3 %v3286_v47  ;;  %v12681_v59 = vunpack.i.l.bf16 %v12680_v19  ;;  %v10083_v34 = vsel %vm2269_vm13, -inf, %v12682_v37  ;;  %v4791_v47 = vunpack.i.h.bf16 %v9921_v0  ;;  %v3094_v61 = vmax.f32 %v2489_v63, %v12684_v27  ;;  %v12692_v37 = vld [vmem:[#allocation39_spill] sm:$0xff]  ;;  %v12698_v7 = vld [vmem:[#allocation78_spill] sm:$0xff] }
 0x325   :  { %12674 = vst [vmem:[#allocation18_spill] sm:$0xff] %v10061_v22  ;;  %v2503_v5 = vsel %vm2269_vm13, -inf, %v12675_v6  ;;  %v2520_v57 = vsel %vm2269_vm13, -inf, %v12677_v41  ;;  %v10069_v42 = vpop.permute.xlu2 %4848  ;;  %v4794_v15 = vpop.permute.xlu0 %4793  ;;  %v12685_v41 = vld [vmem:[#allocation194_spill] sm:$0xff] }
 0x326   :  { %v10078_v33 = vsel %vm2269_vm13, -inf, %v12681_v59  ;;  %v10086_v21 = vpop.permute.xlu1 %4798  ;;  %v4796_v6 = vunpack.i.h.bf16 %v4794_v15  ;;  %v4795_v60 = vunpack.i.l.bf16 %v4794_v15  ;;  %v12686_v35 = vunpack.i.l.bf16 %v12685_v41  ;;  %v12687_v59 = vld [vmem:[#allocation51_spill] sm:$0xff] }
 0x327   :  { %12683 = vst [vmem:[#allocation86_spill] sm:$0xff] %v10086_v21  ;;  %v4801_v45 = vunpack.i.h.bf16 %v10086_v21  ;;  %v11545_v36 = vunpack.i.l.bf16 %v10086_v21  ;;  %v3122_v51 = vmax.f32 %v2503_v5, %v12688_v46  ;;  %v3156_v22 = vmax.f32 %v2520_v57, %v12689_v14  ;;  %v12694_v5 = vld [vmem:[#allocation166_spill] sm:$0xff] }
 0x328   :  { %v2488_v19 = vsel %vm2269_vm13, -inf, %v12686_v35  ;;  %v2810_v63 = vsel %vm2782_vm14, %v4791_v47, %v4795_v60  ;;  %v12691_v15 = vunpack.i.l.bf16 %v9954_v12  ;;  %v3095_v46 = vmax.f32 %v12693_v39, %v12692_v37  ;;  %v12696_v47 = vld [vmem:[#allocation43_spill] sm:$0xff]  ;;  %v12701_v39 = vld [vmem:[#allocation92_spill] sm:$0xff] }
 0x329   :  { %v2824_v27 = vsel %vm2782_vm14, %v4796_v6, %v11545_v36  ;;  %v3222_v62 = vmax.f32 %v3094_v61, %v2810_v63  ;;  %v12695_v14 = vunpack.i.l.bf16 %v12694_v5  ;;  %v3092_v10 = vmax.f32 %v2488_v19, %v12696_v47  ;;  %v12699_v61 = vld [vmem:[#allocation182_spill] sm:$0xff]  ;;  %v12702_v37 = vld [vmem:[#allocation179_spill] sm:$0xff] }
 0x32a   :  { %v2841_v41 = vsel %vm2782_vm14, %v4801_v45, %v12691_v15  ;;  %v3250_v35 = vmax.f32 %v3122_v51, %v2824_v27  ;;  %v3003_v36 = vsel %vm2975_vm15, %v4795_v60, -inf  ;;  %v11546_v45 = vunpack.i.l.bf16 %v12698_v7 }
 0x32b   :  { %v3284_v43 = vmax.f32 %v3156_v22, %v2841_v41  ;;  %v10110_v57 = vsel %vm2269_vm13, -inf, %v12695_v14  ;;  %v11549_v51 = vunpack.i.l.bf16 %v12699_v61  ;;  %3373 = vmatpush.msra.mxu1 %v3222_v62  ;;  %v10118_v22 = vmax.f32 %v3095_v46, %v3003_v36  ;;  %v12705_v36 = vld [vmem:[#allocation160_spill] sm:$0xff] }
 0x32c   :  { %3416 = vmatpush.msra.mxu2 %v3250_v35  ;;  %v3093_v63 = vmax.f32 %v12702_v37, %v12701_v39  ;;  %v12703_v27 = vunpack.i.l.bf16 %v12687_v59  ;;  %v12704_v15 = vunpack.i.l.bf16 %v12690_v23  ;;  %v4806_v60 = vunpack.i.h.bf16 %v9954_v12 }
 0x32d   :  { %12700 = vst [vmem:[#allocation188_spill] sm:$0xff] %v10118_v22  ;;  %3456 = vmatpush.msra.mxu3 %v3284_v43  ;;  %v10130_v62 = vpop.permute.xlu2 %4863  ;;  %v4835_v35 = vunpack.i.l.bf16 %v10036_v13  ;;  %v4850_v14 = vunpack.i.l.bf16 %v10069_v42  ;;  %v10136_v39 = vpop.permute.xlu0 %4808  ;;  %v2500_v43 = vsel %vm2269_vm13, -inf, %v11546_v45  ;;  %v2499_v6 = vsel %vm2269_vm13, -inf, %v11549_v51 }
 0x32e   :  { %v2501_v19 = vsel %vm2269_vm13, -inf, %v12703_v27  ;;  %v2502_v41 = vsel %vm2269_vm13, -inf, %v12704_v15  ;;  %v4814_v47 = vpop.permute.xlu1 %4813  ;;  %v4811_v12 = vunpack.i.h.bf16 %v10136_v39  ;;  %v11552_v15 = vunpack.i.l.bf16 %v10136_v39 }
 0x32f   :  { %v4816_v37 = vunpack.i.h.bf16 %v4814_v47  ;;  %v4815_v27 = vunpack.i.l.bf16 %v4814_v47  ;;  %v3120_v5 = vmax.f32 %v2502_v41, %v12705_v36  ;;  %v4865_v22 = vunpack.i.l.bf16 %v10130_v62  ;;  %v12708_v41 = vld [vmem:[#allocation154_spill] sm:$0xff] }
 0x330   :  { %v2793_v47 = vsel %vm2782_vm14, %v4806_v60, %v11552_v15  ;;  %v12707_v51 = vunpack.i.h.bf16 %v10036_v13  ;;  %v3118_v36 = vmax.f32 %v2501_v19, %v12708_v41  ;;  %v12709_v7 = vunpack.i.h.bf16 %v10069_v42  ;;  %v12710_v60 = vld [vmem:[#allocation24_spill] sm:$0xff]  ;;  %v12715_v19 = vld [vmem:[#allocation105_spill] sm:$0xff] }
 0x331   :  { %v2809_v17 = vsel %vm2782_vm14, %v4811_v12, %v4815_v27  ;;  %v2823_v45 = vsel %vm2782_vm14, %v4816_v37, %v12706_v54  ;;  %v3188_v30 = vmax.f32 %v3060_v4, %v2793_v47  ;;  %v3090_v12 = vmax.f32 %v10110_v57, %v12710_v60  ;;  %v12713_v4 = vld [vmem:[#allocation144_spill] sm:$0xff] }
 0x332   :  { %v3220_v31 = vmax.f32 %v3092_v10, %v2809_v17  ;;  %v3248_v61 = vmax.f32 %v3120_v5, %v2823_v45  ;;  %v2822_v46 = vsel %vm2782_vm14, %v4835_v35, %v12707_v51  ;;  %v2821_v21 = vsel %vm2782_vm14, %v4850_v14, %v12709_v7  ;;  %v12712_v17 = vld [vmem:[#allocation83_spill] sm:$0xff] }
 0x333   :  { %v3002_v15 = vsel %vm2975_vm15, %v4815_v27, -inf  ;;  %v11554_v54 = vunpack.i.l.bf16 %v12711_v52  ;;  %3333 = vmatpush.msra.mxu0 %v3188_v30  ;;  %v3116_v10 = vmax.f32 %v2500_v43, %v12712_v17  ;;  %v3114_v45 = vmax.f32 %v2499_v6, %v12713_v4  ;;  %v12719_v17 = vld [vmem:[#allocation49_spill] sm:$0xff] }
 0x334   :  { %3374 = vmatpush.msra.mxu1 %v3220_v31  ;;  %v10169_v51 = vmax.f32 %v3093_v63, %v3002_v15  ;;  %v12716_v5 = vunpack.i.l.bf16 %v12715_v19  ;;  %v4690_v7 = vunpack.i.l.bf16 %v9793_v24  ;;  %3417 = vmatpush.msra.mxu2 %v3248_v61  ;;  %v3246_v14 = vmax.f32 %v3118_v36, %v2822_v46  ;;  %v12718_v36 = vld [vmem:[#allocation180_spill] sm:$0xff]  ;;  %v12720_v4 = vld [vmem:[#allocation165_spill] sm:$0xff] }
 0x335   :  { %v10175_v57 = vpop.permute.xlu2 %4878  ;;  %v12717_v37 = vunpack.i.h.bf16 %v10130_v62  ;;  %v4821_v31 = vunpack.i.h.bf16 %v9992_v20  ;;  %v10181_v6 = vpop.permute.xlu0 %4823  ;;  %v3244_v43 = vmax.f32 %v3116_v10, %v2821_v21  ;;  %v3091_v19 = vmax.f32 %v12720_v4, %v12719_v17 }
 0x336   :  { %12714 = vst [vmem:[#allocation139_spill] sm:$0xff] %v10169_v51  ;;  %v2519_v35 = vsel %vm2269_vm13, -inf, %v12716_v5  ;;  %v4829_v27 = vpop.permute.xlu1 %4828  ;;  %v11553_v63 = vunpack.i.h.bf16 %v10175_v57  ;;  %v4880_v15 = vunpack.i.l.bf16 %v10175_v57  ;;  %v11558_v61 = vunpack.i.h.bf16 %v10181_v6  ;;  %3418 = vmatpush.msra.mxu2 %v3246_v14 }
 0x337   :  { %v2820_v30 = vsel %vm2782_vm14, %v4865_v22, %v12717_v37  ;;  %v4831_v47 = vunpack.i.h.bf16 %v4829_v27  ;;  %v4830_v24 = vunpack.i.l.bf16 %v4829_v27  ;;  %v4825_v46 = vunpack.i.l.bf16 %v10181_v6 }
 0x338   :  { %v3242_v41 = vmax.f32 %v3114_v45, %v2820_v30  ;;  %v2819_v22 = vsel %vm2782_vm14, %v4880_v15, %v11553_v63  ;;  %v3154_v60 = vmax.f32 %v2519_v35, %v12718_v36  ;;  %3419 = vmatpush.msra.mxu2 %v3244_v43  ;;  %v2792_v21 = vsel %vm2782_vm14, %v4690_v7, %v11558_v61  ;;  %v12723_v15 = vld [vmem:[#allocation189_spill] sm:$0xff] }
 0x339   :  { %v2808_v10 = vsel %vm2782_vm14, %v4830_v24, %v4831_v47  ;;  %v12721_v5 = vmax.f32 %v10083_v34, %v12697_v49  ;;  %v2840_v14 = vsel %vm2782_vm14, %v4821_v31, %v4825_v46  ;;  %v12722_v37 = vmax.f32 %v10023_v1, %v12679_v38  ;;  %v12724_v43 = vld [vmem:[#allocation45_spill] sm:$0xff] }
 0x33a   :  { %v3218_v30 = vmax.f32 %v3090_v12, %v2808_v10  ;;  %v3282_v27 = vmax.f32 %v3154_v60, %v2840_v14  ;;  %v3155_v36 = vmax.f32 %v12724_v43, %v12723_v15  ;;  %v2497_v7 = vsel %vm2269_vm13, -inf, %v11554_v54  ;;  %3420 = vmatpush.msra.mxu2 %v3242_v41  ;;  %v12726_v12 = vld [vmem:[#allocation214_spill] sm:$0xff]  ;;  %v12728_v41 = vld [vmem:[#allocation85_spill] sm:$0xff]  ;;  %v12731_v14 = vld [vmem:[#allocation123_spill] sm:$0xff] }
 0x33b   :  { %v3240_v45 = vmax.f32 %v12721_v5, %v2819_v22  ;;  %v3186_v35 = vmax.f32 %v12722_v37, %v2792_v21  ;;  %v3033_v24 = vsel %vm2975_vm15, %v4825_v46, -inf  ;;  %v3001_v49 = vsel %vm2975_vm15, %v4831_v47, -inf  ;;  %v12729_v47 = vld [vmem:[#allocation192_spill] sm:$0xff]  ;;  %v12730_v5 = vld [vmem:[#allocation9_spill] sm:$0xff]  ;;  %v12732_v15 = vld [vmem:[#allocation142_spill] sm:$0xff] }
 0x33c   :  { %3375 = vmatpush.msra.mxu1 %v3218_v30  ;;  %v10211_v34 = vmax.f32 %v3155_v36, %v3033_v24  ;;  %v10213_v1 = vmax.f32 %v3091_v19, %v3001_v49  ;;  %v4386_v38 = vunpack.i.h.bf16 %v12631_v56  ;;  %v12727_v31 = vunpack.i.l.bf16 %v12726_v12  ;;  %3457 = vmatpush.msra.mxu3 %v3282_v27  ;;  %v12733_v36 = vld [vmem:[#allocation107_spill] sm:$0xff]  ;;  %v12734_v49 = vld [vmem:[#allocation88_spill] sm:$0xff] }
 0x33d   :  { %3334 = vmatpush.msra.mxu0 %v3186_v35  ;;  %3421 = vmatpush.msra.mxu2 %v3240_v45  ;;  %v10219_v60 = vpop.permute.xlu2 %4893  ;;  %v3088_v46 = vmax.f32 %v10078_v33, %v12728_v41  ;;  %v11555_v17 = vunpack.i.l.bf16 %v12729_v47  ;;  %v4839_v21 = vpop.permute.xlu0 %4838  ;;  %v3110_v37 = vmax.f32 %v2497_v7, %v12731_v14  ;;  %v11557_v43 = vunpack.i.l.bf16 %v12732_v15  ;;  %v12735_v12 = vld [vmem:[#allocation203_spill] sm:$0xff] }
 0x33e   :  { %12725 = vst [vmem:[#allocation29_spill] sm:$0xff] %v10213_v1  ;;  %v2518_v22 = vsel %vm2269_vm13, -inf, %v12727_v31  ;;  %v4844_v4 = vpop.permute.xlu1 %4843  ;;  %v11556_v19 = vunpack.i.h.bf16 %v10219_v60  ;;  %v4895_v10 = vunpack.i.l.bf16 %v10219_v60  ;;  %v4841_v30 = vunpack.i.h.bf16 %v4839_v21 }
 0x33f   :  { %3335 = vmatpush.msra.mxu0 %v12730_v5  ;;  %v4846_v35 = vunpack.i.h.bf16 %v4844_v4  ;;  %v4845_v45 = vunpack.i.l.bf16 %v4844_v4  ;;  %v4840_v27 = vunpack.i.l.bf16 %v4839_v21  ;;  %v3152_v24 = vmax.f32 %v2518_v22, %v12733_v36  ;;  %v12736_v5 = vld [vmem:[#allocation134_spill] sm:$0xff]  ;;  %v12738_v22 = vld [vmem:[#allocation209_spill] sm:$0xff] }
 0x340   :  { %v2818_v33 = vsel %vm2782_vm14, %v4895_v10, %v11556_v19  ;;  %v3089_v31 = vmax.f32 %v12735_v12, %v12734_v49  ;;  %v12737_v21 = vld [vmem:[#allocation94_spill] sm:$0xff]  ;;  %v3032_v54 = vsel %vm2975_vm15, %v4841_v30, -inf  ;;  %v12739_v36 = vunpack.i.l.bf16 %v12738_v22  ;;  %v12747_v22 = vld [vmem:[#allocation77_spill] sm:$0xff] }
 0x341   :  { %3336 = vmatpush.msra.mxu0 %v9773_v11  ;;  %v2807_v41 = vsel %vm2782_vm14, %v4845_v45, %v4846_v35  ;;  %v3238_v7 = vmax.f32 %v3110_v37, %v2818_v33  ;;  %v2839_v4 = vsel %vm2782_vm14, %v4840_v27, %v4841_v30  ;;  %v3153_v14 = vmax.f32 %v12737_v21, %v12736_v5  ;;  %v12742_v30 = vld [vmem:[#allocation67_spill] sm:$0xff]  ;;  %v12750_v33 = vld [vmem:[#allocation84_spill] sm:$0xff] }
 0x342   :  { %v3216_v11 = vmax.f32 %v3088_v46, %v2807_v41  ;;  %v3280_v63 = vmax.f32 %v3152_v24, %v2839_v4  ;;  %v3000_v10 = vsel %vm2975_vm15, %v4846_v35, -inf  ;;  %v2485_v49 = vsel %vm2269_vm13, -inf, %v12739_v36  ;;  %v12741_v46 = vld [vmem:[#allocation131_spill] sm:$0xff] }
 0x343   :  { %3337 = vmatpush.msra.mxu0 %v9775_v44  ;;  %v2496_v37 = vsel %vm2269_vm13, -inf, %v11555_v17  ;;  %3422 = vmatpush.msra.mxu2 %v3238_v7  ;;  %v10249_v45 = vmax.f32 %v3153_v14, %v3032_v54  ;;  %v10251_v27 = vmax.f32 %v3089_v31, %v3000_v10  ;;  %v4371_v44 = vunpack.i.h.bf16 %v12650_v40  ;;  %v12744_v31 = vld [vmem:[#allocation6_spill] sm:$0xff] }
 0x344   :  { %3376 = vmatpush.msra.mxu1 %v3216_v11  ;;  %v12743_v35 = vunpack.i.l.bf16 %v12631_v56  ;;  %v4381_v12 = vunpack.i.h.bf16 %v12649_v26  ;;  %v4376_v41 = vunpack.i.h.bf16 %v12654_v16  ;;  %v10266_v54 = vsel %vm2269_vm13, -inf, %v11557_v43  ;;  %3458 = vmatpush.msra.mxu3 %v3280_v63  ;;  %v12746_v11 = vld [vmem:[#allocation87_spill] sm:$0xff]  ;;  %v12754_v63 = vld [vmem:[#allocation213_spill] sm:$0xff] }
 0x345   :  { %12740 = vst [vmem:[#allocation216_spill] sm:$0xff] %v10251_v27  ;;  %3338 = vmatpush.msra.mxu0 %v12742_v30  ;;  %v12745_v7 = vunpack.i.l.bf16 %v12744_v31  ;;  %v10271_v5 = vpop.permute.xlu2 %4908  ;;  %v4854_v21 = vpop.permute.xlu0 %4853  ;;  %v3086_v10 = vmax.f32 %v2485_v49, %v12746_v11  ;;  %v3108_v36 = vmax.f32 %v2496_v37, %v12747_v22  ;;  %v12749_v43 = vld [vmem:[#allocation191_spill] sm:$0xff] }
 0x346   :  { %v10259_v24 = vsel %vm2269_vm13, %v12743_v35, %v4386_v38  ;;  %v4859_v56 = vpop.permute.xlu1 %4858  ;;  %v11573_v38 = vunpack.i.h.bf16 %v10271_v5  ;;  %v4910_v14 = vunpack.i.l.bf16 %v10271_v5  ;;  %v4856_v31 = vunpack.i.h.bf16 %v4854_v21  ;;  %v12752_v11 = vld [vmem:[#allocation187_spill] sm:$0xff] }
 0x347   :  { %v2517_v4 = vsel %vm2269_vm13, -inf, %v12745_v7  ;;  %3339 = vmatpush.msra.mxu0 %v9736_v50  ;;  %v4861_v30 = vunpack.i.h.bf16 %v4859_v56  ;;  %v4860_v35 = vunpack.i.l.bf16 %v4859_v56  ;;  %v4855_v17 = vunpack.i.l.bf16 %v4854_v21  ;;  %v12748_v7 = vld [vmem:[#allocation196_spill] sm:$0xff] }
 0x348   :  { %v2817_v19 = vsel %vm2782_vm14, %v4910_v14, %v11573_v38  ;;  %v3150_v61 = vmax.f32 %v2517_v4, %v12749_v43  ;;  %v12751_v50 = vld [vmem:[#allocation120_spill] sm:$0xff]  ;;  %v3031_v51 = vsel %vm2975_vm15, %v4856_v31, -inf  ;;  %v12755_v43 = vld [vmem:[#allocation141_spill] sm:$0xff] }
 0x349   :  { %3340 = vmatpush.msra.mxu0 %v9738_v2  ;;  %v3087_v27 = vmax.f32 %v12751_v50, %v12750_v33  ;;  %v2806_v49 = vsel %vm2782_vm14, %v4860_v35, %v4861_v30  ;;  %v3236_v37 = vmax.f32 %v3108_v36, %v2817_v19  ;;  %v2838_v56 = vsel %vm2782_vm14, %v4855_v17, %v4856_v31  ;;  %v12753_v21 = vld [vmem:[#allocation72_spill] sm:$0xff] }
 0x34a   :  { %v3151_v22 = vmax.f32 %v12753_v21, %v12752_v11  ;;  %v3214_v2 = vmax.f32 %v3086_v10, %v2806_v49  ;;  %v3278_v1 = vmax.f32 %v3150_v61, %v2838_v56  ;;  %v2999_v14 = vsel %vm2975_vm15, %v4861_v30, -inf  ;;  %v12758_v10 = vld [vmem:[#allocation184_spill] sm:$0xff]  ;;  %v12759_v30 = vld [vmem:[#allocation15_spill] sm:$0xff] }
 0x34b   :  { %3341 = vmatpush.msra.mxu0 %v12754_v63  ;;  %v12756_v4 = vunpack.i.l.bf16 %v12755_v43  ;;  %3423 = vmatpush.msra.mxu2 %v3236_v37  ;;  %v10298_v19 = vmax.f32 %v3087_v27, %v2999_v14  ;;  %v12757_v17 = vunpack.i.l.bf16 %v12741_v46  ;;  %v11571_v61 = vunpack.i.l.bf16 %v12758_v10  ;;  %v12762_v37 = vld [vmem:[#allocation101_spill] sm:$0xff] }
 0x34c   :  { %v10296_v35 = vmax.f32 %v3151_v22, %v3031_v51  ;;  %3377 = vmatpush.msra.mxu1 %v3214_v2  ;;  %v3065_v31 = vmax.f32 %v10259_v24, %v12759_v30  ;;  %v12760_v63 = vunpack.i.l.bf16 %v12650_v40  ;;  %v12761_v27 = vunpack.i.l.bf16 %v12748_v7  ;;  %3459 = vmatpush.msra.mxu3 %v3278_v1  ;;  %v12765_v2 = vld [vmem:[#allocation63_spill] sm:$0xff]  ;;  %v12767_v43 = vld [vmem:[#allocation17_spill] sm:$0xff] }
 0x34d   :  { %v2484_v33 = vsel %vm2269_vm13, -inf, %v12756_v4  ;;  %v10303_v36 = vsel %vm2269_vm13, -inf, %v12757_v17  ;;  %3342 = vmatpush.msra.mxu0 %v9699_v25  ;;  %v10317_v49 = vpop.permute.xlu2 %4923  ;;  %v3106_v56 = vmax.f32 %v10266_v54, %v12762_v37  ;;  %v12763_v25 = vunpack.i.l.bf16 %v12649_v26  ;;  %v10327_v21 = vpop.permute.xlu0 %4868  ;;  %v12766_v54 = vld [vmem:[#allocation89_spill] sm:$0xff]  ;;  %v12770_v37 = vld [vmem:[#allocation124_spill] sm:$0xff] }
 0x34e   :  { %v10312_v51 = vsel %vm2269_vm13, %v12760_v63, %v4371_v44  ;;  %v2516_v50 = vsel %vm2269_vm13, -inf, %v12761_v27  ;;  %v12764_v24 = vunpack.i.l.bf16 %v12654_v16  ;;  %v4874_v44 = vpop.permute.xlu1 %4873  ;;  %v11572_v22 = vunpack.i.h.bf16 %v10317_v49 }
 0x34f   :  { %v2281_v11 = vsel %vm2269_vm13, %v12763_v25, %v4381_v12  ;;  %v4925_v1 = vunpack.i.l.bf16 %v10317_v49  ;;  %3343 = vmatpush.msra.mxu0 %v9701_v32  ;;  %v3084_v14 = vmax.f32 %v2484_v33, %v12765_v2  ;;  %v3085_v26 = vmax.f32 %v12767_v43, %v12766_v54  ;;  %v12768_v33 = vld [vmem:[#allocation117_spill] sm:$0xff] }
 0x350   :  { %v2280_v40 = vsel %vm2269_vm13, %v12764_v24, %v4376_v41  ;;  %v4876_v4 = vunpack.i.h.bf16 %v4874_v44  ;;  %v4875_v12 = vunpack.i.l.bf16 %v4874_v44  ;;  %v11568_v16 = vunpack.i.h.bf16 %v10327_v21 }
 0x351   :  { %v4870_v41 = vunpack.i.l.bf16 %v10327_v21  ;;  %3492 = vmatpush.msrb.mxu0 %v9858_v29  ;;  %v2494_v17 = vsel %vm2269_vm13, -inf, %v11571_v61  ;;  %v2816_v32 = vsel %vm2782_vm14, %v4925_v1, %v11572_v22  ;;  %v3148_v30 = vmax.f32 %v2516_v50, %v12768_v33 }
 0x352   :  { %v12769_v63 = vunpack.i.l.bf16 %v9996_v48  ;;  %v11567_v25 = vunpack.i.l.bf16 %v12770_v37  ;;  %v2805_v29 = vsel %vm2782_vm14, %v4875_v12, %v4876_v4  ;;  %v3234_v24 = vmax.f32 %v3106_v56, %v2816_v32 }
 0x353   :  { %3493 = vmatpush.msrb.mxu0 %v9770_v9  ;;  %v2837_v44 = vsel %vm2782_vm14, %v4870_v41, %v11568_v16  ;;  %v3212_v2 = vmax.f32 %v3084_v14, %v2805_v29  ;;  %v12771_v1 = vunpack.i.l.bf16 %v9921_v0  ;;  %v2998_v48 = vsel %vm2975_vm15, %v4876_v4, -inf  ;;  %v12772_v9 = vld [vmem:[#allocation68_spill] sm:$0xff]  ;;  %v12775_v41 = vld [vmem:[#allocation50_spill] sm:$0xff] }
 0x354   :  { %v2988_v27 = vsel %vm2975_vm15, %v12769_v63, -inf  ;;  %v3276_v54 = vmax.f32 %v3148_v30, %v2837_v44  ;;  %3424 = vmatpush.msra.mxu2 %v3234_v24  ;;  %v3063_v33 = vmax.f32 %v2281_v11, %v12772_v9  ;;  %v12773_v56 = vunpack.i.l.bf16 %v10136_v39  ;;  %v12774_v14 = vld [vmem:[#allocation76_spill] sm:$0xff]  ;;  %v12776_v39 = vld [vmem:[#allocation57_spill] sm:$0xff] }
 0x355   :  { %v2987_v50 = vsel %vm2975_vm15, %v12771_v1, -inf  ;;  %3494 = vmatpush.msrb.mxu0 %v9976_v3  ;;  %v3193_v43 = vmax.f32 %v3065_v31, %v2988_v27  ;;  %v10363_v32 = vmax.f32 %v3085_v26, %v2998_v48  ;;  %3378 = vmatpush.msra.mxu1 %v3212_v2  ;;  %v3061_v0 = vmax.f32 %v2280_v40, %v12774_v14  ;;  %v10371_v31 = vpop.permute.xlu2 %4938  ;;  %v12777_v26 = vld [vmem:[#allocation133_spill] sm:$0xff]  ;;  %v10378_v29 = vpop.permute.xlu0 %4883 }
 0x356   :  { %v2986_v12 = vsel %vm2975_vm15, %v12773_v56, -inf  ;;  %3460 = vmatpush.msra.mxu3 %v3276_v54  ;;  %v3059_v30 = vmax.f32 %v10312_v51, %v12775_v41  ;;  %v2515_v3 = vsel %vm2269_vm13, -inf, %v11567_v25  ;;  %v3191_v11 = vmax.f32 %v3063_v33, %v2987_v50  ;;  %v10376_v27 = vpop.permute.xlu1 %4888  ;;  %v12779_v50 = vld [vmem:[#allocation147_spill] sm:$0xff]  ;;  %v12804_v25 = vld [vmem:[#allocation149_spill] sm:$0xff] }
 0x357   :  { %3495 = vmatpush.msrb.mxu0 %v3193_v43  ;;  %v3082_v4 = vmax.f32 %v10303_v36, %v12776_v39  ;;  %v3104_v63 = vmax.f32 %v2494_v17, %v12777_v26  ;;  %v11570_v40 = vunpack.i.h.bf16 %v10371_v31  ;;  %v4940_v51 = vunpack.i.l.bf16 %v10371_v31  ;;  %v12780_v43 = vld [vmem:[#allocation16_spill] sm:$0xff]  ;;  %v12782_v26 = vld [vmem:[#allocation119_spill] sm:$0xff] }
 0x358   :  { %v3189_v24 = vmax.f32 %v3061_v0, %v2986_v12  ;;  %v12778_v44 = vunpack.i.h.bf16 %v10181_v6  ;;  %v11560_v54 = vunpack.i.h.bf16 %v10376_v27  ;;  %v4890_v1 = vunpack.i.l.bf16 %v10376_v27  ;;  %v12781_v6 = vld [vmem:[#allocation129_spill] sm:$0xff] }
 0x359   :  { %v11566_v36 = vunpack.i.h.bf16 %v10378_v29  ;;  %v4885_v17 = vunpack.i.l.bf16 %v10378_v29  ;;  %3496 = vmatpush.msrb.mxu0 %v3191_v11  ;;  %v11559_v48 = vunpack.i.l.bf16 %v12779_v50  ;;  %v11565_v9 = vunpack.i.l.bf16 %v12780_v43 }
 0x35a   :  { %v2985_v2 = vsel %vm2975_vm15, %v12778_v44, -inf  ;;  %v2815_v33 = vsel %vm2782_vm14, %v4940_v51, %v11570_v40  ;;  %v3146_v56 = vmax.f32 %v2515_v3, %v12781_v6  ;;  %v2804_v14 = vsel %vm2782_vm14, %v4890_v1, %v11560_v54  ;;  %v12783_v51 = vld [vmem:[#allocation26_spill] sm:$0xff]  ;;  %v12806_v40 = vld [vmem:[#allocation137_spill] sm:$0xff] }
 0x35b   :  { %3497 = vmatpush.msrb.mxu0 %v3189_v24  ;;  %v3187_v12 = vmax.f32 %v3059_v30, %v2985_v2  ;;  %v3232_v0 = vmax.f32 %v3104_v63, %v2815_v33  ;;  %v2836_v41 = vsel %vm2782_vm14, %v4885_v17, %v11566_v36  ;;  %v3210_v11 = vmax.f32 %v3082_v4, %v2804_v14  ;;  %v12784_v4 = vld [vmem:[#allocation103_spill] sm:$0xff] }
 0x35c   :  { %v3274_v39 = vmax.f32 %v3146_v56, %v2836_v41  ;;  %v11561_v44 = vunpack.i.l.bf16 %v12782_v26  ;;  %v2482_v30 = vsel %vm2269_vm13, -inf, %v11559_v48  ;;  %v4531_v3 = vunpack.i.h.bf16 %v12664_v53  ;;  %v12785_v41 = vld [vmem:[#allocation42_spill] sm:$0xff]  ;;  %v12787_v48 = vld [vmem:[#allocation81_spill] sm:$0xff] }
 0x35d   :  { %3498 = vmatpush.msrb.mxu0 %v3187_v12  ;;  %3425 = vmatpush.msra.mxu2 %v3232_v0  ;;  %v2514_v63 = vsel %vm2269_vm13, -inf, %v11565_v9  ;;  %v11564_v24 = vunpack.i.l.bf16 %v12784_v4  ;;  %v4521_v2 = vunpack.i.h.bf16 %v12687_v59  ;;  %v4526_v1 = vunpack.i.h.bf16 %v12690_v23  ;;  %v10416_v33 = vpop.permute.xlu0 %4898 }
 0x35e   :  { %3379 = vmatpush.msra.mxu1 %v3210_v11  ;;  %3461 = vmatpush.msra.mxu3 %v3274_v39  ;;  %v10414_v17 = vpop.permute.xlu1 %4903  ;;  %v11563_v12 = vunpack.i.h.bf16 %v10416_v33  ;;  %v4900_v14 = vunpack.i.l.bf16 %v10416_v33  ;;  %v2481_v0 = vsel %vm2269_vm13, -inf, %v11561_v44  ;;  %v3080_v11 = vmax.f32 %v2482_v30, %v12785_v41  ;;  %v12786_v39 = vld [vmem:[#allocation198_spill] sm:$0xff] }
 0x35f   :  { %3499 = vmatpush.msrb.mxu0 %v12783_v51  ;;  %3574 = vmatpush.msrb.mxu2 %v9818_v58  ;;  %v11562_v6 = vunpack.i.h.bf16 %v10414_v17  ;;  %v4905_v56 = vunpack.i.l.bf16 %v10414_v17  ;;  %v10427_v58 = vld [vmem:[%s10985_s1 + $0x10] sm:$0xff]  ;;  %v3144_v51 = vmax.f32 %v2514_v63, %v12786_v39  ;;  %v11569_v54 = vunpack.i.l.bf16 %v12787_v48 }
 0x360   :  { %3426 = vmatmul.f32.vlgmr.msra.gmra.mxu2 %v10427_v58  ;;  %v12788_v30 = vunpack.i.l.bf16 %v12664_v53  ;;  %v12789_v44 = vunpack.i.l.bf16 %v12687_v59  ;;  %v12795_v59 = vld [vmem:[#allocation78_spill] sm:$0xff]  ;;  %v12803_v9 = vunpack.i.l.bf16 %v9992_v20 }
 0x361   :  { %3500 = vmatpush.msrb.mxu0 %v9777_v18  ;;  %3575 = vmatpush.msrb.mxu2 %v9696_v55  ;;  %v2803_v55 = vsel %vm2782_vm14, %v4905_v56, %v11562_v6  ;;  %v2835_v18 = vsel %vm2782_vm14, %v4900_v14, %v11563_v12  ;;  %v12790_v56 = vld [vmem:[#allocation19_spill] sm:$0xff]  ;;  %v12792_v14 = vld [vmem:[#allocation86_spill] sm:$0xff] }
 0x362   :  { %v2311_v63 = vsel %vm2269_vm13, %v12788_v30, %v4531_v3  ;;  %v3208_v41 = vmax.f32 %v3080_v11, %v2803_v55  ;;  %v3272_v39 = vmax.f32 %v3144_v51, %v2835_v18  ;;  %v12791_v6 = vld [vmem:[#allocation3_spill] sm:$0xff]  ;;  %v12793_v12 = vunpack.i.l.bf16 %v12792_v14  ;;  %v12797_v55 = vld [vmem:[#allocation173_spill] sm:$0xff] }
 0x363   :  { %3501 = vmatpush.msrb.mxu0 %v9782_v28  ;;  %3576 = vmatpush.msrb.mxu2 %v9899_v8  ;;  %v2309_v28 = vsel %vm2269_vm13, %v12789_v44, %v4521_v2  ;;  %v10453_v8 = vsel %vm2269_vm13, -inf, %v11564_v24  ;;  %v12794_v3 = vunpack.i.l.bf16 %v12690_v23  ;;  %v4516_v51 = vunpack.i.h.bf16 %v12795_v59  ;;  %v12796_v44 = vld [vmem:[#allocation182_spill] sm:$0xff]  ;;  %v12798_v30 = vld [vmem:[#allocation59_spill] sm:$0xff]  ;;  %v12799_v23 = vld [vmem:[#allocation164_spill] sm:$0xff] }
 0x364   :  { %v3017_v53 = vsel %vm2975_vm15, %v12793_v12, -inf  ;;  %v4511_v2 = vunpack.i.h.bf16 %v12796_v44  ;;  %3380 = vmatpush.msra.mxu1 %v3208_v41  ;;  %3462 = vmatpush.msra.mxu3 %v3272_v39  ;;  %v3123_v18 = vmax.f32 %v2311_v63, %v12797_v55  ;;  %v4491_v12 = vunpack.i.h.bf16 %v12732_v15  ;;  %v12801_v41 = vld [vmem:[#allocation11_spill] sm:$0xff]  ;;  %v12802_v63 = vld [vmem:[#allocation40_spill] sm:$0xff] }
 0x365   :  { %3502 = vmatpush.msrb.mxu0 %v12790_v56  ;;  %3577 = vmatpush.msrb.mxu2 %v12791_v6  ;;  %v2310_v11 = vsel %vm2269_vm13, %v12794_v3, %v4526_v1  ;;  %v3078_v56 = vmax.f32 %v2481_v0, %v12798_v30  ;;  %v10470_v6 = vld [vmem:[%s10985_s1] sm:$0xff]  ;;  %v4506_v14 = vunpack.i.h.bf16 %v12799_v23  ;;  %v2513_v1 = vsel %vm2269_vm13, -inf, %v11569_v54  ;;  %v12800_v3 = vld [vmem:[#allocation53_spill] sm:$0xff]  ;;  %v10483_v30 = vpop.permute.xlu0 %4913  ;;  %v12805_v54 = vld [vmem:[#allocation56_spill] sm:$0xff] }
 0x366   :  { %v3119_v39 = vmax.f32 %v2309_v28, %v12802_v63  ;;  %v4501_v0 = vunpack.i.h.bf16 %v12711_v52  ;;  %v10481_v55 = vpop.permute.xlu1 %4918  ;;  %v3251_v24 = vmax.f32 %v3123_v18, %v3017_v53  ;;  %v3016_v36 = vsel %vm2975_vm15, %v12803_v9, -inf  ;;  %3344 = vmatmul.f32.vlgmr.msra.gmra.mxu0 %v10470_v6  ;;  %v12807_v53 = vld [vmem:[#allocation102_spill] sm:$0xff] }
 0x367   :  { %3503 = vmatpush.msrb.mxu0 %v12800_v3  ;;  %3578 = vmatpush.msrb.mxu2 %v12801_v41  ;;  %v3121_v16 = vmax.f32 %v2310_v11, %v12804_v25  ;;  %v11579_v3 = vunpack.i.h.bf16 %v10481_v55  ;;  %v4920_v41 = vunpack.i.l.bf16 %v10481_v55  ;;  %v4916_v28 = vunpack.i.h.bf16 %v10483_v30 }
 0x368   :  { %v4915_v63 = vunpack.i.l.bf16 %v10483_v30  ;;  %v3142_v20 = vmax.f32 %v2513_v1, %v12807_v53  ;;  %v12808_v9 = vunpack.i.h.bf16 %v10036_v13  ;;  %v12809_v11 = vunpack.i.l.bf16 %v12795_v59  ;;  %v12812_v1 = vld [vmem:[#allocation60_spill] sm:$0xff]  ;;  %v10793_v30 = vld [vmem:[%s10985_s1 + $0xc0] sm:$0xff] }
 0x369   :  { %3504 = vmatpush.msrb.mxu0 %v12805_v54  ;;  %3579 = vmatpush.msrb.mxu2 %v12806_v40  ;;  %v12810_v61 = vunpack.i.l.bf16 %v12796_v44  ;;  %v10509_v54 = vld [vmem:[%s10985_s1 + $0x30] sm:$0xff]  ;;  %v12811_v40 = vld [vmem:[#allocation205_spill] sm:$0xff]  ;;  %v3249_v13 = vmax.f32 %v3121_v16, %v3016_v36  ;;  %v2802_v59 = vsel %vm2782_vm14, %v4920_v41, %v11579_v3  ;;  %v12815_v36 = vld [vmem:[#allocation95_spill] sm:$0xff]  ;;  %v12816_v41 = vunpack.i.h.bf16 %v10130_v62 }
 0x36a   :  { %v3015_v25 = vsel %vm2975_vm15, %v12808_v9, -inf  ;;  %v2308_v18 = vsel %vm2269_vm13, %v12809_v11, %v4516_v51  ;;  %v4575_v38 = vunpack.i.l.bf16 %v12811_v40  ;;  %v2834_v51 = vsel %vm2782_vm14, %v4915_v63, %v4916_v28  ;;  %3429 = vmatmul.f32.gmra.mxu2 %v10509_v54  ;;  %v12814_v9 = vld [vmem:[#allocation104_spill] sm:$0xff]  ;;  %v10539_v62 = vld [vmem:[%s10985_s1 + $0x20] sm:$0xff]  ;;  %v10741_v3 = vld [vmem:[%s10985_s1 + $0x58] sm:$0xff] }
 0x36b   :  { %v2307_v22 = vsel %vm2269_vm13, %v12810_v61, %v4511_v2  ;;  %3505 = vmatpush.msrb.mxu0 %v12812_v1  ;;  %3580 = vmatpush.msrb.mxu2 %v3251_v24  ;;  %v3206_v61 = vmax.f32 %v3078_v56, %v2802_v59  ;;  %v3270_v44 = vmax.f32 %v3142_v20, %v2834_v51  ;;  %v12813_v2 = vunpack.i.h.bf16 %v10069_v42  ;;  %v12818_v20 = vld [vmem:[#allocation146_spill] sm:$0xff]  ;;  %v12819_v59 = vld [vmem:[#allocation153_spill] sm:$0xff] }
 0x36c   :  { %v3247_v16 = vmax.f32 %v3119_v39, %v3015_v25  ;;  %v3117_v24 = vmax.f32 %v2308_v18, %v12815_v36  ;;  %v3013_v11 = vsel %vm2975_vm15, %v12816_v41, -inf  ;;  %v12817_v63 = vunpack.i.l.bf16 %v12799_v23 }
 0x36d   :  { %v3014_v53 = vsel %vm2975_vm15, %v12813_v2, -inf  ;;  %3506 = vmatpush.msrb.mxu0 %v12814_v9  ;;  %3581 = vmatpush.msrb.mxu2 %v3249_v13  ;;  %v11575_v42 = vunpack.i.l.bf16 %v12818_v20  ;;  %v4496_v1 = vunpack.i.h.bf16 %v12729_v47  ;;  %v3115_v51 = vmax.f32 %v2307_v22, %v12819_v59  ;;  %v12820_v13 = vld [vmem:[#allocation20_spill] sm:$0xff]  ;;  %v10554_v9 = vpop.permute.xlu0 %4928 }
 0x36e   :  { %v2306_v56 = vsel %vm2269_vm13, %v12817_v63, %v4506_v14  ;;  %3381 = vmatpush.msra.mxu1 %v3206_v61  ;;  %3463 = vmatpush.msra.mxu3 %v3270_v44  ;;  %v3076_v39 = vmax.f32 %v10453_v8, %v12820_v13  ;;  %v2512_v23 = vsel %vm2269_vm13, -inf, %v4575_v38  ;;  %v12821_v14 = vld [vmem:[#allocation52_spill] sm:$0xff]  ;;  %v3245_v25 = vmax.f32 %v3117_v24, %v3014_v53  ;;  %v10552_v2 = vpop.permute.xlu1 %4933  ;;  %v12825_v53 = vld [vmem:[#allocation90_spill] sm:$0xff] }
 0x36f   :  { %3507 = vmatpush.msrb.mxu0 %v12821_v14  ;;  %3582 = vmatpush.msrb.mxu2 %v3247_v16  ;;  %v12822_v18 = vunpack.i.l.bf16 %v12711_v52  ;;  %v12823_v61 = vunpack.i.l.bf16 %v12732_v15  ;;  %v4486_v44 = vunpack.i.h.bf16 %v12758_v10  ;;  %v3243_v36 = vmax.f32 %v3115_v51, %v3013_v11  ;;  %v12826_v63 = vld [vmem:[#allocation168_spill] sm:$0xff]  ;;  %v12828_v51 = vld [vmem:[#allocation91_spill] sm:$0xff] }
 0x370   :  { %v12824_v41 = vunpack.i.h.bf16 %v10175_v57  ;;  %v3113_v24 = vmax.f32 %v2306_v56, %v12825_v53  ;;  %3347 = vmatmul.f32.gmra.mxu0 %v10539_v62  ;;  %v11574_v52 = vunpack.i.h.bf16 %v10552_v2  ;;  %v4935_v15 = vunpack.i.l.bf16 %v10552_v2 }
 0x371   :  { %v2305_v22 = vsel %vm2269_vm13, %v12822_v18, %v4501_v0  ;;  %v2303_v8 = vsel %vm2269_vm13, %v12823_v61, %v4491_v12  ;;  %v4931_v12 = vunpack.i.h.bf16 %v10554_v9  ;;  %v4930_v0 = vunpack.i.l.bf16 %v10554_v9  ;;  %3583 = vmatpush.msrb.mxu2 %v3245_v25  ;;  %v10576_v18 = vld [vmem:[%s10985_s1 + $0x50] sm:$0xff]  ;;  %v10811_v9 = vld [vmem:[%s10985_s1 + $0x78] sm:$0xff] }
 0x372   :  { %v3012_v16 = vsel %vm2975_vm15, %v12824_v41, -inf  ;;  %v3140_v59 = vmax.f32 %v2512_v23, %v12826_v63  ;;  %v12827_v11 = vunpack.i.h.bf16 %v10219_v60  ;;  %v3111_v13 = vmax.f32 %v2305_v22, %v12828_v51  ;;  %v12830_v61 = vld [vmem:[#allocation208_spill] sm:$0xff]  ;;  %3432 = vmatmul.f32.gmra.mxu2 %v10576_v18 }
 0x373   :  { %v12829_v56 = vunpack.i.l.bf16 %v12729_v47  ;;  %v4570_v41 = vunpack.i.l.bf16 %v12830_v61  ;;  %3584 = vmatpush.msrb.mxu2 %v3243_v36  ;;  %v3241_v25 = vmax.f32 %v3113_v24, %v3012_v16  ;;  %v2801_v60 = vsel %vm2782_vm14, %v4935_v15, %v11574_v52  ;;  %v12831_v47 = vld [vmem:[#allocation62_spill] sm:$0xff]  ;;  %v12833_v16 = vld [vmem:[#allocation41_spill] sm:$0xff] }
 0x374   :  { %v3011_v57 = vsel %vm2975_vm15, %v12827_v11, -inf  ;;  %v2833_v23 = vsel %vm2782_vm14, %v4930_v0, %v4931_v12  ;;  %v11581_v22 = vunpack.i.l.bf16 %v12831_v47  ;;  %v3204_v53 = vmax.f32 %v3076_v39, %v2801_v60  ;;  %v12836_v39 = vld [vmem:[#allocation111_spill] sm:$0xff] }
 0x375   :  { %v2304_v14 = vsel %vm2269_vm13, %v12829_v56, %v4496_v1  ;;  %v10586_v1 = vpop.permute.xlu2 %4953  ;;  %v3268_v63 = vmax.f32 %v3140_v59, %v2833_v23  ;;  %v12832_v11 = vunpack.i.h.bf16 %v10271_v5  ;;  %3585 = vmatpush.msrb.mxu2 %v3241_v25  ;;  %v3239_v36 = vmax.f32 %v3111_v13, %v3011_v57  ;;  %v10606_v57 = vld [vmem:[%s10985_s1 + $0x40] sm:$0xff]  ;;  %v10618_v25 = vpop.permute.xlu0 %4943 }
 0x376   :  { %v3109_v24 = vmax.f32 %v2304_v14, %v12833_v16  ;;  %v12834_v15 = vunpack.i.h.bf16 %v10317_v49  ;;  %v12835_v56 = vunpack.i.l.bf16 %v12758_v10  ;;  %v2479_v5 = vsel %vm2269_vm13, -inf, %v11575_v42  ;;  %3382 = vmatpush.msra.mxu1 %v3204_v53 }
 0x377   :  { %v3010_v51 = vsel %vm2975_vm15, %v12832_v11, -inf  ;;  %3464 = vmatpush.msra.mxu3 %v3268_v63  ;;  %v3107_v59 = vmax.f32 %v2303_v8, %v12836_v39  ;;  %v2511_v49 = vsel %vm2269_vm13, -inf, %v4570_v41  ;;  %v11580_v10 = vunpack.i.h.bf16 %v10586_v1  ;;  %3586 = vmatpush.msrb.mxu2 %v3239_v36  ;;  %v10616_v8 = vpop.permute.xlu1 %4948  ;;  %v12838_v63 = vld [vmem:[#allocation128_spill] sm:$0xff] }
 0x378   :  { %v3009_v0 = vsel %vm2975_vm15, %v12834_v15, -inf  ;;  %v2302_v52 = vsel %vm2269_vm13, %v12835_v56, %v4486_v44  ;;  %v4955_v44 = vunpack.i.l.bf16 %v10586_v1  ;;  %v3237_v13 = vmax.f32 %v3109_v24, %v3010_v51  ;;  %3350 = vmatmul.f32.gmra.mxu0 %v10606_v57  ;;  %v12839_v15 = vld [vmem:[#allocation174_spill] sm:$0xff] }
 0x379   :  { %v2510_v14 = vsel %vm2269_vm13, -inf, %v11581_v22  ;;  %v3235_v60 = vmax.f32 %v3107_v59, %v3009_v0  ;;  %v12837_v23 = vunpack.i.h.bf16 %v10371_v31  ;;  %v3105_v11 = vmax.f32 %v2302_v52, %v12838_v63  ;;  %v12840_v0 = vld [vmem:[#allocation70_spill] sm:$0xff]  ;;  %v12841_v31 = vld [vmem:[#allocation115_spill] sm:$0xff]  ;;  %v10635_v52 = vld [vmem:[%s10985_s1 + $0x70] sm:$0xff] }
 0x37a   :  { %v11578_v36 = vunpack.i.h.bf16 %v10616_v8  ;;  %v4950_v51 = vunpack.i.l.bf16 %v10616_v8  ;;  %v11582_v16 = vunpack.i.h.bf16 %v10618_v25  ;;  %v4945_v24 = vunpack.i.l.bf16 %v10618_v25  ;;  %3587 = vmatpush.msrb.mxu2 %v3237_v13 }
 0x37b   :  { %v3008_v53 = vsel %vm2975_vm15, %v12837_v23, -inf  ;;  %v11577_v56 = vunpack.i.l.bf16 %v12839_v15  ;;  %v3074_v39 = vmax.f32 %v2479_v5, %v12840_v0  ;;  %v3138_v59 = vmax.f32 %v2511_v49, %v12841_v31  ;;  %v12842_v31 = vld [vmem:[#allocation172_spill] sm:$0xff]  ;;  %3435 = vmatmul.f32.gmra.mxu2 %v10635_v52 }
 0x37c   :  { %3588 = vmatpush.msrb.mxu2 %v3235_v60  ;;  %v3233_v23 = vmax.f32 %v3105_v11, %v3008_v53  ;;  %v2800_v63 = vsel %vm2782_vm14, %v4950_v51, %v11578_v36  ;;  %v2832_v13 = vsel %vm2782_vm14, %v4945_v24, %v11582_v16  ;;  %v2831_v5 = vsel %vm2782_vm14, %v4955_v44, %v11580_v10  ;;  %v10651_v53 = vld [vmem:[%s10985_s1 + $0x60] sm:$0xff]  ;;  %v10659_v44 = vld [vmem:[%s10985_s1 + $0x18] sm:$0xff]  ;;  %v12843_v24 = vld [vmem:[#allocation47_spill] sm:$0xff] }
 0x37d   :  { %v3202_v49 = vmax.f32 %v3074_v39, %v2800_v63  ;;  %v3266_v0 = vmax.f32 %v3138_v59, %v2832_v13  ;;  %v3136_v42 = vmax.f32 %v2510_v14, %v12842_v31  ;;  %v2478_v11 = vsel %vm2269_vm13, -inf, %v11577_v56  ;;  %v10661_v14 = vpop.permute.xlu0 %4958  ;;  %v12844_v39 = vld [vmem:[#allocation82_spill] sm:$0xff]  ;;  %v12866_v16 = vld [vmem:[#allocation29_spill] sm:$0xff] }
 0x37e   :  { %3589 = vmatpush.msrb.mxu2 %v3233_v23  ;;  %v4960_v51 = vunpack.i.l.bf16 %v10661_v14  ;;  %v3072_v59 = vmax.f32 %v2478_v11, %v12844_v39  ;;  %v10672_v23 = vld [vmem:[%s10985_s1 + $0x90] sm:$0xff]  ;;  %v12845_v63 = vld [vmem:[#allocation98_spill] sm:$0xff]  ;;  %v10695_v11 = vld [vmem:[%s10985_s1 + $0x38] sm:$0xff]  ;;  %v12855_v56 = vunpack.i.h.bf16 %v10327_v21  ;;  %v4566_v22 = vunpack.i.h.bf16 %v12831_v47 }
 0x37f   :  { %3383 = vmatpush.msra.mxu1 %v3202_v49  ;;  %3465 = vmatpush.msra.mxu3 %v3266_v0  ;;  %v3264_v60 = vmax.f32 %v3136_v42, %v2831_v5  ;;  %v11576_v42 = vunpack.i.h.bf16 %v10661_v14  ;;  %v10681_v49 = vld [vmem:[%s10985_s1 + $0x8] sm:$0xff]  ;;  %v12846_v0 = vld [vmem:[#allocation108_spill] sm:$0xff]  ;;  %v10688_v31 = vld [vmem:[%s10985_s1 + $0x80] sm:$0xff] }
 0x380   :  { %3353 = vmatmul.f32.gmra.mxu0 %v10651_v53  ;;  %v12849_v39 = vld [vmem:[#allocation18_spill] sm:$0xff]  ;;  %v3030_v36 = vsel %vm2975_vm15, %v12855_v56, -inf  ;;  %v12858_v21 = vld [vmem:[#allocation188_spill] sm:$0xff]  ;;  %v12859_v56 = vunpack.i.h.bf16 %v10378_v29  ;;  %v4571_v29 = vunpack.i.h.bf16 %v12830_v61 }
 0x381   :  { %3466 = vmatpush.msra.mxu3 %v3264_v60  ;;  %v2799_v13 = vsel %vm2782_vm14, %v4960_v51, %v11576_v42  ;;  %v12847_v60 = vld [vmem:[#allocation25_spill] sm:$0xff]  ;;  %v4596_v51 = vunpack.i.h.bf16 %v12748_v7 }
 0x382   :  { %3467 = vmatmul.f32.vlgmr.msra.gmra.mxu3 %v10659_v44  ;;  %v3200_v5 = vmax.f32 %v3072_v59, %v2799_v13  ;;  %v10704_v59 = vld [vmem:[%s10985_s1 + $0xb0] sm:$0xff]  ;;  %v12850_v13 = vld [vmem:[#allocation65_spill] sm:$0xff] }
 0x383   :  { %3615 = vmatpush.msrb.mxu3 %v12843_v24  ;;  %3438 = vmatmul.f32.gmra.mxu2 %v10672_v23  ;;  %v12848_v24 = vld [vmem:[#allocation61_spill] sm:$0xff] }
 0x384   :  { %3384 = vmatpush.msra.mxu1 %v3200_v5  ;;  %v12851_v5 = vld [vmem:[#allocation132_spill] sm:$0xff] }
 0x385   :  { %3616 = vmatpush.msrb.mxu3 %v12845_v63  ;;  %3385 = vmatmul.f32.vlgmr.msra.gmra.mxu1 %v10681_v49  ;;  %v4591_v63 = vunpack.i.h.bf16 %v12770_v37 }
 0x386   :  { %3533 = vmatpush.msrb.mxu1 %v12848_v24  ;;  %v10715_v24 = vld [vmem:[%s10985_s1 + $0x28] sm:$0xff] }
 0x387   :  { %3617 = vmatpush.msrb.mxu3 %v12846_v0  ;;  %v4586_v0 = vunpack.i.h.bf16 %v12780_v43 }
 0x388   :  { %3356 = vmatmul.f32.gmra.mxu0 %v10688_v31  ;;  %3534 = vmatpush.msrb.mxu1 %v12850_v13  ;;  %v10725_v13 = vld [vmem:[%s10985_s1 + $0xa0] sm:$0xff] }
 0x389   :  { %3618 = vmatpush.msrb.mxu3 %v12847_v60  ;;  %v12852_v60 = vld [vmem:[#allocation151_spill] sm:$0xff] }
 0x38a   :  { %3470 = vmatmul.f32.gmra.mxu3 %v10695_v11  ;;  %3535 = vmatpush.msrb.mxu1 %v12852_v60  ;;  %v12854_v60 = vld [vmem:[#allocation138_spill] sm:$0xff] }
 0x38b   :  { %3619 = vmatpush.msrb.mxu3 %v12849_v39  ;;  %v12853_v39 = vunpack.i.l.bf16 %v12748_v7  ;;  %3441 = vmatmul.f32.gmra.mxu2 %v10704_v59  ;;  %v12856_v7 = vunpack.i.l.bf16 %v12770_v37  ;;  %v3029_v37 = vsel %vm2975_vm15, %v12859_v56, -inf  ;;  %v12862_v56 = vld [vmem:[#allocation139_spill] sm:$0xff] }
 0x38c   :  { %3536 = vmatpush.msrb.mxu1 %v12854_v60  ;;  %v4576_v60 = vunpack.i.h.bf16 %v12811_v40  ;;  %v3026_v40 = vsel %vm2975_vm15, %v4931_v12, -inf  ;;  %v12872_v12 = vunpack.i.l.bf16 %v12779_v50 }
 0x38d   :  { %3620 = vmatpush.msrb.mxu3 %v12851_v5  ;;  %v2324_v42 = vsel %vm2269_vm13, %v12853_v39, %v4596_v51  ;;  %v4581_v5 = vunpack.i.h.bf16 %v12787_v48  ;;  %v2323_v51 = vsel %vm2269_vm13, %v12856_v7, %v4591_v63  ;;  %3388 = vmatmul.f32.gmra.mxu1 %v10715_v24  ;;  %v12860_v63 = vunpack.i.l.bf16 %v12780_v43 }
 0x38e   :  { %3537 = vmatpush.msrb.mxu1 %v12858_v21  ;;  %v10758_v21 = vld [vmem:[%s10985_s1 + $0xd0] sm:$0xff]  ;;  %v12863_v43 = vunpack.i.h.bf16 %v10416_v33  ;;  %v10776_v33 = vld [vmem:[%s10985_s1 + $0x48] sm:$0xff] }
 0x38f   :  { %3621 = vmatpush.msrb.mxu3 %v10211_v34  ;;  %v12857_v34 = vld [vmem:[#allocation136_spill] sm:$0xff]  ;;  %v2322_v7 = vsel %vm2269_vm13, %v12860_v63, %v4586_v0  ;;  %v12865_v63 = vld [vmem:[#allocation190_spill] sm:$0xff] }
 0x390   :  { %v3149_v39 = vmax.f32 %v2324_v42, %v12857_v34  ;;  %3359 = vmatmul.f32.gmra.mxu0 %v10725_v13  ;;  %v12861_v34 = vld [vmem:[#allocation116_spill] sm:$0xff]  ;;  %3538 = vmatpush.msrb.mxu1 %v12862_v56  ;;  %v3028_v0 = vsel %vm2975_vm15, %v12863_v43, -inf }
 0x391   :  { %3622 = vmatpush.msrb.mxu3 %v10249_v45  ;;  %v4431_v45 = vunpack.i.h.bf16 %v12741_v46  ;;  %v3147_v10 = vmax.f32 %v2323_v51, %v12861_v34  ;;  %v4426_v51 = vunpack.i.h.bf16 %v12779_v50  ;;  %v3145_v34 = vmax.f32 %v2322_v7, %v12865_v63 }
 0x392   :  { %v3277_v42 = vmax.f32 %v3149_v39, %v3030_v36  ;;  %3473 = vmatmul.f32.gmra.mxu3 %v10741_v3  ;;  %3539 = vmatpush.msrb.mxu1 %v12866_v16  ;;  %v12867_v16 = vld [vmem:[#allocation171_spill] sm:$0xff]  ;;  %v12875_v63 = vunpack.i.l.bf16 %v12831_v47  ;;  %v10836_v47 = vld [vmem:[%s10985_s1 + $0xf0] sm:$0xff] }
 0x393   :  { %3623 = vmatpush.msrb.mxu3 %v10296_v35  ;;  %v12864_v35 = vunpack.i.l.bf16 %v12787_v48  ;;  %v3275_v39 = vmax.f32 %v3147_v10, %v3029_v37  ;;  %v3027_v48 = vsel %vm2975_vm15, %v4916_v28, -inf  ;;  %3444 = vmatmul.f32.gmra.mxu2 %v10758_v21  ;;  %v4421_v10 = vunpack.i.h.bf16 %v12782_v26 }
 0x394   :  { %v3273_v37 = vmax.f32 %v3145_v34, %v3028_v0  ;;  %v4416_v28 = vunpack.i.h.bf16 %v12784_v4  ;;  %v12871_v0 = vld [vmem:[#allocation177_spill] sm:$0xff]  ;;  %v2290_v61 = vsel %vm2269_vm13, %v12872_v12, %v4426_v51  ;;  %v2318_v34 = vsel %vm2269_vm13, %v12875_v63, %v4566_v22 }
 0x395   :  { %v2321_v36 = vsel %vm2269_vm13, %v12864_v35, %v4581_v5  ;;  %3624 = vmatpush.msrb.mxu3 %v3277_v42  ;;  %v2320_v5 = vsel %vm2269_vm13, %v4575_v38, %v4576_v60  ;;  %v12868_v42 = vunpack.i.l.bf16 %v12741_v46  ;;  %v12869_v38 = vld [vmem:[#allocation216_spill] sm:$0xff]  ;;  %v2319_v60 = vsel %vm2269_vm13, %v4570_v41, %v4571_v29  ;;  %3391 = vmatmul.f32.gmra.mxu1 %v10776_v33 }
 0x396   :  { %v3143_v7 = vmax.f32 %v2321_v36, %v12867_v16  ;;  %3540 = vmatpush.msrb.mxu1 %v12869_v38  ;;  %v3141_v35 = vmax.f32 %v2320_v5, %v12871_v0  ;;  %v4411_v41 = vunpack.i.h.bf16 %v12818_v20  ;;  %v12873_v29 = vld [vmem:[#allocation80_spill] sm:$0xff]  ;;  %v12876_v51 = vunpack.i.h.bf16 %v10414_v17  ;;  %v12877_v5 = vld [vmem:[#allocation109_spill] sm:$0xff] }
 0x397   :  { %3625 = vmatpush.msrb.mxu3 %v3275_v39  ;;  %v2291_v56 = vsel %vm2269_vm13, %v12868_v42, %v4431_v45  ;;  %v12870_v45 = vunpack.i.h.bf16 %v10376_v27  ;;  %v12874_v27 = vunpack.i.h.bf16 %v10618_v25  ;;  %v12879_v16 = vld [vmem:[#allocation36_spill] sm:$0xff]  ;;  %v12885_v0 = vunpack.i.h.bf16 %v10552_v2 }
 0x398   :  { %v3271_v46 = vmax.f32 %v3143_v7, %v3027_v48  ;;  %3541 = vmatpush.msrb.mxu1 %v10298_v19  ;;  %v3083_v36 = vmax.f32 %v2291_v56, %v12873_v29  ;;  %3362 = vmatmul.f32.gmra.mxu0 %v10793_v30  ;;  %v3269_v50 = vmax.f32 %v3141_v35, %v3026_v40  ;;  %v2996_v48 = vsel %vm2975_vm15, %v12876_v51, -inf }
 0x399   :  { %3626 = vmatpush.msrb.mxu3 %v3273_v37  ;;  %v2997_v43 = vsel %vm2975_vm15, %v12870_v45, -inf  ;;  %v3025_v39 = vsel %vm2975_vm15, %v12874_v27, -inf  ;;  %v3139_v19 = vmax.f32 %v2319_v60, %v12877_v5  ;;  %v12878_v37 = vunpack.i.l.bf16 %v12782_v26  ;;  %v12883_v60 = vld [vmem:[#allocation178_spill] sm:$0xff] }
 0x39a   :  { %3542 = vmatpush.msrb.mxu1 %v10363_v32  ;;  %v3211_v22 = vmax.f32 %v3083_v36, %v2997_v43  ;;  %3476 = vmatmul.f32.gmra.mxu3 %v10811_v9  ;;  %v3081_v17 = vmax.f32 %v2290_v61, %v12879_v16  ;;  %v12880_v7 = vunpack.i.h.bf16 %v10586_v1  ;;  %v12881_v26 = vunpack.i.l.bf16 %v12784_v4  ;;  %v10855_v1 = vld [vmem:[%s10985_s1 + $0x68] sm:$0xff]  ;;  %v12884_v4 = vld [vmem:[#allocation33_spill] sm:$0xff]  ;;  %v3324_v61 = vld [vmem:[%s10985_s1 + $0xe0] sm:$0xff] }
 0x39b   :  { %3627 = vmatpush.msrb.mxu3 %v3271_v46  ;;  %v2289_v25 = vsel %vm2269_vm13, %v12878_v37, %v4421_v10  ;;  %v4406_v56 = vunpack.i.h.bf16 %v12839_v15  ;;  %v3267_v38 = vmax.f32 %v3139_v19, %v3025_v39  ;;  %v12882_v40 = vunpack.i.h.bf16 %v10481_v55  ;;  %3447 = vmatmul.f32.gmra.mxu2 %v10836_v47  ;;  %v12887_v36 = vld [vmem:[#allocation71_spill] sm:$0xff]  ;;  %v12892_v19 = vld [vmem:[#allocation54_spill] sm:$0xff] }
 0x39c   :  { %v3024_v42 = vsel %vm2975_vm15, %v12880_v7, -inf  ;;  %v2288_v10 = vsel %vm2269_vm13, %v12881_v26, %v4416_v28  ;;  %v3137_v46 = vmax.f32 %v2318_v34, %v12883_v60  ;;  %3543 = vmatpush.msrb.mxu1 %v3211_v22  ;;  %v3209_v45 = vmax.f32 %v3081_v17, %v2996_v48  ;;  %v3317_v22 = vld [vmem:[%s10985_s1 + $0xa8] sm:$0xff] }
 0x39d   :  { %3628 = vmatpush.msrb.mxu3 %v3269_v50  ;;  %v2995_v32 = vsel %vm2975_vm15, %v12882_v40, -inf  ;;  %v3079_v43 = vmax.f32 %v2289_v25, %v12884_v4  ;;  %v2994_v55 = vsel %vm2975_vm15, %v12885_v0, -inf  ;;  %v12886_v35 = vunpack.i.l.bf16 %v12818_v20  ;;  %3394 = vmatmul.f32.gmra.mxu1 %v10855_v1  ;;  %v3315_v20 = vld [vmem:[%s10985_s1 + $0x98] sm:$0xff]  ;;  %v3321_v16 = vld [vmem:[%s10985_s1 + $0xc8] sm:$0xff] }
 0x39e   :  { %v3265_v28 = vmax.f32 %v3137_v46, %v3024_v42  ;;  %3544 = vmatpush.msrb.mxu1 %v3209_v45  ;;  %v3077_v27 = vmax.f32 %v2288_v10, %v12887_v36  ;;  %v12888_v39 = vunpack.i.h.bf16 %v10616_v8  ;;  %v12890_v50 = vld [vmem:[#allocation21_spill] sm:$0xff]  ;;  %v12891_v48 = vunpack.i.h.bf16 %v10661_v14 }
 0x39f   :  { %3629 = vmatpush.msrb.mxu3 %v3267_v38  ;;  %v2287_v12 = vsel %vm2269_vm13, %v12886_v35, %v4411_v41  ;;  %v3207_v29 = vmax.f32 %v3079_v43, %v2995_v32  ;;  %v12889_v41 = vunpack.i.l.bf16 %v12839_v15  ;;  %v3313_v15 = vld [vmem:[%s10985_s1 + $0x88] sm:$0xff]  ;;  %v3319_v14 = vld [vmem:[%s10985_s1 + $0xb8] sm:$0xff] }
 0x3a0   :  { %v2993_v2 = vsel %vm2975_vm15, %v12888_v39, -inf  ;;  %v3205_v34 = vmax.f32 %v3077_v27, %v2994_v55  ;;  %v3075_v51 = vmax.f32 %v2287_v12, %v12890_v50  ;;  %3365 = vmatmul.f32.gmra.mxu0 %v3324_v61  ;;  %v2992_v5 = vsel %vm2975_vm15, %v12891_v48, -inf }
 0x3a1   :  { %3630 = vmatpush.msrb.mxu3 %v3265_v28  ;;  %v2286_v63 = vsel %vm2269_vm13, %v12889_v41, %v4406_v56  ;;  %3545 = vmatpush.msrb.mxu1 %v3207_v29 }
 0x3a2   :  { %v3203_v8 = vmax.f32 %v3075_v51, %v2993_v2  ;;  %3479 = vmatmul.f32.gmra.mxu3 %v3315_v20  ;;  %v3073_v37 = vmax.f32 %v2286_v63, %v12892_v19 }
 0x3a3   :  { %3546 = vmatpush.msrb.mxu1 %v3205_v34  ;;  %3590 = vmatmul.f32.vlgmr.msrb.gmra.mxu2 %v10427_v58  ;;  %v3323_v58 = vld [vmem:[%s10985_s1 + $0xd8] sm:$0xff] }
 0x3a4   :  { %v3201_v25 = vmax.f32 %v3073_v37, %v2992_v5 }
 0x3a5   :  { %3547 = vmatpush.msrb.mxu1 %v3203_v8 }
 0x3a6   :  { %3397 = vmatmul.f32.gmra.mxu1 %v3313_v15 }
 0x3a7   :  { %3548 = vmatpush.msrb.mxu1 %v3201_v25 }
 0x3a8   :  { %3508 = vmatmul.f32.vlgmr.msrb.gmra.mxu0 %v10470_v6  ;;  %v3327_v6 = vld [vmem:[%s10985_s1 + $0xf8] sm:$0xff] }
 0x3aa   :  { %3482 = vmatmul.f32.gmra.mxu3 %v3319_v14 }
 0x3ab   :  { %3593 = vmatmul.f32.gmra.mxu2 %v10509_v54  ;;  %v3325_v54 = vld [vmem:[%s10985_s1 + $0xe8] sm:$0xff] }
 0x3ae   :  { %3400 = vmatmul.f32.gmra.mxu1 %v3317_v22 }
 0x3b0   :  { %3511 = vmatmul.f32.gmra.mxu0 %v10539_v62 }
 0x3b2   :  { %3485 = vmatmul.f32.gmra.mxu3 %v3323_v58 }
 0x3b3   :  { %3596 = vmatmul.f32.gmra.mxu2 %v10576_v18 }
 0x3b6   :  { %3403 = vmatmul.f32.gmra.mxu1 %v3321_v16 }
 0x3b8   :  { %3514 = vmatmul.f32.gmra.mxu0 %v10606_v57 }
 0x3ba   :  { %3488 = vmatmul.f32.gmra.mxu3 %v3327_v6 }
 0x3bb   :  { %3599 = vmatmul.f32.gmra.mxu2 %v10635_v52 }
 0x3be   :  { %3406 = vmatmul.f32.gmra.mxu1 %v3325_v54 }
 0x3c0   :  { %3517 = vmatmul.f32.gmra.mxu0 %v10651_v53 }
 0x3c2   :  { %3631 = vmatmul.f32.vlgmr.msrb.gmra.mxu3 %v10659_v44 }
 0x3c3   :  { %3602 = vmatmul.f32.gmra.mxu2 %v10672_v23 }
 0x3c6   :  { %3549 = vmatmul.f32.vlgmr.msrb.gmra.mxu1 %v10681_v49 }
 0x3c8   :  { %3520 = vmatmul.f32.gmra.mxu0 %v10688_v31 }
 0x3ca   :  { %3634 = vmatmul.f32.gmra.mxu3 %v10695_v11 }
 0x3cb   :  { %3605 = vmatmul.f32.gmra.mxu2 %v10704_v59 }
 0x3ce   :  { %3552 = vmatmul.f32.gmra.mxu1 %v10715_v24 }
 0x3d0   :  { %3523 = vmatmul.f32.gmra.mxu0 %v10725_v13 }
 0x3d2   :  { %3637 = vmatmul.f32.gmra.mxu3 %v10741_v3 }
 0x3d3   :  { %3608 = vmatmul.f32.gmra.mxu2 %v10758_v21 }
 0x3d6   :  { %3555 = vmatmul.f32.gmra.mxu1 %v10776_v33 }
 0x3d8   :  { %3526 = vmatmul.f32.gmra.mxu0 %v10793_v30 }
 0x3da   :  { %3640 = vmatmul.f32.gmra.mxu3 %v10811_v9 }
 0x3db   :  { %3611 = vmatmul.f32.gmra.mxu2 %v10836_v47 }
 0x3de   :  { %3558 = vmatmul.f32.gmra.mxu1 %v10855_v1 }
 0x3e0   :  { %3529 = vmatmul.f32.gmra.mxu0 %v3324_v61 }
 0x3e2   :  { %3643 = vmatmul.f32.gmra.mxu3 %v3315_v20 }
 0x3e3   :  { %v3345_v62 = vpop.f32.mrf.mxu0  ;;  %v3427_v18 = vpop.f32.mrf.mxu2 }
 0x3e6   :  { %3561 = vmatmul.f32.gmra.mxu1 %v3313_v15 }
 0x3ea   :  { %3646 = vmatmul.f32.gmra.mxu3 %v3319_v14 }
 0x3ed   :  { %v3348_v57 = vpop.f32.mrf.mxu0  ;;  %v3430_v3 = vpop.f32.mrf.mxu2 }
 0x3ee   :  { %3564 = vmatmul.f32.gmra.mxu1 %v3317_v22 }
 0x3f2   :  { %3649 = vmatmul.f32.gmra.mxu3 %v3323_v58 }
 0x3f5   :  { %v3351_v52 = vpop.f32.mrf.mxu0  ;;  %v3433_v53 = vpop.f32.mrf.mxu2 }
 0x3f6   :  { %3567 = vmatmul.f32.gmra.mxu1 %v3321_v16 }
 0x3fa   :  { %3652 = vmatmul.f32.gmra.mxu3 %v3327_v6 }
 0x3fd   :  { %v3354_v44 = vpop.f32.mrf.mxu0 }
 0x3fe   :  { %3570 = vmatmul.f32.gmra.mxu1 %v3325_v54  ;;  %v3436_v49 = vpop.f32.mrf.mxu2 }
 0x402   :  { %v3386_v23 = vpop.f32.mrf.mxu1 }
 0x403   :  { %v3387_v31 = vadd.f32 %v3386_v23, %v3345_v62 }
 0x405   :  { %v3468_v11 = vpop.f32.mrf.mxu3  ;;  %v3428_v59 = vadd.f32 %v3427_v18, %v3387_v31  ;;  %v3357_v21 = vpop.f32.mrf.mxu0 }
 0x406   :  { %v3439_v9 = vpop.f32.mrf.mxu2 }
 0x407   :  { %v3469_v24 = vadd.f32 %v3468_v11, %v3428_v59 }
 0x409   :  { %3656 = vst [vmem:[%s10986_s2] sm:$0xff] %v3469_v24 }
 0x40a   :  { %v3389_v13 = vpop.f32.mrf.mxu1 }
 0x40b   :  { %v3390_v33 = vadd.f32 %v3389_v13, %v3348_v57 }
 0x40d   :  { %v3471_v30 = vpop.f32.mrf.mxu3  ;;  %v3431_v47 = vadd.f32 %v3430_v3, %v3390_v33  ;;  %v3360_v10 = vpop.f32.mrf.mxu0 }
 0x40e   :  { %v3442_v38 = vpop.f32.mrf.mxu2 }
 0x40f   :  { %v3472_v17 = vadd.f32 %v3471_v30, %v3431_v47 }
 0x411   :  { %3659 = vst [vmem:[%s10986_s2 + $0x10] sm:$0xff] %v3472_v17 }
 0x412   :  { %v3392_v7 = vpop.f32.mrf.mxu1 }
 0x413   :  { %v3393_v42 = vadd.f32 %v3392_v7, %v3351_v52 }
 0x415   :  { %v3474_v26 = vpop.f32.mrf.mxu3  ;;  %v3434_v56 = vadd.f32 %v3433_v53, %v3393_v42  ;;  %v3363_v1 = vpop.f32.mrf.mxu0 }
 0x416   :  { %v3445_v43 = vpop.f32.mrf.mxu2 }
 0x417   :  { %v3475_v40 = vadd.f32 %v3474_v26, %v3434_v56 }
 0x419   :  { %3661 = vst [vmem:[%s10986_s2 + $0x20] sm:$0xff] %v3475_v40 }
 0x41a   :  { %v3395_v32 = vpop.f32.mrf.mxu1 }
 0x41b   :  { %v3396_v60 = vadd.f32 %v3395_v32, %v3354_v44 }
 0x41d   :  { %v3477_v46 = vpop.f32.mrf.mxu3  ;;  %v3437_v45 = vadd.f32 %v3436_v49, %v3396_v60  ;;  %v3366_v61 = vpop.f32.mrf.mxu0 }
 0x41e   :  { %v3448_v36 = vpop.f32.mrf.mxu2 }
 0x41f   :  { %v3478_v4 = vadd.f32 %v3477_v46, %v3437_v45 }
 0x421   :  { %3663 = vst [vmem:[%s10986_s2 + $0x30] sm:$0xff] %v3478_v4 }
 0x423   :  { %v3398_v28 = vpop.f32.mrf.mxu1 }
 0x424   :  { %v3399_v0 = vadd.f32 %v3398_v28, %v3357_v21 }
 0x425   :  { %v3480_v55 = vpop.f32.mrf.mxu3  ;;  %v3509_v63 = vpop.f32.mrf.mxu0 }
 0x426   :  { %v3440_v35 = vadd.f32 %v3439_v9, %v3399_v0  ;;  %v3591_v51 = vpop.f32.mrf.mxu2 }
 0x428   :  { %v3481_v12 = vadd.f32 %v3480_v55, %v3440_v35 }
 0x42a   :  { %3665 = vst [vmem:[%s10986_s2 + $0x40] sm:$0xff] %v3481_v12 }
 0x42b   :  { %v3401_v29 = vpop.f32.mrf.mxu1 }
 0x42c   :  { %v3402_v27 = vadd.f32 %v3401_v29, %v3360_v10 }
 0x42d   :  { %v3483_v39 = vpop.f32.mrf.mxu3  ;;  %v3512_v25 = vpop.f32.mrf.mxu0 }
 0x42e   :  { %v3443_v2 = vadd.f32 %v3442_v38, %v3402_v27  ;;  %v3594_v14 = vpop.f32.mrf.mxu2 }
 0x430   :  { %v3484_v20 = vadd.f32 %v3483_v39, %v3443_v2 }
 0x432   :  { %3667 = vst [vmem:[%s10986_s2 + $0x50] sm:$0xff] %v3484_v20 }
 0x433   :  { %v3404_v41 = vpop.f32.mrf.mxu1 }
 0x434   :  { %v3405_v34 = vadd.f32 %v3404_v41, %v3363_v1 }
 0x435   :  { %v3486_v50 = vpop.f32.mrf.mxu3  ;;  %v3515_v62 = vpop.f32.mrf.mxu0 }
 0x436   :  { %v3446_v48 = vadd.f32 %v3445_v43, %v3405_v34  ;;  %v3597_v57 = vpop.f32.mrf.mxu2 }
 0x438   :  { %v3487_v5 = vadd.f32 %v3486_v50, %v3446_v48 }
 0x43a   :  { %3669 = vst [vmem:[%s10986_s2 + $0x60] sm:$0xff] %v3487_v5 }
 0x43b   :  { %v3407_v8 = vpop.f32.mrf.mxu1 }
 0x43c   :  { %v3408_v19 = vadd.f32 %v3407_v8, %v3366_v61 }
 0x43d   :  { %v3489_v37 = vpop.f32.mrf.mxu3  ;;  %v3518_v49 = vpop.f32.mrf.mxu0 }
 0x43e   :  { %v3449_v15 = vadd.f32 %v3448_v36, %v3408_v19  ;;  %v3600_v11 = vpop.f32.mrf.mxu2 }
 0x440   :  { %v3490_v22 = vadd.f32 %v3489_v37, %v3449_v15 }
 0x442   :  { %3671 = vst [vmem:[%s10986_s2 + $0x70] sm:$0xff] %v3490_v22 }
 0x443   :  { %v3550_v58 = vpop.f32.mrf.mxu1 }
 0x444   :  { %v3551_v16 = vadd.f32 %v3550_v58, %v3509_v63 }
 0x445   :  { %v3632_v6 = vpop.f32.mrf.mxu3  ;;  %v3521_v30 = vpop.f32.mrf.mxu0 }
 0x446   :  { %v3592_v54 = vadd.f32 %v3591_v51, %v3551_v16  ;;  %v3603_v17 = vpop.f32.mrf.mxu2 }
 0x448   :  { %v3633_v18 = vadd.f32 %v3632_v6, %v3592_v54 }
 0x44a   :  { %3658 = vst.msk [vmem:[%s10986_s2 + $0x8] sm:$0xff] %vm3657_vm0, %v3633_v18 }
 0x44b   :  { %v3553_v3 = vpop.f32.mrf.mxu1 }
 0x44c   :  { %v3554_v52 = vadd.f32 %v3553_v3, %v3512_v25 }
 0x44d   :  { %v3635_v53 = vpop.f32.mrf.mxu3  ;;  %v3524_v38 = vpop.f32.mrf.mxu0 }
 0x44e   :  { %v3595_v44 = vadd.f32 %v3594_v14, %v3554_v52  ;;  %v3606_v32 = vpop.f32.mrf.mxu2 }
 0x450   :  { %v3636_v23 = vadd.f32 %v3635_v53, %v3595_v44 }
 0x452   :  { %3660 = vst.msk [vmem:[%s10986_s2 + $0x18] sm:$0xff] %vm3657_vm0, %v3636_v23 }
 0x453   :  { %v3556_v31 = vpop.f32.mrf.mxu1 }
 0x454   :  { %v3557_v59 = vadd.f32 %v3556_v31, %v3515_v62 }
 0x455   :  { %v3638_v24 = vpop.f32.mrf.mxu3  ;;  %v3527_v43 = vpop.f32.mrf.mxu0 }
 0x456   :  { %v3598_v13 = vadd.f32 %v3597_v57, %v3557_v59  ;;  %v3609_v0 = vpop.f32.mrf.mxu2 }
 0x458   :  { %v3639_v21 = vadd.f32 %v3638_v24, %v3598_v13 }
 0x45a   :  { %3662 = vst.msk [vmem:[%s10986_s2 + $0x28] sm:$0xff] %vm3657_vm0, %v3639_v21 }
 0x45b   :  { %v3559_v33 = vpop.f32.mrf.mxu1 }
 0x45c   :  { %v3560_v9 = vadd.f32 %v3559_v33, %v3518_v49 }
 0x45d   :  { %v3641_v47 = vpop.f32.mrf.mxu3  ;;  %v3530_v36 = vpop.f32.mrf.mxu0 }
 0x45e   :  { %v3601_v7 = vadd.f32 %v3600_v11, %v3560_v9  ;;  %v3612_v39 = vpop.f32.mrf.mxu2 }
 0x460   :  { %v3642_v42 = vadd.f32 %v3641_v47, %v3601_v7 }
 0x462   :  { %3664 = vst.msk [vmem:[%s10986_s2 + $0x38] sm:$0xff] %vm3657_vm0, %v3642_v42 }
 0x463   :  { %v3562_v26 = vpop.f32.mrf.mxu1 }
 0x464   :  { %v3563_v10 = vadd.f32 %v3562_v26, %v3521_v30 }
 0x465   :  { %v3644_v56 = vpop.f32.mrf.mxu3 }
 0x466   :  { %v3604_v40 = vadd.f32 %v3603_v17, %v3563_v10 }
 0x468   :  { %v3645_v60 = vadd.f32 %v3644_v56, %v3604_v40 }
 0x46a   :  { %3666 = vst.msk [vmem:[%s10986_s2 + $0x48] sm:$0xff] %vm3657_vm0, %v3645_v60 }
 0x46b   :  { %v3565_v46 = vpop.f32.mrf.mxu1 }
 0x46c   :  { %v3566_v45 = vadd.f32 %v3565_v46, %v3524_v38 }
 0x46d   :  { %v3647_v1 = vpop.f32.mrf.mxu3 }
 0x46e   :  { %v3607_v4 = vadd.f32 %v3606_v32, %v3566_v45 }
 0x470   :  { %v3648_v28 = vadd.f32 %v3647_v1, %v3607_v4 }
 0x472   :  { %3668 = vst.msk [vmem:[%s10986_s2 + $0x58] sm:$0xff] %vm3657_vm0, %v3648_v28 }
 0x473   :  { %v3568_v55 = vpop.f32.mrf.mxu1 }
 0x474   :  { %v3569_v35 = vadd.f32 %v3568_v55, %v3527_v43 }
 0x475   :  { %v3650_v12 = vpop.f32.mrf.mxu3 }
 0x476   :  { %v3610_v61 = vadd.f32 %v3609_v0, %v3569_v35 }
 0x478   :  { %v3651_v29 = vadd.f32 %v3650_v12, %v3610_v61 }
 0x47a   :  { %3670 = vst.msk [vmem:[%s10986_s2 + $0x68] sm:$0xff] %vm3657_vm0, %v3651_v29 }
 0x47b   :  { %v3571_v27 = vpop.f32.mrf.mxu1 }
 0x47c   :  { %v3572_v2 = vadd.f32 %v3571_v27, %v3530_v36 }
 0x47d   :  { %v3653_v20 = vpop.f32.mrf.mxu3 }
 0x47e   :  { %v3613_v41 = vadd.f32 %v3612_v39, %v3572_v2 }
 0x480   :  { %v3654_v63 = vadd.f32 %v3653_v20, %v3613_v41 }
 0x482   :  { %3672 = vst.msk [vmem:[%s10986_s2 + $0x78] sm:$0xff] %vm3657_vm0, %v3654_v63 }

</bundles_post_ra>
